<compile_context>
chip_gen: v6e
topology: v6e:2x2x1
jax: 0.10.0
libtpu: 0.0.40
codegen_flags: <defaults>
</compile_context>

<pallas_src>
import functools
import numpy as np
import jax
import jax.numpy as jnp
from jax import lax
from jax.experimental import pallas as pl
from jax.experimental.pallas import tpu as pltpu

# ----------------------- scaled-down Swin config -----------------------------
IMG = 32          # PyTorch module expects 224; scaled down
IN_CHANS = 3
PATCH = 4
WINDOW = 4
EMBED = 32        # swin_base uses 128
DEPTHS = (2, 2)   # swin_base uses (2, 2, 18, 2)
HEADS = (2, 4)    # swin_base uses (4, 8, 16, 32)
MLP_RATIO = 4
LN_EPS = 1e-5
NEG_INF = -1e9    # cross-window / cross-batch blocking value in the dense attention bias

# --------------------------- in-kernel helpers --------------------------------

def _ln(x, g, b):
    mu = jnp.mean(x, axis=-1, keepdims=True)
    var = jnp.mean(jnp.square(x - mu), axis=-1, keepdims=True)
    return (x - mu) * lax.rsqrt(var + LN_EPS) * g + b


def _gelu(x):
    # tanh-approx GELU (EUP slot); ~1e-3 deviation from PyTorch's exact-erf nn.GELU.
    c = np.float32(0.7978845608028654)  # sqrt(2/pi)
    return 0.5 * x * (1.0 + jnp.tanh(c * (x + np.float32(0.044715) * x * x * x)))


def _bf16(x):
    return x.astype(jnp.bfloat16)

# ----------------------------- Pallas kernels --------------------------------

def _patch_embed_kernel(x_ref, w_ref, b_ref, g_ref, beta_ref, o_ref):
    # conv4x4/stride4 expressed as a matmul on pre-extracted patches, fused with the embed LN.
    acc = jnp.dot(_bf16(x_ref[...]), w_ref[...],
                  preferred_element_type=jnp.float32) + b_ref[...]
    o_ref[...] = _ln(acc, g_ref[...], beta_ref[...]).astype(o_ref.dtype)


def _stage_kernel(x_ref, ln1g_ref, ln1b_ref, wqkv_ref, bqkv_ref, bias_ref,
                  wproj_ref, bproj_ref, ln2g_ref, ln2b_ref,
                  w1_ref, b1_ref, w2_ref, b2_ref, *rest,
                  depth, heads, pool):
    """All `depth` Swin blocks of one stage in a single fused kernel step.

    x_ref: (T, C) tokens in (batch, row, col) order, T = B*H*W.
    bias_ref: (depth, heads, T, T) additive attention bias precomputed at init — rel-pos bias
    (+ SW-MSA -100 shift mask) on same-(shifted-)window pairs, NEG_INF on cross-window /
    cross-batch pairs, so the dense softmax equals per-window attention exactly.
    """
    if pool:
        ng_ref, nb_ref, pmat_ref, o_ref, ocat_ref = rest
    else:
        o_ref, ocat_ref = rest

    x = x_ref[...]                                      # (T, C) f32 residual stream
    C = x.shape[-1]
    hd = C // heads

    for bi in range(depth):                             # static unroll (depth == 2)
        # ---- (S)W-MSA ----
        y = _bf16(_ln(x, ln1g_ref[bi], ln1b_ref[bi]))
        # ONE lane-dense (C, 3C) QKV matmul; 1/sqrt(hd) already folded into Wq / bq at init.
        qkv = jnp.dot(y, wqkv_ref[bi], preferred_element_type=jnp.float32) + bqkv_ref[bi]
        for h in range(heads):                          # static unroll (2 or 4 heads)
            q = _bf16(qkv[:, h * hd:(h + 1) * hd])
            k = _bf16(qkv[:, C + h * hd:C + (h + 1) * hd])
            v = _bf16(qkv[:, 2 * C + h * hd:2 * C + (h + 1) * hd])
            # TODO(synk): at head_dim >= 32 pre-transpose K to keep this off the XLU.
            s = jnp.einsum('nd,md->nm', q, k, preferred_element_type=jnp.float32)
            s = s + bias_ref[bi, h]
            s = s - jnp.max(s, axis=-1, keepdims=True)
            p = jnp.exp(s)
            p = p * pl.reciprocal(jnp.sum(p, axis=-1, keepdims=True), approx=True)
            # lane-pack this head's output into the (T, C) scratch (heads concatenated on lanes)
            ocat_ref[:, h * hd:(h + 1) * hd] = jnp.dot(
                _bf16(p), v, preferred_element_type=jnp.float32)
        # ONE (T, C) @ (C, C) output projection on the lane-concatenated heads.
        x = x + jnp.dot(_bf16(ocat_ref[...]), wproj_ref[bi],
                        preferred_element_type=jnp.float32) + bproj_ref[bi]
        # ---- MLP ----
        y2 = _ln(x, ln2g_ref[bi], ln2b_ref[bi])
        h1 = _gelu(jnp.dot(_bf16(y2), w1_ref[bi],
                           preferred_element_type=jnp.float32) + b1_ref[bi])
        x = x + jnp.dot(_bf16(h1), w2_ref[bi],
                        preferred_element_type=jnp.float32) + b2_ref[bi]

    if pool:
        # fused final LayerNorm + AdaptiveAvgPool2d((1,1)): per-batch token mean via a small
        # f32 matmul with a precomputed (B, T) pooling matrix (1/S on each batch's tokens).
        y = _ln(x, ng_ref[...], nb_ref[...])
        o_ref[...] = jnp.dot(pmat_ref[...], y,
                             preferred_element_type=jnp.float32).astype(o_ref.dtype)
    else:
        o_ref[...] = x.astype(o_ref.dtype)


def _merge_kernel(x_ref, g_ref, b_ref, w_ref, o_ref):
    # PatchMerging: LayerNorm + (bias-free) channel reduction, fused.
    y = _ln(x_ref[...], g_ref[...], b_ref[...])
    o_ref[...] = jnp.dot(_bf16(y), w_ref[...],
                         preferred_element_type=jnp.float32).astype(o_ref.dtype)

# --------------------------- pallas_call wrappers -----------------------------
# The scaled-down model fits in VMEM, so each fused kernel runs as a single whole-array step.

def _fused_call(kernel, out_shape, *args, input_output_aliases=None, scratch_shapes=()):
    return pl.pallas_call(
        kernel,
        out_shape=out_shape,
        in_specs=[pl.BlockSpec(memory_space=pltpu.MemorySpace.VMEM)] * len(args),
        out_specs=pl.BlockSpec(memory_space=pltpu.MemorySpace.VMEM),
        scratch_shapes=list(scratch_shapes),
        input_output_aliases=input_output_aliases or {},
    )(*args)


def patch_embed(x_nchw, p):
    B, Cin, H, W = x_nchw.shape
    ph, pw = H // PATCH, W // PATCH
    xp = x_nchw.reshape(B, Cin, ph, PATCH, pw, PATCH)
    xp = xp.transpose(0, 2, 4, 1, 3, 5).reshape(B * ph * pw, Cin * PATCH * PATCH)
    return _fused_call(_patch_embed_kernel,
                       jax.ShapeDtypeStruct((xp.shape[0], EMBED), jnp.float32),
                       xp, p['w'], p['b'], p['g'], p['beta'])


def run_stage(tokens, sp, *, heads, depth, pool_extras=None):
    T, C = tokens.shape
    pool = pool_extras is not None
    args = [tokens, sp['ln1_g'], sp['ln1_b'], sp['wqkv'], sp['bqkv'], sp['bias'],
            sp['wproj'], sp['bproj'], sp['ln2_g'], sp['ln2_b'],
            sp['w1'], sp['b1'], sp['w2'], sp['b2']]
    if pool:
        args += [pool_extras['norm_g'], pool_extras['norm_b'], pool_extras['pmat']]
        out_shape = jax.ShapeDtypeStruct((pool_extras['pmat'].shape[0], C), jnp.float32)
        aliases = None                          # output shape differs -> no aliasing
    else:
        out_shape = jax.ShapeDtypeStruct((T, C), jnp.float32)
        aliases = {0: 0}                        # residual stream reuses its HBM buffer
    return _fused_call(
        functools.partial(_stage_kernel, depth=depth, heads=heads, pool=pool),
        out_shape, *args,
        input_output_aliases=aliases,
        scratch_shapes=[pltpu.VMEM((T, C), jnp.float32)])   # lane-packed head outputs


def patch_merging(tokens, p, B, H, W, C):
    fm = tokens.reshape(B, H, W, C)
    # TODO(synk): fold this even/odd gather + concat into the merge kernel (BlockSpec
    # index_map / in-kernel strided reads) to drop one XLA round trip of the feature map.
    x0 = fm[:, 0::2, 0::2, :]
    x1 = fm[:, 1::2, 0::2, :]
    x2 = fm[:, 0::2, 1::2, :]
    x3 = fm[:, 1::2, 1::2, :]
    xc = jnp.concatenate([x0, x1, x2, x3], axis=-1).reshape(-1, 4 * C)
    return _fused_call(_merge_kernel,
                       jax.ShapeDtypeStruct((xc.shape[0], 2 * C), jnp.float32),
                       xc, p['g'], p['b'], p['w'])

# ------------------------------- forward --------------------------------------

def swin_extractor(x_nchw, params):
    """PyTorch: forward_features(x) -> permute(0,3,1,2) -> AdaptiveAvgPool2d((1,1)) -> squeeze."""
    B = x_nchw.shape[0]
    tokens = patch_embed(x_nchw, params['patch_embed'])     # (B*H*W, C), (b, i, j)-major rows
    H = x_nchw.shape[2] // PATCH
    W = x_nchw.shape[3] // PATCH
    C = EMBED
    for si, depth in enumerate(DEPTHS):
        sp = params[f'stage{si}']
        if si == len(DEPTHS) - 1:
            tokens = run_stage(tokens, sp, heads=HEADS[si], depth=depth,
                               pool_extras={'norm_g': params['norm_g'],
                                            'norm_b': params['norm_b'],
                                            'pmat': params['pmat']})
        else:
            tokens = run_stage(tokens, sp, heads=HEADS[si], depth=depth)
            tokens = patch_merging(tokens, params[f'merge{si}'], B, H, W, C)
            H //= 2
            W //= 2
            C *= 2
    return tokens                                            # (B, C_final)

# ------------------- attention-bias precompute (ONCE, at init) -----------------

def _make_rel_idx(win):
    coords = np.stack(np.meshgrid(np.arange(win), np.arange(win), indexing='ij'))
    flat = coords.reshape(2, -1)
    rel = (flat[:, :, None] - flat[:, None, :]).transpose(1, 2, 0).copy()
    rel[..., 0] += win - 1
    rel[..., 1] += win - 1
    rel[..., 0] *= 2 * win - 1
    return rel.sum(-1)                       # (N, N)


def _dense_block_bias(rel_table, H, W, win, shift, batch):
    """Dense (heads, B*H*W, B*H*W) additive bias in (b, i, j) token order.

    Exactly reproduces per-(shifted-)window attention: allowed pairs get the relative-position
    bias (+ timm's -100 shift-region mask); cross-window / cross-batch pairs get NEG_INF.
    """
    heads = rel_table.shape[-1]
    rel_idx = _make_rel_idx(win)
    ii, jj = np.meshgrid(np.arange(H), np.arange(W), indexing='ij')
    p = (ii - shift) % H                      # coordinate on the cyclically shifted map
    q = (jj - shift) % W
    win_id = (p // win) * (W // win) + (q // win)
    pos = (p % win) * win + (q % win)
    region = np.zeros((H, W), np.int64)
    if shift > 0:
        cnt = 0
        for hs in (slice(0, -win), slice(-win, -shift), slice(-shift, None)):
            for ws in (slice(0, -win), slice(-win, -shift), slice(-shift, None)):
                region[hs, ws] = cnt
                cnt += 1
        region = region[p, q]
    win_f, pos_f, reg_f = win_id.reshape(-1), pos.reshape(-1), region.reshape(-1)
    S = H * W
    rp = rel_table[rel_idx[pos_f[:, None], pos_f[None, :]]]           # (S, S, heads)
    same_win = (win_f[:, None] == win_f[None, :])[..., None]
    same_reg = (reg_f[:, None] == reg_f[None, :])[..., None]
    bias_sp = np.where(same_win, rp + np.where(same_reg, 0.0, -100.0), NEG_INF)
    bias_sp = bias_sp.transpose(2, 0, 1).astype(np.float32)           # (heads, S, S)
    T = batch * S
    full = np.full((heads, T, T), NEG_INF, np.float32)
    for b in range(batch):
        full[:, b * S:(b + 1) * S, b * S:(b + 1) * S] = bias_sp
    return full

# ---------------------------- parameter init -----------------------------------

def init_params(seed=42, batch=2):
    rng = np.random.default_rng(seed)

    def nrm(*shape):
        return (0.02 * rng.standard_normal(shape)).astype(np.float32)   # f32 master weights

    params = {
        'patch_embed': {
            # conv4x4/s4 weight flattened to (Cin*P*P, EMBED); bf16 copy for the MXU operand.
            'w': jnp.asarray(nrm(IN_CHANS * PATCH * PATCH, EMBED), jnp.bfloat16),
            'b': jnp.zeros((1, EMBED), jnp.float32),
            'g': jnp.ones((1, EMBED), jnp.float32),
            'beta': jnp.zeros((1, EMBED), jnp.float32),
        }
    }
    C = EMBED
    H = W = IMG // PATCH
    for si, depth in enumerate(DEPTHS):
        heads = HEADS[si]
        hd = C // heads
        win = min(WINDOW, H)
        scale = float(hd) ** -0.5

        wqkv = np.stack([nrm(C, 3 * C) for _ in range(depth)])
        bqkv = np.zeros((depth, 1, 3 * C), np.float32)
        wqkv[:, :, :C] *= scale        # fold 1/sqrt(head_dim) into Wq (and bq)
        bqkv[:, :, :C] *= scale
        # dense per-block attention bias (rel-pos + shift mask + window/batch blocking),
        # built ONCE here — never rebuilt inside the forward pass.
        bias = np.stack([
            _dense_block_bias(nrm((2 * win - 1) ** 2, heads), H, W, win,
                              0 if (bi % 2 == 0 or win >= H) else win // 2, batch)
            for bi in range(depth)])

        params[f'stage{si}'] = {
            'ln1_g': jnp.ones((depth, 1, C), jnp.float32),
            'ln1_b': jnp.zeros((depth, 1, C), jnp.float32),
            'wqkv': jnp.asarray(wqkv, jnp.bfloat16),
            'bqkv': jnp.asarray(bqkv),
            'bias': jnp.asarray(bias),     # f32; TODO(synk): store bf16 at real scale (v5e BW)
            'wproj': jnp.asarray(np.stack([nrm(C, C) for _ in range(depth)]), jnp.bfloat16),
            'bproj': jnp.zeros((depth, 1, C), jnp.float32),
            'ln2_g': jnp.ones((depth, 1, C), jnp.float32),
            'ln2_b': jnp.zeros((depth, 1, C), jnp.float32),
            'w1': jnp.asarray(np.stack([nrm(C, MLP_RATIO * C) for _ in range(depth)]),
                              jnp.bfloat16),
            'b1': jnp.zeros((depth, 1, MLP_RATIO * C), jnp.float32),
            'w2': jnp.asarray(np.stack([nrm(MLP_RATIO * C, C) for _ in range(depth)]),
                              jnp.bfloat16),
            'b2': jnp.zeros((depth, 1, C), jnp.float32),
        }
        if si < len(DEPTHS) - 1:
            params[f'merge{si}'] = {
                'g': jnp.ones((1, 4 * C), jnp.float32),
                'b': jnp.zeros((1, 4 * C), jnp.float32),
                'w': jnp.asarray(nrm(4 * C, 2 * C), jnp.bfloat16),  # timm reduction: no bias
            }
            C *= 2
            H //= 2
            W //= 2

    params['norm_g'] = jnp.ones((1, C), jnp.float32)
    params['norm_b'] = jnp.zeros((1, C), jnp.float32)
    # pooling matrix: per-batch mean over that batch element's tokens (fused into last stage)
    S = H * W
    pmat = np.zeros((batch, batch * S), np.float32)
    for b in range(batch):
        pmat[b, b * S:(b + 1) * S] = 1.0 / S
    params['pmat'] = jnp.asarray(pmat)
    return params

# ----------------------------------- main ---------------------------------------

if __name__ == "__main__":
    # TODO(synk): pretrained swin_base_patch4_window7_224 weights cannot be loaded in-script;
    # this runs a deterministically initialized, architecturally faithful scaled-down Swin.
    B = 2
    x = jax.random.normal(jax.random.PRNGKey(0), (B, IN_CHANS, IMG, IMG), jnp.float32)
    params = init_params(seed=42, batch=B)
    fwd = jax.jit(swin_extractor)
    out = jax.block_until_ready(fwd(x, params))
    expected_feat_dim = EMBED * 2 ** (len(DEPTHS) - 1)
    assert out.shape == (B, expected_feat_dim), out.shape
    assert bool(jnp.all(jnp.isfinite(out)))
    print("KERNEL_OK")
</pallas_src>

<mosaic_0001>
module attributes {stable_mosaic.version = 11 : i64} {
  func.func @_patch_embed_kernel(%arg0: memref<128x48xf32, #tpu.memory_space<vmem>>, %arg1: memref<48x32xbf16, #tpu.memory_space<vmem>>, %arg2: memref<1x32xf32, #tpu.memory_space<vmem>>, %arg3: memref<1x32xf32, #tpu.memory_space<vmem>>, %arg4: memref<1x32xf32, #tpu.memory_space<vmem>>, %arg5: memref<128x32xf32, #tpu.memory_space<vmem>>) attributes {dimension_semantics = [], scalar_prefetch = 0 : i64, scratch_operands = 0 : i64, tpu.core_type = #tpu.core_type<tc>} {
    %c0 = arith.constant 0 : index
    %c0_0 = arith.constant 0 : index
    %0 = vector.load %arg0[%c0, %c0_0] : memref<128x48xf32, #tpu.memory_space<vmem>>, vector<128x48xf32>
    %1 = arith.truncf %0 : vector<128x48xf32> to vector<128x48xbf16>
    %c0_1 = arith.constant 0 : index
    %c0_2 = arith.constant 0 : index
    %2 = vector.load %arg1[%c0_1, %c0_2] : memref<48x32xbf16, #tpu.memory_space<vmem>>, vector<48x32xbf16>
    %cst = arith.constant dense<0.000000e+00> : vector<128x32xf32>
    %3 = tpu.matmul %1, %2, %cst {dimension_numbers = #tpu.dot_dimension_numbers<[1], [0], [0], [1], [0, 0, 1, 1], [], []>} : vector<128x48xbf16>, vector<48x32xbf16>, vector<128x32xf32> -> vector<128x32xf32>
    %c0_3 = arith.constant 0 : index
    %c0_4 = arith.constant 0 : index
    %4 = vector.load %arg2[%c0_3, %c0_4] : memref<1x32xf32, #tpu.memory_space<vmem>>, vector<1x32xf32>
    %5 = vector.broadcast %4 : vector<1x32xf32> to vector<128x32xf32>
    %6 = arith.addf %3, %5 : vector<128x32xf32>
    %c0_5 = arith.constant 0 : index
    %c0_6 = arith.constant 0 : index
    %7 = vector.load %arg3[%c0_5, %c0_6] : memref<1x32xf32, #tpu.memory_space<vmem>>, vector<1x32xf32>
    %c0_7 = arith.constant 0 : index
    %c0_8 = arith.constant 0 : index
    %8 = vector.load %arg4[%c0_7, %c0_8] : memref<1x32xf32, #tpu.memory_space<vmem>>, vector<1x32xf32>
    %cst_9 = arith.constant dense<0.000000e+00> : vector<128xf32>
    %9 = vector.multi_reduction <add>, %6, %cst_9 [1] : vector<128x32xf32> to vector<128xf32>
    %10 = vector.shape_cast %9 : vector<128xf32> to vector<128x1xf32>
    %cst_10 = arith.constant 3.200000e+01 : f32
    %11 = vector.broadcast %cst_10 : f32 to vector<128x1xf32>
    %12 = arith.divf %10, %11 : vector<128x1xf32>
    %13 = vector.broadcast %12 : vector<128x1xf32> to vector<128x32xf32>
    %14 = arith.subf %6, %13 : vector<128x32xf32>
    %15 = arith.mulf %14, %14 : vector<128x32xf32>
    %cst_11 = arith.constant dense<0.000000e+00> : vector<128xf32>
    %16 = vector.multi_reduction <add>, %15, %cst_11 [1] : vector<128x32xf32> to vector<128xf32>
    %17 = vector.shape_cast %16 : vector<128xf32> to vector<128x1xf32>
    %cst_12 = arith.constant 3.200000e+01 : f32
    %18 = vector.broadcast %cst_12 : f32 to vector<128x1xf32>
    %19 = arith.divf %17, %18 : vector<128x1xf32>
    %20 = vector.broadcast %12 : vector<128x1xf32> to vector<128x32xf32>
    %21 = arith.subf %6, %20 : vector<128x32xf32>
    %cst_13 = arith.constant 9.99999974E-6 : f32
    %22 = vector.broadcast %cst_13 : f32 to vector<128x1xf32>
    %23 = arith.addf %19, %22 : vector<128x1xf32>
    %24 = math.rsqrt %23 : vector<128x1xf32>
    %25 = vector.broadcast %24 : vector<128x1xf32> to vector<128x32xf32>
    %26 = arith.mulf %21, %25 : vector<128x32xf32>
    %27 = vector.broadcast %7 : vector<1x32xf32> to vector<128x32xf32>
    %28 = arith.mulf %26, %27 : vector<128x32xf32>
    %29 = vector.broadcast %8 : vector<1x32xf32> to vector<128x32xf32>
    %30 = arith.addf %28, %29 : vector<128x32xf32>
    %c0_14 = arith.constant 0 : index
    %c0_15 = arith.constant 0 : index
    %31 = vector.load %arg5[%c0_14, %c0_15] : memref<128x32xf32, #tpu.memory_space<vmem>>, vector<128x32xf32>
    tpu.vector_store %arg5[%c0_14, %c0_15], %30 {strides = array<i32>} : memref<128x32xf32, #tpu.memory_space<vmem>>, vector<128x32xf32>,
    return
  }
}

module attributes {stable_mosaic.version = 11 : i64} {
  func.func @_stage_kernel(%arg0: memref<128x32xf32, #tpu.memory_space<vmem>>, %arg1: memref<2x1x32xf32, #tpu.memory_space<vmem>>, %arg2: memref<2x1x32xf32, #tpu.memory_space<vmem>>, %arg3: memref<2x32x96xbf16, #tpu.memory_space<vmem>>, %arg4: memref<2x1x96xf32, #tpu.memory_space<vmem>>, %arg5: memref<2x2x128x128xf32, #tpu.memory_space<vmem>>, %arg6: memref<2x32x32xbf16, #tpu.memory_space<vmem>>, %arg7: memref<2x1x32xf32, #tpu.memory_space<vmem>>, %arg8: memref<2x1x32xf32, #tpu.memory_space<vmem>>, %arg9: memref<2x1x32xf32, #tpu.memory_space<vmem>>, %arg10: memref<2x32x128xbf16, #tpu.memory_space<vmem>>, %arg11: memref<2x1x128xf32, #tpu.memory_space<vmem>>, %arg12: memref<2x128x32xbf16, #tpu.memory_space<vmem>>, %arg13: memref<2x1x32xf32, #tpu.memory_space<vmem>>, %arg14: memref<128x32xf32, #tpu.memory_space<vmem>>, %arg15: memref<128x32xf32, #tpu.memory_space<vmem>>) attributes {dimension_semantics = [], scalar_prefetch = 0 : i64, scratch_operands = 1 : i64, tpu.core_type = #tpu.core_type<tc>} {
    %c0 = arith.constant 0 : index
    %c0_0 = arith.constant 0 : index
    %0 = vector.load %arg0[%c0, %c0_0] : memref<128x32xf32, #tpu.memory_space<vmem>>, vector<128x32xf32>
    %c0_1 = arith.constant 0 : index
    %c0_2 = arith.constant 0 : index
    %c0_3 = arith.constant 0 : index
    %1 = vector.load %arg1[%c0_1, %c0_2, %c0_3] : memref<2x1x32xf32, #tpu.memory_space<vmem>>, vector<1x1x32xf32>
    %2 = vector.shape_cast %1 : vector<1x1x32xf32> to vector<1x32xf32>
    %c0_4 = arith.constant 0 : index
    %c0_5 = arith.constant 0 : index
    %c0_6 = arith.constant 0 : index
    %3 = vector.load %arg2[%c0_4, %c0_5, %c0_6] : memref<2x1x32xf32, #tpu.memory_space<vmem>>, vector<1x1x32xf32>
    %4 = vector.shape_cast %3 : vector<1x1x32xf32> to vector<1x32xf32>
    %cst = arith.constant dense<0.000000e+00> : vector<128xf32>
    %5 = vector.multi_reduction <add>, %0, %cst [1] : vector<128x32xf32> to vector<128xf32>
    %6 = vector.shape_cast %5 : vector<128xf32> to vector<128x1xf32>
    %cst_7 = arith.constant 3.200000e+01 : f32
    %7 = vector.broadcast %cst_7 : f32 to vector<128x1xf32>
    %8 = arith.divf %6, %7 : vector<128x1xf32>
    %9 = vector.broadcast %8 : vector<128x1xf32> to vector<128x32xf32>
    %10 = arith.subf %0, %9 : vector<128x32xf32>
    %11 = arith.mulf %10, %10 : vector<128x32xf32>
    %cst_8 = arith.constant dense<0.000000e+00> : vector<128xf32>
    %12 = vector.multi_reduction <add>, %11, %cst_8 [1] : vector<128x32xf32> to vector<128xf32>
    %13 = vector.shape_cast %12 : vector<128xf32> to vector<128x1xf32>
    %cst_9 = arith.constant 3.200000e+01 : f32
    %14 = vector.broadcast %cst_9 : f32 to vector<128x1xf32>
    %15 = arith.divf %13, %14 : vector<128x1xf32>
    %16 = vector.broadcast %8 : vector<128x1xf32> to vector<128x32xf32>
    %17 = arith.subf %0, %16 : vector<128x32xf32>
    %cst_10 = arith.constant 9.99999974E-6 : f32
    %18 = vector.broadcast %cst_10 : f32 to vector<128x1xf32>
    %19 = arith.addf %15, %18 : vector<128x1xf32>
    %20 = math.rsqrt %19 : vector<128x1xf32>
    %21 = vector.broadcast %20 : vector<128x1xf32> to vector<128x32xf32>
    %22 = arith.mulf %17, %21 : vector<128x32xf32>
    %23 = vector.broadcast %2 : vector<1x32xf32> to vector<128x32xf32>
    %24 = arith.mulf %22, %23 : vector<128x32xf32>
    %25 = vector.broadcast %4 : vector<1x32xf32> to vector<128x32xf32>
    %26 = arith.addf %24, %25 : vector<128x32xf32>
    %27 = arith.truncf %26 : vector<128x32xf32> to vector<128x32xbf16>
    %c0_11 = arith.constant 0 : index
    %c0_12 = arith.constant 0 : index
    %c0_13 = arith.constant 0 : index
    %28 = vector.load %arg3[%c0_11, %c0_12, %c0_13] : memref<2x32x96xbf16, #tpu.memory_space<vmem>>, vector<1x32x96xbf16>
    %29 = vector.shape_cast %28 : vector<1x32x96xbf16> to vector<32x96xbf16>
    %cst_14 = arith.constant dense<0.000000e+00> : vector<128x96xf32>
    %30 = tpu.matmul %27, %29, %cst_14 {dimension_numbers = #tpu.dot_dimension_numbers<[1], [0], [0], [1], [0, 0, 1, 1], [], []>} : vector<128x32xbf16>, vector<32x96xbf16>, vector<128x96xf32> -> vector<128x96xf32>
    %c0_15 = arith.constant 0 : index
    %c0_16 = arith.constant 0 : index
    %c0_17 = arith.constant 0 : index
    %31 = vector.load %arg4[%c0_15, %c0_16, %c0_17] : memref<2x1x96xf32, #tpu.memory_space<vmem>>, vector<1x1x96xf32>
    %32 = vector.shape_cast %31 : vector<1x1x96xf32> to vector<1x96xf32>
    %33 = vector.broadcast %32 : vector<1x96xf32> to vector<128x96xf32>
    %34 = arith.addf %30, %33 : vector<128x96xf32>
    %35 = vector.extract_strided_slice %34 {offsets = [0, 0], sizes = [128, 16], strides = [1, 1]} : vector<128x96xf32> to vector<128x16xf32>
    %36 = arith.truncf %35 : vector<128x16xf32> to vector<128x16xbf16>
    %37 = vector.extract_strided_slice %34 {offsets = [0, 32], sizes = [128, 16], strides = [1, 1]} : vector<128x96xf32> to vector<128x16xf32>
    %38 = arith.truncf %37 : vector<128x16xf32> to vector<128x16xbf16>
    %39 = vector.extract_strided_slice %34 {offsets = [0, 64], sizes = [128, 16], strides = [1, 1]} : vector<128x96xf32> to vector<128x16xf32>
    %40 = arith.truncf %39 : vector<128x16xf32> to vector<128x16xbf16>
    "tpu.trace_start"() <{level = 10 : i32, message = "nd,md->nm"}> : () -> ()
    %cst_18 = arith.constant dense<0.000000e+00> : vector<128x128xf32>
    %41 = tpu.matmul %36, %38, %cst_18 {dimension_numbers = #tpu.dot_dimension_numbers<[1], [1], [0], [0], [0, 0, 1, 0], [], []>} : vector<128x16xbf16>, vector<128x16xbf16>, vector<128x128xf32> -> vector<128x128xf32>
    "tpu.trace_stop"() : () -> ()
    %c0_19 = arith.constant 0 : index
    %c0_20 = arith.constant 0 : index
    %c0_21 = arith.constant 0 : index
    %c0_22 = arith.constant 0 : index
    %42 = vector.load %arg5[%c0_19, %c0_20, %c0_21, %c0_22] : memref<2x2x128x128xf32, #tpu.memory_space<vmem>>, vector<1x1x128x128xf32>
    %43 = vector.shape_cast %42 : vector<1x1x128x128xf32> to vector<128x128xf32>
    %44 = arith.addf %41, %43 : vector<128x128xf32>
    %cst_23 = arith.constant dense<0xFF800000> : vector<128xf32>
    %45 = vector.multi_reduction <maximumf>, %44, %cst_23 [1] : vector<128x128xf32> to vector<128xf32>
    %46 = vector.shape_cast %45 : vector<128xf32> to vector<128x1xf32>
    %47 = vector.broadcast %46 : vector<128x1xf32> to vector<128x128xf32>
    %48 = arith.subf %44, %47 : vector<128x128xf32>
    %49 = math.exp %48 : vector<128x128xf32>
    %cst_24 = arith.constant dense<0.000000e+00> : vector<128xf32>
    %50 = vector.multi_reduction <add>, %49, %cst_24 [1] : vector<128x128xf32> to vector<128xf32>
    %51 = vector.shape_cast %50 : vector<128xf32> to vector<128x1xf32>
    %52 = tpu.reciprocal %51 {approx = true} : vector<128x1xf32> -> vector<128x1xf32>
    %53 = vector.broadcast %52 : vector<128x1xf32> to vector<128x128xf32>
    %54 = arith.mulf %49, %53 : vector<128x128xf32>
    %55 = arith.truncf %54 : vector<128x128xf32> to vector<128x128xbf16>
    %cst_25 = arith.constant dense<0.000000e+00> : vector<128x16xf32>
    %56 = tpu.matmul %55, %40, %cst_25 {dimension_numbers = #tpu.dot_dimension_numbers<[1], [0], [0], [1], [0, 0, 1, 1], [], []>} : vector<128x128xbf16>, vector<128x16xbf16>, vector<128x16xf32> -> vector<128x16xf32>
    %c0_26 = arith.constant 0 : index
    %c0_27 = arith.constant 0 : index
    %57 = vector.load %arg15[%c0_26, %c0_27] : memref<128x32xf32, #tpu.memory_space<vmem>>, vector<128x16xf32>
    tpu.vector_store %arg15[%c0_26, %c0_27], %56 {strides = array<i32>} : memref<128x32xf32, #tpu.memory_space<vmem>>, vector<128x16xf32>,
    %58 = vector.extract_strided_slice %34 {offsets = [0, 16], sizes = [128, 16], strides = [1, 1]} : vector<128x96xf32> to vector<128x16xf32>
    %59 = arith.truncf %58 : vector<128x16xf32> to vector<128x16xbf16>
    %60 = vector.extract_strided_slice %34 {offsets = [0, 48], sizes = [128, 16], strides = [1, 1]} : vector<128x96xf32> to vector<128x16xf32>
    %61 = arith.truncf %60 : vector<128x16xf32> to vector<128x16xbf16>
    %62 = vector.extract_strided_slice %34 {offsets = [0, 80], sizes = [128, 16], strides = [1, 1]} : vector<128x96xf32> to vector<128x16xf32>
    %63 = arith.truncf %62 : vector<128x16xf32> to vector<128x16xbf16>
    "tpu.trace_start"() <{level = 10 : i32, message = "nd,md->nm"}> : () -> ()
    %cst_28 = arith.constant dense<0.000000e+00> : vector<128x128xf32>
    %64 = tpu.matmul %59, %61, %cst_28 {dimension_numbers = #tpu.dot_dimension_numbers<[1], [1], [0], [0], [0, 0, 1, 0], [], []>} : vector<128x16xbf16>, vector<128x16xbf16>, vector<128x128xf32> -> vector<128x128xf32>
    "tpu.trace_stop"() : () -> ()
    %c0_29 = arith.constant 0 : index
    %c1 = arith.constant 1 : index
    %c0_30 = arith.constant 0 : index
    %c0_31 = arith.constant 0 : index
    %65 = vector.load %arg5[%c0_29, %c1, %c0_30, %c0_31] : memref<2x2x128x128xf32, #tpu.memory_space<vmem>>, vector<1x1x128x128xf32>
    %66 = vector.shape_cast %65 : vector<1x1x128x128xf32> to vector<128x128xf32>
    %67 = arith.addf %64, %66 : vector<128x128xf32>
    %cst_32 = arith.constant dense<0xFF800000> : vector<128xf32>
    %68 = vector.multi_reduction <maximumf>, %67, %cst_32 [1] : vector<128x128xf32> to vector<128xf32>
    %69 = vector.shape_cast %68 : vector<128xf32> to vector<128x1xf32>
    %70 = vector.broadcast %69 : vector<128x1xf32> to vector<128x128xf32>
    %71 = arith.subf %67, %70 : vector<128x128xf32>
    %72 = math.exp %71 : vector<128x128xf32>
    %cst_33 = arith.constant dense<0.000000e+00> : vector<128xf32>
    %73 = vector.multi_reduction <add>, %72, %cst_33 [1] : vector<128x128xf32> to vector<128xf32>
    %74 = vector.shape_cast %73 : vector<128xf32> to vector<128x1xf32>
    %75 = tpu.reciprocal %74 {approx = true} : vector<128x1xf32> -> vector<128x1xf32>
    %76 = vector.broadcast %75 : vector<128x1xf32> to vector<128x128xf32>
    %77 = arith.mulf %72, %76 : vector<128x128xf32>
    %78 = arith.truncf %77 : vector<128x128xf32> to vector<128x128xbf16>
    %cst_34 = arith.constant dense<0.000000e+00> : vector<128x16xf32>
    %79 = tpu.matmul %78, %63, %cst_34 {dimension_numbers = #tpu.dot_dimension_numbers<[1], [0], [0], [1], [0, 0, 1, 1], [], []>} : vector<128x128xbf16>, vector<128x16xbf16>, vector<128x16xf32> -> vector<128x16xf32>
    %c0_35 = arith.constant 0 : index
    %c16 = arith.constant 16 : index
    %80 = vector.load %arg15[%c0_35, %c16] : memref<128x32xf32, #tpu.memory_space<vmem>>, vector<128x16xf32>
    tpu.vector_store %arg15[%c0_35, %c16], %79 {strides = array<i32>} : memref<128x32xf32, #tpu.memory_space<vmem>>, vector<128x16xf32>,
    %c0_36 = arith.constant 0 : index
    %c0_37 = arith.constant 0 : index
    %81 = vector.load %arg15[%c0_36, %c0_37] : memref<128x32xf32, #tpu.memory_space<vmem>>, vector<128x32xf32>
    %82 = arith.truncf %81 : vector<128x32xf32> to vector<128x32xbf16>
    %c0_38 = arith.constant 0 : index
    %c0_39 = arith.constant 0 : index
    %c0_40 = arith.constant 0 : index
    %83 = vector.load %arg6[%c0_38, %c0_39, %c0_40] : memref<2x32x32xbf16, #tpu.memory_space<vmem>>, vector<1x32x32xbf16>
    %84 = vector.shape_cast %83 : vector<1x32x32xbf16> to vector<32x32xbf16>
    %cst_41 = arith.constant dense<0.000000e+00> : vector<128x32xf32>
    %85 = tpu.matmul %82, %84, %cst_41 {dimension_numbers = #tpu.dot_dimension_numbers<[1], [0], [0], [1], [0, 0, 1, 1], [], []>} : vector<128x32xbf16>, vector<32x32xbf16>, vector<128x32xf32> -> vector<128x32xf32>
    %86 = arith.addf %0, %85 : vector<128x32xf32>
    %c0_42 = arith.constant 0 : index
    %c0_43 = arith.constant 0 : index
    %c0_44 = arith.constant 0 : index
    %87 = vector.load %arg7[%c0_42, %c0_43, %c0_44] : memref<2x1x32xf32, #tpu.memory_space<vmem>>, vector<1x1x32xf32>
    %88 = vector.shape_cast %87 : vector<1x1x32xf32> to vector<1x32xf32>
    %89 = vector.broadcast %88 : vector<1x32xf32> to vector<128x32xf32>
    %90 = arith.addf %86, %89 : vector<128x32xf32>
    %c0_45 = arith.constant 0 : index
    %c0_46 = arith.constant 0 : index
    %c0_47 = arith.constant 0 : index
    %91 = vector.load %arg8[%c0_45, %c0_46, %c0_47] : memref<2x1x32xf32, #tpu.memory_space<vmem>>, vector<1x1x32xf32>
    %92 = vector.shape_cast %91 : vector<1x1x32xf32> to vector<1x32xf32>
    %c0_48 = arith.constant 0 : index
    %c0_49 = arith.constant 0 : index
    %c0_50 = arith.constant 0 : index
    %93 = vector.load %arg9[%c0_48, %c0_49, %c0_50] : memref<2x1x32xf32, #tpu.memory_space<vmem>>, vector<1x1x32xf32>
    %94 = vector.shape_cast %93 : vector<1x1x32xf32> to vector<1x32xf32>
    %cst_51 = arith.constant dense<0.000000e+00> : vector<128xf32>
    %95 = vector.multi_reduction <add>, %90, %cst_51 [1] : vector<128x32xf32> to vector<128xf32>
    %96 = vector.shape_cast %95 : vector<128xf32> to vector<128x1xf32>
    %cst_52 = arith.constant 3.200000e+01 : f32
    %97 = vector.broadcast %cst_52 : f32 to vector<128x1xf32>
    %98 = arith.divf %96, %97 : vector<128x1xf32>
    %99 = vector.broadcast %98 : vector<128x1xf32> to vector<128x32xf32>
    %100 = arith.subf %90, %99 : vector<128x32xf32>
    %101 = arith.mulf %100, %100 : vector<128x32xf32>
    %cst_53 = arith.constant dense<0.000000e+00> : vector<128xf32>
    %102 = vector.multi_reduction <add>, %101, %cst_53 [1] : vector<128x32xf32> to vector<128xf32>
    %103 = vector.shape_cast %102 : vector<128xf32> to vector<128x1xf32>
    %cst_54 = arith.constant 3.200000e+01 : f32
    %104 = vector.broadcast %cst_54 : f32 to vector<128x1xf32>
    %105 = arith.divf %103, %104 : vector<128x1xf32>
    %106 = vector.broadcast %98 : vector<128x1xf32> to vector<128x32xf32>
    %107 = arith.subf %90, %106 : vector<128x32xf32>
    %cst_55 = arith.constant 9.99999974E-6 : f32
    %108 = vector.broadcast %cst_55 : f32 to vector<128x1xf32>
    %109 = arith.addf %105, %108 : vector<128x1xf32>
    %110 = math.rsqrt %109 : vector<128x1xf32>
    %111 = vector.broadcast %110 : vector<128x1xf32> to vector<128x32xf32>
    %112 = arith.mulf %107, %111 : vector<128x32xf32>
    %113 = vector.broadcast %92 : vector<1x32xf32> to vector<128x32xf32>
    %114 = arith.mulf %112, %113 : vector<128x32xf32>
    %115 = vector.broadcast %94 : vector<1x32xf32> to vector<128x32xf32>
    %116 = arith.addf %114, %115 : vector<128x32xf32>
    %117 = arith.truncf %116 : vector<128x32xf32> to vector<128x32xbf16>
    %c0_56 = arith.constant 0 : index
    %c0_57 = arith.constant 0 : index
    %c0_58 = arith.constant 0 : index
    %118 = vector.load %arg10[%c0_56, %c0_57, %c0_58] : memref<2x32x128xbf16, #tpu.memory_space<vmem>>, vector<1x32x128xbf16>
    %119 = vector.shape_cast %118 : vector<1x32x128xbf16> to vector<32x128xbf16>
    %cst_59 = arith.constant dense<0.000000e+00> : vector<128x128xf32>
    %120 = tpu.matmul %117, %119, %cst_59 {dimension_numbers = #tpu.dot_dimension_numbers<[1], [0], [0], [1], [0, 0, 1, 1], [], []>} : vector<128x32xbf16>, vector<32x128xbf16>, vector<128x128xf32> -> vector<128x128xf32>
    %c0_60 = arith.constant 0 : index
    %c0_61 = arith.constant 0 : index
    %c0_62 = arith.constant 0 : index
    %121 = vector.load %arg11[%c0_60, %c0_61, %c0_62] : memref<2x1x128xf32, #tpu.memory_space<vmem>>, vector<1x1x128xf32>
    %122 = vector.shape_cast %121 : vector<1x1x128xf32> to vector<1x128xf32>
    %123 = vector.broadcast %122 : vector<1x128xf32> to vector<128x128xf32>
    %124 = arith.addf %120, %123 : vector<128x128xf32>
    %cst_63 = arith.constant 5.000000e-01 : f32
    %125 = vector.broadcast %cst_63 : f32 to vector<128x128xf32>
    %126 = arith.mulf %125, %124 : vector<128x128xf32>
    %cst_64 = arith.constant 4.471500e-02 : f32
    %127 = vector.broadcast %cst_64 : f32 to vector<128x128xf32>
    %128 = arith.mulf %127, %124 : vector<128x128xf32>
    %129 = arith.mulf %128, %124 : vector<128x128xf32>
    %130 = arith.mulf %129, %124 : vector<128x128xf32>
    %131 = arith.addf %124, %130 : vector<128x128xf32>
    %cst_65 = arith.constant 0.797884583 : f32
    %132 = vector.broadcast %cst_65 : f32 to vector<128x128xf32>
    %133 = arith.mulf %132, %131 : vector<128x128xf32>
    %134 = math.tanh %133 : vector<128x128xf32>
    %cst_66 = arith.constant 1.000000e+00 : f32
    %135 = vector.broadcast %cst_66 : f32 to vector<128x128xf32>
    %136 = arith.addf %135, %134 : vector<128x128xf32>
    %137 = arith.mulf %126, %136 : vector<128x128xf32>
    %138 = arith.truncf %137 : vector<128x128xf32> to vector<128x128xbf16>
    %c0_67 = arith.constant 0 : index
    %c0_68 = arith.constant 0 : index
    %c0_69 = arith.constant 0 : index
    %139 = vector.load %arg12[%c0_67, %c0_68, %c0_69] : memref<2x128x32xbf16, #tpu.memory_space<vmem>>, vector<1x128x32xbf16>
    %140 = vector.shape_cast %139 : vector<1x128x32xbf16> to vector<128x32xbf16>
    %cst_70 = arith.constant dense<0.000000e+00> : vector<128x32xf32>
    %141 = tpu.matmul %138, %140, %cst_70 {dimension_numbers = #tpu.dot_dimension_numbers<[1], [0], [0], [1], [0, 0, 1, 1], [], []>} : vector<128x128xbf16>, vector<128x32xbf16>, vector<128x32xf32> -> vector<128x32xf32>
    %142 = arith.addf %90, %141 : vector<128x32xf32>
    %c0_71 = arith.constant 0 : index
    %c0_72 = arith.constant 0 : index
    %c0_73 = arith.constant 0 : index
    %143 = vector.load %arg13[%c0_71, %c0_72, %c0_73] : memref<2x1x32xf32, #tpu.memory_space<vmem>>, vector<1x1x32xf32>
    %144 = vector.shape_cast %143 : vector<1x1x32xf32> to vector<1x32xf32>
    %145 = vector.broadcast %144 : vector<1x32xf32> to vector<128x32xf32>
    %146 = arith.addf %142, %145 : vector<128x32xf32>
    %c1_74 = arith.constant 1 : index
    %c0_75 = arith.constant 0 : index
    %c0_76 = arith.constant 0 : index
    %147 = vector.load %arg1[%c1_74, %c0_75, %c0_76] : memref<2x1x32xf32, #tpu.memory_space<vmem>>, vector<1x1x32xf32>
    %148 = vector.shape_cast %147 : vector<1x1x32xf32> to vector<1x32xf32>
    %c1_77 = arith.constant 1 : index
    %c0_78 = arith.constant 0 : index
    %c0_79 = arith.constant 0 : index
    %149 = vector.load %arg2[%c1_77, %c0_78, %c0_79] : memref<2x1x32xf32, #tpu.memory_space<vmem>>, vector<1x1x32xf32>
    %150 = vector.shape_cast %149 : vector<1x1x32xf32> to vector<1x32xf32>
    %cst_80 = arith.constant dense<0.000000e+00> : vector<128xf32>
    %151 = vector.multi_reduction <add>, %146, %cst_80 [1] : vector<128x32xf32> to vector<128xf32>
    %152 = vector.shape_cast %151 : vector<128xf32> to vector<128x1xf32>
    %cst_81 = arith.constant 3.200000e+01 : f32
    %153 = vector.broadcast %cst_81 : f32 to vector<128x1xf32>
    %154 = arith.divf %152, %153 : vector<128x1xf32>
    %155 = vector.broadcast %154 : vector<128x1xf32> to vector<128x32xf32>
    %156 = arith.subf %146, %155 : vector<128x32xf32>
    %157 = arith.mulf %156, %156 : vector<128x32xf32>
    %cst_82 = arith.constant dense<0.000000e+00> : vector<128xf32>
    %158 = vector.multi_reduction <add>, %157, %cst_82 [1] : vector<128x32xf32> to vector<128xf32>
    %159 = vector.shape_cast %158 : vector<128xf32> to vector<128x1xf32>
    %cst_83 = arith.constant 3.200000e+01 : f32
    %160 = vector.broadcast %cst_83 : f32 to vector<128x1xf32>
    %161 = arith.divf %159, %160 : vector<128x1xf32>
    %162 = vector.broadcast %154 : vector<128x1xf32> to vector<128x32xf32>
    %163 = arith.subf %146, %162 : vector<128x32xf32>
    %cst_84 = arith.constant 9.99999974E-6 : f32
    %164 = vector.broadcast %cst_84 : f32 to vector<128x1xf32>
    %165 = arith.addf %161, %164 : vector<128x1xf32>
    %166 = math.rsqrt %165 : vector<128x1xf32>
    %167 = vector.broadcast %166 : vector<128x1xf32> to vector<128x32xf32>
    %168 = arith.mulf %163, %167 : vector<128x32xf32>
    %169 = vector.broadcast %148 : vector<1x32xf32> to vector<128x32xf32>
    %170 = arith.mulf %168, %169 : vector<128x32xf32>
    %171 = vector.broadcast %150 : vector<1x32xf32> to vector<128x32xf32>
    %172 = arith.addf %170, %171 : vector<128x32xf32>
    %173 = arith.truncf %172 : vector<128x32xf32> to vector<128x32xbf16>
    %c1_85 = arith.constant 1 : index
    %c0_86 = arith.constant 0 : index
    %c0_87 = arith.constant 0 : index
    %174 = vector.load %arg3[%c1_85, %c0_86, %c0_87] : memref<2x32x96xbf16, #tpu.memory_space<vmem>>, vector<1x32x96xbf16>
    %175 = vector.shape_cast %174 : vector<1x32x96xbf16> to vector<32x96xbf16>
    %cst_88 = arith.constant dense<0.000000e+00> : vector<128x96xf32>
    %176 = tpu.matmul %173, %175, %cst_88 {dimension_numbers = #tpu.dot_dimension_numbers<[1], [0], [0], [1], [0, 0, 1, 1], [], []>} : vector<128x32xbf16>, vector<32x96xbf16>, vector<128x96xf32> -> vector<128x96xf32>
    %c1_89 = arith.constant 1 : index
    %c0_90 = arith.constant 0 : index
    %c0_91 = arith.constant 0 : index
    %177 = vector.load %arg4[%c1_89, %c0_90, %c0_91] : memref<2x1x96xf32, #tpu.memory_space<vmem>>, vector<1x1x96xf32>
    %178 = vector.shape_cast %177 : vector<1x1x96xf32> to vector<1x96xf32>
    %179 = vector.broadcast %178 : vector<1x96xf32> to vector<128x96xf32>
    %180 = arith.addf %176, %179 : vector<128x96xf32>
    %181 = vector.extract_strided_slice %180 {offsets = [0, 0], sizes = [128, 16], strides = [1, 1]} : vector<128x96xf32> to vector<128x16xf32>
    %182 = arith.truncf %181 : vector<128x16xf32> to vector<128x16xbf16>
    %183 = vector.extract_strided_slice %180 {offsets = [0, 32], sizes = [128, 16], strides = [1, 1]} : vector<128x96xf32> to vector<128x16xf32>
    %184 = arith.truncf %183 : vector<128x16xf32> to vector<128x16xbf16>
    %185 = vector.extract_strided_slice %180 {offsets = [0, 64], sizes = [128, 16], strides = [1, 1]} : vector<128x96xf32> to vector<128x16xf32>
    %186 = arith.truncf %185 : vector<128x16xf32> to vector<128x16xbf16>
    "tpu.trace_start"() <{level = 10 : i32, message = "nd,md->nm"}> : () -> ()
    %cst_92 = arith.constant dense<0.000000e+00> : vector<128x128xf32>
    %187 = tpu.matmul %182, %184, %cst_92 {dimension_numbers = #tpu.dot_dimension_numbers<[1], [1], [0], [0], [0, 0, 1, 0], [], []>} : vector<128x16xbf16>, vector<128x16xbf16>, vector<128x128xf32> -> vector<128x128xf32>
    "tpu.trace_stop"() : () -> ()
    %c1_93 = arith.constant 1 : index
    %c0_94 = arith.constant 0 : index
    %c0_95 = arith.constant 0 : index
    %c0_96 = arith.constant 0 : index
    %188 = vector.load %arg5[%c1_93, %c0_94, %c0_95, %c0_96] : memref<2x2x128x128xf32, #tpu.memory_space<vmem>>, vector<1x1x128x128xf32>
    %189 = vector.shape_cast %188 : vector<1x1x128x128xf32> to vector<128x128xf32>
    %190 = arith.addf %187, %189 : vector<128x128xf32>
    %cst_97 = arith.constant dense<0xFF800000> : vector<128xf32>
    %191 = vector.multi_reduction <maximumf>, %190, %cst_97 [1] : vector<128x128xf32> to vector<128xf32>
    %192 = vector.shape_cast %191 : vector<128xf32> to vector<128x1xf32>
    %193 = vector.broadcast %192 : vector<128x1xf32> to vector<128x128xf32>
    %194 = arith.subf %190, %193 : vector<128x128xf32>
    %195 = math.exp %194 : vector<128x128xf32>
    %cst_98 = arith.constant dense<0.000000e+00> : vector<128xf32>
    %196 = vector.multi_reduction <add>, %195, %cst_98 [1] : vector<128x128xf32> to vector<128xf32>
    %197 = vector.shape_cast %196 : vector<128xf32> to vector<128x1xf32>
    %198 = tpu.reciprocal %197 {approx = true} : vector<128x1xf32> -> vector<128x1xf32>
    %199 = vector.broadcast %198 : vector<128x1xf32> to vector<128x128xf32>
    %200 = arith.mulf %195, %199 : vector<128x128xf32>
    %201 = arith.truncf %200 : vector<128x128xf32> to vector<128x128xbf16>
    %cst_99 = arith.constant dense<0.000000e+00> : vector<128x16xf32>
    %202 = tpu.matmul %201, %186, %cst_99 {dimension_numbers = #tpu.dot_dimension_numbers<[1], [0], [0], [1], [0, 0, 1, 1], [], []>} : vector<128x128xbf16>, vector<128x16xbf16>, vector<128x16xf32> -> vector<128x16xf32>
    %c0_100 = arith.constant 0 : index
    %c0_101 = arith.constant 0 : index
    %203 = vector.load %arg15[%c0_100, %c0_101] : memref<128x32xf32, #tpu.memory_space<vmem>>, vector<128x16xf32>
    tpu.vector_store %arg15[%c0_100, %c0_101], %202 {strides = array<i32>} : memref<128x32xf32, #tpu.memory_space<vmem>>, vector<128x16xf32>,
    %204 = vector.extract_strided_slice %180 {offsets = [0, 16], sizes = [128, 16], strides = [1, 1]} : vector<128x96xf32> to vector<128x16xf32>
    %205 = arith.truncf %204 : vector<128x16xf32> to vector<128x16xbf16>
    %206 = vector.extract_strided_slice %180 {offsets = [0, 48], sizes = [128, 16], strides = [1, 1]} : vector<128x96xf32> to vector<128x16xf32>
    %207 = arith.truncf %206 : vector<128x16xf32> to vector<128x16xbf16>
    %208 = vector.extract_strided_slice %180 {offsets = [0, 80], sizes = [128, 16], strides = [1, 1]} : vector<128x96xf32> to vector<128x16xf32>
    %209 = arith.truncf %208 : vector<128x16xf32> to vector<128x16xbf16>
    "tpu.trace_start"() <{level = 10 : i32, message = "nd,md->nm"}> : () -> ()
    %cst_102 = arith.constant dense<0.000000e+00> : vector<128x128xf32>
    %210 = tpu.matmul %205, %207, %cst_102 {dimension_numbers = #tpu.dot_dimension_numbers<[1], [1], [0], [0], [0, 0, 1, 0], [], []>} : vector<128x16xbf16>, vector<128x16xbf16>, vector<128x128xf32> -> vector<128x128xf32>
    "tpu.trace_stop"() : () -> ()
    %c1_103 = arith.constant 1 : index
    %c1_104 = arith.constant 1 : index
    %c0_105 = arith.constant 0 : index
    %c0_106 = arith.constant 0 : index
    %211 = vector.load %arg5[%c1_103, %c1_104, %c0_105, %c0_106] : memref<2x2x128x128xf32, #tpu.memory_space<vmem>>, vector<1x1x128x128xf32>
    %212 = vector.shape_cast %211 : vector<1x1x128x128xf32> to vector<128x128xf32>
    %213 = arith.addf %210, %212 : vector<128x128xf32>
    %cst_107 = arith.constant dense<0xFF800000> : vector<128xf32>
    %214 = vector.multi_reduction <maximumf>, %213, %cst_107 [1] : vector<128x128xf32> to vector<128xf32>
    %215 = vector.shape_cast %214 : vector<128xf32> to vector<128x1xf32>
    %216 = vector.broadcast %215 : vector<128x1xf32> to vector<128x128xf32>
    %217 = arith.subf %213, %216 : vector<128x128xf32>
    %218 = math.exp %217 : vector<128x128xf32>
    %cst_108 = arith.constant dense<0.000000e+00> : vector<128xf32>
    %219 = vector.multi_reduction <add>, %218, %cst_108 [1] : vector<128x128xf32> to vector<128xf32>
    %220 = vector.shape_cast %219 : vector<128xf32> to vector<128x1xf32>
    %221 = tpu.reciprocal %220 {approx = true} : vector<128x1xf32> -> vector<128x1xf32>
    %222 = vector.broadcast %221 : vector<128x1xf32> to vector<128x128xf32>
    %223 = arith.mulf %218, %222 : vector<128x128xf32>
    %224 = arith.truncf %223 : vector<128x128xf32> to vector<128x128xbf16>
    %cst_109 = arith.constant dense<0.000000e+00> : vector<128x16xf32>
    %225 = tpu.matmul %224, %209, %cst_109 {dimension_numbers = #tpu.dot_dimension_numbers<[1], [0], [0], [1], [0, 0, 1, 1], [], []>} : vector<128x128xbf16>, vector<128x16xbf16>, vector<128x16xf32> -> vector<128x16xf32>
    %c0_110 = arith.constant 0 : index
    %c16_111 = arith.constant 16 : index
    %226 = vector.load %arg15[%c0_110, %c16_111] : memref<128x32xf32, #tpu.memory_space<vmem>>, vector<128x16xf32>
    tpu.vector_store %arg15[%c0_110, %c16_111], %225 {strides = array<i32>} : memref<128x32xf32, #tpu.memory_space<vmem>>, vector<128x16xf32>,
    %c0_112 = arith.constant 0 : index
    %c0_113 = arith.constant 0 : index
    %227 = vector.load %arg15[%c0_112, %c0_113] : memref<128x32xf32, #tpu.memory_space<vmem>>, vector<128x32xf32>
    %228 = arith.truncf %227 : vector<128x32xf32> to vector<128x32xbf16>
    %c1_114 = arith.constant 1 : index
    %c0_115 = arith.constant 0 : index
    %c0_116 = arith.constant 0 : index
    %229 = vector.load %arg6[%c1_114, %c0_115, %c0_116] : memref<2x32x32xbf16, #tpu.memory_space<vmem>>, vector<1x32x32xbf16>
    %230 = vector.shape_cast %229 : vector<1x32x32xbf16> to vector<32x32xbf16>
    %cst_117 = arith.constant dense<0.000000e+00> : vector<128x32xf32>
    %231 = tpu.matmul %228, %230, %cst_117 {dimension_numbers = #tpu.dot_dimension_numbers<[1], [0], [0], [1], [0, 0, 1, 1], [], []>} : vector<128x32xbf16>, vector<32x32xbf16>, vector<128x32xf32> -> vector<128x32xf32>
    %232 = arith.addf %146, %231 : vector<128x32xf32>
    %c1_118 = arith.constant 1 : index
    %c0_119 = arith.constant 0 : index
    %c0_120 = arith.constant 0 : index
    %233 = vector.load %arg7[%c1_118, %c0_119, %c0_120] : memref<2x1x32xf32, #tpu.memory_space<vmem>>, vector<1x1x32xf32>
    %234 = vector.shape_cast %233 : vector<1x1x32xf32> to vector<1x32xf32>
    %235 = vector.broadcast %234 : vector<1x32xf32> to vector<128x32xf32>
    %236 = arith.addf %232, %235 : vector<128x32xf32>
    %c1_121 = arith.constant 1 : index
    %c0_122 = arith.constant 0 : index
    %c0_123 = arith.constant 0 : index
    %237 = vector.load %arg8[%c1_121, %c0_122, %c0_123] : memref<2x1x32xf32, #tpu.memory_space<vmem>>, vector<1x1x32xf32>
    %238 = vector.shape_cast %237 : vector<1x1x32xf32> to vector<1x32xf32>
    %c1_124 = arith.constant 1 : index
    %c0_125 = arith.constant 0 : index
    %c0_126 = arith.constant 0 : index
    %239 = vector.load %arg9[%c1_124, %c0_125, %c0_126] : memref<2x1x32xf32, #tpu.memory_space<vmem>>, vector<1x1x32xf32>
    %240 = vector.shape_cast %239 : vector<1x1x32xf32> to vector<1x32xf32>
    %cst_127 = arith.constant dense<0.000000e+00> : vector<128xf32>
    %241 = vector.multi_reduction <add>, %236, %cst_127 [1] : vector<128x32xf32> to vector<128xf32>
    %242 = vector.shape_cast %241 : vector<128xf32> to vector<128x1xf32>
    %cst_128 = arith.constant 3.200000e+01 : f32
    %243 = vector.broadcast %cst_128 : f32 to vector<128x1xf32>
    %244 = arith.divf %242, %243 : vector<128x1xf32>
    %245 = vector.broadcast %244 : vector<128x1xf32> to vector<128x32xf32>
    %246 = arith.subf %236, %245 : vector<128x32xf32>
    %247 = arith.mulf %246, %246 : vector<128x32xf32>
    %cst_129 = arith.constant dense<0.000000e+00> : vector<128xf32>
    %248 = vector.multi_reduction <add>, %247, %cst_129 [1] : vector<128x32xf32> to vector<128xf32>
    %249 = vector.shape_cast %248 : vector<128xf32> to vector<128x1xf32>
    %cst_130 = arith.constant 3.200000e+01 : f32
    %250 = vector.broadcast %cst_130 : f32 to vector<128x1xf32>
    %251 = arith.divf %249, %250 : vector<128x1xf32>
    %252 = vector.broadcast %244 : vector<128x1xf32> to vector<128x32xf32>
    %253 = arith.subf %236, %252 : vector<128x32xf32>
    %cst_131 = arith.constant 9.99999974E-6 : f32
    %254 = vector.broadcast %cst_131 : f32 to vector<128x1xf32>
    %255 = arith.addf %251, %254 : vector<128x1xf32>
    %256 = math.rsqrt %255 : vector<128x1xf32>
    %257 = vector.broadcast %256 : vector<128x1xf32> to vector<128x32xf32>
    %258 = arith.mulf %253, %257 : vector<128x32xf32>
    %259 = vector.broadcast %238 : vector<1x32xf32> to vector<128x32xf32>
    %260 = arith.mulf %258, %259 : vector<128x32xf32>
    %261 = vector.broadcast %240 : vector<1x32xf32> to vector<128x32xf32>
    %262 = arith.addf %260, %261 : vector<128x32xf32>
    %263 = arith.truncf %262 : vector<128x32xf32> to vector<128x32xbf16>
    %c1_132 = arith.constant 1 : index
    %c0_133 = arith.constant 0 : index
    %c0_134 = arith.constant 0 : index
    %264 = vector.load %arg10[%c1_132, %c0_133, %c0_134] : memref<2x32x128xbf16, #tpu.memory_space<vmem>>, vector<1x32x128xbf16>
    %265 = vector.shape_cast %264 : vector<1x32x128xbf16> to vector<32x128xbf16>
    %cst_135 = arith.constant dense<0.000000e+00> : vector<128x128xf32>
    %266 = tpu.matmul %263, %265, %cst_135 {dimension_numbers = #tpu.dot_dimension_numbers<[1], [0], [0], [1], [0, 0, 1, 1], [], []>} : vector<128x32xbf16>, vector<32x128xbf16>, vector<128x128xf32> -> vector<128x128xf32>
    %c1_136 = arith.constant 1 : index
    %c0_137 = arith.constant 0 : index
    %c0_138 = arith.constant 0 : index
    %267 = vector.load %arg11[%c1_136, %c0_137, %c0_138] : memref<2x1x128xf32, #tpu.memory_space<vmem>>, vector<1x1x128xf32>
    %268 = vector.shape_cast %267 : vector<1x1x128xf32> to vector<1x128xf32>
    %269 = vector.broadcast %268 : vector<1x128xf32> to vector<128x128xf32>
    %270 = arith.addf %266, %269 : vector<128x128xf32>
    %cst_139 = arith.constant 5.000000e-01 : f32
    %271 = vector.broadcast %cst_139 : f32 to vector<128x128xf32>
    %272 = arith.mulf %271, %270 : vector<128x128xf32>
    %cst_140 = arith.constant 4.471500e-02 : f32
    %273 = vector.broadcast %cst_140 : f32 to vector<128x128xf32>
    %274 = arith.mulf %273, %270 : vector<128x128xf32>
    %275 = arith.mulf %274, %270 : vector<128x128xf32>
    %276 = arith.mulf %275, %270 : vector<128x128xf32>
    %277 = arith.addf %270, %276 : vector<128x128xf32>
    %cst_141 = arith.constant 0.797884583 : f32
    %278 = vector.broadcast %cst_141 : f32 to vector<128x128xf32>
    %279 = arith.mulf %278, %277 : vector<128x128xf32>
    %280 = math.tanh %279 : vector<128x128xf32>
    %cst_142 = arith.constant 1.000000e+00 : f32
    %281 = vector.broadcast %cst_142 : f32 to vector<128x128xf32>
    %282 = arith.addf %281, %280 : vector<128x128xf32>
    %283 = arith.mulf %272, %282 : vector<128x128xf32>
    %284 = arith.truncf %283 : vector<128x128xf32> to vector<128x128xbf16>
    %c1_143 = arith.constant 1 : index
    %c0_144 = arith.constant 0 : index
    %c0_145 = arith.constant 0 : index
    %285 = vector.load %arg12[%c1_143, %c0_144, %c0_145] : memref<2x128x32xbf16, #tpu.memory_space<vmem>>, vector<1x128x32xbf16>
    %286 = vector.shape_cast %285 : vector<1x128x32xbf16> to vector<128x32xbf16>
    %cst_146 = arith.constant dense<0.000000e+00> : vector<128x32xf32>
    %287 = tpu.matmul %284, %286, %cst_146 {dimension_numbers = #tpu.dot_dimension_numbers<[1], [0], [0], [1], [0, 0, 1, 1], [], []>} : vector<128x128xbf16>, vector<128x32xbf16>, vector<128x32xf32> -> vector<128x32xf32>
    %288 = arith.addf %236, %287 : vector<128x32xf32>
    %c1_147 = arith.constant 1 : index
    %c0_148 = arith.constant 0 : index
    %c0_149 = arith.constant 0 : index
    %289 = vector.load %arg13[%c1_147, %c0_148, %c0_149] : memref<2x1x32xf32, #tpu.memory_space<vmem>>, vector<1x1x32xf32>
    %290 = vector.shape_cast %289 : vector<1x1x32xf32> to vector<1x32xf32>
    %291 = vector.broadcast %290 : vector<1x32xf32> to vector<128x32xf32>
    %292 = arith.addf %288, %291 : vector<128x32xf32>
    %c0_150 = arith.constant 0 : index
    %c0_151 = arith.constant 0 : index
    %293 = vector.load %arg14[%c0_150, %c0_151] : memref<128x32xf32, #tpu.memory_space<vmem>>, vector<128x32xf32>
    tpu.vector_store %arg14[%c0_150, %c0_151], %292 {strides = array<i32>} : memref<128x32xf32, #tpu.memory_space<vmem>>, vector<128x32xf32>,
    return
  }
}

module attributes {stable_mosaic.version = 11 : i64} {
  func.func @_merge_kernel(%arg0: memref<32x128xf32, #tpu.memory_space<vmem>>, %arg1: memref<1x128xf32, #tpu.memory_space<vmem>>, %arg2: memref<1x128xf32, #tpu.memory_space<vmem>>, %arg3: memref<128x64xbf16, #tpu.memory_space<vmem>>, %arg4: memref<32x64xf32, #tpu.memory_space<vmem>>) attributes {dimension_semantics = [], scalar_prefetch = 0 : i64, scratch_operands = 0 : i64, tpu.core_type = #tpu.core_type<tc>} {
    %c0 = arith.constant 0 : index
    %c0_0 = arith.constant 0 : index
    %0 = vector.load %arg0[%c0, %c0_0] : memref<32x128xf32, #tpu.memory_space<vmem>>, vector<32x128xf32>
    %c0_1 = arith.constant 0 : index
    %c0_2 = arith.constant 0 : index
    %1 = vector.load %arg1[%c0_1, %c0_2] : memref<1x128xf32, #tpu.memory_space<vmem>>, vector<1x128xf32>
    %c0_3 = arith.constant 0 : index
    %c0_4 = arith.constant 0 : index
    %2 = vector.load %arg2[%c0_3, %c0_4] : memref<1x128xf32, #tpu.memory_space<vmem>>, vector<1x128xf32>
    %cst = arith.constant dense<0.000000e+00> : vector<32xf32>
    %3 = vector.multi_reduction <add>, %0, %cst [1] : vector<32x128xf32> to vector<32xf32>
    %4 = vector.shape_cast %3 : vector<32xf32> to vector<32x1xf32>
    %cst_5 = arith.constant 1.280000e+02 : f32
    %5 = vector.broadcast %cst_5 : f32 to vector<32x1xf32>
    %6 = arith.divf %4, %5 : vector<32x1xf32>
    %7 = vector.broadcast %6 : vector<32x1xf32> to vector<32x128xf32>
    %8 = arith.subf %0, %7 : vector<32x128xf32>
    %9 = arith.mulf %8, %8 : vector<32x128xf32>
    %cst_6 = arith.constant dense<0.000000e+00> : vector<32xf32>
    %10 = vector.multi_reduction <add>, %9, %cst_6 [1] : vector<32x128xf32> to vector<32xf32>
    %11 = vector.shape_cast %10 : vector<32xf32> to vector<32x1xf32>
    %cst_7 = arith.constant 1.280000e+02 : f32
    %12 = vector.broadcast %cst_7 : f32 to vector<32x1xf32>
    %13 = arith.divf %11, %12 : vector<32x1xf32>
    %14 = vector.broadcast %6 : vector<32x1xf32> to vector<32x128xf32>
    %15 = arith.subf %0, %14 : vector<32x128xf32>
    %cst_8 = arith.constant 9.99999974E-6 : f32
    %16 = vector.broadcast %cst_8 : f32 to vector<32x1xf32>
    %17 = arith.addf %13, %16 : vector<32x1xf32>
    %18 = math.rsqrt %17 : vector<32x1xf32>
    %19 = vector.broadcast %18 : vector<32x1xf32> to vector<32x128xf32>
    %20 = arith.mulf %15, %19 : vector<32x128xf32>
    %21 = vector.broadcast %1 : vector<1x128xf32> to vector<32x128xf32>
    %22 = arith.mulf %20, %21 : vector<32x128xf32>
    %23 = vector.broadcast %2 : vector<1x128xf32> to vector<32x128xf32>
    %24 = arith.addf %22, %23 : vector<32x128xf32>
    %25 = arith.truncf %24 : vector<32x128xf32> to vector<32x128xbf16>
    %c0_9 = arith.constant 0 : index
    %c0_10 = arith.constant 0 : index
    %26 = vector.load %arg3[%c0_9, %c0_10] : memref<128x64xbf16, #tpu.memory_space<vmem>>, vector<128x64xbf16>
    %cst_11 = arith.constant dense<0.000000e+00> : vector<32x64xf32>
    %27 = tpu.matmul %25, %26, %cst_11 {dimension_numbers = #tpu.dot_dimension_numbers<[1], [0], [0], [1], [0, 0, 1, 1], [], []>} : vector<32x128xbf16>, vector<128x64xbf16>, vector<32x64xf32> -> vector<32x64xf32>
    %c0_12 = arith.constant 0 : index
    %c0_13 = arith.constant 0 : index
    %28 = vector.load %arg4[%c0_12, %c0_13] : memref<32x64xf32, #tpu.memory_space<vmem>>, vector<32x64xf32>
    tpu.vector_store %arg4[%c0_12, %c0_13], %27 {strides = array<i32>} : memref<32x64xf32, #tpu.memory_space<vmem>>, vector<32x64xf32>,
    return
  }
}

module attributes {stable_mosaic.version = 11 : i64} {
  func.func @_stage_kernel(%arg0: memref<32x64xf32, #tpu.memory_space<vmem>>, %arg1: memref<2x1x64xf32, #tpu.memory_space<vmem>>, %arg2: memref<2x1x64xf32, #tpu.memory_space<vmem>>, %arg3: memref<2x64x192xbf16, #tpu.memory_space<vmem>>, %arg4: memref<2x1x192xf32, #tpu.memory_space<vmem>>, %arg5: memref<2x4x32x32xf32, #tpu.memory_space<vmem>>, %arg6: memref<2x64x64xbf16, #tpu.memory_space<vmem>>, %arg7: memref<2x1x64xf32, #tpu.memory_space<vmem>>, %arg8: memref<2x1x64xf32, #tpu.memory_space<vmem>>, %arg9: memref<2x1x64xf32, #tpu.memory_space<vmem>>, %arg10: memref<2x64x256xbf16, #tpu.memory_space<vmem>>, %arg11: memref<2x1x256xf32, #tpu.memory_space<vmem>>, %arg12: memref<2x256x64xbf16, #tpu.memory_space<vmem>>, %arg13: memref<2x1x64xf32, #tpu.memory_space<vmem>>, %arg14: memref<1x64xf32, #tpu.memory_space<vmem>>, %arg15: memref<1x64xf32, #tpu.memory_space<vmem>>, %arg16: memref<2x32xf32, #tpu.memory_space<vmem>>, %arg17: memref<2x64xf32, #tpu.memory_space<vmem>>, %arg18: memref<32x64xf32, #tpu.memory_space<vmem>>) attributes {dimension_semantics = [], scalar_prefetch = 0 : i64, scratch_operands = 1 : i64, tpu.core_type = #tpu.core_type<tc>} {
    %c0 = arith.constant 0 : index
    %c0_0 = arith.constant 0 : index
    %0 = vector.load %arg0[%c0, %c0_0] : memref<32x64xf32, #tpu.memory_space<vmem>>, vector<32x64xf32>
    %c0_1 = arith.constant 0 : index
    %c0_2 = arith.constant 0 : index
    %c0_3 = arith.constant 0 : index
    %1 = vector.load %arg1[%c0_1, %c0_2, %c0_3] : memref<2x1x64xf32, #tpu.memory_space<vmem>>, vector<1x1x64xf32>
    %2 = vector.shape_cast %1 : vector<1x1x64xf32> to vector<1x64xf32>
    %c0_4 = arith.constant 0 : index
    %c0_5 = arith.constant 0 : index
    %c0_6 = arith.constant 0 : index
    %3 = vector.load %arg2[%c0_4, %c0_5, %c0_6] : memref<2x1x64xf32, #tpu.memory_space<vmem>>, vector<1x1x64xf32>
    %4 = vector.shape_cast %3 : vector<1x1x64xf32> to vector<1x64xf32>
    %cst = arith.constant dense<0.000000e+00> : vector<32xf32>
    %5 = vector.multi_reduction <add>, %0, %cst [1] : vector<32x64xf32> to vector<32xf32>
    %6 = vector.shape_cast %5 : vector<32xf32> to vector<32x1xf32>
    %cst_7 = arith.constant 6.400000e+01 : f32
    %7 = vector.broadcast %cst_7 : f32 to vector<32x1xf32>
    %8 = arith.divf %6, %7 : vector<32x1xf32>
    %9 = vector.broadcast %8 : vector<32x1xf32> to vector<32x64xf32>
    %10 = arith.subf %0, %9 : vector<32x64xf32>
    %11 = arith.mulf %10, %10 : vector<32x64xf32>
    %cst_8 = arith.constant dense<0.000000e+00> : vector<32xf32>
    %12 = vector.multi_reduction <add>, %11, %cst_8 [1] : vector<32x64xf32> to vector<32xf32>
    %13 = vector.shape_cast %12 : vector<32xf32> to vector<32x1xf32>
    %cst_9 = arith.constant 6.400000e+01 : f32
    %14 = vector.broadcast %cst_9 : f32 to vector<32x1xf32>
    %15 = arith.divf %13, %14 : vector<32x1xf32>
    %16 = vector.broadcast %8 : vector<32x1xf32> to vector<32x64xf32>
    %17 = arith.subf %0, %16 : vector<32x64xf32>
    %cst_10 = arith.constant 9.99999974E-6 : f32
    %18 = vector.broadcast %cst_10 : f32 to vector<32x1xf32>
    %19 = arith.addf %15, %18 : vector<32x1xf32>
    %20 = math.rsqrt %19 : vector<32x1xf32>
    %21 = vector.broadcast %20 : vector<32x1xf32> to vector<32x64xf32>
    %22 = arith.mulf %17, %21 : vector<32x64xf32>
    %23 = vector.broadcast %2 : vector<1x64xf32> to vector<32x64xf32>
    %24 = arith.mulf %22, %23 : vector<32x64xf32>
    %25 = vector.broadcast %4 : vector<1x64xf32> to vector<32x64xf32>
    %26 = arith.addf %24, %25 : vector<32x64xf32>
    %27 = arith.truncf %26 : vector<32x64xf32> to vector<32x64xbf16>
    %c0_11 = arith.constant 0 : index
    %c0_12 = arith.constant 0 : index
    %c0_13 = arith.constant 0 : index
    %28 = vector.load %arg3[%c0_11, %c0_12, %c0_13] : memref<2x64x192xbf16, #tpu.memory_space<vmem>>, vector<1x64x192xbf16>
    %29 = vector.shape_cast %28 : vector<1x64x192xbf16> to vector<64x192xbf16>
    %cst_14 = arith.constant dense<0.000000e+00> : vector<32x192xf32>
    %30 = tpu.matmul %27, %29, %cst_14 {dimension_numbers = #tpu.dot_dimension_numbers<[1], [0], [0], [1], [0, 0, 1, 1], [], []>} : vector<32x64xbf16>, vector<64x192xbf16>, vector<32x192xf32> -> vector<32x192xf32>
    %c0_15 = arith.constant 0 : index
    %c0_16 = arith.constant 0 : index
    %c0_17 = arith.constant 0 : index
    %31 = vector.load %arg4[%c0_15, %c0_16, %c0_17] : memref<2x1x192xf32, #tpu.memory_space<vmem>>, vector<1x1x192xf32>
    %32 = vector.shape_cast %31 : vector<1x1x192xf32> to vector<1x192xf32>
    %33 = vector.broadcast %32 : vector<1x192xf32> to vector<32x192xf32>
    %34 = arith.addf %30, %33 : vector<32x192xf32>
    %35 = vector.extract_strided_slice %34 {offsets = [0, 0], sizes = [32, 16], strides = [1, 1]} : vector<32x192xf32> to vector<32x16xf32>
    %36 = arith.truncf %35 : vector<32x16xf32> to vector<32x16xbf16>
    %37 = vector.extract_strided_slice %34 {offsets = [0, 64], sizes = [32, 16], strides = [1, 1]} : vector<32x192xf32> to vector<32x16xf32>
    %38 = arith.truncf %37 : vector<32x16xf32> to vector<32x16xbf16>
    %39 = vector.extract_strided_slice %34 {offsets = [0, 128], sizes = [32, 16], strides = [1, 1]} : vector<32x192xf32> to vector<32x16xf32>
    %40 = arith.truncf %39 : vector<32x16xf32> to vector<32x16xbf16>
    "tpu.trace_start"() <{level = 10 : i32, message = "nd,md->nm"}> : () -> ()
    %cst_18 = arith.constant dense<0.000000e+00> : vector<32x32xf32>
    %41 = tpu.matmul %36, %38, %cst_18 {dimension_numbers = #tpu.dot_dimension_numbers<[1], [1], [0], [0], [0, 0, 1, 0], [], []>} : vector<32x16xbf16>, vector<32x16xbf16>, vector<32x32xf32> -> vector<32x32xf32>
    "tpu.trace_stop"() : () -> ()
    %c0_19 = arith.constant 0 : index
    %c0_20 = arith.constant 0 : index
    %c0_21 = arith.constant 0 : index
    %c0_22 = arith.constant 0 : index
    %42 = vector.load %arg5[%c0_19, %c0_20, %c0_21, %c0_22] : memref<2x4x32x32xf32, #tpu.memory_space<vmem>>, vector<1x1x32x32xf32>
    %43 = vector.shape_cast %42 : vector<1x1x32x32xf32> to vector<32x32xf32>
    %44 = arith.addf %41, %43 : vector<32x32xf32>
    %cst_23 = arith.constant dense<0xFF800000> : vector<32xf32>
    %45 = vector.multi_reduction <maximumf>, %44, %cst_23 [1] : vector<32x32xf32> to vector<32xf32>
    %46 = vector.shape_cast %45 : vector<32xf32> to vector<32x1xf32>
    %47 = vector.broadcast %46 : vector<32x1xf32> to vector<32x32xf32>
    %48 = arith.subf %44, %47 : vector<32x32xf32>
    %49 = math.exp %48 : vector<32x32xf32>
    %cst_24 = arith.constant dense<0.000000e+00> : vector<32xf32>
    %50 = vector.multi_reduction <add>, %49, %cst_24 [1] : vector<32x32xf32> to vector<32xf32>
    %51 = vector.shape_cast %50 : vector<32xf32> to vector<32x1xf32>
    %52 = tpu.reciprocal %51 {approx = true} : vector<32x1xf32> -> vector<32x1xf32>
    %53 = vector.broadcast %52 : vector<32x1xf32> to vector<32x32xf32>
    %54 = arith.mulf %49, %53 : vector<32x32xf32>
    %55 = arith.truncf %54 : vector<32x32xf32> to vector<32x32xbf16>
    %cst_25 = arith.constant dense<0.000000e+00> : vector<32x16xf32>
    %56 = tpu.matmul %55, %40, %cst_25 {dimension_numbers = #tpu.dot_dimension_numbers<[1], [0], [0], [1], [0, 0, 1, 1], [], []>} : vector<32x32xbf16>, vector<32x16xbf16>, vector<32x16xf32> -> vector<32x16xf32>
    %c0_26 = arith.constant 0 : index
    %c0_27 = arith.constant 0 : index
    %57 = vector.load %arg18[%c0_26, %c0_27] : memref<32x64xf32, #tpu.memory_space<vmem>>, vector<32x16xf32>
    tpu.vector_store %arg18[%c0_26, %c0_27], %56 {strides = array<i32>} : memref<32x64xf32, #tpu.memory_space<vmem>>, vector<32x16xf32>,
    %58 = vector.extract_strided_slice %34 {offsets = [0, 16], sizes = [32, 16], strides = [1, 1]} : vector<32x192xf32> to vector<32x16xf32>
    %59 = arith.truncf %58 : vector<32x16xf32> to vector<32x16xbf16>
    %60 = vector.extract_strided_slice %34 {offsets = [0, 80], sizes = [32, 16], strides = [1, 1]} : vector<32x192xf32> to vector<32x16xf32>
    %61 = arith.truncf %60 : vector<32x16xf32> to vector<32x16xbf16>
    %62 = vector.extract_strided_slice %34 {offsets = [0, 144], sizes = [32, 16], strides = [1, 1]} : vector<32x192xf32> to vector<32x16xf32>
    %63 = arith.truncf %62 : vector<32x16xf32> to vector<32x16xbf16>
    "tpu.trace_start"() <{level = 10 : i32, message = "nd,md->nm"}> : () -> ()
    %cst_28 = arith.constant dense<0.000000e+00> : vector<32x32xf32>
    %64 = tpu.matmul %59, %61, %cst_28 {dimension_numbers = #tpu.dot_dimension_numbers<[1], [1], [0], [0], [0, 0, 1, 0], [], []>} : vector<32x16xbf16>, vector<32x16xbf16>, vector<32x32xf32> -> vector<32x32xf32>
    "tpu.trace_stop"() : () -> ()
    %c0_29 = arith.constant 0 : index
    %c1 = arith.constant 1 : index
    %c0_30 = arith.constant 0 : index
    %c0_31 = arith.constant 0 : index
    %65 = vector.load %arg5[%c0_29, %c1, %c0_30, %c0_31] : memref<2x4x32x32xf32, #tpu.memory_space<vmem>>, vector<1x1x32x32xf32>
    %66 = vector.shape_cast %65 : vector<1x1x32x32xf32> to vector<32x32xf32>
    %67 = arith.addf %64, %66 : vector<32x32xf32>
    %cst_32 = arith.constant dense<0xFF800000> : vector<32xf32>
    %68 = vector.multi_reduction <maximumf>, %67, %cst_32 [1] : vector<32x32xf32> to vector<32xf32>
    %69 = vector.shape_cast %68 : vector<32xf32> to vector<32x1xf32>
    %70 = vector.broadcast %69 : vector<32x1xf32> to vector<32x32xf32>
    %71 = arith.subf %67, %70 : vector<32x32xf32>
    %72 = math.exp %71 : vector<32x32xf32>
    %cst_33 = arith.constant dense<0.000000e+00> : vector<32xf32>
    %73 = vector.multi_reduction <add>, %72, %cst_33 [1] : vector<32x32xf32> to vector<32xf32>
    %74 = vector.shape_cast %73 : vector<32xf32> to vector<32x1xf32>
    %75 = tpu.reciprocal %74 {approx = true} : vector<32x1xf32> -> vector<32x1xf32>
    %76 = vector.broadcast %75 : vector<32x1xf32> to vector<32x32xf32>
    %77 = arith.mulf %72, %76 : vector<32x32xf32>
    %78 = arith.truncf %77 : vector<32x32xf32> to vector<32x32xbf16>
    %cst_34 = arith.constant dense<0.000000e+00> : vector<32x16xf32>
    %79 = tpu.matmul %78, %63, %cst_34 {dimension_numbers = #tpu.dot_dimension_numbers<[1], [0], [0], [1], [0, 0, 1, 1], [], []>} : vector<32x32xbf16>, vector<32x16xbf16>, vector<32x16xf32> -> vector<32x16xf32>
    %c0_35 = arith.constant 0 : index
    %c16 = arith.constant 16 : index
    %80 = vector.load %arg18[%c0_35, %c16] : memref<32x64xf32, #tpu.memory_space<vmem>>, vector<32x16xf32>
    tpu.vector_store %arg18[%c0_35, %c16], %79 {strides = array<i32>} : memref<32x64xf32, #tpu.memory_space<vmem>>, vector<32x16xf32>,
    %81 = vector.extract_strided_slice %34 {offsets = [0, 32], sizes = [32, 16], strides = [1, 1]} : vector<32x192xf32> to vector<32x16xf32>
    %82 = arith.truncf %81 : vector<32x16xf32> to vector<32x16xbf16>
    %83 = vector.extract_strided_slice %34 {offsets = [0, 96], sizes = [32, 16], strides = [1, 1]} : vector<32x192xf32> to vector<32x16xf32>
    %84 = arith.truncf %83 : vector<32x16xf32> to vector<32x16xbf16>
    %85 = vector.extract_strided_slice %34 {offsets = [0, 160], sizes = [32, 16], strides = [1, 1]} : vector<32x192xf32> to vector<32x16xf32>
    %86 = arith.truncf %85 : vector<32x16xf32> to vector<32x16xbf16>
    "tpu.trace_start"() <{level = 10 : i32, message = "nd,md->nm"}> : () -> ()
    %cst_36 = arith.constant dense<0.000000e+00> : vector<32x32xf32>
    %87 = tpu.matmul %82, %84, %cst_36 {dimension_numbers = #tpu.dot_dimension_numbers<[1], [1], [0], [0], [0, 0, 1, 0], [], []>} : vector<32x16xbf16>, vector<32x16xbf16>, vector<32x32xf32> -> vector<32x32xf32>
    "tpu.trace_stop"() : () -> ()
    %c0_37 = arith.constant 0 : index
    %c2 = arith.constant 2 : index
    %c0_38 = arith.constant 0 : index
    %c0_39 = arith.constant 0 : index
    %88 = vector.load %arg5[%c0_37, %c2, %c0_38, %c0_39] : memref<2x4x32x32xf32, #tpu.memory_space<vmem>>, vector<1x1x32x32xf32>
    %89 = vector.shape_cast %88 : vector<1x1x32x32xf32> to vector<32x32xf32>
    %90 = arith.addf %87, %89 : vector<32x32xf32>
    %cst_40 = arith.constant dense<0xFF800000> : vector<32xf32>
    %91 = vector.multi_reduction <maximumf>, %90, %cst_40 [1] : vector<32x32xf32> to vector<32xf32>
    %92 = vector.shape_cast %91 : vector<32xf32> to vector<32x1xf32>
    %93 = vector.broadcast %92 : vector<32x1xf32> to vector<32x32xf32>
    %94 = arith.subf %90, %93 : vector<32x32xf32>
    %95 = math.exp %94 : vector<32x32xf32>
    %cst_41 = arith.constant dense<0.000000e+00> : vector<32xf32>
    %96 = vector.multi_reduction <add>, %95, %cst_41 [1] : vector<32x32xf32> to vector<32xf32>
    %97 = vector.shape_cast %96 : vector<32xf32> to vector<32x1xf32>
    %98 = tpu.reciprocal %97 {approx = true} : vector<32x1xf32> -> vector<32x1xf32>
    %99 = vector.broadcast %98 : vector<32x1xf32> to vector<32x32xf32>
    %100 = arith.mulf %95, %99 : vector<32x32xf32>
    %101 = arith.truncf %100 : vector<32x32xf32> to vector<32x32xbf16>
    %cst_42 = arith.constant dense<0.000000e+00> : vector<32x16xf32>
    %102 = tpu.matmul %101, %86, %cst_42 {dimension_numbers = #tpu.dot_dimension_numbers<[1], [0], [0], [1], [0, 0, 1, 1], [], []>} : vector<32x32xbf16>, vector<32x16xbf16>, vector<32x16xf32> -> vector<32x16xf32>
    %c0_43 = arith.constant 0 : index
    %c32 = arith.constant 32 : index
    %103 = vector.load %arg18[%c0_43, %c32] : memref<32x64xf32, #tpu.memory_space<vmem>>, vector<32x16xf32>
    tpu.vector_store %arg18[%c0_43, %c32], %102 {strides = array<i32>} : memref<32x64xf32, #tpu.memory_space<vmem>>, vector<32x16xf32>,
    %104 = vector.extract_strided_slice %34 {offsets = [0, 48], sizes = [32, 16], strides = [1, 1]} : vector<32x192xf32> to vector<32x16xf32>
    %105 = arith.truncf %104 : vector<32x16xf32> to vector<32x16xbf16>
    %106 = vector.extract_strided_slice %34 {offsets = [0, 112], sizes = [32, 16], strides = [1, 1]} : vector<32x192xf32> to vector<32x16xf32>
    %107 = arith.truncf %106 : vector<32x16xf32> to vector<32x16xbf16>
    %108 = vector.extract_strided_slice %34 {offsets = [0, 176], sizes = [32, 16], strides = [1, 1]} : vector<32x192xf32> to vector<32x16xf32>
    %109 = arith.truncf %108 : vector<32x16xf32> to vector<32x16xbf16>
    "tpu.trace_start"() <{level = 10 : i32, message = "nd,md->nm"}> : () -> ()
    %cst_44 = arith.constant dense<0.000000e+00> : vector<32x32xf32>
    %110 = tpu.matmul %105, %107, %cst_44 {dimension_numbers = #tpu.dot_dimension_numbers<[1], [1], [0], [0], [0, 0, 1, 0], [], []>} : vector<32x16xbf16>, vector<32x16xbf16>, vector<32x32xf32> -> vector<32x32xf32>
    "tpu.trace_stop"() : () -> ()
    %c0_45 = arith.constant 0 : index
    %c3 = arith.constant 3 : index
    %c0_46 = arith.constant 0 : index
    %c0_47 = arith.constant 0 : index
    %111 = vector.load %arg5[%c0_45, %c3, %c0_46, %c0_47] : memref<2x4x32x32xf32, #tpu.memory_space<vmem>>, vector<1x1x32x32xf32>
    %112 = vector.shape_cast %111 : vector<1x1x32x32xf32> to vector<32x32xf32>
    %113 = arith.addf %110, %112 : vector<32x32xf32>
    %cst_48 = arith.constant dense<0xFF800000> : vector<32xf32>
    %114 = vector.multi_reduction <maximumf>, %113, %cst_48 [1] : vector<32x32xf32> to vector<32xf32>
    %115 = vector.shape_cast %114 : vector<32xf32> to vector<32x1xf32>
    %116 = vector.broadcast %115 : vector<32x1xf32> to vector<32x32xf32>
    %117 = arith.subf %113, %116 : vector<32x32xf32>
    %118 = math.exp %117 : vector<32x32xf32>
    %cst_49 = arith.constant dense<0.000000e+00> : vector<32xf32>
    %119 = vector.multi_reduction <add>, %118, %cst_49 [1] : vector<32x32xf32> to vector<32xf32>
    %120 = vector.shape_cast %119 : vector<32xf32> to vector<32x1xf32>
    %121 = tpu.reciprocal %120 {approx = true} : vector<32x1xf32> -> vector<32x1xf32>
    %122 = vector.broadcast %121 : vector<32x1xf32> to vector<32x32xf32>
    %123 = arith.mulf %118, %122 : vector<32x32xf32>
    %124 = arith.truncf %123 : vector<32x32xf32> to vector<32x32xbf16>
    %cst_50 = arith.constant dense<0.000000e+00> : vector<32x16xf32>
    %125 = tpu.matmul %124, %109, %cst_50 {dimension_numbers = #tpu.dot_dimension_numbers<[1], [0], [0], [1], [0, 0, 1, 1], [], []>} : vector<32x32xbf16>, vector<32x16xbf16>, vector<32x16xf32> -> vector<32x16xf32>
    %c0_51 = arith.constant 0 : index
    %c48 = arith.constant 48 : index
    %126 = vector.load %arg18[%c0_51, %c48] : memref<32x64xf32, #tpu.memory_space<vmem>>, vector<32x16xf32>
    tpu.vector_store %arg18[%c0_51, %c48], %125 {strides = array<i32>} : memref<32x64xf32, #tpu.memory_space<vmem>>, vector<32x16xf32>,
    %c0_52 = arith.constant 0 : index
    %c0_53 = arith.constant 0 : index
    %127 = vector.load %arg18[%c0_52, %c0_53] : memref<32x64xf32, #tpu.memory_space<vmem>>, vector<32x64xf32>
    %128 = arith.truncf %127 : vector<32x64xf32> to vector<32x64xbf16>
    %c0_54 = arith.constant 0 : index
    %c0_55 = arith.constant 0 : index
    %c0_56 = arith.constant 0 : index
    %129 = vector.load %arg6[%c0_54, %c0_55, %c0_56] : memref<2x64x64xbf16, #tpu.memory_space<vmem>>, vector<1x64x64xbf16>
    %130 = vector.shape_cast %129 : vector<1x64x64xbf16> to vector<64x64xbf16>
    %cst_57 = arith.constant dense<0.000000e+00> : vector<32x64xf32>
    %131 = tpu.matmul %128, %130, %cst_57 {dimension_numbers = #tpu.dot_dimension_numbers<[1], [0], [0], [1], [0, 0, 1, 1], [], []>} : vector<32x64xbf16>, vector<64x64xbf16>, vector<32x64xf32> -> vector<32x64xf32>
    %132 = arith.addf %0, %131 : vector<32x64xf32>
    %c0_58 = arith.constant 0 : index
    %c0_59 = arith.constant 0 : index
    %c0_60 = arith.constant 0 : index
    %133 = vector.load %arg7[%c0_58, %c0_59, %c0_60] : memref<2x1x64xf32, #tpu.memory_space<vmem>>, vector<1x1x64xf32>
    %134 = vector.shape_cast %133 : vector<1x1x64xf32> to vector<1x64xf32>
    %135 = vector.broadcast %134 : vector<1x64xf32> to vector<32x64xf32>
    %136 = arith.addf %132, %135 : vector<32x64xf32>
    %c0_61 = arith.constant 0 : index
    %c0_62 = arith.constant 0 : index
    %c0_63 = arith.constant 0 : index
    %137 = vector.load %arg8[%c0_61, %c0_62, %c0_63] : memref<2x1x64xf32, #tpu.memory_space<vmem>>, vector<1x1x64xf32>
    %138 = vector.shape_cast %137 : vector<1x1x64xf32> to vector<1x64xf32>
    %c0_64 = arith.constant 0 : index
    %c0_65 = arith.constant 0 : index
    %c0_66 = arith.constant 0 : index
    %139 = vector.load %arg9[%c0_64, %c0_65, %c0_66] : memref<2x1x64xf32, #tpu.memory_space<vmem>>, vector<1x1x64xf32>
    %140 = vector.shape_cast %139 : vector<1x1x64xf32> to vector<1x64xf32>
    %cst_67 = arith.constant dense<0.000000e+00> : vector<32xf32>
    %141 = vector.multi_reduction <add>, %136, %cst_67 [1] : vector<32x64xf32> to vector<32xf32>
    %142 = vector.shape_cast %141 : vector<32xf32> to vector<32x1xf32>
    %cst_68 = arith.constant 6.400000e+01 : f32
    %143 = vector.broadcast %cst_68 : f32 to vector<32x1xf32>
    %144 = arith.divf %142, %143 : vector<32x1xf32>
    %145 = vector.broadcast %144 : vector<32x1xf32> to vector<32x64xf32>
    %146 = arith.subf %136, %145 : vector<32x64xf32>
    %147 = arith.mulf %146, %146 : vector<32x64xf32>
    %cst_69 = arith.constant dense<0.000000e+00> : vector<32xf32>
    %148 = vector.multi_reduction <add>, %147, %cst_69 [1] : vector<32x64xf32> to vector<32xf32>
    %149 = vector.shape_cast %148 : vector<32xf32> to vector<32x1xf32>
    %cst_70 = arith.constant 6.400000e+01 : f32
    %150 = vector.broadcast %cst_70 : f32 to vector<32x1xf32>
    %151 = arith.divf %149, %150 : vector<32x1xf32>
    %152 = vector.broadcast %144 : vector<32x1xf32> to vector<32x64xf32>
    %153 = arith.subf %136, %152 : vector<32x64xf32>
    %cst_71 = arith.constant 9.99999974E-6 : f32
    %154 = vector.broadcast %cst_71 : f32 to vector<32x1xf32>
    %155 = arith.addf %151, %154 : vector<32x1xf32>
    %156 = math.rsqrt %155 : vector<32x1xf32>
    %157 = vector.broadcast %156 : vector<32x1xf32> to vector<32x64xf32>
    %158 = arith.mulf %153, %157 : vector<32x64xf32>
    %159 = vector.broadcast %138 : vector<1x64xf32> to vector<32x64xf32>
    %160 = arith.mulf %158, %159 : vector<32x64xf32>
    %161 = vector.broadcast %140 : vector<1x64xf32> to vector<32x64xf32>
    %162 = arith.addf %160, %161 : vector<32x64xf32>
    %163 = arith.truncf %162 : vector<32x64xf32> to vector<32x64xbf16>
    %c0_72 = arith.constant 0 : index
    %c0_73 = arith.constant 0 : index
    %c0_74 = arith.constant 0 : index
    %164 = vector.load %arg10[%c0_72, %c0_73, %c0_74] : memref<2x64x256xbf16, #tpu.memory_space<vmem>>, vector<1x64x256xbf16>
    %165 = vector.shape_cast %164 : vector<1x64x256xbf16> to vector<64x256xbf16>
    %cst_75 = arith.constant dense<0.000000e+00> : vector<32x256xf32>
    %166 = tpu.matmul %163, %165, %cst_75 {dimension_numbers = #tpu.dot_dimension_numbers<[1], [0], [0], [1], [0, 0, 1, 1], [], []>} : vector<32x64xbf16>, vector<64x256xbf16>, vector<32x256xf32> -> vector<32x256xf32>
    %c0_76 = arith.constant 0 : index
    %c0_77 = arith.constant 0 : index
    %c0_78 = arith.constant 0 : index
    %167 = vector.load %arg11[%c0_76, %c0_77, %c0_78] : memref<2x1x256xf32, #tpu.memory_space<vmem>>, vector<1x1x256xf32>
    %168 = vector.shape_cast %167 : vector<1x1x256xf32> to vector<1x256xf32>
    %169 = vector.broadcast %168 : vector<1x256xf32> to vector<32x256xf32>
    %170 = arith.addf %166, %169 : vector<32x256xf32>
    %cst_79 = arith.constant 5.000000e-01 : f32
    %171 = vector.broadcast %cst_79 : f32 to vector<32x256xf32>
    %172 = arith.mulf %171, %170 : vector<32x256xf32>
    %cst_80 = arith.constant 4.471500e-02 : f32
    %173 = vector.broadcast %cst_80 : f32 to vector<32x256xf32>
    %174 = arith.mulf %173, %170 : vector<32x256xf32>
    %175 = arith.mulf %174, %170 : vector<32x256xf32>
    %176 = arith.mulf %175, %170 : vector<32x256xf32>
    %177 = arith.addf %170, %176 : vector<32x256xf32>
    %cst_81 = arith.constant 0.797884583 : f32
    %178 = vector.broadcast %cst_81 : f32 to vector<32x256xf32>
    %179 = arith.mulf %178, %177 : vector<32x256xf32>
    %180 = math.tanh %179 : vector<32x256xf32>
    %cst_82 = arith.constant 1.000000e+00 : f32
    %181 = vector.broadcast %cst_82 : f32 to vector<32x256xf32>
    %182 = arith.addf %181, %180 : vector<32x256xf32>
    %183 = arith.mulf %172, %182 : vector<32x256xf32>
    %184 = arith.truncf %183 : vector<32x256xf32> to vector<32x256xbf16>
    %c0_83 = arith.constant 0 : index
    %c0_84 = arith.constant 0 : index
    %c0_85 = arith.constant 0 : index
    %185 = vector.load %arg12[%c0_83, %c0_84, %c0_85] : memref<2x256x64xbf16, #tpu.memory_space<vmem>>, vector<1x256x64xbf16>
    %186 = vector.shape_cast %185 : vector<1x256x64xbf16> to vector<256x64xbf16>
    %cst_86 = arith.constant dense<0.000000e+00> : vector<32x64xf32>
    %187 = tpu.matmul %184, %186, %cst_86 {dimension_numbers = #tpu.dot_dimension_numbers<[1], [0], [0], [1], [0, 0, 1, 1], [], []>} : vector<32x256xbf16>, vector<256x64xbf16>, vector<32x64xf32> -> vector<32x64xf32>
    %188 = arith.addf %136, %187 : vector<32x64xf32>
    %c0_87 = arith.constant 0 : index
    %c0_88 = arith.constant 0 : index
    %c0_89 = arith.constant 0 : index
    %189 = vector.load %arg13[%c0_87, %c0_88, %c0_89] : memref<2x1x64xf32, #tpu.memory_space<vmem>>, vector<1x1x64xf32>
    %190 = vector.shape_cast %189 : vector<1x1x64xf32> to vector<1x64xf32>
    %191 = vector.broadcast %190 : vector<1x64xf32> to vector<32x64xf32>
    %192 = arith.addf %188, %191 : vector<32x64xf32>
    %c1_90 = arith.constant 1 : index
    %c0_91 = arith.constant 0 : index
    %c0_92 = arith.constant 0 : index
    %193 = vector.load %arg1[%c1_90, %c0_91, %c0_92] : memref<2x1x64xf32, #tpu.memory_space<vmem>>, vector<1x1x64xf32>
    %194 = vector.shape_cast %193 : vector<1x1x64xf32> to vector<1x64xf32>
    %c1_93 = arith.constant 1 : index
    %c0_94 = arith.constant 0 : index
    %c0_95 = arith.constant 0 : index
    %195 = vector.load %arg2[%c1_93, %c0_94, %c0_95] : memref<2x1x64xf32, #tpu.memory_space<vmem>>, vector<1x1x64xf32>
    %196 = vector.shape_cast %195 : vector<1x1x64xf32> to vector<1x64xf32>
    %cst_96 = arith.constant dense<0.000000e+00> : vector<32xf32>
    %197 = vector.multi_reduction <add>, %192, %cst_96 [1] : vector<32x64xf32> to vector<32xf32>
    %198 = vector.shape_cast %197 : vector<32xf32> to vector<32x1xf32>
    %cst_97 = arith.constant 6.400000e+01 : f32
    %199 = vector.broadcast %cst_97 : f32 to vector<32x1xf32>
    %200 = arith.divf %198, %199 : vector<32x1xf32>
    %201 = vector.broadcast %200 : vector<32x1xf32> to vector<32x64xf32>
    %202 = arith.subf %192, %201 : vector<32x64xf32>
    %203 = arith.mulf %202, %202 : vector<32x64xf32>
    %cst_98 = arith.constant dense<0.000000e+00> : vector<32xf32>
    %204 = vector.multi_reduction <add>, %203, %cst_98 [1] : vector<32x64xf32> to vector<32xf32>
    %205 = vector.shape_cast %204 : vector<32xf32> to vector<32x1xf32>
    %cst_99 = arith.constant 6.400000e+01 : f32
    %206 = vector.broadcast %cst_99 : f32 to vector<32x1xf32>
    %207 = arith.divf %205, %206 : vector<32x1xf32>
    %208 = vector.broadcast %200 : vector<32x1xf32> to vector<32x64xf32>
    %209 = arith.subf %192, %208 : vector<32x64xf32>
    %cst_100 = arith.constant 9.99999974E-6 : f32
    %210 = vector.broadcast %cst_100 : f32 to vector<32x1xf32>
    %211 = arith.addf %207, %210 : vector<32x1xf32>
    %212 = math.rsqrt %211 : vector<32x1xf32>
    %213 = vector.broadcast %212 : vector<32x1xf32> to vector<32x64xf32>
    %214 = arith.mulf %209, %213 : vector<32x64xf32>
    %215 = vector.broadcast %194 : vector<1x64xf32> to vector<32x64xf32>
    %216 = arith.mulf %214, %215 : vector<32x64xf32>
    %217 = vector.broadcast %196 : vector<1x64xf32> to vector<32x64xf32>
    %218 = arith.addf %216, %217 : vector<32x64xf32>
    %219 = arith.truncf %218 : vector<32x64xf32> to vector<32x64xbf16>
    %c1_101 = arith.constant 1 : index
    %c0_102 = arith.constant 0 : index
    %c0_103 = arith.constant 0 : index
    %220 = vector.load %arg3[%c1_101, %c0_102, %c0_103] : memref<2x64x192xbf16, #tpu.memory_space<vmem>>, vector<1x64x192xbf16>
    %221 = vector.shape_cast %220 : vector<1x64x192xbf16> to vector<64x192xbf16>
    %cst_104 = arith.constant dense<0.000000e+00> : vector<32x192xf32>
    %222 = tpu.matmul %219, %221, %cst_104 {dimension_numbers = #tpu.dot_dimension_numbers<[1], [0], [0], [1], [0, 0, 1, 1], [], []>} : vector<32x64xbf16>, vector<64x192xbf16>, vector<32x192xf32> -> vector<32x192xf32>
    %c1_105 = arith.constant 1 : index
    %c0_106 = arith.constant 0 : index
    %c0_107 = arith.constant 0 : index
    %223 = vector.load %arg4[%c1_105, %c0_106, %c0_107] : memref<2x1x192xf32, #tpu.memory_space<vmem>>, vector<1x1x192xf32>
    %224 = vector.shape_cast %223 : vector<1x1x192xf32> to vector<1x192xf32>
    %225 = vector.broadcast %224 : vector<1x192xf32> to vector<32x192xf32>
    %226 = arith.addf %222, %225 : vector<32x192xf32>
    %227 = vector.extract_strided_slice %226 {offsets = [0, 0], sizes = [32, 16], strides = [1, 1]} : vector<32x192xf32> to vector<32x16xf32>
    %228 = arith.truncf %227 : vector<32x16xf32> to vector<32x16xbf16>
    %229 = vector.extract_strided_slice %226 {offsets = [0, 64], sizes = [32, 16], strides = [1, 1]} : vector<32x192xf32> to vector<32x16xf32>
    %230 = arith.truncf %229 : vector<32x16xf32> to vector<32x16xbf16>
    %231 = vector.extract_strided_slice %226 {offsets = [0, 128], sizes = [32, 16], strides = [1, 1]} : vector<32x192xf32> to vector<32x16xf32>
    %232 = arith.truncf %231 : vector<32x16xf32> to vector<32x16xbf16>
    "tpu.trace_start"() <{level = 10 : i32, message = "nd,md->nm"}> : () -> ()
    %cst_108 = arith.constant dense<0.000000e+00> : vector<32x32xf32>
    %233 = tpu.matmul %228, %230, %cst_108 {dimension_numbers = #tpu.dot_dimension_numbers<[1], [1], [0], [0], [0, 0, 1, 0], [], []>} : vector<32x16xbf16>, vector<32x16xbf16>, vector<32x32xf32> -> vector<32x32xf32>
    "tpu.trace_stop"() : () -> ()
    %c1_109 = arith.constant 1 : index
    %c0_110 = arith.constant 0 : index
    %c0_111 = arith.constant 0 : index
    %c0_112 = arith.constant 0 : index
    %234 = vector.load %arg5[%c1_109, %c0_110, %c0_111, %c0_112] : memref<2x4x32x32xf32, #tpu.memory_space<vmem>>, vector<1x1x32x32xf32>
    %235 = vector.shape_cast %234 : vector<1x1x32x32xf32> to vector<32x32xf32>
    %236 = arith.addf %233, %235 : vector<32x32xf32>
    %cst_113 = arith.constant dense<0xFF800000> : vector<32xf32>
    %237 = vector.multi_reduction <maximumf>, %236, %cst_113 [1] : vector<32x32xf32> to vector<32xf32>
    %238 = vector.shape_cast %237 : vector<32xf32> to vector<32x1xf32>
    %239 = vector.broadcast %238 : vector<32x1xf32> to vector<32x32xf32>
    %240 = arith.subf %236, %239 : vector<32x32xf32>
    %241 = math.exp %240 : vector<32x32xf32>
    %cst_114 = arith.constant dense<0.000000e+00> : vector<32xf32>
    %242 = vector.multi_reduction <add>, %241, %cst_114 [1] : vector<32x32xf32> to vector<32xf32>
    %243 = vector.shape_cast %242 : vector<32xf32> to vector<32x1xf32>
    %244 = tpu.reciprocal %243 {approx = true} : vector<32x1xf32> -> vector<32x1xf32>
    %245 = vector.broadcast %244 : vector<32x1xf32> to vector<32x32xf32>
    %246 = arith.mulf %241, %245 : vector<32x32xf32>
    %247 = arith.truncf %246 : vector<32x32xf32> to vector<32x32xbf16>
    %cst_115 = arith.constant dense<0.000000e+00> : vector<32x16xf32>
    %248 = tpu.matmul %247, %232, %cst_115 {dimension_numbers = #tpu.dot_dimension_numbers<[1], [0], [0], [1], [0, 0, 1, 1], [], []>} : vector<32x32xbf16>, vector<32x16xbf16>, vector<32x16xf32> -> vector<32x16xf32>
    %c0_116 = arith.constant 0 : index
    %c0_117 = arith.constant 0 : index
    %249 = vector.load %arg18[%c0_116, %c0_117] : memref<32x64xf32, #tpu.memory_space<vmem>>, vector<32x16xf32>
    tpu.vector_store %arg18[%c0_116, %c0_117], %248 {strides = array<i32>} : memref<32x64xf32, #tpu.memory_space<vmem>>, vector<32x16xf32>,
    %250 = vector.extract_strided_slice %226 {offsets = [0, 16], sizes = [32, 16], strides = [1, 1]} : vector<32x192xf32> to vector<32x16xf32>
    %251 = arith.truncf %250 : vector<32x16xf32> to vector<32x16xbf16>
    %252 = vector.extract_strided_slice %226 {offsets = [0, 80], sizes = [32, 16], strides = [1, 1]} : vector<32x192xf32> to vector<32x16xf32>
    %253 = arith.truncf %252 : vector<32x16xf32> to vector<32x16xbf16>
    %254 = vector.extract_strided_slice %226 {offsets = [0, 144], sizes = [32, 16], strides = [1, 1]} : vector<32x192xf32> to vector<32x16xf32>
    %255 = arith.truncf %254 : vector<32x16xf32> to vector<32x16xbf16>
    "tpu.trace_start"() <{level = 10 : i32, message = "nd,md->nm"}> : () -> ()
    %cst_118 = arith.constant dense<0.000000e+00> : vector<32x32xf32>
    %256 = tpu.matmul %251, %253, %cst_118 {dimension_numbers = #tpu.dot_dimension_numbers<[1], [1], [0], [0], [0, 0, 1, 0], [], []>} : vector<32x16xbf16>, vector<32x16xbf16>, vector<32x32xf32> -> vector<32x32xf32>
    "tpu.trace_stop"() : () -> ()
    %c1_119 = arith.constant 1 : index
    %c1_120 = arith.constant 1 : index
    %c0_121 = arith.constant 0 : index
    %c0_122 = arith.constant 0 : index
    %257 = vector.load %arg5[%c1_119, %c1_120, %c0_121, %c0_122] : memref<2x4x32x32xf32, #tpu.memory_space<vmem>>, vector<1x1x32x32xf32>
    %258 = vector.shape_cast %257 : vector<1x1x32x32xf32> to vector<32x32xf32>
    %259 = arith.addf %256, %258 : vector<32x32xf32>
    %cst_123 = arith.constant dense<0xFF800000> : vector<32xf32>
    %260 = vector.multi_reduction <maximumf>, %259, %cst_123 [1] : vector<32x32xf32> to vector<32xf32>
    %261 = vector.shape_cast %260 : vector<32xf32> to vector<32x1xf32>
    %262 = vector.broadcast %261 : vector<32x1xf32> to vector<32x32xf32>
    %263 = arith.subf %259, %262 : vector<32x32xf32>
    %264 = math.exp %263 : vector<32x32xf32>
    %cst_124 = arith.constant dense<0.000000e+00> : vector<32xf32>
    %265 = vector.multi_reduction <add>, %264, %cst_124 [1] : vector<32x32xf32> to vector<32xf32>
    %266 = vector.shape_cast %265 : vector<32xf32> to vector<32x1xf32>
    %267 = tpu.reciprocal %266 {approx = true} : vector<32x1xf32> -> vector<32x1xf32>
    %268 = vector.broadcast %267 : vector<32x1xf32> to vector<32x32xf32>
    %269 = arith.mulf %264, %268 : vector<32x32xf32>
    %270 = arith.truncf %269 : vector<32x32xf32> to vector<32x32xbf16>
    %cst_125 = arith.constant dense<0.000000e+00> : vector<32x16xf32>
    %271 = tpu.matmul %270, %255, %cst_125 {dimension_numbers = #tpu.dot_dimension_numbers<[1], [0], [0], [1], [0, 0, 1, 1], [], []>} : vector<32x32xbf16>, vector<32x16xbf16>, vector<32x16xf32> -> vector<32x16xf32>
    %c0_126 = arith.constant 0 : index
    %c16_127 = arith.constant 16 : index
    %272 = vector.load %arg18[%c0_126, %c16_127] : memref<32x64xf32, #tpu.memory_space<vmem>>, vector<32x16xf32>
    tpu.vector_store %arg18[%c0_126, %c16_127], %271 {strides = array<i32>} : memref<32x64xf32, #tpu.memory_space<vmem>>, vector<32x16xf32>,
    %273 = vector.extract_strided_slice %226 {offsets = [0, 32], sizes = [32, 16], strides = [1, 1]} : vector<32x192xf32> to vector<32x16xf32>
    %274 = arith.truncf %273 : vector<32x16xf32> to vector<32x16xbf16>
    %275 = vector.extract_strided_slice %226 {offsets = [0, 96], sizes = [32, 16], strides = [1, 1]} : vector<32x192xf32> to vector<32x16xf32>
    %276 = arith.truncf %275 : vector<32x16xf32> to vector<32x16xbf16>
    %277 = vector.extract_strided_slice %226 {offsets = [0, 160], sizes = [32, 16], strides = [1, 1]} : vector<32x192xf32> to vector<32x16xf32>
    %278 = arith.truncf %277 : vector<32x16xf32> to vector<32x16xbf16>
    "tpu.trace_start"() <{level = 10 : i32, message = "nd,md->nm"}> : () -> ()
    %cst_128 = arith.constant dense<0.000000e+00> : vector<32x32xf32>
    %279 = tpu.matmul %274, %276, %cst_128 {dimension_numbers = #tpu.dot_dimension_numbers<[1], [1], [0], [0], [0, 0, 1, 0], [], []>} : vector<32x16xbf16>, vector<32x16xbf16>, vector<32x32xf32> -> vector<32x32xf32>
    "tpu.trace_stop"() : () -> ()
    %c1_129 = arith.constant 1 : index
    %c2_130 = arith.constant 2 : index
    %c0_131 = arith.constant 0 : index
    %c0_132 = arith.constant 0 : index
    %280 = vector.load %arg5[%c1_129, %c2_130, %c0_131, %c0_132] : memref<2x4x32x32xf32, #tpu.memory_space<vmem>>, vector<1x1x32x32xf32>
    %281 = vector.shape_cast %280 : vector<1x1x32x32xf32> to vector<32x32xf32>
    %282 = arith.addf %279, %281 : vector<32x32xf32>
    %cst_133 = arith.constant dense<0xFF800000> : vector<32xf32>
    %283 = vector.multi_reduction <maximumf>, %282, %cst_133 [1] : vector<32x32xf32> to vector<32xf32>
    %284 = vector.shape_cast %283 : vector<32xf32> to vector<32x1xf32>
    %285 = vector.broadcast %284 : vector<32x1xf32> to vector<32x32xf32>
    %286 = arith.subf %282, %285 : vector<32x32xf32>
    %287 = math.exp %286 : vector<32x32xf32>
    %cst_134 = arith.constant dense<0.000000e+00> : vector<32xf32>
    %288 = vector.multi_reduction <add>, %287, %cst_134 [1] : vector<32x32xf32> to vector<32xf32>
    %289 = vector.shape_cast %288 : vector<32xf32> to vector<32x1xf32>
    %290 = tpu.reciprocal %289 {approx = true} : vector<32x1xf32> -> vector<32x1xf32>
    %291 = vector.broadcast %290 : vector<32x1xf32> to vector<32x32xf32>
    %292 = arith.mulf %287, %291 : vector<32x32xf32>
    %293 = arith.truncf %292 : vector<32x32xf32> to vector<32x32xbf16>
    %cst_135 = arith.constant dense<0.000000e+00> : vector<32x16xf32>
    %294 = tpu.matmul %293, %278, %cst_135 {dimension_numbers = #tpu.dot_dimension_numbers<[1], [0], [0], [1], [0, 0, 1, 1], [], []>} : vector<32x32xbf16>, vector<32x16xbf16>, vector<32x16xf32> -> vector<32x16xf32>
    %c0_136 = arith.constant 0 : index
    %c32_137 = arith.constant 32 : index
    %295 = vector.load %arg18[%c0_136, %c32_137] : memref<32x64xf32, #tpu.memory_space<vmem>>, vector<32x16xf32>
    tpu.vector_store %arg18[%c0_136, %c32_137], %294 {strides = array<i32>} : memref<32x64xf32, #tpu.memory_space<vmem>>, vector<32x16xf32>,
    %296 = vector.extract_strided_slice %226 {offsets = [0, 48], sizes = [32, 16], strides = [1, 1]} : vector<32x192xf32> to vector<32x16xf32>
    %297 = arith.truncf %296 : vector<32x16xf32> to vector<32x16xbf16>
    %298 = vector.extract_strided_slice %226 {offsets = [0, 112], sizes = [32, 16], strides = [1, 1]} : vector<32x192xf32> to vector<32x16xf32>
    %299 = arith.truncf %298 : vector<32x16xf32> to vector<32x16xbf16>
    %300 = vector.extract_strided_slice %226 {offsets = [0, 176], sizes = [32, 16], strides = [1, 1]} : vector<32x192xf32> to vector<32x16xf32>
    %301 = arith.truncf %300 : vector<32x16xf32> to vector<32x16xbf16>
    "tpu.trace_start"() <{level = 10 : i32, message = "nd,md->nm"}> : () -> ()
    %cst_138 = arith.constant dense<0.000000e+00> : vector<32x32xf32>
    %302 = tpu.matmul %297, %299, %cst_138 {dimension_numbers = #tpu.dot_dimension_numbers<[1], [1], [0], [0], [0, 0, 1, 0], [], []>} : vector<32x16xbf16>, vector<32x16xbf16>, vector<32x32xf32> -> vector<32x32xf32>
    "tpu.trace_stop"() : () -> ()
    %c1_139 = arith.constant 1 : index
    %c3_140 = arith.constant 3 : index
    %c0_141 = arith.constant 0 : index
    %c0_142 = arith.constant 0 : index
    %303 = vector.load %arg5[%c1_139, %c3_140, %c0_141, %c0_142] : memref<2x4x32x32xf32, #tpu.memory_space<vmem>>, vector<1x1x32x32xf32>
    %304 = vector.shape_cast %303 : vector<1x1x32x32xf32> to vector<32x32xf32>
    %305 = arith.addf %302, %304 : vector<32x32xf32>
    %cst_143 = arith.constant dense<0xFF800000> : vector<32xf32>
    %306 = vector.multi_reduction <maximumf>, %305, %cst_143 [1] : vector<32x32xf32> to vector<32xf32>
    %307 = vector.shape_cast %306 : vector<32xf32> to vector<32x1xf32>
    %308 = vector.broadcast %307 : vector<32x1xf32> to vector<32x32xf32>
    %309 = arith.subf %305, %308 : vector<32x32xf32>
    %310 = math.exp %309 : vector<32x32xf32>
    %cst_144 = arith.constant dense<0.000000e+00> : vector<32xf32>
    %311 = vector.multi_reduction <add>, %310, %cst_144 [1] : vector<32x32xf32> to vector<32xf32>
    %312 = vector.shape_cast %311 : vector<32xf32> to vector<32x1xf32>
    %313 = tpu.reciprocal %312 {approx = true} : vector<32x1xf32> -> vector<32x1xf32>
    %314 = vector.broadcast %313 : vector<32x1xf32> to vector<32x32xf32>
    %315 = arith.mulf %310, %314 : vector<32x32xf32>
    %316 = arith.truncf %315 : vector<32x32xf32> to vector<32x32xbf16>
    %cst_145 = arith.constant dense<0.000000e+00> : vector<32x16xf32>
    %317 = tpu.matmul %316, %301, %cst_145 {dimension_numbers = #tpu.dot_dimension_numbers<[1], [0], [0], [1], [0, 0, 1, 1], [], []>} : vector<32x32xbf16>, vector<32x16xbf16>, vector<32x16xf32> -> vector<32x16xf32>
    %c0_146 = arith.constant 0 : index
    %c48_147 = arith.constant 48 : index
    %318 = vector.load %arg18[%c0_146, %c48_147] : memref<32x64xf32, #tpu.memory_space<vmem>>, vector<32x16xf32>
    tpu.vector_store %arg18[%c0_146, %c48_147], %317 {strides = array<i32>} : memref<32x64xf32, #tpu.memory_space<vmem>>, vector<32x16xf32>,
    %c0_148 = arith.constant 0 : index
    %c0_149 = arith.constant 0 : index
    %319 = vector.load %arg18[%c0_148, %c0_149] : memref<32x64xf32, #tpu.memory_space<vmem>>, vector<32x64xf32>
    %320 = arith.truncf %319 : vector<32x64xf32> to vector<32x64xbf16>
    %c1_150 = arith.constant 1 : index
    %c0_151 = arith.constant 0 : index
    %c0_152 = arith.constant 0 : index
    %321 = vector.load %arg6[%c1_150, %c0_151, %c0_152] : memref<2x64x64xbf16, #tpu.memory_space<vmem>>, vector<1x64x64xbf16>
    %322 = vector.shape_cast %321 : vector<1x64x64xbf16> to vector<64x64xbf16>
    %cst_153 = arith.constant dense<0.000000e+00> : vector<32x64xf32>
    %323 = tpu.matmul %320, %322, %cst_153 {dimension_numbers = #tpu.dot_dimension_numbers<[1], [0], [0], [1], [0, 0, 1, 1], [], []>} : vector<32x64xbf16>, vector<64x64xbf16>, vector<32x64xf32> -> vector<32x64xf32>
    %324 = arith.addf %192, %323 : vector<32x64xf32>
    %c1_154 = arith.constant 1 : index
    %c0_155 = arith.constant 0 : index
    %c0_156 = arith.constant 0 : index
    %325 = vector.load %arg7[%c1_154, %c0_155, %c0_156] : memref<2x1x64xf32, #tpu.memory_space<vmem>>, vector<1x1x64xf32>
    %326 = vector.shape_cast %325 : vector<1x1x64xf32> to vector<1x64xf32>
    %327 = vector.broadcast %326 : vector<1x64xf32> to vector<32x64xf32>
    %328 = arith.addf %324, %327 : vector<32x64xf32>
    %c1_157 = arith.constant 1 : index
    %c0_158 = arith.constant 0 : index
    %c0_159 = arith.constant 0 : index
    %329 = vector.load %arg8[%c1_157, %c0_158, %c0_159] : memref<2x1x64xf32, #tpu.memory_space<vmem>>, vector<1x1x64xf32>
    %330 = vector.shape_cast %329 : vector<1x1x64xf32> to vector<1x64xf32>
    %c1_160 = arith.constant 1 : index
    %c0_161 = arith.constant 0 : index
    %c0_162 = arith.constant 0 : index
    %331 = vector.load %arg9[%c1_160, %c0_161, %c0_162] : memref<2x1x64xf32, #tpu.memory_space<vmem>>, vector<1x1x64xf32>
    %332 = vector.shape_cast %331 : vector<1x1x64xf32> to vector<1x64xf32>
    %cst_163 = arith.constant dense<0.000000e+00> : vector<32xf32>
    %333 = vector.multi_reduction <add>, %328, %cst_163 [1] : vector<32x64xf32> to vector<32xf32>
    %334 = vector.shape_cast %333 : vector<32xf32> to vector<32x1xf32>
    %cst_164 = arith.constant 6.400000e+01 : f32
    %335 = vector.broadcast %cst_164 : f32 to vector<32x1xf32>
    %336 = arith.divf %334, %335 : vector<32x1xf32>
    %337 = vector.broadcast %336 : vector<32x1xf32> to vector<32x64xf32>
    %338 = arith.subf %328, %337 : vector<32x64xf32>
    %339 = arith.mulf %338, %338 : vector<32x64xf32>
    %cst_165 = arith.constant dense<0.000000e+00> : vector<32xf32>
    %340 = vector.multi_reduction <add>, %339, %cst_165 [1] : vector<32x64xf32> to vector<32xf32>
    %341 = vector.shape_cast %340 : vector<32xf32> to vector<32x1xf32>
    %cst_166 = arith.constant 6.400000e+01 : f32
    %342 = vector.broadcast %cst_166 : f32 to vector<32x1xf32>
    %343 = arith.divf %341, %342 : vector<32x1xf32>
    %344 = vector.broadcast %336 : vector<32x1xf32> to vector<32x64xf32>
    %345 = arith.subf %328, %344 : vector<32x64xf32>
    %cst_167 = arith.constant 9.99999974E-6 : f32
    %346 = vector.broadcast %cst_167 : f32 to vector<32x1xf32>
    %347 = arith.addf %343, %346 : vector<32x1xf32>
    %348 = math.rsqrt %347 : vector<32x1xf32>
    %349 = vector.broadcast %348 : vector<32x1xf32> to vector<32x64xf32>
    %350 = arith.mulf %345, %349 : vector<32x64xf32>
    %351 = vector.broadcast %330 : vector<1x64xf32> to vector<32x64xf32>
    %352 = arith.mulf %350, %351 : vector<32x64xf32>
    %353 = vector.broadcast %332 : vector<1x64xf32> to vector<32x64xf32>
    %354 = arith.addf %352, %353 : vector<32x64xf32>
    %355 = arith.truncf %354 : vector<32x64xf32> to vector<32x64xbf16>
    %c1_168 = arith.constant 1 : index
    %c0_169 = arith.constant 0 : index
    %c0_170 = arith.constant 0 : index
    %356 = vector.load %arg10[%c1_168, %c0_169, %c0_170] : memref<2x64x256xbf16, #tpu.memory_space<vmem>>, vector<1x64x256xbf16>
    %357 = vector.shape_cast %356 : vector<1x64x256xbf16> to vector<64x256xbf16>
    %cst_171 = arith.constant dense<0.000000e+00> : vector<32x256xf32>
    %358 = tpu.matmul %355, %357, %cst_171 {dimension_numbers = #tpu.dot_dimension_numbers<[1], [0], [0], [1], [0, 0, 1, 1], [], []>} : vector<32x64xbf16>, vector<64x256xbf16>, vector<32x256xf32> -> vector<32x256xf32>
    %c1_172 = arith.constant 1 : index
    %c0_173 = arith.constant 0 : index
    %c0_174 = arith.constant 0 : index
    %359 = vector.load %arg11[%c1_172, %c0_173, %c0_174] : memref<2x1x256xf32, #tpu.memory_space<vmem>>, vector<1x1x256xf32>
    %360 = vector.shape_cast %359 : vector<1x1x256xf32> to vector<1x256xf32>
    %361 = vector.broadcast %360 : vector<1x256xf32> to vector<32x256xf32>
    %362 = arith.addf %358, %361 : vector<32x256xf32>
    %cst_175 = arith.constant 5.000000e-01 : f32
    %363 = vector.broadcast %cst_175 : f32 to vector<32x256xf32>
    %364 = arith.mulf %363, %362 : vector<32x256xf32>
    %cst_176 = arith.constant 4.471500e-02 : f32
    %365 = vector.broadcast %cst_176 : f32 to vector<32x256xf32>
    %366 = arith.mulf %365, %362 : vector<32x256xf32>
    %367 = arith.mulf %366, %362 : vector<32x256xf32>
    %368 = arith.mulf %367, %362 : vector<32x256xf32>
    %369 = arith.addf %362, %368 : vector<32x256xf32>
    %cst_177 = arith.constant 0.797884583 : f32
    %370 = vector.broadcast %cst_177 : f32 to vector<32x256xf32>
    %371 = arith.mulf %370, %369 : vector<32x256xf32>
    %372 = math.tanh %371 : vector<32x256xf32>
    %cst_178 = arith.constant 1.000000e+00 : f32
    %373 = vector.broadcast %cst_178 : f32 to vector<32x256xf32>
    %374 = arith.addf %373, %372 : vector<32x256xf32>
    %375 = arith.mulf %364, %374 : vector<32x256xf32>
    %376 = arith.truncf %375 : vector<32x256xf32> to vector<32x256xbf16>
    %c1_179 = arith.constant 1 : index
    %c0_180 = arith.constant 0 : index
    %c0_181 = arith.constant 0 : index
    %377 = vector.load %arg12[%c1_179, %c0_180, %c0_181] : memref<2x256x64xbf16, #tpu.memory_space<vmem>>, vector<1x256x64xbf16>
    %378 = vector.shape_cast %377 : vector<1x256x64xbf16> to vector<256x64xbf16>
    %cst_182 = arith.constant dense<0.000000e+00> : vector<32x64xf32>
    %379 = tpu.matmul %376, %378, %cst_182 {dimension_numbers = #tpu.dot_dimension_numbers<[1], [0], [0], [1], [0, 0, 1, 1], [], []>} : vector<32x256xbf16>, vector<256x64xbf16>, vector<32x64xf32> -> vector<32x64xf32>
    %380 = arith.addf %328, %379 : vector<32x64xf32>
    %c1_183 = arith.constant 1 : index
    %c0_184 = arith.constant 0 : index
    %c0_185 = arith.constant 0 : index
    %381 = vector.load %arg13[%c1_183, %c0_184, %c0_185] : memref<2x1x64xf32, #tpu.memory_space<vmem>>, vector<1x1x64xf32>
    %382 = vector.shape_cast %381 : vector<1x1x64xf32> to vector<1x64xf32>
    %383 = vector.broadcast %382 : vector<1x64xf32> to vector<32x64xf32>
    %384 = arith.addf %380, %383 : vector<32x64xf32>
    %c0_186 = arith.constant 0 : index
    %c0_187 = arith.constant 0 : index
    %385 = vector.load %arg14[%c0_186, %c0_187] : memref<1x64xf32, #tpu.memory_space<vmem>>, vector<1x64xf32>
    %c0_188 = arith.constant 0 : index
    %c0_189 = arith.constant 0 : index
    %386 = vector.load %arg15[%c0_188, %c0_189] : memref<1x64xf32, #tpu.memory_space<vmem>>, vector<1x64xf32>
    %cst_190 = arith.constant dense<0.000000e+00> : vector<32xf32>
    %387 = vector.multi_reduction <add>, %384, %cst_190 [1] : vector<32x64xf32> to vector<32xf32>
    %388 = vector.shape_cast %387 : vector<32xf32> to vector<32x1xf32>
    %cst_191 = arith.constant 6.400000e+01 : f32
    %389 = vector.broadcast %cst_191 : f32 to vector<32x1xf32>
    %390 = arith.divf %388, %389 : vector<32x1xf32>
    %391 = vector.broadcast %390 : vector<32x1xf32> to vector<32x64xf32>
    %392 = arith.subf %384, %391 : vector<32x64xf32>
    %393 = arith.mulf %392, %392 : vector<32x64xf32>
    %cst_192 = arith.constant dense<0.000000e+00> : vector<32xf32>
    %394 = vector.multi_reduction <add>, %393, %cst_192 [1] : vector<32x64xf32> to vector<32xf32>
    %395 = vector.shape_cast %394 : vector<32xf32> to vector<32x1xf32>
    %cst_193 = arith.constant 6.400000e+01 : f32
    %396 = vector.broadcast %cst_193 : f32 to vector<32x1xf32>
    %397 = arith.divf %395, %396 : vector<32x1xf32>
    %398 = vector.broadcast %390 : vector<32x1xf32> to vector<32x64xf32>
    %399 = arith.subf %384, %398 : vector<32x64xf32>
    %cst_194 = arith.constant 9.99999974E-6 : f32
    %400 = vector.broadcast %cst_194 : f32 to vector<32x1xf32>
    %401 = arith.addf %397, %400 : vector<32x1xf32>
    %402 = math.rsqrt %401 : vector<32x1xf32>
    %403 = vector.broadcast %402 : vector<32x1xf32> to vector<32x64xf32>
    %404 = arith.mulf %399, %403 : vector<32x64xf32>
    %405 = vector.broadcast %385 : vector<1x64xf32> to vector<32x64xf32>
    %406 = arith.mulf %404, %405 : vector<32x64xf32>
    %407 = vector.broadcast %386 : vector<1x64xf32> to vector<32x64xf32>
    %408 = arith.addf %406, %407 : vector<32x64xf32>
    %c0_195 = arith.constant 0 : index
    %c0_196 = arith.constant 0 : index
    %409 = vector.load %arg16[%c0_195, %c0_196] : memref<2x32xf32, #tpu.memory_space<vmem>>, vector<2x32xf32>
    %cst_197 = arith.constant dense<0.000000e+00> : vector<2x64xf32>
    %410 = tpu.matmul %409, %408, %cst_197 {dimension_numbers = #tpu.dot_dimension_numbers<[1], [0], [0], [1], [0, 0, 1, 1], [], []>} : vector<2x32xf32>, vector<32x64xf32>, vector<2x64xf32> -> vector<2x64xf32>
    %c0_198 = arith.constant 0 : index
    %c0_199 = arith.constant 0 : index
    %411 = vector.load %arg17[%c0_198, %c0_199] : memref<2x64xf32, #tpu.memory_space<vmem>>, vector<2x64xf32>
    tpu.vector_store %arg17[%c0_198, %c0_199], %410 {strides = array<i32>} : memref<2x64xf32, #tpu.memory_space<vmem>>, vector<2x64xf32>,
    return
  }
}

</mosaic_0001>

<bundles_post_ra>
// kernel: swin_extractor.4
= control target key start
LH: loop header
LB: loop body
LE: loop exit
PB: predicated region body
PF: predicated region fallthrough
CT: control target
= control target key end

     0   :  { %vm76_vm0 = vcmask 392192   ;;  %vm200_vm1 = vcmask 261120   ;;  %s938_s1 = inlined_call_operand.vmem [shape: bf16[48,32], index: 1, kind: input, shape index: {}]   ;;  %s939_s0 = inlined_call_operand.vmem [shape: f32[128,48], index: 0, kind: input, shape index: {}]   ;;  %s940_s2 = inlined_call_operand.vmem [shape: f32[1,32], index: 2, kind: input, shape index: {}]   ;;  %s941_s3 = inlined_call_operand.vmem [shape: f32[1,32], index: 3, kind: input, shape index: {}]   ;;  %s942_s4 = inlined_call_operand.vmem [shape: f32[1,32], index: 4, kind: input, shape index: {}]   ;;  %s943_s5 = inlined_call_operand.vmem [shape: f32[128,32], index: 5, kind: output, shape index: {}]  }
   0x1   :  { %v527_v0 = vld [vmem:[%s938_s1 + $0x10] sm:$0xff]   ;;  %v528_v1 = vld [vmem:[%s938_s1 + $0x8] sm:$0xff]   ;;  %v21_v2 = vld [vmem:[%s939_s0] sm:$0xff] }
   0x2   :  { %499 = vmatprep.subr.bf16.mxu0 %v527_v0  ;;  %521 = vmatprep.subr.bf16.mxu1 %v527_v0  ;;  %v22_v3 = vld [vmem:[%s939_s0 + $0x8] sm:$0xff]  ;;  %v29_v4 = vld [vmem:[%s939_s0 + $0x40] sm:$0xff]  ;;  %v23_v9 = vld [vmem:[%s939_s0 + $0x10] sm:$0xff] }
   0x3   :  { %500 = vmatpush3.bf16.msra.mxu0 %v527_v0  ;;  %524 = vmatpush3.bf16.msra.mxu1 %v527_v0  ;;  %v529_v5 = vld [vmem:[%s938_s1] sm:$0xff]   ;;  %v37_v6 = vpack.c.bf16 %v22_v3, %v21_v2  ;;  %v30_v7 = vld [vmem:[%s939_s0 + $0x48] sm:$0xff]  ;;  %v24_v10 = vld [vmem:[%s939_s0 + $0x18] sm:$0xff] }
   0x4   :  { %501 = vmatprep.subr.bf16.mxu0 %v528_v1  ;;  %522 = vmatprep.subr.bf16.mxu1 %v528_v1  ;;  %v41_v8 = vpack.c.bf16 %v30_v7, %v29_v4  ;;  %v31_v11 = vld [vmem:[%s939_s0 + $0x50] sm:$0xff]  ;;  %v32_v12 = vld [vmem:[%s939_s0 + $0x58] sm:$0xff]  ;;  %v25_v13 = vld [vmem:[%s939_s0 + $0x20] sm:$0xff]  ;;  %v38_v17 = vpack.c.bf16 %v24_v10, %v23_v9 }
   0x5   :  { %505 = vmatprep.mubr.msk.bf16.mxu0 %vm76_vm0, %v37_v6  ;;  %v26_v14 = vld [vmem:[%s939_s0 + $0x28] sm:$0xff]  ;;  %v33_v15 = vld [vmem:[%s939_s0 + $0x60] sm:$0xff]  ;;  %v42_v18 = vpack.c.bf16 %v32_v12, %v31_v11  ;;  %v27_v21 = vld [vmem:[%s939_s0 + $0x30] sm:$0xff] }
   0x6   :  { %v34_v16 = vld [vmem:[%s939_s0 + $0x68] sm:$0xff]  ;;  %513 = vmatprep.mubr.msk.bf16.mxu1 %vm76_vm0, %v41_v8  ;;  %v39_v19 = vpack.c.bf16 %v26_v14, %v25_v13  ;;  %v28_v22 = vld [vmem:[%s939_s0 + $0x38] sm:$0xff]  ;;  %v35_v23 = vld [vmem:[%s939_s0 + $0x70] sm:$0xff] }
   0x7   :  { %502 = vmatpush3.bf16.msra.mxu0 %v528_v1  ;;  %525 = vmatpush3.bf16.msra.mxu1 %v528_v1  ;;  %v43_v20 = vpack.c.bf16 %v34_v16, %v33_v15  ;;  %v36_v24 = vld [vmem:[%s939_s0 + $0x78] sm:$0xff]  ;;  %v40_v25 = vpack.c.bf16 %v28_v22, %v27_v21  ;;  %v474_v27 = vld [vmem:[%s940_s2] ss:$0 sm:$0xff] }
   0x8   :  { %503 = vmatprep.subr.bf16.mxu0 %v529_v5  ;;  %523 = vmatprep.subr.bf16.mxu1 %v529_v5  ;;  %v44_v26 = vpack.c.bf16 %v36_v24, %v35_v23 }
   0xb   :  { %504 = vmatpush3.bf16.msra.mxu0 %v529_v5  ;;  %526 = vmatpush3.bf16.msra.mxu1 %v529_v5 }
   0xe   :  { %506 = vmatmul.mubr.msk.bf16.vlgmr.msra.gmra.mxu0 %vm76_vm0, %v38_v17  ;;  %514 = vmatmul.mubr.msk.bf16.vlgmr.msra.gmra.mxu1 %vm76_vm0, %v42_v18 }
   0xf   :  { %509 = vmatprep.mubr.msk.bf16.mxu0 %vm76_vm0, %v39_v19  ;;  %517 = vmatprep.mubr.msk.bf16.mxu1 %vm76_vm0, %v43_v20 }
  0x16   :  { %510 = vmatmul.mubr.msk.bf16.gmra.mxu0 %vm76_vm0, %v40_v25  ;;  %518 = vmatmul.mubr.msk.bf16.gmra.mxu1 %vm76_vm0, %v44_v26 }
  0xce   :  { %v507_v28 = vpop.f32.mrf.mxu0  ;;  %v515_v29 = vpop.f32.mrf.mxu1 }
  0xcf   :  { %v660_v30 = vadd.f32 %v507_v28, %v474_v27  ;;  %v662_v31 = vadd.f32 %v515_v29, %v474_v27 }
  0xd0   :  { %v135_v32 = vpop.f32.mrf.mxu0  ;;  %v167_v33 = vpop.f32.mrf.mxu1 }
  0xd1   :  { %v664_v34 = vadd.f32 %v474_v27, %v135_v32  ;;  %v231_v35 = vsel %vm200_vm1, %v662_v31, 0.0  ;;  %v207_v36 = vsel %vm200_vm1, %v660_v30, 0.0  ;;  %v670_v42 = vadd.f32 %v474_v27, %v167_v33 }
  0xd2   :  { %232 = vadd.xlane.f32.xlu0 %v231_v35  ;;  %v516_v37 = vpop.f32.mrf.mxu1  ;;  %208 = vadd.xlane.f32.xlu1 %v207_v36  ;;  %v508_v38 = vpop.f32.mrf.mxu0 }
  0xd3   :  { %v147_v39 = vadd.f32 %v508_v38, %v474_v27  ;;  %v672_v43 = vadd.f32 %v516_v37, %v474_v27  ;;  %v201_v45 = vsel %vm200_vm1, %v664_v34, 0.0  ;;  %v225_v52 = vsel %vm200_vm1, %v670_v42, 0.0 }
  0xd4   :  { %v138_v40 = vpop.f32.mrf.mxu0  ;;  %v170_v41 = vpop.f32.mrf.mxu1 }
  0xd5   :  { %v210_v44 = vsel %vm200_vm1, %v147_v39, 0.0  ;;  %v677_v49 = vadd.f32 %v474_v27, %v138_v40  ;;  %v679_v50 = vadd.f32 %v474_v27, %v170_v41  ;;  %v234_v51 = vsel %vm200_vm1, %v672_v43, 0.0 }
  0xd6   :  { %211 = vadd.xlane.f32.xlu1 %v210_v44  ;;  %202 = vadd.xlane.f32.xlu0 %v201_v45  ;;  %v511_v46 = vpop.f32.mrf.mxu0  ;;  %v519_v47 = vpop.f32.mrf.mxu1 }
  0xd7   :  { %v685_v55 = vadd.f32 %v511_v46, %v474_v27  ;;  %v228_v57 = vsel %vm200_vm1, %v679_v50, 0.0  ;;  %v204_v58 = vsel %vm200_vm1, %v677_v49, 0.0  ;;  %v709_v6 = vadd.f32 %v519_v47, %v474_v27 }
  0xd8   :  { %v151_v48 = vpop.f32.mrf.mxu0  ;;  %v183_v54 = vpop.f32.mrf.mxu1 }
  0xd9   :  { %v219_v62 = vsel %vm200_vm1, %v685_v55, 0.0  ;;  %v697_v63 = vadd.f32 %v474_v27, %v151_v48  ;;  %v701_v2 = vadd.f32 %v474_v27, %v183_v54  ;;  %v243_v11 = vsel %vm200_vm1, %v709_v6, 0.0 }
  0xda   :  { %235 = vadd.xlane.f32.xlu1 %v234_v51  ;;  %226 = vadd.xlane.f32.xlu0 %v225_v52  ;;  %v512_v53 = vpop.f32.mrf.mxu0  ;;  %v520_v60 = vpop.f32.mrf.mxu1 }
  0xdb   :  { %v687_v56 = vadd.f32 %v512_v53, %v474_v27  ;;  %v213_v5 = vsel %vm200_vm1, %v697_v63, 0.0  ;;  %v711_v7 = vadd.f32 %v520_v60, %v474_v27  ;;  %v237_v9 = vsel %vm200_vm1, %v701_v2, 0.0 }
  0xdc   :  { %v154_v59 = vpop.f32.mrf.mxu0  ;;  %v186_v1 = vpop.f32.mrf.mxu1 }
  0xdd   :  { %v222_v61 = vsel %vm200_vm1, %v687_v56, 0.0  ;;  %v699_v0 = vadd.f32 %v474_v27, %v154_v59  ;;  %v703_v3 = vadd.f32 %v474_v27, %v186_v1  ;;  %v246_v10 = vsel %vm200_vm1, %v711_v7, 0.0 }
  0xde   :  { %229 = vadd.xlane.f32.xlu1 %v228_v57  ;;  %205 = vadd.xlane.f32.xlu0 %v204_v58 }
  0xdf   :  { %v216_v4 = vsel %vm200_vm1, %v699_v0, 0.0  ;;  %v240_v8 = vsel %vm200_vm1, %v703_v3, 0.0 }
  0xe2   :  { %223 = vadd.xlane.f32.xlu1 %v222_v61  ;;  %220 = vadd.xlane.f32.xlu0 %v219_v62 }
  0xe6   :  { %217 = vadd.xlane.f32.xlu1 %v216_v4  ;;  %214 = vadd.xlane.f32.xlu0 %v213_v5 }
  0xea   :  { %241 = vadd.xlane.f32.xlu1 %v240_v8  ;;  %238 = vadd.xlane.f32.xlu0 %v237_v9 }
  0xee   :  { %247 = vadd.xlane.f32.xlu1 %v246_v10  ;;  %244 = vadd.xlane.f32.xlu0 %v243_v11 }
 0x15b   :  { %v233_v12 = vpop.xlane.xlu0 %232  ;;  %v209_v13 = vpop.xlane.xlu1 %208 }
 0x15c   :  { %v260_v14 = vmul.f32 0.03125, %v233_v12  ;;  %v252_v15 = vmul.f32 0.03125, %v209_v13 }
 0x15e   :  { %v722_v16 = vsub.f32 %v662_v31, %v260_v14  ;;  %v725_v17 = vsub.f32 %v660_v30, %v252_v15 }
 0x15f   :  { %v212_v18 = vpop.xlane.xlu1 %211  ;;  %v203_v19 = vpop.xlane.xlu0 %202 }
 0x160   :  { %v253_v20 = vmul.f32 0.03125, %v212_v18  ;;  %v250_v21 = vmul.f32 0.03125, %v203_v19  ;;  %v284_v22 = vmul.f32 %v725_v17, %v725_v17  ;;  %v292_v26 = vmul.f32 %v722_v16, %v722_v16 }
 0x162   :  { %v729_v23 = vsub.f32 %v147_v39, %v253_v20  ;;  %v732_v24 = vsub.f32 %v664_v34, %v250_v21  ;;  %v304_v25 = vsel %vm200_vm1, %v284_v22, 0.0  ;;  %v328_v36 = vsel %vm200_vm1, %v292_v26, 0.0 }
 0x163   :  { %v236_v27 = vpop.xlane.xlu1 %235  ;;  %305 = vadd.xlane.f32.xlu0 %v304_v25  ;;  %v227_v28 = vpop.xlane.xlu0 %226 }
 0x164   :  { %v261_v29 = vmul.f32 0.03125, %v236_v27  ;;  %v258_v30 = vmul.f32 0.03125, %v227_v28  ;;  %v285_v31 = vmul.f32 %v729_v23, %v729_v23  ;;  %v282_v32 = vmul.f32 %v732_v24, %v732_v24 }
 0x166   :  { %v742_v33 = vsub.f32 %v672_v43, %v261_v29  ;;  %v745_v34 = vsub.f32 %v670_v42, %v258_v30  ;;  %v307_v35 = vsel %vm200_vm1, %v285_v31, 0.0  ;;  %v298_v44 = vsel %vm200_vm1, %v282_v32, 0.0 }
 0x167   :  { %v230_v37 = vpop.xlane.xlu1 %229  ;;  %308 = vadd.xlane.f32.xlu1 %v307_v35  ;;  %329 = vadd.xlane.f32.xlu0 %v328_v36  ;;  %v206_v38 = vpop.xlane.xlu0 %205 }
 0x168   :  { %v259_v39 = vmul.f32 0.03125, %v230_v37  ;;  %v251_v40 = vmul.f32 0.03125, %v206_v38  ;;  %v293_v41 = vmul.f32 %v742_v33, %v742_v33  ;;  %v290_v46 = vmul.f32 %v745_v34, %v745_v34 }
 0x16a   :  { %v753_v43 = vsub.f32 %v679_v50, %v259_v39  ;;  %v756_v42 = vsub.f32 %v677_v49, %v251_v40  ;;  %v331_v45 = vsel %vm200_vm1, %v293_v41, 0.0  ;;  %v322_v57 = vsel %vm200_vm1, %v290_v46, 0.0 }
 0x16b   :  { %v224_v47 = vpop.xlane.xlu1 %223  ;;  %332 = vadd.xlane.f32.xlu1 %v331_v45  ;;  %299 = vadd.xlane.f32.xlu0 %v298_v44  ;;  %v221_v48 = vpop.xlane.xlu0 %220 }
 0x16c   :  { %v257_v51 = vmul.f32 0.03125, %v224_v47  ;;  %v256_v52 = vmul.f32 0.03125, %v221_v48  ;;  %v283_v53 = vmul.f32 %v756_v42, %v756_v42  ;;  %v291_v50 = vmul.f32 %v753_v43, %v753_v43 }
 0x16e   :  { %v766_v49 = vsub.f32 %v687_v56, %v257_v51  ;;  %v769_v54 = vsub.f32 %v685_v55, %v256_v52  ;;  %v301_v58 = vsel %vm200_vm1, %v283_v53, 0.0  ;;  %v325_v4 = vsel %vm200_vm1, %v291_v50, 0.0 }
 0x16f   :  { %v218_v59 = vpop.xlane.xlu1 %217  ;;  %323 = vadd.xlane.f32.xlu0 %v322_v57  ;;  %302 = vadd.xlane.f32.xlu1 %v301_v58  ;;  %v215_v60 = vpop.xlane.xlu0 %214 }
 0x170   :  { %v255_v61 = vmul.f32 0.03125, %v218_v59  ;;  %v254_v62 = vmul.f32 0.03125, %v215_v60  ;;  %v288_v1 = vmul.f32 %v769_v54, %v769_v54  ;;  %v289_v8 = vmul.f32 %v766_v49, %v766_v49 }
 0x172   :  { %v777_v56 = vsub.f32 %v699_v0, %v255_v61  ;;  %v780_v55 = vsub.f32 %v697_v63, %v254_v62  ;;  %v316_v5 = vsel %vm200_vm1, %v288_v1, 0.0  ;;  %v319_v15 = vsel %vm200_vm1, %v289_v8, 0.0  ;;  %v819_v8 = vld [vmem:[%s941_s3] ss:$0 sm:$0xff] }
 0x173   :  { %v242_v9 = vpop.xlane.xlu1 %241  ;;  %326 = vadd.xlane.f32.xlu1 %v325_v4  ;;  %317 = vadd.xlane.f32.xlu0 %v316_v5  ;;  %v239_v10 = vpop.xlane.xlu0 %238 }
 0x174   :  { %v263_v11 = vmul.f32 0.03125, %v242_v9  ;;  %v262_v12 = vmul.f32 0.03125, %v239_v10  ;;  %v286_v13 = vmul.f32 %v780_v55, %v780_v55  ;;  %v287_v0 = vmul.f32 %v777_v56, %v777_v56 }
 0x176   :  { %v790_v63 = vsub.f32 %v703_v3, %v263_v11  ;;  %v793_v14 = vsub.f32 %v701_v2, %v262_v12  ;;  %v310_v18 = vsel %vm200_vm1, %v286_v13, 0.0  ;;  %v313_v26 = vsel %vm200_vm1, %v287_v0, 0.0  ;;  %v825_v12 = vld [vmem:[%s942_s4] ss:$0 sm:$0xff] }
 0x177   :  { %v248_v19 = vpop.xlane.xlu1 %247  ;;  %320 = vadd.xlane.f32.xlu1 %v319_v15  ;;  %311 = vadd.xlane.f32.xlu0 %v310_v18  ;;  %v245_v20 = vpop.xlane.xlu0 %244 }
 0x178   :  { %v265_v21 = vmul.f32 0.03125, %v248_v19  ;;  %v264_v22 = vmul.f32 0.03125, %v245_v20  ;;  %v294_v25 = vmul.f32 %v793_v14, %v793_v14  ;;  %v295_v28 = vmul.f32 %v790_v63, %v790_v63 }
 0x17a   :  { %v801_v3 = vsub.f32 %v711_v7, %v265_v21  ;;  %v804_v2 = vsub.f32 %v709_v6, %v264_v22  ;;  %v334_v27 = vsel %vm200_vm1, %v294_v25, 0.0  ;;  %v337_v30 = vsel %vm200_vm1, %v295_v28, 0.0 }
 0x17b   :  { %314 = vadd.xlane.f32.xlu1 %v313_v26  ;;  %335 = vadd.xlane.f32.xlu0 %v334_v27 }
 0x17c   :  { %v296_v29 = vmul.f32 %v804_v2, %v804_v2  ;;  %v297_v7 = vmul.f32 %v801_v3, %v801_v3 }
 0x17e   :  { %v340_v31 = vsel %vm200_vm1, %v296_v29, 0.0  ;;  %v343_v6 = vsel %vm200_vm1, %v297_v7, 0.0 }
 0x17f   :  { %338 = vadd.xlane.f32.xlu1 %v337_v30  ;;  %341 = vadd.xlane.f32.xlu0 %v340_v31 }
 0x183   :  { %344 = vadd.xlane.f32.xlu1 %v343_v6 }
 0x1ec   :  { %v306_v32 = vpop.xlane.xlu0 %305 }
 0x1ed   :  { %v348_v35 = vmul.f32 0.03125, %v306_v32 }
 0x1ef   :  { %v364_v36 = vadd.f32 1e-05, %v348_v35 }
 0x1f0   :  { %v309_v37 = vpop.xlane.xlu1 %308  ;;  %v330_v38 = vpop.xlane.xlu0 %329 }
 0x1f1   :  { %530 = vrsqrt.f32 %v364_v36  ;;  %v349_v39 = vmul.f32 0.03125, %v309_v37  ;;  %v356_v40 = vmul.f32 0.03125, %v330_v38 }
 0x1f3   :  { %v365_v41 = vadd.f32 1e-05, %v349_v39  ;;  %v372_v44 = vadd.f32 1e-05, %v356_v40 }
 0x1f4   :  { %v333_v45 = vpop.xlane.xlu1 %332  ;;  %v300_v46 = vpop.xlane.xlu0 %299 }
 0x1f5   :  { %532 = vrsqrt.f32 %v365_v41  ;;  %v357_v47 = vmul.f32 0.03125, %v333_v45  ;;  %v346_v48 = vmul.f32 0.03125, %v300_v46 }
 0x1f6   :  { %534 = vrsqrt.f32 %v372_v44 }
 0x1f7   :  { %v373_v51 = vadd.f32 1e-05, %v357_v47  ;;  %v362_v52 = vadd.f32 1e-05, %v346_v48 }
 0x1f8   :  { %v303_v53 = vpop.xlane.xlu1 %302  ;;  %v324_v50 = vpop.xlane.xlu0 %323 }
 0x1f9   :  { %536 = vrsqrt.f32 %v373_v51  ;;  %v347_v57 = vmul.f32 0.03125, %v303_v53  ;;  %v354_v58 = vmul.f32 0.03125, %v324_v50 }
 0x1fa   :  { %538 = vrsqrt.f32 %v362_v52 }
 0x1fb   :  { %v363_v59 = vadd.f32 1e-05, %v347_v57  ;;  %v370_v60 = vadd.f32 1e-05, %v354_v58 }
 0x1fc   :  { %v327_v61 = vpop.xlane.xlu1 %326  ;;  %v318_v62 = vpop.xlane.xlu0 %317 }
 0x1fd   :  { %540 = vrsqrt.f32 %v363_v59  ;;  %v355_v1 = vmul.f32 0.03125, %v327_v61  ;;  %v352_v4 = vmul.f32 0.03125, %v318_v62 }
 0x1fe   :  { %v531_v5 = vpop.eup %530  ;;  %542 = vrsqrt.f32 %v370_v60 }
 0x1ff   :  { %v396_v9 = vmul.f32 %v531_v5, %v725_v17  ;;  %v371_v10 = vadd.f32 1e-05, %v355_v1  ;;  %v368_v11 = vadd.f32 1e-05, %v352_v4 }
 0x200   :  { %v321_v13 = vpop.xlane.xlu1 %320  ;;  %v312_v0 = vpop.xlane.xlu0 %311 }
 0x201   :  { %v418_v15 = vmul.f32 %v819_v8, %v396_v9  ;;  %544 = vrsqrt.f32 %v371_v10  ;;  %v353_v18 = vmul.f32 0.03125, %v321_v13  ;;  %v350_v19 = vmul.f32 0.03125, %v312_v0 }
 0x202   :  { %v533_v20 = vpop.eup %532  ;;  %546 = vrsqrt.f32 %v368_v11 }
 0x203   :  { %v535_v21 = vpop.eup %534  ;;  %v440_v22 = vadd.f32 %v825_v12, %v418_v15  ;;  %v397_v17 = vmul.f32 %v533_v20, %v729_v23  ;;  %v369_v25 = vadd.f32 1e-05, %v353_v18  ;;  %v366_v26 = vadd.f32 1e-05, %v350_v19 }
 0x204   :  { %v404_v27 = vmul.f32 %v535_v21, %v722_v16  ;;  %v315_v28 = vpop.xlane.xlu1 %314  ;;  %v336_v29 = vpop.xlane.xlu0 %335 }
 0x205   :  { %456 = vst.msk [vmem:[%s943_s5 + $0x10] sm:$0xff] %vm200_vm1, %v440_v22  ;;  %v419_v30 = vmul.f32 %v819_v8, %v397_v17  ;;  %548 = vrsqrt.f32 %v369_v25  ;;  %v351_v31 = vmul.f32 0.03125, %v315_v28  ;;  %v358_v7 = vmul.f32 0.03125, %v336_v29 }
 0x206   :  { %v537_v6 = vpop.eup %536  ;;  %v426_v32 = vmul.f32 %v819_v8, %v404_v27  ;;  %550 = vrsqrt.f32 %v366_v26 }
 0x207   :  { %v539_v23 = vpop.eup %538  ;;  %v441_v35 = vadd.f32 %v825_v12, %v419_v30  ;;  %v405_v16 = vmul.f32 %v537_v6, %v742_v33  ;;  %v367_v36 = vadd.f32 1e-05, %v351_v31  ;;  %v374_v37 = vadd.f32 1e-05, %v358_v7 }
 0x208   :  { %v448_v38 = vadd.f32 %v825_v12, %v426_v32  ;;  %v394_v39 = vmul.f32 %v539_v23, %v732_v24  ;;  %v339_v40 = vpop.xlane.xlu1 %338  ;;  %v342_v41 = vpop.xlane.xlu0 %341 }
 0x209   :  { %457 = vst.msk [vmem:[%s943_s5 + $0x18] sm:$0xff] %vm200_vm1, %v441_v35  ;;  %v427_v44 = vmul.f32 %v819_v8, %v405_v16  ;;  %552 = vrsqrt.f32 %v367_v36  ;;  %v359_v45 = vmul.f32 0.03125, %v339_v40  ;;  %v360_v46 = vmul.f32 0.03125, %v342_v41 }
 0x20a   :  { %v541_v47 = vpop.eup %540  ;;  %464 = vst.msk [vmem:[%s943_s5 + $0x50] sm:$0xff] %vm200_vm1, %v448_v38  ;;  %v416_v24 = vmul.f32 %v819_v8, %v394_v39  ;;  %554 = vrsqrt.f32 %v374_v37 }
 0x20b   :  { %v543_v33 = vpop.eup %542  ;;  %v449_v48 = vadd.f32 %v825_v12, %v427_v44  ;;  %v395_v51 = vmul.f32 %v541_v47, %v756_v42  ;;  %v375_v52 = vadd.f32 1e-05, %v359_v45  ;;  %v376_v53 = vadd.f32 1e-05, %v360_v46 }
 0x20c   :  { %v438_v50 = vadd.f32 %v825_v12, %v416_v24  ;;  %v402_v57 = vmul.f32 %v543_v33, %v745_v34  ;;  %v345_v58 = vpop.xlane.xlu1 %344 }
 0x20d   :  { %465 = vst.msk [vmem:[%s943_s5 + $0x58] sm:$0xff] %vm200_vm1, %v449_v48  ;;  %v417_v59 = vmul.f32 %v819_v8, %v395_v51  ;;  %556 = vrsqrt.f32 %v375_v52  ;;  %v361_v60 = vmul.f32 0.03125, %v345_v58 }
 0x20e   :  { %v545_v61 = vpop.eup %544  ;;  %454 = vst.msk [vmem:[%s943_s5] sm:$0xff] %vm200_vm1, %v438_v50  ;;  %v424_v42 = vmul.f32 %v819_v8, %v402_v57  ;;  %558 = vrsqrt.f32 %v376_v53 }
 0x20f   :  { %v547_v34 = vpop.eup %546  ;;  %v439_v62 = vadd.f32 %v825_v12, %v417_v59  ;;  %v403_v1 = vmul.f32 %v545_v61, %v753_v43  ;;  %v377_v4 = vadd.f32 1e-05, %v361_v60 }
 0x210   :  { %v446_v5 = vadd.f32 %v825_v12, %v424_v42  ;;  %v400_v9 = vmul.f32 %v547_v34, %v769_v54 }
 0x211   :  { %455 = vst.msk [vmem:[%s943_s5 + $0x8] sm:$0xff] %vm200_vm1, %v439_v62  ;;  %v425_v10 = vmul.f32 %v819_v8, %v403_v1  ;;  %560 = vrsqrt.f32 %v377_v4 }
 0x212   :  { %v549_v11 = vpop.eup %548  ;;  %462 = vst.msk [vmem:[%s943_s5 + $0x40] sm:$0xff] %vm200_vm1, %v446_v5  ;;  %v422_v43 = vmul.f32 %v819_v8, %v400_v9 }
 0x213   :  { %v551_v13 = vpop.eup %550  ;;  %v447_v0 = vadd.f32 %v825_v12, %v425_v10  ;;  %v401_v54 = vmul.f32 %v549_v11, %v766_v49 }
 0x214   :  { %v444_v15 = vadd.f32 %v825_v12, %v422_v43  ;;  %v398_v18 = vmul.f32 %v551_v13, %v780_v55 }
 0x215   :  { %463 = vst.msk [vmem:[%s943_s5 + $0x48] sm:$0xff] %vm200_vm1, %v447_v0  ;;  %v423_v19 = vmul.f32 %v819_v8, %v401_v54 }
 0x216   :  { %v553_v20 = vpop.eup %552  ;;  %460 = vst.msk [vmem:[%s943_s5 + $0x30] sm:$0xff] %vm200_vm1, %v444_v15  ;;  %v420_v21 = vmul.f32 %v819_v8, %v398_v18 }
 0x217   :  { %v555_v49 = vpop.eup %554  ;;  %v445_v22 = vadd.f32 %v825_v12, %v423_v19  ;;  %v399_v55 = vmul.f32 %v553_v20, %v777_v56 }
 0x218   :  { %v442_v17 = vadd.f32 %v825_v12, %v420_v21  ;;  %v406_v25 = vmul.f32 %v555_v49, %v793_v14 }
 0x219   :  { %461 = vst.msk [vmem:[%s943_s5 + $0x38] sm:$0xff] %vm200_vm1, %v445_v22  ;;  %v421_v26 = vmul.f32 %v819_v8, %v399_v55 }
 0x21a   :  { %v557_v27 = vpop.eup %556  ;;  %458 = vst.msk [vmem:[%s943_s5 + $0x20] sm:$0xff] %vm200_vm1, %v442_v17  ;;  %v428_v28 = vmul.f32 %v819_v8, %v406_v25 }
 0x21b   :  { %v559_v56 = vpop.eup %558  ;;  %v443_v29 = vadd.f32 %v825_v12, %v421_v26  ;;  %v407_v14 = vmul.f32 %v557_v27, %v790_v63 }
 0x21c   :  { %v450_v30 = vadd.f32 %v825_v12, %v428_v28  ;;  %v408_v31 = vmul.f32 %v559_v56, %v804_v2 }
 0x21d   :  { %459 = vst.msk [vmem:[%s943_s5 + $0x28] sm:$0xff] %vm200_vm1, %v443_v29  ;;  %v429_v7 = vmul.f32 %v819_v8, %v407_v14 }
 0x21e   :  { %v561_v6 = vpop.eup %560  ;;  %466 = vst.msk [vmem:[%s943_s5 + $0x60] sm:$0xff] %vm200_vm1, %v450_v30  ;;  %v430_v32 = vmul.f32 %v819_v8, %v408_v31 }
 0x21f   :  { %v451_v63 = vadd.f32 %v825_v12, %v429_v7  ;;  %v409_v23 = vmul.f32 %v561_v6, %v801_v3 }
 0x220   :  { %v452_v2 = vadd.f32 %v825_v12, %v430_v32 }
 0x221   :  { %467 = vst.msk [vmem:[%s943_s5 + $0x68] sm:$0xff] %vm200_vm1, %v451_v63  ;;  %v431_v35 = vmul.f32 %v819_v8, %v409_v23 }
 0x222   :  { %468 = vst.msk [vmem:[%s943_s5 + $0x70] sm:$0xff] %vm200_vm1, %v452_v2 }
 0x223   :  { %v453_v16 = vadd.f32 %v825_v12, %v431_v35 }
 0x225   :  { %469 = vst.msk [vmem:[%s943_s5 + $0x78] sm:$0xff] %vm200_vm1, %v453_v16 }

// kernel: swin_extractor.6
= control target key start
LH: loop header
LB: loop body
LE: loop exit
PB: predicated region body
PF: predicated region fallthrough
CT: control target
= control target key end

     0   :  { %vm204_vm0 = vcmask 523264   ;;  %s358_s0 = inlined_call_operand.vmem [shape: f32[32,128], index: 0, kind: input, shape index: {}]   ;;  %s359_s3 = inlined_call_operand.vmem [shape: bf16[128,64], index: 3, kind: input, shape index: {}]   ;;  %s360_s1 = inlined_call_operand.vmem [shape: f32[1,128], index: 1, kind: input, shape index: {}]   ;;  %s361_s2 = inlined_call_operand.vmem [shape: f32[1,128], index: 2, kind: input, shape index: {}]   ;;  %s362_s4 = inlined_call_operand.vmem [shape: f32[32,64], index: 4, kind: output, shape index: {}]  }
   0x1   :  { %v18_v0 = vld [vmem:[%s358_s0] sm:$0xff]  ;;  %v20_v1 = vld [vmem:[%s358_s0 + $0x10] sm:$0xff]  ;;  %v19_v2 = vld [vmem:[%s358_s0 + $0x8] sm:$0xff] }
   0x2   :  { %24 = vadd.xlane.f32.xlu0 %v18_v0  ;;  %28 = vadd.xlane.f32.xlu1 %v20_v1  ;;  %v21_v3 = vld [vmem:[%s358_s0 + $0x18] sm:$0xff]  ;;  %v254_v21 = vld [vmem:[%s359_s3 + $0x30] sm:$0xff]   ;;  %v255_v22 = vld [vmem:[%s359_s3 + $0x28] sm:$0xff]  }
   0x3   :  { %v253_v20 = vld [vmem:[%s359_s3 + $0x38] sm:$0xff]   ;;  %v256_v23 = vld [vmem:[%s359_s3 + $0x20] sm:$0xff]   ;;  %v258_v25 = vld [vmem:[%s359_s3 + $0x10] sm:$0xff]  }
   0x4   :  { %233 = vmatprep.subr.bf16.mxu0 %v253_v20  ;;  %v257_v24 = vld [vmem:[%s359_s3 + $0x18] sm:$0xff]   ;;  %v259_v26 = vld [vmem:[%s359_s3 + $0x8] sm:$0xff]   ;;  %v260_v27 = vld [vmem:[%s359_s3] sm:$0xff]  }
   0x5   :  { %234 = vmatpush3.bf16.msra.mxu0 %v253_v20  ;;  %v213_v42 = vld [vmem:[%s360_s1] ss:$0 sm:$0xff] }
   0x6   :  { %26 = vadd.xlane.f32.xlu0 %v19_v2  ;;  %30 = vadd.xlane.f32.xlu1 %v21_v3  ;;  %v214_v47 = vld [vmem:[%s361_s2] ss:$0 sm:$0xff] }
   0x7   :  { %235 = vmatprep.subr.bf16.mxu0 %v254_v21 }
   0x9   :  { %236 = vmatpush3.bf16.msra.mxu0 %v254_v21 }
   0xa   :  { %237 = vmatprep.subr.bf16.mxu0 %v255_v22 }
   0xd   :  { %238 = vmatpush3.bf16.msra.mxu0 %v255_v22 }
   0xe   :  { %239 = vmatprep.subr.bf16.mxu0 %v256_v23 }
  0x11   :  { %240 = vmatpush3.bf16.msra.mxu0 %v256_v23 }
  0x12   :  { %241 = vmatprep.subr.bf16.mxu0 %v257_v24 }
  0x15   :  { %242 = vmatpush3.bf16.msra.mxu0 %v257_v24 }
  0x16   :  { %243 = vmatprep.subr.bf16.mxu0 %v258_v25 }
  0x19   :  { %244 = vmatpush3.bf16.msra.mxu0 %v258_v25 }
  0x1a   :  { %245 = vmatprep.subr.bf16.mxu0 %v259_v26 }
  0x1d   :  { %246 = vmatpush3.bf16.msra.mxu0 %v259_v26 }
  0x1e   :  { %247 = vmatprep.subr.bf16.mxu0 %v260_v27 }
  0x21   :  { %248 = vmatpush3.bf16.msra.mxu0 %v260_v27 }
  0x8b   :  { %v25_v4 = vpop.xlane.xlu0 %24  ;;  %v29_v5 = vpop.xlane.xlu1 %28 }
  0x8c   :  { %v33_v6 = vmul.f32 0.0078125, %v25_v4  ;;  %v35_v7 = vmul.f32 0.0078125, %v29_v5 }
  0x8e   :  { %v37_v8 = vsub.f32 %v18_v0, %v33_v6  ;;  %v306_v9 = vsub.f32 %v20_v1, %v35_v7 }
  0x8f   :  { %v27_v10 = vpop.xlane.xlu0 %26  ;;  %v31_v11 = vpop.xlane.xlu1 %30 }
  0x90   :  { %v34_v12 = vmul.f32 0.0078125, %v27_v10  ;;  %v41_v13 = vmul.f32 %v37_v8, %v37_v8  ;;  %v36_v14 = vmul.f32 0.0078125, %v31_v11  ;;  %v43_v17 = vmul.f32 %v306_v9, %v306_v9 }
  0x92   :  { %v38_v15 = vsub.f32 %v19_v2, %v34_v12  ;;  %45 = vadd.xlane.f32.xlu0 %v41_v13  ;;  %v308_v16 = vsub.f32 %v21_v3, %v36_v14 }
  0x94   :  { %v42_v18 = vmul.f32 %v38_v15, %v38_v15  ;;  %v44_v19 = vmul.f32 %v308_v16, %v308_v16 }
  0x96   :  { %49 = vadd.xlane.f32.xlu0 %v43_v17  ;;  %47 = vadd.xlane.f32.xlu1 %v42_v18 }
  0x9a   :  { %51 = vadd.xlane.f32.xlu1 %v44_v19 }
 0x11b   :  { %v46_v28 = vpop.xlane.xlu0 %45 }
 0x11c   :  { %v53_v29 = vmul.f32 0.0078125, %v46_v28 }
 0x11e   :  { %v57_v30 = vadd.f32 1e-05, %v53_v29 }
 0x11f   :  { %v48_v31 = vpop.xlane.xlu1 %47  ;;  %v50_v32 = vpop.xlane.xlu0 %49 }
 0x120   :  { %261 = vrsqrt.f32 %v57_v30  ;;  %v54_v33 = vmul.f32 0.0078125, %v48_v31  ;;  %v55_v34 = vmul.f32 0.0078125, %v50_v32 }
 0x122   :  { %v58_v35 = vadd.f32 1e-05, %v54_v33  ;;  %v59_v36 = vadd.f32 1e-05, %v55_v34 }
 0x123   :  { %v52_v37 = vpop.xlane.xlu1 %51 }
 0x124   :  { %263 = vrsqrt.f32 %v58_v35  ;;  %v56_v38 = vmul.f32 0.0078125, %v52_v37 }
 0x125   :  { %265 = vrsqrt.f32 %v59_v36 }
 0x126   :  { %v60_v39 = vadd.f32 1e-05, %v56_v38 }
 0x128   :  { %267 = vrsqrt.f32 %v60_v39 }
 0x12d   :  { %v262_v40 = vpop.eup %261 }
 0x12e   :  { %v65_v41 = vmul.f32 %v262_v40, %v37_v8 }
 0x130   :  { %v75_v46 = vmul.f32 %v213_v42, %v65_v41 }
 0x131   :  { %v264_v43 = vpop.eup %263 }
 0x132   :  { %v266_v44 = vpop.eup %265  ;;  %v66_v45 = vmul.f32 %v264_v43, %v38_v15  ;;  %v85_v51 = vadd.f32 %v214_v47, %v75_v46 }
 0x133   :  { %v67_v48 = vmul.f32 %v266_v44, %v306_v9 }
 0x134   :  { %v76_v49 = vmul.f32 %v213_v42, %v66_v45 }
 0x135   :  { %v268_v50 = vpop.eup %267  ;;  %v77_v54 = vmul.f32 %v213_v42, %v67_v48 }
 0x136   :  { %v86_v52 = vadd.f32 %v214_v47, %v76_v49  ;;  %v68_v53 = vmul.f32 %v268_v50, %v308_v16 }
 0x137   :  { %v87_v57 = vadd.f32 %v214_v47, %v77_v54 }
 0x138   :  { %v89_v55 = vpack.c.bf16 %v86_v52, %v85_v51  ;;  %v78_v56 = vmul.f32 %v213_v42, %v68_v53 }
 0x13a   :  { %249 = vmatprep.mubr.bf16.mxu0 %v89_v55  ;;  %v88_v58 = vadd.f32 %v214_v47, %v78_v56 }
 0x13c   :  { %v90_v59 = vpack.c.bf16 %v88_v58, %v87_v57 }
 0x13e   :  { %250 = vmatmul.mubr.bf16.vlgmr.msra.gmra.mxu0 %v90_v59 }
 0x1fe   :  { %v251_v60 = vpop.f32.mrf.mxu0 }
 0x1ff   :  { %207 = vst.msk [vmem:[%s362_s4 + $0x10] sm:$0xff] %vm204_vm0, %v251_v60 }
 0x200   :  { %v189_v61 = vpop.f32.mrf.mxu0 }
 0x201   :  { %205 = vst.msk [vmem:[%s362_s4] sm:$0xff] %vm204_vm0, %v189_v61 }
 0x202   :  { %v252_v62 = vpop.f32.mrf.mxu0 }
 0x203   :  { %208 = vst.msk [vmem:[%s362_s4 + $0x18] sm:$0xff] %vm204_vm0, %v252_v62 }
 0x204   :  { %v192_v63 = vpop.f32.mrf.mxu0 }
 0x205   :  { %206 = vst.msk [vmem:[%s362_s4 + $0x8] sm:$0xff] %vm204_vm0, %v192_v63 }

// kernel: swin_extractor.5
= control target key start
LH: loop header
LB: loop body
LE: loop exit
PB: predicated region body
PF: predicated region fallthrough
CT: control target
= control target key end

     0   :  { %vm66_vm0 = vcmask 261120   ;;  %vm520_vm1 = vcmask 130048   ;;  %s6301_s23 = smov 96   ;;  %s6302_s24 = smov 64   ;;  %vm1486_vm2 = vcmask 261248   ;;  %s8990_s0 = inlined_call_operand.vmem [shape: f32[128,32], index: 0, kind: input, shape index: {}, may-alias: {0,14}]   ;;  %s8991_s3 = inlined_call_operand.vmem [shape: bf16[2,32,96], index: 3, kind: input, shape index: {}]   ;;  %s8992_s1 = inlined_call_operand.vmem [shape: f32[2,1,32], index: 1, kind: input, shape index: {}]   ;;  %s8993_s2 = inlined_call_operand.vmem [shape: f32[2,1,32], index: 2, kind: input, shape index: {}]   ;;  %s8994_s4 = inlined_call_operand.vmem [shape: f32[2,1,96], index: 4, kind: input, shape index: {}]   ;;  %s8995_s5 = inlined_call_operand.vmem [shape: f32[2,2,128,128], index: 5, kind: input, shape index: {}]   ;;  %s8996_s6 = inlined_call_operand.vmem [shape: bf16[2,32,32], index: 6, kind: input, shape index: {}]   ;;  %s8997_s7 = inlined_call_operand.vmem [shape: f32[2,1,32], index: 7, kind: input, shape index: {}]   ;;  %s8998_s10 = inlined_call_operand.vmem [shape: bf16[2,32,128], index: 10, kind: input, shape index: {}]   ;;  %s8999_s8 = inlined_call_operand.vmem [shape: f32[2,1,32], index: 8, kind: input, shape index: {}]   ;;  %s9000_s9 = inlined_call_operand.vmem [shape: f32[2,1,32], index: 9, kind: input, shape index: {}]   ;;  %s9001_s12 = inlined_call_operand.vmem [shape: bf16[2,128,32], index: 12, kind: input, shape index: {}]   ;;  %s9002_s11 = inlined_call_operand.vmem [shape: f32[2,1,128], index: 11, kind: input, shape index: {}]   ;;  %s9003_s13 = inlined_call_operand.vmem [shape: f32[2,1,32], index: 13, kind: input, shape index: {}]   ;;  %s9004_s14 = inlined_call_operand.vmem [shape: f32[128,32], index: 14, kind: output, shape index: {}, may-alias: {0,14}]  }
   0x1   :  { %v48_v0 = vld [vmem:[%s8990_s0] sm:$0xff]  ;;  %v50_v1 = vld [vmem:[%s8990_s0 + $0x10] sm:$0xff]  ;;  %v49_v2 = vld [vmem:[%s8990_s0 + $0x8] sm:$0xff]  ;;  %s6303_s27 = smov 80   ;;  %s6304_s15 = smov 112  }
   0x2   :  { %v67_v3 = vsel %vm66_vm0, %v48_v0, 0.0  ;;  %v73_v4 = vsel %vm66_vm0, %v50_v1, 0.0  ;;  %v51_v5 = vld [vmem:[%s8990_s0 + $0x18] sm:$0xff]  ;;  %v70_v6 = vsel %vm66_vm0, %v49_v2, 0.0  ;;  %v52_v8 = vld [vmem:[%s8990_s0 + $0x20] sm:$0xff]  ;;  %v53_v9 = vld [vmem:[%s8990_s0 + $0x28] sm:$0xff] }
   0x3   :  { %68 = vadd.xlane.f32.xlu0 %v67_v3  ;;  %74 = vadd.xlane.f32.xlu1 %v73_v4  ;;  %v76_v7 = vsel %vm66_vm0, %v51_v5, 0.0  ;;  %v79_v10 = vsel %vm66_vm0, %v52_v8, 0.0  ;;  %v82_v11 = vsel %vm66_vm0, %v53_v9, 0.0  ;;  %v6409_v12 = vld [vmem:[%s8990_s0 + $0x30] sm:$0xff]  ;;  %v6414_v13 = vld [vmem:[%s8990_s0 + $0x38] sm:$0xff]  ;;  %v6423_v16 = vld [vmem:[%s8990_s0 + $0x40] sm:$0xff] }
   0x4   :  { %v85_v14 = vsel %vm66_vm0, %v6409_v12, 0.0  ;;  %v88_v15 = vsel %vm66_vm0, %v6414_v13, 0.0  ;;  %v6428_v17 = vld [vmem:[%s8990_s0 + $0x48] sm:$0xff]  ;;  %v91_v18 = vsel %vm66_vm0, %v6423_v16, 0.0  ;;  %v6437_v20 = vld [vmem:[%s8990_s0 + $0x50] sm:$0xff]  ;;  %v6442_v21 = vld [vmem:[%s8990_s0 + $0x58] sm:$0xff] }
   0x5   :  { %v94_v19 = vsel %vm66_vm0, %v6428_v17, 0.0  ;;  %v97_v22 = vsel %vm66_vm0, %v6437_v20, 0.0  ;;  %v100_v23 = vsel %vm66_vm0, %v6442_v21, 0.0  ;;  %v6451_v24 = vld [vmem:[%s8990_s0 + $0x60] sm:$0xff]  ;;  %v6456_v25 = vld [vmem:[%s8990_s0 + $0x68] sm:$0xff]  ;;  %v6465_v28 = vld [vmem:[%s8990_s0 + $0x70] sm:$0xff] }
   0x6   :  { %v103_v26 = vsel %vm66_vm0, %v6451_v24, 0.0  ;;  %v106_v27 = vsel %vm66_vm0, %v6456_v25, 0.0  ;;  %v6470_v29 = vld [vmem:[%s8990_s0 + $0x78] sm:$0xff]  ;;  %v109_v30 = vsel %vm66_vm0, %v6465_v28, 0.0  ;;  %s6305_s16 = smov 48   ;;  %s6306_s18 = smov 16  }
   0x7   :  { %71 = vadd.xlane.f32.xlu0 %v70_v6  ;;  %77 = vadd.xlane.f32.xlu1 %v76_v7  ;;  %v112_v31 = vsel %vm66_vm0, %v6470_v29, 0.0 }
   0xb   :  { %80 = vadd.xlane.f32.xlu0 %v79_v10  ;;  %83 = vadd.xlane.f32.xlu1 %v82_v11 }
   0xf   :  { %86 = vadd.xlane.f32.xlu0 %v85_v14  ;;  %89 = vadd.xlane.f32.xlu1 %v88_v15 }
  0x13   :  { %92 = vadd.xlane.f32.xlu0 %v91_v18  ;;  %95 = vadd.xlane.f32.xlu1 %v94_v19 }
  0x17   :  { %98 = vadd.xlane.f32.xlu0 %v97_v22  ;;  %101 = vadd.xlane.f32.xlu1 %v100_v23 }
  0x1b   :  { %104 = vadd.xlane.f32.xlu0 %v103_v26  ;;  %107 = vadd.xlane.f32.xlu1 %v106_v27 }
  0x1f   :  { %110 = vadd.xlane.f32.xlu0 %v109_v30  ;;  %113 = vadd.xlane.f32.xlu1 %v112_v31 }
  0x8c   :  { %v69_v32 = vpop.xlane.xlu0 %68  ;;  %v75_v33 = vpop.xlane.xlu1 %74 }
  0x8d   :  { %v116_v34 = vmul.f32 0.03125, %v69_v32  ;;  %v118_v35 = vmul.f32 0.03125, %v75_v33 }
  0x8f   :  { %v6476_v36 = vsub.f32 %v48_v0, %v116_v34  ;;  %v6478_v37 = vsub.f32 %v50_v1, %v118_v35 }
  0x90   :  { %v72_v38 = vpop.xlane.xlu0 %71  ;;  %v78_v39 = vpop.xlane.xlu1 %77 }
  0x91   :  { %v117_v40 = vmul.f32 0.03125, %v72_v38  ;;  %v119_v41 = vmul.f32 0.03125, %v78_v39  ;;  %v148_v42 = vmul.f32 %v6476_v36, %v6476_v36  ;;  %v150_v43 = vmul.f32 %v6478_v37, %v6478_v37 }
  0x93   :  { %v6484_v44 = vsub.f32 %v49_v2, %v117_v40  ;;  %v6486_v45 = vsub.f32 %v51_v5, %v119_v41  ;;  %v164_v46 = vsel %vm66_vm0, %v148_v42, 0.0  ;;  %v170_v49 = vsel %vm66_vm0, %v150_v43, 0.0 }
  0x94   :  { %165 = vadd.xlane.f32.xlu0 %v164_v46  ;;  %v81_v47 = vpop.xlane.xlu0 %80  ;;  %v84_v48 = vpop.xlane.xlu1 %83 }
  0x95   :  { %v120_v50 = vmul.f32 0.03125, %v81_v47  ;;  %v121_v51 = vmul.f32 0.03125, %v84_v48  ;;  %v149_v52 = vmul.f32 %v6484_v44, %v6484_v44  ;;  %v151_v53 = vmul.f32 %v6486_v45, %v6486_v45 }
  0x97   :  { %v6494_v54 = vsub.f32 %v52_v8, %v120_v50  ;;  %v6496_v55 = vsub.f32 %v53_v9, %v121_v51  ;;  %v167_v56 = vsel %vm66_vm0, %v149_v52, 0.0  ;;  %v173_v59 = vsel %vm66_vm0, %v151_v53, 0.0  ;;  %v5810_v53 = vld [vmem:[%s8991_s3] sm:$0xff]  }
  0x98   :  { %171 = vadd.xlane.f32.xlu0 %v170_v49  ;;  %168 = vadd.xlane.f32.xlu1 %v167_v56  ;;  %v87_v57 = vpop.xlane.xlu0 %86  ;;  %v90_v58 = vpop.xlane.xlu1 %89 }
  0x99   :  { %v122_v60 = vmul.f32 0.03125, %v87_v57  ;;  %v123_v61 = vmul.f32 0.03125, %v90_v58  ;;  %v152_v62 = vmul.f32 %v6494_v54, %v6494_v54  ;;  %v153_v63 = vmul.f32 %v6496_v55, %v6496_v55 }
  0x9b   :  { %v6505_v0 = vsub.f32 %v6409_v12, %v122_v60  ;;  %v6508_v1 = vsub.f32 %v6414_v13, %v123_v61  ;;  %v176_v2 = vsel %vm66_vm0, %v152_v62, 0.0  ;;  %v179_v5 = vsel %vm66_vm0, %v153_v63, 0.0 }
  0x9c   :  { %174 = vadd.xlane.f32.xlu1 %v173_v59  ;;  %177 = vadd.xlane.f32.xlu0 %v176_v2  ;;  %v93_v3 = vpop.xlane.xlu0 %92  ;;  %v96_v4 = vpop.xlane.xlu1 %95 }
  0x9d   :  { %v124_v6 = vmul.f32 0.03125, %v93_v3  ;;  %v125_v7 = vmul.f32 0.03125, %v96_v4  ;;  %v154_v8 = vmul.f32 %v6505_v0, %v6505_v0  ;;  %v155_v9 = vmul.f32 %v6508_v1, %v6508_v1 }
  0x9f   :  { %v6517_v10 = vsub.f32 %v6423_v16, %v124_v6  ;;  %v6520_v11 = vsub.f32 %v6428_v17, %v125_v7  ;;  %v182_v12 = vsel %vm66_vm0, %v154_v8, 0.0  ;;  %v185_v15 = vsel %vm66_vm0, %v155_v9, 0.0 }
  0xa0   :  { %180 = vadd.xlane.f32.xlu1 %v179_v5  ;;  %183 = vadd.xlane.f32.xlu0 %v182_v12  ;;  %v99_v13 = vpop.xlane.xlu0 %98  ;;  %v102_v14 = vpop.xlane.xlu1 %101 }
  0xa1   :  { %v126_v18 = vmul.f32 0.03125, %v99_v13  ;;  %v127_v19 = vmul.f32 0.03125, %v102_v14  ;;  %v156_v22 = vmul.f32 %v6517_v10, %v6517_v10  ;;  %v157_v16 = vmul.f32 %v6520_v11, %v6520_v11 }
  0xa3   :  { %v6529_v23 = vsub.f32 %v6437_v20, %v126_v18  ;;  %v6532_v17 = vsub.f32 %v6442_v21, %v127_v19  ;;  %v188_v26 = vsel %vm66_vm0, %v156_v22, 0.0  ;;  %v191_v31 = vsel %vm66_vm0, %v157_v16, 0.0 }
  0xa4   :  { %186 = vadd.xlane.f32.xlu1 %v185_v15  ;;  %189 = vadd.xlane.f32.xlu0 %v188_v26  ;;  %v105_v27 = vpop.xlane.xlu0 %104  ;;  %v108_v30 = vpop.xlane.xlu1 %107 }
  0xa5   :  { %v128_v32 = vmul.f32 0.03125, %v105_v27  ;;  %v129_v33 = vmul.f32 0.03125, %v108_v30  ;;  %v158_v34 = vmul.f32 %v6529_v23, %v6529_v23  ;;  %v159_v20 = vmul.f32 %v6532_v17, %v6532_v17 }
  0xa7   :  { %v6541_v35 = vsub.f32 %v6451_v24, %v128_v32  ;;  %v6544_v21 = vsub.f32 %v6456_v25, %v129_v33  ;;  %v194_v38 = vsel %vm66_vm0, %v158_v34, 0.0  ;;  %v197_v41 = vsel %vm66_vm0, %v159_v20, 0.0  ;;  %v6575_v32 = vld [vmem:[%s8992_s1] ss:$0 sm:$0xff] }
  0xa8   :  { %192 = vadd.xlane.f32.xlu1 %v191_v31  ;;  %195 = vadd.xlane.f32.xlu0 %v194_v38  ;;  %v111_v39 = vpop.xlane.xlu0 %110  ;;  %v114_v40 = vpop.xlane.xlu1 %113 }
  0xa9   :  { %v130_v42 = vmul.f32 0.03125, %v111_v39  ;;  %v131_v43 = vmul.f32 0.03125, %v114_v40  ;;  %v160_v46 = vmul.f32 %v6541_v35, %v6541_v35  ;;  %v161_v24 = vmul.f32 %v6544_v21, %v6544_v21 }
  0xab   :  { %v6553_v47 = vsub.f32 %v6465_v28, %v130_v42  ;;  %v6556_v25 = vsub.f32 %v6470_v29, %v131_v43  ;;  %v200_v48 = vsel %vm66_vm0, %v160_v46, 0.0  ;;  %v203_v49 = vsel %vm66_vm0, %v161_v24, 0.0  ;;  %v5809_v29 = vld [vmem:[%s8991_s3 + $0x8] sm:$0xff]   ;;  %v6582_v24 = vld [vmem:[%s8993_s2] ss:$0 sm:$0xff] }
  0xac   :  { %198 = vadd.xlane.f32.xlu1 %v197_v41  ;;  %201 = vadd.xlane.f32.xlu0 %v200_v48 }
  0xad   :  { %v162_v50 = vmul.f32 %v6553_v47, %v6553_v47  ;;  %v163_v51 = vmul.f32 %v6556_v25, %v6556_v25  ;;  %5315 = vmatprep.subr.bf16.mxu0 %v5809_v29 }
  0xae   :  { %5316 = vmatpush3.bf16.msra.mxu0 %v5809_v29 }
  0xaf   :  { %v206_v52 = vsel %vm66_vm0, %v162_v50, 0.0  ;;  %v209_v28 = vsel %vm66_vm0, %v163_v51, 0.0  ;;  %5317 = vmatprep.subr.bf16.mxu0 %v5810_v53 }
  0xb0   :  { %204 = vadd.xlane.f32.xlu1 %v203_v49  ;;  %207 = vadd.xlane.f32.xlu0 %v206_v52 }
  0xb2   :  { %5318 = vmatpush3.bf16.msra.mxu0 %v5810_v53 }
  0xb4   :  { %210 = vadd.xlane.f32.xlu1 %v209_v28 }
 0x11d   :  { %v166_v56 = vpop.xlane.xlu0 %165 }
 0x11e   :  { %v212_v57 = vmul.f32 0.03125, %v166_v56 }
 0x120   :  { %v228_v58 = vadd.f32 1e-05, %v212_v57 }
 0x121   :  { %v169_v59 = vpop.xlane.xlu1 %168  ;;  %v172_v60 = vpop.xlane.xlu0 %171 }
 0x122   :  { %5837 = vrsqrt.f32 %v228_v58  ;;  %v213_v61 = vmul.f32 0.03125, %v169_v59  ;;  %v214_v62 = vmul.f32 0.03125, %v172_v60 }
 0x124   :  { %v229_v63 = vadd.f32 1e-05, %v213_v61  ;;  %v230_v2 = vadd.f32 1e-05, %v214_v62 }
 0x125   :  { %v175_v3 = vpop.xlane.xlu1 %174  ;;  %v178_v4 = vpop.xlane.xlu0 %177 }
 0x126   :  { %5839 = vrsqrt.f32 %v229_v63  ;;  %v215_v5 = vmul.f32 0.03125, %v175_v3  ;;  %v216_v6 = vmul.f32 0.03125, %v178_v4 }
 0x127   :  { %5841 = vrsqrt.f32 %v230_v2 }
 0x128   :  { %v231_v7 = vadd.f32 1e-05, %v215_v5  ;;  %v232_v8 = vadd.f32 1e-05, %v216_v6 }
 0x129   :  { %v181_v9 = vpop.xlane.xlu1 %180  ;;  %v184_v12 = vpop.xlane.xlu0 %183 }
 0x12a   :  { %5843 = vrsqrt.f32 %v231_v7  ;;  %v217_v13 = vmul.f32 0.03125, %v181_v9  ;;  %v218_v14 = vmul.f32 0.03125, %v184_v12 }
 0x12b   :  { %5845 = vrsqrt.f32 %v232_v8 }
 0x12c   :  { %v233_v15 = vadd.f32 1e-05, %v217_v13  ;;  %v234_v18 = vadd.f32 1e-05, %v218_v14 }
 0x12d   :  { %v187_v19 = vpop.xlane.xlu1 %186  ;;  %v190_v22 = vpop.xlane.xlu0 %189 }
 0x12e   :  { %5847 = vrsqrt.f32 %v233_v15  ;;  %v219_v16 = vmul.f32 0.03125, %v187_v19  ;;  %v220_v26 = vmul.f32 0.03125, %v190_v22 }
 0x12f   :  { %v5838_v27 = vpop.eup %5837  ;;  %5849 = vrsqrt.f32 %v234_v18 }
 0x130   :  { %v235_v30 = vadd.f32 1e-05, %v219_v16  ;;  %v236_v31 = vadd.f32 1e-05, %v220_v26  ;;  %v260_v33 = vmul.f32 %v5838_v27, %v6476_v36 }
 0x131   :  { %v193_v34 = vpop.xlane.xlu1 %192  ;;  %v196_v20 = vpop.xlane.xlu0 %195 }
 0x132   :  { %5851 = vrsqrt.f32 %v235_v30  ;;  %v221_v38 = vmul.f32 0.03125, %v193_v34  ;;  %v222_v39 = vmul.f32 0.03125, %v196_v20  ;;  %v282_v41 = vmul.f32 %v6575_v32, %v260_v33 }
 0x133   :  { %v5840_v40 = vpop.eup %5839  ;;  %5853 = vrsqrt.f32 %v236_v31 }
 0x134   :  { %v5842_v42 = vpop.eup %5841  ;;  %v237_v43 = vadd.f32 1e-05, %v221_v38  ;;  %v238_v46 = vadd.f32 1e-05, %v222_v39  ;;  %v261_v48 = vmul.f32 %v5840_v40, %v6484_v44  ;;  %v304_v53 = vadd.f32 %v6582_v24, %v282_v41 }
 0x135   :  { %v199_v36 = vpop.xlane.xlu1 %198  ;;  %v202_v49 = vpop.xlane.xlu0 %201  ;;  %v262_v50 = vmul.f32 %v5842_v42, %v6478_v37 }
 0x136   :  { %5855 = vrsqrt.f32 %v237_v43  ;;  %v223_v51 = vmul.f32 0.03125, %v199_v36  ;;  %v224_v52 = vmul.f32 0.03125, %v202_v49  ;;  %v283_v28 = vmul.f32 %v6575_v32, %v261_v48 }
 0x137   :  { %v5844_v29 = vpop.eup %5843  ;;  %5857 = vrsqrt.f32 %v238_v46  ;;  %v284_v37 = vmul.f32 %v6575_v32, %v262_v50 }
 0x138   :  { %v5846_v56 = vpop.eup %5845  ;;  %v239_v57 = vadd.f32 1e-05, %v223_v51  ;;  %v240_v58 = vadd.f32 1e-05, %v224_v52  ;;  %v305_v59 = vadd.f32 %v6582_v24, %v283_v28  ;;  %v263_v44 = vmul.f32 %v5844_v29, %v6486_v45 }
 0x139   :  { %v205_v60 = vpop.xlane.xlu1 %204  ;;  %v208_v61 = vpop.xlane.xlu0 %207  ;;  %v264_v62 = vmul.f32 %v5846_v56, %v6494_v54  ;;  %v306_v54 = vadd.f32 %v6582_v24, %v284_v37 }
 0x13a   :  { %5859 = vrsqrt.f32 %v239_v57  ;;  %v225_v63 = vmul.f32 0.03125, %v205_v60  ;;  %v226_v2 = vmul.f32 0.03125, %v208_v61  ;;  %v320_v3 = vpack.c.bf16 %v305_v59, %v304_v53 }
 0x13b   :  { %v5848_v4 = vpop.eup %5847  ;;  %5861 = vrsqrt.f32 %v240_v58  ;;  %v285_v5 = vmul.f32 %v6575_v32, %v263_v44  ;;  %v286_v6 = vmul.f32 %v6575_v32, %v264_v62 }
 0x13c   :  { %v5850_v7 = vpop.eup %5849  ;;  %v241_v8 = vadd.f32 1e-05, %v225_v63  ;;  %v242_v9 = vadd.f32 1e-05, %v226_v2  ;;  %5319 = vmatprep.mubr.msk.bf16.mxu0 %vm66_vm0, %v320_v3  ;;  %v265_v45 = vmul.f32 %v5848_v4, %v6496_v55 }
 0x13d   :  { %v211_v12 = vpop.xlane.xlu1 %210  ;;  %v307_v13 = vadd.f32 %v6582_v24, %v285_v5  ;;  %v266_v14 = vmul.f32 %v5850_v7, %v6505_v0  ;;  %v308_v16 = vadd.f32 %v6582_v24, %v286_v6 }
 0x13e   :  { %5863 = vrsqrt.f32 %v241_v8  ;;  %v227_v15 = vmul.f32 0.03125, %v211_v12  ;;  %v287_v18 = vmul.f32 %v6575_v32, %v265_v45 }
 0x13f   :  { %v5852_v19 = vpop.eup %5851  ;;  %5865 = vrsqrt.f32 %v242_v9  ;;  %v321_v22 = vpack.c.bf16 %v307_v13, %v306_v54  ;;  %v288_v31 = vmul.f32 %v6575_v32, %v266_v14 }
 0x140   :  { %v5854_v26 = vpop.eup %5853  ;;  %v243_v27 = vadd.f32 1e-05, %v227_v15  ;;  %v309_v55 = vadd.f32 %v6582_v24, %v287_v18  ;;  %v267_v30 = vmul.f32 %v5852_v19, %v6508_v1 }
 0x141   :  { %5320 = vmatmul.mubr.msk.bf16.vlgmr.msra.gmra.mxu0 %vm66_vm0, %v321_v22  ;;  %v268_v0 = vmul.f32 %v5854_v26, %v6517_v10  ;;  %v310_v39 = vadd.f32 %v6582_v24, %v288_v31 }
 0x142   :  { %5867 = vrsqrt.f32 %v243_v27  ;;  %v322_v33 = vpack.c.bf16 %v309_v55, %v308_v16  ;;  %v289_v34 = vmul.f32 %v6575_v32, %v267_v30 }
 0x143   :  { %v5856_v20 = vpop.eup %5855  ;;  %v290_v41 = vmul.f32 %v6575_v32, %v268_v0 }
 0x144   :  { %v5858_v38 = vpop.eup %5857  ;;  %5323 = vmatprep.mubr.msk.bf16.mxu0 %vm66_vm0, %v322_v33  ;;  %v311_v40 = vadd.f32 %v6582_v24, %v289_v34  ;;  %v269_v1 = vmul.f32 %v5856_v20, %v6520_v11 }
 0x145   :  { %v270_v42 = vmul.f32 %v5858_v38, %v6529_v23  ;;  %v312_v36 = vadd.f32 %v6582_v24, %v290_v41 }
 0x146   :  { %v323_v43 = vpack.c.bf16 %v311_v40, %v310_v39  ;;  %v291_v10 = vmul.f32 %v6575_v32, %v269_v1 }
 0x147   :  { %v5860_v46 = vpop.eup %5859  ;;  %v292_v51 = vmul.f32 %v6575_v32, %v270_v42 }
 0x148   :  { %v5862_v48 = vpop.eup %5861  ;;  %v313_v49 = vadd.f32 %v6582_v24, %v291_v10  ;;  %v271_v50 = vmul.f32 %v5860_v46, %v6532_v17 }
 0x149   :  { %5324 = vmatmul.mubr.msk.bf16.gmra.mxu0 %vm66_vm0, %v323_v43  ;;  %v272_v11 = vmul.f32 %v5862_v48, %v6541_v35  ;;  %v314_v53 = vadd.f32 %v6582_v24, %v292_v51 }
 0x14a   :  { %v324_v52 = vpack.c.bf16 %v313_v49, %v312_v36  ;;  %v293_v23 = vmul.f32 %v6575_v32, %v271_v50 }
 0x14b   :  { %v5864_v28 = vpop.eup %5863  ;;  %v294_v17 = vmul.f32 %v6575_v32, %v272_v11 }
 0x14c   :  { %v5866_v29 = vpop.eup %5865  ;;  %5327 = vmatprep.mubr.msk.bf16.mxu0 %vm66_vm0, %v324_v52  ;;  %v315_v56 = vadd.f32 %v6582_v24, %v293_v23  ;;  %v273_v57 = vmul.f32 %v5864_v28, %v6544_v21 }
 0x14d   :  { %v274_v58 = vmul.f32 %v5866_v29, %v6553_v47  ;;  %v316_v60 = vadd.f32 %v6582_v24, %v294_v17 }
 0x14e   :  { %v325_v59 = vpack.c.bf16 %v315_v56, %v314_v53  ;;  %v295_v35 = vmul.f32 %v6575_v32, %v273_v57 }
 0x14f   :  { %v5868_v44 = vpop.eup %5867  ;;  %v296_v62 = vmul.f32 %v6575_v32, %v274_v58 }
 0x150   :  { %v317_v61 = vadd.f32 %v6582_v24, %v295_v35  ;;  %v275_v37 = vmul.f32 %v5868_v44, %v6556_v25  ;;  %v4889_v25 = vld [vmem:[%s8994_s4] ss:$0 sm:$0xff] }
 0x151   :  { %5328 = vmatmul.mubr.msk.bf16.gmra.mxu0 %vm66_vm0, %v325_v59  ;;  %v318_v47 = vadd.f32 %v6582_v24, %v296_v62 }
 0x152   :  { %v326_v63 = vpack.c.bf16 %v317_v61, %v316_v60  ;;  %v297_v21 = vmul.f32 %v6575_v32, %v275_v37 }
 0x154   :  { %5331 = vmatprep.mubr.msk.bf16.mxu0 %vm66_vm0, %v326_v63  ;;  %v319_v2 = vadd.f32 %v6582_v24, %v297_v21 }
 0x156   :  { %v327_v3 = vpack.c.bf16 %v319_v2, %v318_v47 }
 0x159   :  { %5332 = vmatmul.mubr.msk.bf16.gmra.mxu0 %vm66_vm0, %v327_v3  ;;  %v482_v3 = vld [vmem:[%s8995_s5 + $0x10] sm:$0xff] }
 0x201   :  { %v5321_v4 = vpop.f32.mrf.mxu0 }
 0x202   :  { %v418_v41 = vadd.f32 %v5321_v4, %v4889_v25 }
 0x203   :  { %v409_v5 = vpop.f32.mrf.mxu0 }
 0x204   :  { %v410_v8 = vadd.f32 %v4889_v25, %v409_v5 }
 0x205   :  { %v5322_v6 = vpop.f32.mrf.mxu0 }
 0x206   :  { %v421_v39 = vadd.f32 %v5322_v6, %v4889_v25 }
 0x207   :  { %v412_v7 = vpop.f32.mrf.mxu0 }
 0x208   :  { %v413_v9 = vadd.f32 %v4889_v25, %v412_v7  ;;  %v6659_v10 = vpack.c.bf16 %v421_v39, %v418_v41 }
 0x209   :  { %v5325_v32 = vpop.f32.mrf.mxu0 }
 0x20a   :  { %v6641_v45 = vpack.c.bf16 %v413_v9, %v410_v8  ;;  %v434_v34 = vadd.f32 %v5325_v32, %v4889_v25  ;;  %v481_v8 = vld [vmem:[%s8995_s5 + $0x8] sm:$0xff]  ;;  %v483_v32 = vld [vmem:[%s8995_s5 + $0x18] sm:$0xff] }
 0x20b   :  { %v425_v12 = vpop.f32.mrf.mxu0 }
 0x20c   :  { %5351 = vmatprep.mubr.msk.bf16.mxu1 %vm520_vm1, %v6641_v45  ;;  %v426_v49 = vadd.f32 %v4889_v25, %v425_v12 }
 0x20d   :  { %v5326_v24 = vpop.f32.mrf.mxu0 }
 0x20e   :  { %v437_v30 = vadd.f32 %v5326_v24, %v4889_v25 }
 0x20f   :  { %v428_v54 = vpop.f32.mrf.mxu0 }
 0x210   :  { %v6651_v40 = vpack.c.bf16 %v437_v30, %v434_v34  ;;  %v429_v48 = vadd.f32 %v4889_v25, %v428_v54  ;;  %v491_v30 = vld [vmem:[%s8995_s5 + $0x58] sm:$0xff] }
 0x211   :  { %v5329_v13 = vpop.f32.mrf.mxu0 }
 0x212   :  { %v450_v1 = vadd.f32 %v5329_v13, %v4889_v25  ;;  %v6669_v50 = vpack.c.bf16 %v429_v48, %v426_v49  ;;  %v490_v48 = vld [vmem:[%s8995_s5 + $0x50] sm:$0xff] }
 0x213   :  { %v441_v14 = vpop.f32.mrf.mxu0 }
 0x214   :  { %v442_v46 = vadd.f32 %v4889_v25, %v441_v14 }
 0x215   :  { %v5330_v15 = vpop.f32.mrf.mxu0 }
 0x216   :  { %v453_v20 = vadd.f32 %v5330_v15, %v4889_v25  ;;  %v487_v15 = vld [vmem:[%s8995_s5 + $0x38] sm:$0xff] }
 0x217   :  { %v444_v18 = vpop.f32.mrf.mxu0 }
 0x218   :  { %v6655_v42 = vpack.c.bf16 %v453_v20, %v450_v1  ;;  %v445_v43 = vadd.f32 %v4889_v25, %v444_v18  ;;  %v489_v20 = vld [vmem:[%s8995_s5 + $0x48] sm:$0xff]  ;;  %v486_v1 = vld [vmem:[%s8995_s5 + $0x30] sm:$0xff] }
 0x219   :  { %v5333_v19 = vpop.f32.mrf.mxu0 }
 0x21a   :  { %v466_v26 = vadd.f32 %v5333_v19, %v4889_v25  ;;  %v6663_v36 = vpack.c.bf16 %v445_v43, %v442_v46  ;;  %v484_v43 = vld [vmem:[%s8995_s5 + $0x20] sm:$0xff] }
 0x21b   :  { %v457_v22 = vpop.f32.mrf.mxu0 }
 0x21c   :  { %v458_v31 = vadd.f32 %v4889_v25, %v457_v22 }
 0x21d   :  { %v5334_v16 = vpop.f32.mrf.mxu0 }
 0x21e   :  { %v469_v27 = vadd.f32 %v5334_v16, %v4889_v25  ;;  %v485_v16 = vld [vmem:[%s8995_s5 + $0x28] sm:$0xff] }
 0x21f   :  { %v460_v55 = vpop.f32.mrf.mxu0 }
 0x220   :  { %v6645_v0 = vpack.c.bf16 %v469_v27, %v466_v26  ;;  %v461_v33 = vadd.f32 %v4889_v25, %v460_v55  ;;  %v480_v25 = vld [vmem:[%s8995_s5] sm:$0xff] }
 0x222   :  { %v6647_v38 = vpack.c.bf16 %v461_v33, %v458_v31  ;;  %518 = vrot.lane.b32.xlu0 %v6645_v0, %s6301_s23 }
 0x224   :  { %516 = vrot.lane.b32.xlu1 %v6647_v38, %s6301_s23 }
 0x226   :  { %510 = vrot.lane.b32.xlu0 %v6651_v40, %s6301_s23 }
 0x228   :  { %514 = vrot.lane.b32.xlu1 %v6655_v42, %s6301_s23 }
 0x22a   :  { %506 = vrot.lane.b32.xlu0 %v6659_v10, %s6301_s23 }
 0x22c   :  { %512 = vrot.lane.b32.xlu1 %v6663_v36, %s6301_s23 }
 0x22e   :  { %832 = vrot.lane.b32.xlu0 %v6645_v0, %s6302_s24 }
 0x230   :  { %508 = vrot.lane.b32.xlu1 %v6669_v50, %s6301_s23 }
 0x232   :  { %828 = vrot.lane.b32.xlu0 %v6655_v42, %s6302_s24 }
 0x234   :  { %504 = vrot.lane.b32.xlu1 %v6641_v45, %s6301_s23 }
 0x236   :  { %826 = vrot.lane.b32.xlu0 %v6663_v36, %s6302_s24 }
 0x238   :  { %822 = vrot.lane.b32.xlu1 %v6669_v50, %s6302_s24 }
 0x23a   :  { %824 = vrot.lane.b32.xlu0 %v6651_v40, %s6302_s24 }
 0x23c   :  { %830 = vrot.lane.b32.xlu1 %v6647_v38, %s6302_s24 }
 0x240   :  { %818 = vrot.lane.b32.xlu1 %v6641_v45, %s6302_s24 }
 0x294   :  { %v519_v51 = vpop.permute.xlu0 %518 }
 0x295   :  { %5771 = vmatprep.subr.msk.bf16.mxu1 %vm520_vm1, %v519_v51  ;;  %v567_v11 = vsel %vm520_vm1, %v519_v51, 0  ;;  %v488_v51 = vld [vmem:[%s8995_s5 + $0x40] sm:$0xff] }
 0x296   :  { %5336 = vmatpush3.bf16.xpose.msra.mxu1 %v567_v11  ;;  %v517_v52 = vpop.permute.xlu1 %516 }
 0x297   :  { %5772 = vmatprep.subr.msk.bf16.mxu1 %vm520_vm1, %v517_v52  ;;  %v564_v53 = vsel %vm520_vm1, %v517_v52, 0 }
 0x298   :  { %v511_v23 = vpop.permute.xlu0 %510 }
 0x299   :  { %v555_v62 = vsel %vm520_vm1, %v511_v23, 0 }
 0x29a   :  { %v515_v28 = vpop.permute.xlu1 %514 }
 0x29b   :  { %v561_v58 = vsel %vm520_vm1, %v515_v28, 0 }
 0x29c   :  { %v507_v29 = vpop.permute.xlu0 %506 }
 0x29d   :  { %v549_v47 = vsel %vm520_vm1, %v507_v29, 0 }
 0x29e   :  { %5338 = vmatpush3.bf16.xpose.msra.mxu1 %v564_v53  ;;  %v513_v56 = vpop.permute.xlu1 %512  ;;  %v492_v53 = vld [vmem:[%s8995_s5 + $0x60] sm:$0xff] }
 0x29f   :  { %5773 = vmatprep.subr.msk.bf16.mxu1 %vm520_vm1, %v515_v28  ;;  %v558_v60 = vsel %vm520_vm1, %v513_v56, 0 }
 0x2a0   :  { %v833_v57 = vpop.permute.xlu0 %832 }
 0x2a1   :  { %5367 = vmatprep.subr.bf16.mxu0 %v833_v57 }
 0x2a2   :  { %5368 = vmatpush3.bf16.msra.mxu0 %v833_v57  ;;  %v509_v17 = vpop.permute.xlu1 %508 }
 0x2a3   :  { %v552_v21 = vsel %vm520_vm1, %v509_v17, 0 }
 0x2a4   :  { %v829_v44 = vpop.permute.xlu0 %828 }
 0x2a6   :  { %5340 = vmatpush3.bf16.xpose.msra.mxu1 %v561_v58  ;;  %v505_v59 = vpop.permute.xlu1 %504 }
 0x2a7   :  { %5774 = vmatprep.subr.msk.bf16.mxu1 %vm520_vm1, %v513_v56  ;;  %v546_v2 = vsel %vm520_vm1, %v505_v59, 0  ;;  %v495_v56 = vld [vmem:[%s8995_s5 + $0x78] sm:$0xff] }
 0x2a8   :  { %v827_v37 = vpop.permute.xlu0 %826 }
 0x2aa   :  { %v823_v35 = vpop.permute.xlu1 %822 }
 0x2ac   :  { %v825_v63 = vpop.permute.xlu0 %824 }
 0x2ae   :  { %5342 = vmatpush3.bf16.xpose.msra.mxu1 %v558_v60  ;;  %v831_v61 = vpop.permute.xlu1 %830 }
 0x2af   :  { %5775 = vmatprep.subr.msk.bf16.mxu1 %vm520_vm1, %v511_v23  ;;  %5369 = vmatprep.subr.bf16.mxu0 %v831_v61  ;;  %v494_v23 = vld [vmem:[%s8995_s5 + $0x70] sm:$0xff] }
 0x2b0   :  { %5370 = vmatpush3.bf16.msra.mxu0 %v831_v61 }
 0x2b1   :  { %5371 = vmatprep.subr.bf16.mxu0 %v829_v44 }
 0x2b4   :  { %5372 = vmatpush3.bf16.msra.mxu0 %v829_v44 }
 0x2b5   :  { %5373 = vmatprep.subr.bf16.mxu0 %v827_v37 }
 0x2b6   :  { %5344 = vmatpush3.bf16.xpose.msra.mxu1 %v555_v62 }
 0x2b7   :  { %5776 = vmatprep.subr.msk.bf16.mxu1 %vm520_vm1, %v509_v17 }
 0x2b8   :  { %5374 = vmatpush3.bf16.msra.mxu0 %v827_v37  ;;  %v819_v37 = vpop.permute.xlu1 %818 }
 0x2b9   :  { %5375 = vmatprep.subr.bf16.mxu0 %v825_v63 }
 0x2bc   :  { %5376 = vmatpush3.bf16.msra.mxu0 %v825_v63 }
 0x2bd   :  { %5377 = vmatprep.subr.bf16.mxu0 %v823_v35 }
 0x2be   :  { %5346 = vmatpush3.bf16.xpose.msra.mxu1 %v552_v21 }
 0x2bf   :  { %5777 = vmatprep.subr.msk.bf16.mxu1 %vm520_vm1, %v507_v29 }
 0x2c0   :  { %5378 = vmatpush3.bf16.msra.mxu0 %v823_v35  ;;  %v493_v35 = vld [vmem:[%s8995_s5 + $0x68] sm:$0xff] }
 0x2c6   :  { %5348 = vmatpush3.bf16.xpose.msra.mxu1 %v549_v47 }
 0x2c7   :  { %5778 = vmatprep.subr.msk.bf16.mxu1 %vm520_vm1, %v505_v59 }
 0x2ce   :  { %5350 = vmatpush3.bf16.xpose.msra.mxu1 %v546_v2 }
 0x2d5   :  { %5352 = vmatmul.mubr.msk.bf16.vlgmr.msra.gmra.mxu1 %vm520_vm1, %v6659_v10 }
 0x2d6   :  { %5355 = vmatprep.mubr.msk.bf16.mxu1 %vm520_vm1, %v6669_v50 }
 0x2dd   :  { %5356 = vmatmul.mubr.msk.bf16.gmra.mxu1 %vm520_vm1, %v6651_v40 }
 0x2de   :  { %5359 = vmatprep.mubr.msk.bf16.mxu1 %vm520_vm1, %v6663_v36 }
 0x2e5   :  { %5360 = vmatmul.mubr.msk.bf16.gmra.mxu1 %vm520_vm1, %v6655_v42 }
 0x2e6   :  { %5363 = vmatprep.mubr.msk.bf16.mxu1 %vm520_vm1, %v6647_v38 }
 0x2ed   :  { %5364 = vmatmul.mubr.msk.bf16.gmra.mxu1 %vm520_vm1, %v6645_v0 }
 0x395   :  { %v5353_v4 = vpop.f32.mrf.mxu1 }
 0x396   :  { %v6722_v5 = vadd.f32 %v5353_v4, %v482_v3 }
 0x397   :  { %v603_v6 = vpop.f32.mrf.mxu1 }
 0x398   :  { %670 = vmax.xlane.f32.xlu0 %v6722_v5  ;;  %v6731_v9 = vadd.f32 %v603_v6, %v480_v25 }
 0x399   :  { %v5354_v7 = vpop.f32.mrf.mxu1 }
 0x39a   :  { %v6739_v13 = vadd.f32 %v5354_v7, %v483_v32 }
 0x39b   :  { %v606_v12 = vpop.f32.mrf.mxu1 }
 0x39c   :  { %666 = vmax.xlane.f32.xlu0 %v6731_v9  ;;  %v6737_v24 = vadd.f32 %v606_v12, %v481_v8 }
 0x39d   :  { %v5357_v54 = vpop.f32.mrf.mxu1 }
 0x39e   :  { %668 = vmax.xlane.f32.xlu1 %v6737_v24  ;;  %v6776_v41 = vadd.f32 %v5357_v54, %v486_v1 }
 0x39f   :  { %v619_v14 = vpop.f32.mrf.mxu1 }
 0x3a0   :  { %672 = vmax.xlane.f32.xlu0 %v6739_v13  ;;  %v6782_v46 = vadd.f32 %v619_v14, %v484_v43 }
 0x3a1   :  { %v5358_v18 = vpop.f32.mrf.mxu1 }
 0x3a2   :  { %v6746_v19 = vadd.f32 %v5358_v18, %v487_v15 }
 0x3a3   :  { %v622_v22 = vpop.f32.mrf.mxu1 }
 0x3a4   :  { %680 = vmax.xlane.f32.xlu1 %v6746_v19  ;;  %v6752_v27 = vadd.f32 %v622_v22, %v485_v16 }
 0x3a5   :  { %v5361_v26 = vpop.f32.mrf.mxu1 }
 0x3a6   :  { %v6788_v49 = vadd.f32 %v5361_v26, %v490_v48 }
 0x3a7   :  { %v635_v55 = vpop.f32.mrf.mxu1 }
 0x3a8   :  { %676 = vmax.xlane.f32.xlu1 %v6752_v27  ;;  %v6794_v52 = vadd.f32 %v635_v55, %v488_v51 }
 0x3a9   :  { %v5362_v31 = vpop.f32.mrf.mxu1 }
 0x3aa   :  { %v6758_v33 = vadd.f32 %v5362_v31, %v491_v30 }
 0x3ab   :  { %v638_v34 = vpop.f32.mrf.mxu1 }
 0x3ac   :  { %688 = vmax.xlane.f32.xlu1 %v6758_v33  ;;  %v6764_v39 = vadd.f32 %v638_v34, %v489_v20 }
 0x3ad   :  { %v5365_v11 = vpop.f32.mrf.mxu1 }
 0x3ae   :  { %v6800_v29 = vadd.f32 %v5365_v11, %v494_v23 }
 0x3af   :  { %v651_v28 = vpop.f32.mrf.mxu1 }
 0x3b0   :  { %684 = vmax.xlane.f32.xlu1 %v6764_v39  ;;  %v6809_v17 = vadd.f32 %v651_v28, %v492_v53 }
 0x3b1   :  { %v5366_v57 = vpop.f32.mrf.mxu1 }
 0x3b2   :  { %v6811_v58 = vadd.f32 %v5366_v57, %v495_v56 }
 0x3b3   :  { %v654_v59 = vpop.f32.mrf.mxu1 }
 0x3b4   :  { %v6818_v44 = vadd.f32 %v654_v59, %v493_v35 }
 0x3b6   :  { %820 = vrot.lane.b32.xlu0 %v6659_v10, %s6302_s24 }
 0x3c1   :  { %1000 = vrot.lane.b32.xlu1 %v6647_v38, %s6303_s27 }
 0x3c5   :  { %996 = vrot.lane.b32.xlu1 %v6663_v36, %s6303_s27 }
 0x3d5   :  { %678 = vmax.xlane.f32.xlu0 %v6776_v41 }
 0x3d9   :  { %674 = vmax.xlane.f32.xlu0 %v6782_v46 }
 0x3dd   :  { %686 = vmax.xlane.f32.xlu0 %v6788_v49 }
 0x3e1   :  { %682 = vmax.xlane.f32.xlu0 %v6794_v52 }
 0x3e5   :  { %694 = vmax.xlane.f32.xlu0 %v6800_v29 }
 0x3e9   :  { %696 = vmax.xlane.f32.xlu1 %v6811_v58  ;;  %690 = vmax.xlane.f32.xlu0 %v6809_v17 }
 0x3ed   :  { %692 = vmax.xlane.f32.xlu1 %v6818_v44 }
 0x3ff   :  { %1002 = vrot.lane.b32.xlu0 %v6645_v0, %s6303_s27 }
 0x403   :  { %998 = vrot.lane.b32.xlu0 %v6655_v42, %s6303_s27 }
 0x407   :  { %994 = vrot.lane.b32.xlu0 %v6651_v40, %s6303_s27 }
 0x421   :  { %v671_v60 = vpop.xlane.xlu0 %670 }
 0x422   :  { %v700_v61 = vsub.f32 %v6722_v5, %v671_v60 }
 0x424   :  { %v718_v62 = vmul.f32 1.442695, %v700_v61 }
 0x425   :  { %v667_v63 = vpop.xlane.xlu0 %666 }
 0x426   :  { %5869 = vpow2.f32 %v718_v62  ;;  %v698_v21 = vsub.f32 %v6731_v9, %v667_v63 }
 0x427   :  { %v669_v47 = vpop.xlane.xlu1 %668 }
 0x428   :  { %v714_v2 = vmul.f32 1.442695, %v698_v21  ;;  %v699_v4 = vsub.f32 %v6737_v24, %v669_v47 }
 0x429   :  { %v673_v3 = vpop.xlane.xlu0 %672 }
 0x42a   :  { %5871 = vpow2.f32 %v714_v2  ;;  %v701_v6 = vsub.f32 %v6739_v13, %v673_v3  ;;  %v716_v8 = vmul.f32 1.442695, %v699_v4 }
 0x42c   :  { %v720_v25 = vmul.f32 1.442695, %v701_v6 }
 0x42d   :  { %v821_v7 = vpop.permute.xlu0 %820  ;;  %v681_v24 = vpop.xlane.xlu1 %680 }
 0x42e   :  { %5873 = vpow2.f32 %v720_v25  ;;  %5379 = vmatprep.subr.bf16.mxu0 %v821_v7  ;;  %v705_v16 = vsub.f32 %v6746_v19, %v681_v24 }
 0x42f   :  { %5380 = vmatpush3.bf16.msra.mxu0 %v821_v7  ;;  %5875 = vpow2.f32 %v716_v8 }
 0x430   :  { %5381 = vmatprep.subr.bf16.mxu0 %v819_v37  ;;  %v728_v20 = vmul.f32 1.442695, %v705_v16 }
 0x431   :  { %v677_v54 = vpop.xlane.xlu1 %676 }
 0x432   :  { %v703_v14 = vsub.f32 %v6752_v27, %v677_v54 }
 0x433   :  { %v6831_v5 = vpop.eup %5869  ;;  %5382 = vmatpush3.bf16.msra.mxu0 %v819_v37 }
 0x434   :  { %750 = vadd.xlane.f32.xlu1 %v6831_v5  ;;  %v724_v26 = vmul.f32 1.442695, %v703_v14 }
 0x435   :  { %v689_v13 = vpop.xlane.xlu1 %688 }
 0x437   :  { %v6834_v9 = vpop.eup %5871 }
 0x438   :  { %746 = vadd.xlane.f32.xlu1 %v6834_v9 }
 0x439   :  { %v685_v55 = vpop.xlane.xlu1 %684 }
 0x43b   :  { %v6837_v32 = vpop.eup %5873 }
 0x43c   :  { %752 = vadd.xlane.f32.xlu1 %v6837_v32  ;;  %v6840_v12 = vpop.eup %5875 }
 0x43d   :  { %v6850_v27 = vpop.permute.xlu1 %1000 }
 0x440   :  { %748 = vadd.xlane.f32.xlu1 %v6840_v12 }
 0x441   :  { %v6855_v28 = vpop.permute.xlu1 %996 }
 0x451   :  { %992 = vrot.lane.b32.xlu1 %v6669_v50, %s6303_s27 }
 0x45e   :  { %v679_v15 = vpop.xlane.xlu0 %678 }
 0x45f   :  { %v704_v18 = vsub.f32 %v6776_v41, %v679_v15  ;;  %v709_v41 = vsub.f32 %v6758_v33, %v689_v13 }
 0x461   :  { %v726_v22 = vmul.f32 1.442695, %v704_v18  ;;  %v736_v23 = vmul.f32 1.442695, %v709_v41 }
 0x462   :  { %v675_v30 = vpop.xlane.xlu0 %674 }
 0x463   :  { %5877 = vpow2.f32 %v726_v22  ;;  %v702_v31 = vsub.f32 %v6782_v46, %v675_v30  ;;  %v707_v46 = vsub.f32 %v6764_v39, %v685_v55 }
 0x464   :  { %5879 = vpow2.f32 %v724_v26 }
 0x465   :  { %v722_v34 = vmul.f32 1.442695, %v702_v31  ;;  %v732_v33 = vmul.f32 1.442695, %v707_v46  ;;  %v1047_v31 = vsel %vm520_vm1, %v6850_v27, 0 }
 0x466   :  { %v687_v1 = vpop.xlane.xlu0 %686 }
 0x467   :  { %5881 = vpow2.f32 %v722_v34  ;;  %v708_v43 = vsub.f32 %v6788_v49, %v687_v1 }
 0x468   :  { %5883 = vpow2.f32 %v728_v20 }
 0x469   :  { %v734_v48 = vmul.f32 1.442695, %v708_v43 }
 0x46a   :  { %v683_v19 = vpop.xlane.xlu0 %682 }
 0x46b   :  { %5885 = vpow2.f32 %v734_v48  ;;  %v706_v51 = vsub.f32 %v6794_v52, %v683_v19 }
 0x46d   :  { %v730_v11 = vmul.f32 1.442695, %v706_v51 }
 0x46e   :  { %v695_v53 = vpop.xlane.xlu0 %694 }
 0x46f   :  { %5887 = vpow2.f32 %v730_v11  ;;  %v712_v49 = vsub.f32 %v6800_v29, %v695_v53 }
 0x470   :  { %v6858_v56 = vpop.eup %5877  ;;  %5889 = vpow2.f32 %v736_v23 }
 0x471   :  { %v742_v57 = vmul.f32 1.442695, %v712_v49  ;;  %758 = vadd.xlane.f32.xlu0 %v6858_v56  ;;  %v6861_v52 = vpop.eup %5879 }
 0x472   :  { %v691_v59 = vpop.xlane.xlu0 %690  ;;  %v697_v35 = vpop.xlane.xlu1 %696 }
 0x473   :  { %5891 = vpow2.f32 %v742_v57  ;;  %v710_v39 = vsub.f32 %v6809_v17, %v691_v59  ;;  %v713_v60 = vsub.f32 %v6811_v58, %v697_v35 }
 0x474   :  { %v6865_v61 = vpop.eup %5881  ;;  %5893 = vpow2.f32 %v732_v33 }
 0x475   :  { %v738_v37 = vmul.f32 1.442695, %v710_v39  ;;  %754 = vadd.xlane.f32.xlu0 %v6865_v61  ;;  %756 = vadd.xlane.f32.xlu1 %v6861_v52  ;;  %v744_v29 = vmul.f32 1.442695, %v713_v60  ;;  %v6869_v21 = vpop.eup %5883 }
 0x476   :  { %v1003_v62 = vpop.permute.xlu0 %1002  ;;  %v693_v63 = vpop.xlane.xlu1 %692 }
 0x477   :  { %5895 = vpow2.f32 %v738_v37  ;;  %v711_v47 = vsub.f32 %v6818_v44, %v693_v63  ;;  %5779 = vmatprep.subr.msk.bf16.mxu0 %vm520_vm1, %v1003_v62  ;;  %v1050_v30 = vsel %vm520_vm1, %v1003_v62, 0 }
 0x478   :  { %v6873_v17 = vpop.eup %5885  ;;  %5897 = vpow2.f32 %v744_v29 }
 0x479   :  { %v740_v58 = vmul.f32 1.442695, %v711_v47  ;;  %760 = vadd.xlane.f32.xlu0 %v6869_v21  ;;  %766 = vadd.xlane.f32.xlu1 %v6873_v17 }
 0x47b   :  { %5899 = vpow2.f32 %v740_v58 }
 0x47c   :  { %v6877_v2 = vpop.eup %5887 }
 0x47d   :  { %762 = vadd.xlane.f32.xlu1 %v6877_v2  ;;  %v6880_v3 = vpop.eup %5889 }
 0x480   :  { %v6882_v4 = vpop.eup %5891 }
 0x481   :  { %774 = vadd.xlane.f32.xlu0 %v6882_v4  ;;  %768 = vadd.xlane.f32.xlu1 %v6880_v3  ;;  %v6886_v44 = vpop.eup %5893 }
 0x484   :  { %v6888_v6 = vpop.eup %5895 }
 0x485   :  { %770 = vadd.xlane.f32.xlu0 %v6888_v6  ;;  %764 = vadd.xlane.f32.xlu1 %v6886_v44  ;;  %v6892_v25 = vpop.eup %5897 }
 0x488   :  { %v6894_v7 = vpop.eup %5899 }
 0x489   :  { %776 = vadd.xlane.f32.xlu0 %v6892_v25  ;;  %772 = vadd.xlane.f32.xlu1 %v6894_v7 }
 0x49a   :  { %988 = vrot.lane.b32.xlu1 %v6641_v45, %s6303_s27 }
 0x49e   :  { %974 = vrot.lane.b32.xlu1 %v6659_v10, %s6304_s15 }
 0x49f   :  { %990 = vrot.lane.b32.xlu0 %v6659_v10, %s6303_s27 }
 0x4a2   :  { %978 = vrot.lane.b32.xlu1 %v6651_v40, %s6304_s15 }
 0x4a3   :  { %972 = vrot.lane.b32.xlu0 %v6641_v45, %s6304_s15 }
 0x4a6   :  { %982 = vrot.lane.b32.xlu1 %v6655_v42, %s6304_s15 }
 0x4a7   :  { %976 = vrot.lane.b32.xlu0 %v6669_v50, %s6304_s15 }
 0x4aa   :  { %986 = vrot.lane.b32.xlu1 %v6645_v0, %s6304_s15 }
 0x4ab   :  { %980 = vrot.lane.b32.xlu0 %v6663_v36, %s6304_s15 }
 0x4ae   :  { %1313 = vrot.lane.b32.xlu1 %v6647_v38, %s6305_s16 }
 0x4af   :  { %984 = vrot.lane.b32.xlu0 %v6647_v38, %s6304_s15 }
 0x4b3   :  { %1315 = vrot.lane.b32.xlu0 %v6645_v0, %s6305_s16 }
 0x4b7   :  { %1311 = vrot.lane.b32.xlu0 %v6655_v42, %s6305_s16 }
 0x4bd   :  { %v751_v8 = vpop.xlane.xlu1 %750 }
 0x4c1   :  { %v747_v24 = vpop.xlane.xlu1 %746 }
 0x4c5   :  { %v753_v54 = vpop.xlane.xlu1 %752 }
 0x4c6   :  { %5901 = vrcp.f32 %v753_v54 }
 0x4c7   :  { %5903 = vrcp.f32 %v747_v24 }
 0x4c8   :  { %5905 = vrcp.f32 %v751_v8 }
 0x4c9   :  { %v749_v13 = vpop.xlane.xlu1 %748 }
 0x4ca   :  { %5907 = vrcp.f32 %v749_v13 }
 0x4cd   :  { %v993_v34 = vpop.permute.xlu1 %992 }
 0x4ce   :  { %v1035_v19 = vsel %vm520_vm1, %v993_v34, 0 }
 0x4d3   :  { %v5902_v14 = vpop.eup %5901 }
 0x4d4   :  { %v5904_v15 = vpop.eup %5903  ;;  %v797_v38 = vmul.f32 %v5902_v14, %v6837_v32  ;;  %v999_v32 = vpop.permute.xlu0 %998 }
 0x4d5   :  { %v5906_v18 = vpop.eup %5905  ;;  %v794_v16 = vmul.f32 %v5904_v15, %v6834_v9  ;;  %v1044_v9 = vsel %vm520_vm1, %v999_v32, 0 }
 0x4d6   :  { %v796_v42 = vmul.f32 %v5906_v18, %v6831_v5  ;;  %v1041_v5 = vsel %vm520_vm1, %v6855_v28, 0 }
 0x4d7   :  { %v5908_v22 = vpop.eup %5907 }
 0x4d8   :  { %v795_v0 = vmul.f32 %v5908_v22, %v6840_v12  ;;  %v811_v55 = vpack.c.bf16 %v797_v38, %v796_v42  ;;  %v995_v12 = vpop.permute.xlu0 %994 }
 0x4d9   :  { %v1038_v1 = vsel %vm520_vm1, %v995_v12, 0 }
 0x4da   :  { %v810_v26 = vpack.c.bf16 %v795_v0, %v794_v16 }
 0x4dc   :  { %5383 = vmatprep.mubr.bf16.mxu0 %v810_v26 }
 0x4dd   :  { %5384 = vmatmul.mubr.bf16.vlgmr.msra.gmra.mxu0 %v811_v55 }
 0x4de   :  { %5400 = vmatpush3.bf16.xpose.msra.mxu0 %v1050_v30 }
 0x4df   :  { %5780 = vmatprep.subr.msk.bf16.mxu0 %vm520_vm1, %v6850_v27 }
 0x4e6   :  { %5402 = vmatpush3.bf16.xpose.msra.mxu0 %v1047_v31 }
 0x4e7   :  { %5781 = vmatprep.subr.msk.bf16.mxu0 %vm520_vm1, %v999_v32 }
 0x4ee   :  { %5404 = vmatpush3.bf16.xpose.msra.mxu0 %v1044_v9 }
 0x4ef   :  { %5782 = vmatprep.subr.msk.bf16.mxu0 %vm520_vm1, %v6855_v28 }
 0x4f6   :  { %5406 = vmatpush3.bf16.xpose.msra.mxu0 %v1041_v5 }
 0x4f7   :  { %5783 = vmatprep.subr.msk.bf16.mxu0 %vm520_vm1, %v995_v12 }
 0x4fa   :  { %v759_v20 = vpop.xlane.xlu0 %758 }
 0x4fe   :  { %5408 = vmatpush3.bf16.xpose.msra.mxu0 %v1038_v1  ;;  %v755_v43 = vpop.xlane.xlu0 %754  ;;  %v757_v27 = vpop.xlane.xlu1 %756 }
 0x4ff   :  { %5909 = vrcp.f32 %v755_v43  ;;  %5784 = vmatprep.subr.msk.bf16.mxu0 %vm520_vm1, %v993_v34 }
 0x500   :  { %5911 = vrcp.f32 %v757_v27 }
 0x501   :  { %5913 = vrcp.f32 %v759_v20 }
 0x502   :  { %v761_v48 = vpop.xlane.xlu0 %760  ;;  %v767_v41 = vpop.xlane.xlu1 %766 }
 0x503   :  { %5915 = vrcp.f32 %v761_v48 }
 0x506   :  { %5410 = vmatpush3.bf16.xpose.msra.mxu0 %v1035_v19  ;;  %v763_v51 = vpop.xlane.xlu1 %762 }
 0x50a   :  { %v775_v11 = vpop.xlane.xlu0 %774  ;;  %v769_v23 = vpop.xlane.xlu1 %768 }
 0x50b   :  { %5917 = vrcp.f32 %v769_v23 }
 0x50c   :  { %v5910_v46 = vpop.eup %5909  ;;  %5919 = vrcp.f32 %v763_v51 }
 0x50d   :  { %v5912_v28 = vpop.eup %5911  ;;  %v798_v53 = vmul.f32 %v5910_v46, %v6865_v61  ;;  %5921 = vrcp.f32 %v767_v41 }
 0x50e   :  { %v5914_v49 = vpop.eup %5913  ;;  %v771_v57 = vpop.xlane.xlu0 %770  ;;  %v799_v59 = vmul.f32 %v5912_v28, %v6861_v52 }
 0x50f   :  { %v765_v33 = vpop.xlane.xlu1 %764  ;;  %v800_v60 = vmul.f32 %v5914_v49, %v6858_v56 }
 0x510   :  { %v5916_v35 = vpop.eup %5915  ;;  %5923 = vrcp.f32 %v765_v33  ;;  %v812_v39 = vpack.c.bf16 %v799_v59, %v798_v53  ;;  %v4910_v59 = vld [vmem:[%s8995_s5 + $0x90] sm:$0xff] }
 0x511   :  { %v801_v37 = vmul.f32 %v5916_v35, %v6869_v21  ;;  %5925 = vrcp.f32 %v771_v57 }
 0x512   :  { %5387 = vmatprep.mubr.bf16.mxu0 %v812_v39  ;;  %v777_v29 = vpop.xlane.xlu0 %776 }
 0x513   :  { %v773_v62 = vpop.xlane.xlu1 %772  ;;  %v813_v63 = vpack.c.bf16 %v801_v37, %v800_v60  ;;  %v4908_v37 = vld [vmem:[%s8995_s5 + $0x80] sm:$0xff] }
 0x514   :  { %5927 = vrcp.f32 %v773_v62  ;;  %v4909_v62 = vld [vmem:[%s8995_s5 + $0x88] sm:$0xff] }
 0x515   :  { %5929 = vrcp.f32 %v777_v29  ;;  %5388 = vmatmul.mubr.bf16.gmra.mxu0 %v813_v63 }
 0x516   :  { %v991_v61 = vpop.permute.xlu0 %990  ;;  %5931 = vrcp.f32 %v775_v11 }
 0x517   :  { %v989_v47 = vpop.permute.xlu1 %988  ;;  %5785 = vmatprep.subr.msk.bf16.mxu0 %vm520_vm1, %v991_v61  ;;  %v1032_v52 = vsel %vm520_vm1, %v991_v61, 0  ;;  %v4911_v61 = vld [vmem:[%s8995_s5 + $0x98] sm:$0xff] }
 0x518   :  { %5412 = vmatpush3.bf16.xpose.msra.mxu0 %v1032_v52  ;;  %v5918_v56 = vpop.eup %5917  ;;  %v1029_v16 = vsel %vm520_vm1, %v989_v47, 0 }
 0x519   :  { %5786 = vmatprep.subr.msk.bf16.mxu0 %vm520_vm1, %v989_v47  ;;  %v5920_v8 = vpop.eup %5919  ;;  %v805_v13 = vmul.f32 %v5918_v56, %v6880_v3 }
 0x51a   :  { %v973_v21 = vpop.permute.xlu0 %972  ;;  %v5922_v24 = vpop.eup %5921  ;;  %v802_v18 = vmul.f32 %v5920_v8, %v6877_v2 }
 0x51b   :  { %v975_v58 = vpop.permute.xlu1 %974  ;;  %v804_v0 = vmul.f32 %v5922_v24, %v6873_v17  ;;  %v4915_v24 = vld [vmem:[%s8995_s5 + $0xb8] sm:$0xff] }
 0x51d   :  { %v5924_v54 = vpop.eup %5923  ;;  %v815_v55 = vpack.c.bf16 %v805_v13, %v804_v0 }
 0x51e   :  { %v977_v14 = vpop.permute.xlu0 %976  ;;  %v803_v22 = vmul.f32 %v5924_v54, %v6886_v44  ;;  %v5926_v38 = vpop.eup %5925 }
 0x51f   :  { %v979_v15 = vpop.permute.xlu1 %978  ;;  %v806_v3 = vmul.f32 %v5926_v38, %v6888_v6 }
 0x520   :  { %5414 = vmatpush3.bf16.xpose.msra.mxu0 %v1029_v16  ;;  %v814_v42 = vpack.c.bf16 %v803_v22, %v802_v18  ;;  %v4913_v22 = vld [vmem:[%s8995_s5 + $0xa8] sm:$0xff] }
 0x521   :  { %v5928_v26 = vpop.eup %5927 }
 0x522   :  { %v5930_v30 = vpop.eup %5929  ;;  %5391 = vmatprep.mubr.bf16.mxu0 %v814_v42  ;;  %v981_v31 = vpop.permute.xlu0 %980  ;;  %v807_v9 = vmul.f32 %v5928_v26, %v6894_v7  ;;  %v4918_v42 = vld [vmem:[%s8995_s5 + $0xd0] sm:$0xff] }
 0x523   :  { %v983_v32 = vpop.permute.xlu1 %982  ;;  %5392 = vmatmul.mubr.bf16.gmra.mxu0 %v815_v55  ;;  %v5932_v2 = vpop.eup %5931  ;;  %v809_v5 = vmul.f32 %v5930_v30, %v6892_v25  ;;  %v4919_v55 = vld [vmem:[%s8995_s5 + $0xd8] sm:$0xff] }
 0x524   :  { %v816_v44 = vpack.c.bf16 %v807_v9, %v806_v3  ;;  %v808_v34 = vmul.f32 %v5932_v2, %v6882_v4  ;;  %v4916_v3 = vld [vmem:[%s8995_s5 + $0xc0] sm:$0xff]  ;;  %v4917_v2 = vld [vmem:[%s8995_s5 + $0xc8] sm:$0xff] }
 0x526   :  { %5395 = vmatprep.mubr.bf16.mxu0 %v816_v44  ;;  %v985_v12 = vpop.permute.xlu0 %984  ;;  %v817_v20 = vpack.c.bf16 %v809_v5, %v808_v34 }
 0x527   :  { %v987_v17 = vpop.permute.xlu1 %986 }
 0x52a   :  { %v1316_v1 = vpop.permute.xlu0 %1315 }
 0x52b   :  { %5396 = vmatmul.mubr.bf16.gmra.mxu0 %v817_v20  ;;  %5431 = vmatprep.subr.bf16.mxu0 %v1316_v1  ;;  %v1314_v6 = vpop.permute.xlu1 %1313 }
 0x52c   :  { %5415 = vmatprep.mubr.msk.bf16.mxu0 %vm520_vm1, %v973_v21  ;;  %5755 = vmatprep.subr.bf16.mxu1 %v1316_v1 }
 0x52d   :  { %5763 = vmatpush3.bf16.msra.mxu1 %v1316_v1 }
 0x52e   :  { %5756 = vmatprep.subr.bf16.mxu1 %v1314_v6  ;;  %v1312_v7 = vpop.permute.xlu0 %1311 }
 0x531   :  { %5764 = vmatpush3.bf16.msra.mxu1 %v1314_v6 }
 0x532   :  { %5757 = vmatprep.subr.bf16.mxu1 %v1312_v7 }
 0x533   :  { %5416 = vmatmul.mubr.msk.bf16.vlgmr.msra.gmra.mxu0 %vm520_vm1, %v975_v58  ;;  %v4914_v58 = vld [vmem:[%s8995_s5 + $0xb0] sm:$0xff] }
 0x534   :  { %5432 = vmatpush3.bf16.msra.mxu0 %v1316_v1  ;;  %5419 = vmatprep.mubr.msk.bf16.mxu0 %vm520_vm1, %v977_v14  ;;  %v4920_v1 = vld [vmem:[%s8995_s5 + $0xe0] sm:$0xff] }
 0x535   :  { %5433 = vmatprep.subr.bf16.mxu0 %v1314_v6  ;;  %5765 = vmatpush3.bf16.msra.mxu1 %v1312_v7 }
 0x538   :  { %5434 = vmatpush3.bf16.msra.mxu0 %v1314_v6 }
 0x539   :  { %5435 = vmatprep.subr.bf16.mxu0 %v1312_v7 }
 0x53b   :  { %5420 = vmatmul.mubr.msk.bf16.gmra.mxu0 %vm520_vm1, %v979_v15  ;;  %v4912_v15 = vld [vmem:[%s8995_s5 + $0xa0] sm:$0xff] }
 0x53c   :  { %5436 = vmatpush3.bf16.msra.mxu0 %v1312_v7  ;;  %5423 = vmatprep.mubr.msk.bf16.mxu0 %vm520_vm1, %v981_v31  ;;  %v4923_v7 = vld [vmem:[%s8995_s5 + $0xf8] sm:$0xff] }
 0x543   :  { %5424 = vmatmul.mubr.msk.bf16.gmra.mxu0 %vm520_vm1, %v983_v32 }
 0x544   :  { %5427 = vmatprep.mubr.msk.bf16.mxu0 %vm520_vm1, %v985_v12  ;;  %v4922_v12 = vld [vmem:[%s8995_s5 + $0xf0] sm:$0xff] }
 0x54b   :  { %5428 = vmatmul.mubr.msk.bf16.gmra.mxu0 %vm520_vm1, %v987_v17 }
 0x59d   :  { %v5385_v4 = vpop.f32.mrf.mxu0 }
 0x59e   :  { %941 = vst.msk [vmem:[#allocation2 + $0x10] sm:$0xff] %vm520_vm1, %v5385_v4 }
 0x59f   :  { %v876_v25 = vpop.f32.mrf.mxu0 }
 0x5a0   :  { %939 = vst.msk [vmem:[#allocation2] sm:$0xff] %vm520_vm1, %v876_v25 }
 0x5a1   :  { %v5386_v43 = vpop.f32.mrf.mxu0 }
 0x5a2   :  { %942 = vst.msk [vmem:[#allocation2 + $0x18] sm:$0xff] %vm520_vm1, %v5386_v43 }
 0x5a3   :  { %v879_v27 = vpop.f32.mrf.mxu0 }
 0x5a4   :  { %940 = vst.msk [vmem:[#allocation2 + $0x8] sm:$0xff] %vm520_vm1, %v879_v27  ;;  %v4921_v27 = vld [vmem:[%s8995_s5 + $0xe8] sm:$0xff] }
 0x5d5   :  { %v5389_v48 = vpop.f32.mrf.mxu0 }
 0x5d6   :  { %945 = vst.msk [vmem:[#allocation2 + $0x30] sm:$0xff] %vm520_vm1, %v5389_v48 }
 0x5d7   :  { %v892_v41 = vpop.f32.mrf.mxu0 }
 0x5d8   :  { %943 = vst.msk [vmem:[#allocation2 + $0x20] sm:$0xff] %vm520_vm1, %v892_v41 }
 0x5d9   :  { %v5390_v19 = vpop.f32.mrf.mxu0 }
 0x5da   :  { %946 = vst.msk [vmem:[#allocation2 + $0x38] sm:$0xff] %vm520_vm1, %v5390_v19 }
 0x5db   :  { %v895_v51 = vpop.f32.mrf.mxu0 }
 0x5dc   :  { %944 = vst.msk [vmem:[#allocation2 + $0x28] sm:$0xff] %vm520_vm1, %v895_v51 }
 0x5e3   :  { %v5393_v11 = vpop.f32.mrf.mxu0 }
 0x5e4   :  { %949 = vst.msk [vmem:[#allocation2 + $0x50] sm:$0xff] %vm520_vm1, %v5393_v11 }
 0x5e5   :  { %v908_v23 = vpop.f32.mrf.mxu0 }
 0x5e6   :  { %947 = vst.msk [vmem:[#allocation2 + $0x40] sm:$0xff] %vm520_vm1, %v908_v23 }
 0x5e7   :  { %v5394_v46 = vpop.f32.mrf.mxu0 }
 0x5e8   :  { %950 = vst.msk [vmem:[#allocation2 + $0x58] sm:$0xff] %vm520_vm1, %v5394_v46 }
 0x5e9   :  { %v911_v28 = vpop.f32.mrf.mxu0 }
 0x5ea   :  { %948 = vst.msk [vmem:[#allocation2 + $0x48] sm:$0xff] %vm520_vm1, %v911_v28 }
 0x5eb   :  { %v5397_v53 = vpop.f32.mrf.mxu0 }
 0x5ec   :  { %953 = vst.msk [vmem:[#allocation2 + $0x70] sm:$0xff] %vm520_vm1, %v5397_v53 }
 0x5ed   :  { %v924_v49 = vpop.f32.mrf.mxu0 }
 0x5ee   :  { %951 = vst.msk [vmem:[#allocation2 + $0x60] sm:$0xff] %vm520_vm1, %v924_v49 }
 0x5ef   :  { %v5398_v57 = vpop.f32.mrf.mxu0 }
 0x5f0   :  { %954 = vst.msk [vmem:[#allocation2 + $0x78] sm:$0xff] %vm520_vm1, %v5398_v57 }
 0x5f1   :  { %v927_v33 = vpop.f32.mrf.mxu0 }
 0x5f2   :  { %952 = vst.msk [vmem:[#allocation2 + $0x68] sm:$0xff] %vm520_vm1, %v927_v33 }
 0x5f3   :  { %v5417_v35 = vpop.f32.mrf.mxu0 }
 0x5f4   :  { %v6986_v39 = vadd.f32 %v5417_v35, %v4910_v59 }
 0x5f5   :  { %v1086_v60 = vpop.f32.mrf.mxu0 }
 0x5f6   :  { %1153 = vmax.xlane.f32.xlu0 %v6986_v39  ;;  %v6995_v63 = vadd.f32 %v4908_v37, %v1086_v60 }
 0x5f7   :  { %v5418_v29 = vpop.f32.mrf.mxu0 }
 0x5f8   :  { %v7003_v21 = vadd.f32 %v5418_v29, %v4911_v61 }
 0x5f9   :  { %v1089_v47 = vpop.f32.mrf.mxu0 }
 0x5fa   :  { %v7000_v52 = vadd.f32 %v4909_v62, %v1089_v47  ;;  %1149 = vmax.xlane.f32.xlu0 %v6995_v63 }
 0x5fb   :  { %v5421_v56 = vpop.f32.mrf.mxu0 }
 0x5fc   :  { %1151 = vmax.xlane.f32.xlu1 %v7000_v52  ;;  %v7013_v13 = vadd.f32 %v5421_v56, %v4914_v58 }
 0x5fd   :  { %v1102_v8 = vpop.f32.mrf.mxu0 }
 0x5fe   :  { %1155 = vmax.xlane.f32.xlu0 %v7003_v21  ;;  %v7025_v16 = vadd.f32 %v4912_v15, %v1102_v8 }
 0x5ff   :  { %v5422_v54 = vpop.f32.mrf.mxu0 }
 0x600   :  { %v7015_v14 = vadd.f32 %v5422_v54, %v4915_v24 }
 0x601   :  { %v1105_v18 = vpop.f32.mrf.mxu0 }
 0x602   :  { %1161 = vmax.xlane.f32.xlu0 %v7013_v13  ;;  %1163 = vmax.xlane.f32.xlu1 %v7015_v14  ;;  %v7027_v0 = vadd.f32 %v4913_v22, %v1105_v18 }
 0x603   :  { %v5425_v38 = vpop.f32.mrf.mxu0 }
 0x604   :  { %v7037_v31 = vadd.f32 %v5425_v38, %v4918_v42 }
 0x605   :  { %v1118_v26 = vpop.f32.mrf.mxu0 }
 0x606   :  { %1159 = vmax.xlane.f32.xlu1 %v7027_v0  ;;  %1157 = vmax.xlane.f32.xlu0 %v7025_v16  ;;  %v7049_v44 = vadd.f32 %v4916_v3, %v1118_v26 }
 0x607   :  { %v5426_v30 = vpop.f32.mrf.mxu0 }
 0x608   :  { %v7039_v32 = vadd.f32 %v5426_v30, %v4919_v55 }
 0x609   :  { %v1121_v9 = vpop.f32.mrf.mxu0 }
 0x60a   :  { %1169 = vmax.xlane.f32.xlu0 %v7037_v31  ;;  %1171 = vmax.xlane.f32.xlu1 %v7039_v32  ;;  %v7051_v5 = vadd.f32 %v4917_v2, %v1121_v9 }
 0x60b   :  { %v5429_v17 = vpop.f32.mrf.mxu0 }
 0x60c   :  { %v7058_v34 = vadd.f32 %v5429_v17, %v4922_v12 }
 0x60d   :  { %v1134_v20 = vpop.f32.mrf.mxu0 }
 0x60e   :  { %1167 = vmax.xlane.f32.xlu1 %v7051_v5  ;;  %1165 = vmax.xlane.f32.xlu0 %v7049_v44  ;;  %v7064_v6 = vadd.f32 %v4920_v1, %v1134_v20 }
 0x60f   :  { %v5430_v4 = vpop.f32.mrf.mxu0 }
 0x610   :  { %v7074_v25 = vadd.f32 %v5430_v4, %v4923_v7 }
 0x611   :  { %v1137_v43 = vpop.f32.mrf.mxu0 }
 0x612   :  { %1177 = vmax.xlane.f32.xlu0 %v7058_v34  ;;  %v7080_v48 = vadd.f32 %v4921_v27, %v1137_v43 }
 0x616   :  { %1173 = vmax.xlane.f32.xlu0 %v7064_v6 }
 0x61f   :  { %1307 = vrot.lane.b32.xlu1 %v6651_v40, %s6305_s16 }
 0x62c   :  { %1309 = vrot.lane.b32.xlu0 %v6663_v36, %s6305_s16 }
 0x643   :  { %1179 = vmax.xlane.f32.xlu1 %v7074_v25 }
 0x647   :  { %1175 = vmax.xlane.f32.xlu1 %v7080_v48 }
 0x658   :  { %1305 = vrot.lane.b32.xlu1 %v6669_v50, %s6305_s16 }
 0x67f   :  { %v1154_v40 = vpop.xlane.xlu0 %1153 }
 0x680   :  { %v1183_v36 = vsub.f32 %v6986_v39, %v1154_v40 }
 0x682   :  { %v1201_v41 = vmul.f32 1.442695, %v1183_v36 }
 0x683   :  { %v1150_v19 = vpop.xlane.xlu0 %1149 }
 0x684   :  { %5933 = vpow2.f32 %v1201_v41  ;;  %v1181_v51 = vsub.f32 %v6995_v63, %v1150_v19 }
 0x685   :  { %v1152_v11 = vpop.xlane.xlu1 %1151 }
 0x686   :  { %v1197_v23 = vmul.f32 1.442695, %v1181_v51  ;;  %v1182_v46 = vsub.f32 %v7000_v52, %v1152_v11 }
 0x687   :  { %v1156_v28 = vpop.xlane.xlu0 %1155 }
 0x688   :  { %5935 = vpow2.f32 %v1197_v23  ;;  %v1184_v53 = vsub.f32 %v7003_v21, %v1156_v28  ;;  %v1199_v57 = vmul.f32 1.442695, %v1182_v46 }
 0x68a   :  { %v1203_v49 = vmul.f32 1.442695, %v1184_v53 }
 0x68b   :  { %v1162_v33 = vpop.xlane.xlu0 %1161  ;;  %v1164_v50 = vpop.xlane.xlu1 %1163 }
 0x68c   :  { %5937 = vpow2.f32 %v1203_v49  ;;  %v1187_v59 = vsub.f32 %v7013_v13, %v1162_v33  ;;  %v1188_v37 = vsub.f32 %v7015_v14, %v1164_v50 }
 0x68d   :  { %5939 = vpow2.f32 %v1199_v57 }
 0x68e   :  { %v1209_v35 = vmul.f32 1.442695, %v1187_v59  ;;  %v1211_v21 = vmul.f32 1.442695, %v1188_v37 }
 0x68f   :  { %v1158_v39 = vpop.xlane.xlu0 %1157  ;;  %v1160_v60 = vpop.xlane.xlu1 %1159 }
 0x690   :  { %5941 = vpow2.f32 %v1209_v35  ;;  %v1185_v29 = vsub.f32 %v7025_v16, %v1158_v39  ;;  %v1186_v62 = vsub.f32 %v7027_v0, %v1160_v60 }
 0x691   :  { %v7093_v63 = vpop.eup %5933 }
 0x692   :  { %v1205_v61 = vmul.f32 1.442695, %v1185_v29  ;;  %v1207_v47 = vmul.f32 1.442695, %v1186_v62  ;;  %1233 = vadd.xlane.f32.xlu1 %v7093_v63 }
 0x693   :  { %v1170_v52 = vpop.xlane.xlu0 %1169  ;;  %v1172_v56 = vpop.xlane.xlu1 %1171 }
 0x694   :  { %5943 = vpow2.f32 %v1205_v61  ;;  %v1191_v58 = vsub.f32 %v7037_v31, %v1170_v52  ;;  %v1192_v54 = vsub.f32 %v7039_v32, %v1172_v56 }
 0x695   :  { %v7097_v8 = vpop.eup %5935  ;;  %5945 = vpow2.f32 %v1207_v47 }
 0x696   :  { %1229 = vadd.xlane.f32.xlu1 %v7097_v8  ;;  %v1217_v24 = vmul.f32 1.442695, %v1191_v58  ;;  %5947 = vpow2.f32 %v1211_v21  ;;  %v1219_v38 = vmul.f32 1.442695, %v1192_v54 }
 0x697   :  { %v1166_v13 = vpop.xlane.xlu0 %1165  ;;  %v1168_v15 = vpop.xlane.xlu1 %1167 }
 0x698   :  { %v1189_v14 = vsub.f32 %v7049_v44, %v1166_v13  ;;  %5949 = vpow2.f32 %v1217_v24  ;;  %v1190_v16 = vsub.f32 %v7051_v5, %v1168_v15 }
 0x699   :  { %v7102_v18 = vpop.eup %5937 }
 0x69a   :  { %v1213_v22 = vmul.f32 1.442695, %v1189_v14  ;;  %1235 = vadd.xlane.f32.xlu1 %v7102_v18  ;;  %v7106_v42 = vpop.eup %5939  ;;  %v1215_v31 = vmul.f32 1.442695, %v1190_v16 }
 0x69b   :  { %v1178_v0 = vpop.xlane.xlu0 %1177  ;;  %v1308_v17 = vpop.permute.xlu1 %1307 }
 0x69c   :  { %5951 = vpow2.f32 %v1213_v22  ;;  %v1195_v26 = vsub.f32 %v7058_v34, %v1178_v0 }
 0x69d   :  { %v7109_v55 = vpop.eup %5941  ;;  %5953 = vpow2.f32 %v1219_v38 }
 0x69e   :  { %v1225_v30 = vmul.f32 1.442695, %v1195_v26  ;;  %1241 = vadd.xlane.f32.xlu0 %v7109_v55  ;;  %1231 = vadd.xlane.f32.xlu1 %v7106_v42 }
 0x69f   :  { %v1174_v32 = vpop.xlane.xlu0 %1173 }
 0x6a0   :  { %5955 = vpow2.f32 %v1225_v30  ;;  %v1193_v3 = vsub.f32 %v7064_v6, %v1174_v32 }
 0x6a1   :  { %v7114_v9 = vpop.eup %5943  ;;  %5957 = vpow2.f32 %v1215_v31 }
 0x6a2   :  { %v7116_v2 = vpop.eup %5945  ;;  %v1221_v44 = vmul.f32 1.442695, %v1193_v3  ;;  %1237 = vadd.xlane.f32.xlu0 %v7114_v9 }
 0x6a3   :  { %1239 = vadd.xlane.f32.xlu1 %v7116_v2  ;;  %v1310_v5 = vpop.permute.xlu0 %1309  ;;  %v7120_v12 = vpop.eup %5947 }
 0x6a4   :  { %5959 = vpow2.f32 %v1221_v44  ;;  %5437 = vmatprep.subr.bf16.mxu0 %v1310_v5  ;;  %5758 = vmatprep.subr.bf16.mxu1 %v1310_v5 }
 0x6a5   :  { %5438 = vmatpush3.bf16.msra.mxu0 %v1310_v5  ;;  %5766 = vmatpush3.bf16.msra.mxu1 %v1310_v5  ;;  %v7123_v34 = vpop.eup %5949 }
 0x6a6   :  { %1243 = vadd.xlane.f32.xlu0 %v7120_v12  ;;  %5439 = vmatprep.subr.bf16.mxu0 %v1308_v17 }
 0x6a7   :  { %5759 = vmatprep.subr.bf16.mxu1 %v1308_v17 }
 0x6a9   :  { %v7125_v20 = vpop.eup %5951  ;;  %5440 = vmatpush3.bf16.msra.mxu0 %v1308_v17  ;;  %5767 = vmatpush3.bf16.msra.mxu1 %v1308_v17 }
 0x6aa   :  { %1249 = vadd.xlane.f32.xlu0 %v7123_v34  ;;  %1245 = vadd.xlane.f32.xlu1 %v7125_v20  ;;  %v7129_v1 = vpop.eup %5953 }
 0x6ad   :  { %v7131_v6 = vpop.eup %5955 }
 0x6ae   :  { %1257 = vadd.xlane.f32.xlu1 %v7131_v6  ;;  %1251 = vadd.xlane.f32.xlu0 %v7129_v1  ;;  %v7135_v7 = vpop.eup %5957 }
 0x6b1   :  { %v7137_v4 = vpop.eup %5959 }
 0x6b2   :  { %1253 = vadd.xlane.f32.xlu1 %v7137_v4  ;;  %1247 = vadd.xlane.f32.xlu0 %v7135_v7 }
 0x6c3   :  { %1301 = vrot.lane.b32.xlu1 %v6641_v45, %s6305_s16 }
 0x6c8   :  { %1303 = vrot.lane.b32.xlu0 %v6659_v10, %s6305_s16 }
 0x6cc   :  { %v1180_v43 = vpop.xlane.xlu1 %1179 }
 0x6cd   :  { %v1196_v41 = vsub.f32 %v7074_v25, %v1180_v43 }
 0x6cf   :  { %v1227_v51 = vmul.f32 1.442695, %v1196_v41 }
 0x6d0   :  { %v1176_v27 = vpop.xlane.xlu1 %1175 }
 0x6d1   :  { %v1194_v40 = vsub.f32 %v7080_v48, %v1176_v27 }
 0x6d3   :  { %v1223_v19 = vmul.f32 1.442695, %v1194_v40 }
 0x6d4   :  { %v1306_v36 = vpop.permute.xlu1 %1305 }
 0x6d5   :  { %5441 = vmatprep.subr.bf16.mxu0 %v1306_v36  ;;  %5760 = vmatprep.subr.bf16.mxu1 %v1306_v36  ;;  %5961 = vpow2.f32 %v1223_v19  ;;  %v5811_v19 = vld [vmem:[%s8996_s6 + $0x8] sm:$0xff]  }
 0x6d6   :  { %5442 = vmatpush3.bf16.msra.mxu0 %v1306_v36  ;;  %5768 = vmatpush3.bf16.msra.mxu1 %v1306_v36  ;;  %5963 = vpow2.f32 %v1227_v51 }
 0x6e2   :  { %v7147_v11 = vpop.eup %5961 }
 0x6e3   :  { %v7150_v45 = vpop.eup %5963 }
 0x6e7   :  { %1255 = vadd.xlane.f32.xlu0 %v7147_v11 }
 0x6eb   :  { %1259 = vadd.xlane.f32.xlu0 %v7150_v45 }
 0x71b   :  { %v1234_v10 = vpop.xlane.xlu1 %1233 }
 0x71f   :  { %v1230_v48 = vpop.xlane.xlu1 %1229 }
 0x720   :  { %5965 = vrcp.f32 %v1230_v48 }
 0x723   :  { %v1236_v23 = vpop.xlane.xlu1 %1235 }
 0x727   :  { %v1242_v25 = vpop.xlane.xlu0 %1241  ;;  %v1232_v46 = vpop.xlane.xlu1 %1231 }
 0x728   :  { %5967 = vrcp.f32 %v1232_v46 }
 0x72b   :  { %v1238_v28 = vpop.xlane.xlu0 %1237 }
 0x72c   :  { %5969 = vrcp.f32 %v1238_v28  ;;  %v1240_v53 = vpop.xlane.xlu1 %1239 }
 0x72d   :  { %5971 = vrcp.f32 %v1240_v53  ;;  %v5966_v50 = vpop.eup %5965 }
 0x72e   :  { %5973 = vrcp.f32 %v1236_v23  ;;  %v1277_v60 = vmul.f32 %v5966_v50, %v7097_v8 }
 0x72f   :  { %v1244_v49 = vpop.xlane.xlu0 %1243 }
 0x730   :  { %5975 = vrcp.f32 %v1244_v49 }
 0x731   :  { %5977 = vrcp.f32 %v1234_v10 }
 0x732   :  { %5979 = vrcp.f32 %v1242_v25 }
 0x733   :  { %v1250_v57 = vpop.xlane.xlu0 %1249  ;;  %v1246_v33 = vpop.xlane.xlu1 %1245 }
 0x734   :  { %5981 = vrcp.f32 %v1246_v33 }
 0x735   :  { %v5968_v59 = vpop.eup %5967 }
 0x736   :  { %v1278_v37 = vmul.f32 %v5968_v59, %v7106_v42 }
 0x737   :  { %v1252_v35 = vpop.xlane.xlu0 %1251  ;;  %v1258_v39 = vpop.xlane.xlu1 %1257 }
 0x738   :  { %v1293_v62 = vpack.c.bf16 %v1278_v37, %v1277_v60  ;;  %5983 = vrcp.f32 %v1252_v35 }
 0x739   :  { %v5970_v29 = vpop.eup %5969  ;;  %5985 = vrcp.f32 %v1250_v57 }
 0x73a   :  { %v5972_v61 = vpop.eup %5971  ;;  %v1281_v47 = vmul.f32 %v5970_v29, %v7114_v9  ;;  %5447 = vmatprep.mubr.bf16.mxu0 %v1293_v62 }
 0x73b   :  { %v1248_v52 = vpop.xlane.xlu0 %1247  ;;  %v1254_v56 = vpop.xlane.xlu1 %1253  ;;  %v1282_v21 = vmul.f32 %v5972_v61, %v7116_v2 }
 0x73c   :  { %5987 = vrcp.f32 %v1248_v52  ;;  %v5974_v24 = vpop.eup %5973 }
 0x73d   :  { %v1295_v58 = vpack.c.bf16 %v1282_v21, %v1281_v47  ;;  %v5976_v54 = vpop.eup %5975  ;;  %v1280_v22 = vmul.f32 %v5974_v24, %v7102_v18  ;;  %5989 = vrcp.f32 %v1254_v56 }
 0x73e   :  { %v5978_v13 = vpop.eup %5977  ;;  %v1284_v38 = vmul.f32 %v5976_v54, %v7120_v12 }
 0x73f   :  { %5451 = vmatprep.mubr.bf16.mxu1 %v1295_v58  ;;  %v1304_v8 = vpop.permute.xlu0 %1303  ;;  %v5980_v14 = vpop.eup %5979  ;;  %v1279_v16 = vmul.f32 %v5978_v13, %v7093_v63 }
 0x740   :  { %5443 = vmatprep.subr.bf16.mxu0 %v1304_v8  ;;  %5761 = vmatprep.subr.bf16.mxu1 %v1304_v8  ;;  %v1302_v15 = vpop.permute.xlu1 %1301  ;;  %v1283_v0 = vmul.f32 %v5980_v14, %v7109_v55 }
 0x741   :  { %5444 = vmatpush3.bf16.msra.mxu0 %v1304_v8  ;;  %5769 = vmatpush3.bf16.msra.mxu1 %v1304_v8  ;;  %v5982_v42 = vpop.eup %5981  ;;  %v1294_v26 = vpack.c.bf16 %v1280_v22, %v1279_v16 }
 0x742   :  { %5445 = vmatprep.subr.bf16.mxu0 %v1302_v15  ;;  %5762 = vmatprep.subr.bf16.mxu1 %v1302_v15  ;;  %v1296_v30 = vpack.c.bf16 %v1284_v38, %v1283_v0  ;;  %v1285_v9 = vmul.f32 %v5982_v42, %v7125_v20 }
 0x745   :  { %5446 = vmatpush3.bf16.msra.mxu0 %v1302_v15  ;;  %5770 = vmatpush3.bf16.msra.mxu1 %v1302_v15  ;;  %v5984_v31 = vpop.eup %5983 }
 0x746   :  { %v5986_v32 = vpop.eup %5985  ;;  %v1288_v2 = vmul.f32 %v5984_v31, %v7129_v1  ;;  %5463 = vmatprep.subr.bf16.mxu1 %v5811_v19 }
 0x747   :  { %v1287_v63 = vmul.f32 %v5986_v32, %v7123_v34 }
 0x748   :  { %5448 = vmatmul.mubr.bf16.vlgmr.msra.gmra.mxu0 %v1294_v26  ;;  %5452 = vmatmul.mubr.bf16.vlgmr.msra.gmra.mxu1 %v1296_v30 }
 0x749   :  { %v5988_v3 = vpop.eup %5987  ;;  %v1298_v55 = vpack.c.bf16 %v1288_v2, %v1287_v63  ;;  %5464 = vmatpush3.bf16.msra.mxu1 %v5811_v19  ;;  %v7224_v19 = vld [vmem:[%s8997_s7] ss:$0 sm:$0xff] }
 0x74a   :  { %v1286_v18 = vmul.f32 %v5988_v3, %v7135_v7  ;;  %v5990_v17 = vpop.eup %5989 }
 0x74b   :  { %v1289_v20 = vmul.f32 %v5990_v17, %v7137_v4 }
 0x74c   :  { %v1297_v44 = vpack.c.bf16 %v1286_v18, %v1285_v9 }
 0x74e   :  { %5455 = vmatprep.mubr.bf16.mxu1 %v1297_v44 }
 0x750   :  { %5456 = vmatmul.mubr.bf16.gmra.mxu1 %v1298_v55 }
 0x770   :  { %v1256_v5 = vpop.xlane.xlu0 %1255 }
 0x771   :  { %5991 = vrcp.f32 %v1256_v5 }
 0x772   :  { %5993 = vrcp.f32 %v1258_v39 }
 0x774   :  { %v1260_v12 = vpop.xlane.xlu0 %1259 }
 0x775   :  { %5995 = vrcp.f32 %v1260_v12 }
 0x77e   :  { %v5992_v43 = vpop.eup %5991 }
 0x77f   :  { %v1290_v7 = vmul.f32 %v5992_v43, %v7147_v11  ;;  %v5994_v27 = vpop.eup %5993 }
 0x780   :  { %v1291_v34 = vmul.f32 %v5994_v27, %v7131_v6  ;;  %v5812_v6 = vld [vmem:[%s8996_s6] sm:$0xff]  }
 0x781   :  { %v1299_v1 = vpack.c.bf16 %v1290_v7, %v1289_v20  ;;  %5465 = vmatprep.subr.bf16.mxu1 %v5812_v6 }
 0x782   :  { %v5996_v40 = vpop.eup %5995  ;;  %5466 = vmatpush3.bf16.msra.mxu1 %v5812_v6  ;;  %v6287_v6 = vld [vmem:[%s8990_s0 + $0x18] sm:$0xff] }
 0x783   :  { %5459 = vmatprep.mubr.bf16.mxu1 %v1299_v1  ;;  %v1292_v36 = vmul.f32 %v5996_v40, %v7150_v45  ;;  %v6285_v40 = vld [vmem:[%s8990_s0 + $0x10] sm:$0xff] }
 0x785   :  { %v1300_v41 = vpack.c.bf16 %v1292_v36, %v1291_v34  ;;  %v6286_v36 = vld [vmem:[%s8990_s0] sm:$0xff] }
 0x787   :  { %5460 = vmatmul.mubr.bf16.gmra.mxu1 %v1300_v41 }
 0x808   :  { %v5449_v51 = vpop.f32.mrf.mxu0  ;;  %v5453_v10 = vpop.f32.mrf.mxu1 }
 0x809   :  { %1442 = vrot.lane.b32.xlu1 %v5449_v51, %s6306_s18 }
 0x80a   :  { %v1359_v4 = vpop.f32.mrf.mxu0  ;;  %v1375_v11 = vpop.f32.mrf.mxu1 }
 0x80b   :  { %1438 = vrot.lane.b32.xlu0 %v1359_v4, %s6306_s18 }
 0x80c   :  { %v5450_v45 = vpop.f32.mrf.mxu0  ;;  %v5454_v48 = vpop.f32.mrf.mxu1 }
 0x80e   :  { %v1362_v23 = vpop.f32.mrf.mxu0  ;;  %v1378_v25 = vpop.f32.mrf.mxu1 }
 0x80f   :  { %1446 = vrot.lane.b32.xlu0 %v1375_v11, %s6306_s18  ;;  %1440 = vrot.lane.b32.xlu1 %v1362_v23, %s6306_s18 }
 0x810   :  { %v5457_v46 = vpop.f32.mrf.mxu1 }
 0x812   :  { %v1391_v28 = vpop.f32.mrf.mxu1 }
 0x813   :  { %1450 = vrot.lane.b32.xlu0 %v5453_v10, %s6306_s18  ;;  %1444 = vrot.lane.b32.xlu1 %v5450_v45, %s6306_s18 }
 0x814   :  { %v5458_v53 = vpop.f32.mrf.mxu1 }
 0x816   :  { %v1394_v49 = vpop.f32.mrf.mxu1 }
 0x817   :  { %1454 = vrot.lane.b32.xlu0 %v1391_v28, %s6306_s18  ;;  %1448 = vrot.lane.b32.xlu1 %v1378_v25, %s6306_s18 }
 0x81b   :  { %1458 = vrot.lane.b32.xlu0 %v5457_v46, %s6306_s18  ;;  %1452 = vrot.lane.b32.xlu1 %v5454_v48, %s6306_s18  ;;  %v6288_v48 = vld [vmem:[%s8990_s0 + $0x8] sm:$0xff] }
 0x81f   :  { %1456 = vrot.lane.b32.xlu1 %v1394_v49, %s6306_s18 }
 0x823   :  { %1460 = vrot.lane.b32.xlu1 %v5458_v53, %s6306_s18 }
 0x847   :  { %v5461_v57 = vpop.f32.mrf.mxu1 }
 0x849   :  { %v1407_v33 = vpop.f32.mrf.mxu1 }
 0x84a   :  { %1462 = vrot.lane.b32.xlu0 %v1407_v33, %s6306_s18 }
 0x84b   :  { %v5462_v50 = vpop.f32.mrf.mxu1 }
 0x84d   :  { %v1410_v59 = vpop.f32.mrf.mxu1 }
 0x84e   :  { %1466 = vrot.lane.b32.xlu0 %v5461_v57, %s6306_s18  ;;  %1464 = vrot.lane.b32.xlu1 %v1410_v59, %s6306_s18  ;;  %v6289_v57 = vld [vmem:[%s8990_s0 + $0x20] sm:$0xff] }
 0x852   :  { %1468 = vrot.lane.b32.xlu1 %v5462_v50, %s6306_s18 }
 0x87b   :  { %v1443_v35 = vpop.permute.xlu1 %1442 }
 0x87c   :  { %1489 = vst.msk [vmem:[#allocation2 + $0x10] sm:$0xff] %vm1486_vm2, %v1443_v35 }
 0x87d   :  { %v1439_v39 = vpop.permute.xlu0 %1438 }
 0x87e   :  { %1487 = vst.msk [vmem:[#allocation2] sm:$0xff] %vm1486_vm2, %v1439_v39  ;;  %v6290_v39 = vld [vmem:[%s8990_s0 + $0x30] sm:$0xff] }
 0x881   :  { %v1447_v60 = vpop.permute.xlu0 %1446  ;;  %v1441_v37 = vpop.permute.xlu1 %1440 }
 0x882   :  { %1491 = vst.msk [vmem:[#allocation2 + $0x20] sm:$0xff] %vm1486_vm2, %v1447_v60  ;;  %1488 = vst.msk [vmem:[#allocation2 + $0x8] sm:$0xff] %vm1486_vm2, %v1441_v37 }
 0x883   :  { %v1505_v54 = vld [vmem:[#allocation2 + $0x10] sm:$0xff] }
 0x885   :  { %v1451_v29 = vpop.permute.xlu0 %1450  ;;  %v1445_v62 = vpop.permute.xlu1 %1444  ;;  %v1503_v52 = vld [vmem:[#allocation2] sm:$0xff] }
 0x886   :  { %1493 = vst.msk [vmem:[#allocation2 + $0x30] sm:$0xff] %vm1486_vm2, %v1451_v29  ;;  %1490 = vst.msk [vmem:[#allocation2 + $0x18] sm:$0xff] %vm1486_vm2, %v1445_v62  ;;  %v6291_v62 = vld [vmem:[%s8990_s0 + $0x38] sm:$0xff] }
 0x889   :  { %v1455_v61 = vpop.permute.xlu0 %1454  ;;  %v1449_v47 = vpop.permute.xlu1 %1448  ;;  %v1504_v56 = vld [vmem:[#allocation2 + $0x8] sm:$0xff]  ;;  %v1507_v15 = vld [vmem:[#allocation2 + $0x20] sm:$0xff] }
 0x88a   :  { %1495 = vst.msk [vmem:[#allocation2 + $0x40] sm:$0xff] %vm1486_vm2, %v1455_v61  ;;  %1492 = vst.msk [vmem:[#allocation2 + $0x28] sm:$0xff] %vm1486_vm2, %v1449_v47  ;;  %v1519_v21 = vpack.c.bf16 %v1504_v56, %v1503_v52  ;;  %v6292_v47 = vld [vmem:[%s8990_s0 + $0x28] sm:$0xff] }
 0x88c   :  { %5467 = vmatprep.mubr.msk.bf16.mxu1 %vm66_vm0, %v1519_v21 }
 0x88d   :  { %v1459_v58 = vpop.permute.xlu0 %1458  ;;  %v1453_v24 = vpop.permute.xlu1 %1452  ;;  %v1506_v8 = vld [vmem:[#allocation2 + $0x18] sm:$0xff]  ;;  %v1509_v0 = vld [vmem:[#allocation2 + $0x30] sm:$0xff] }
 0x88e   :  { %1497 = vst.msk [vmem:[#allocation2 + $0x50] sm:$0xff] %vm1486_vm2, %v1459_v58  ;;  %1494 = vst.msk [vmem:[#allocation2 + $0x38] sm:$0xff] %vm1486_vm2, %v1453_v24  ;;  %v1520_v13 = vpack.c.bf16 %v1506_v8, %v1505_v54 }
 0x890   :  { %5468 = vmatmul.mubr.msk.bf16.vlgmr.msra.gmra.mxu1 %vm66_vm0, %v1520_v13  ;;  %v6293_v13 = vld [vmem:[%s8990_s0 + $0x40] sm:$0xff] }
 0x891   :  { %v1457_v14 = vpop.permute.xlu1 %1456  ;;  %v1508_v22 = vld [vmem:[#allocation2 + $0x28] sm:$0xff]  ;;  %v1511_v30 = vld [vmem:[#allocation2 + $0x40] sm:$0xff] }
 0x892   :  { %1496 = vst.msk [vmem:[#allocation2 + $0x48] sm:$0xff] %vm1486_vm2, %v1457_v14  ;;  %v1521_v38 = vpack.c.bf16 %v1508_v22, %v1507_v15 }
 0x894   :  { %5471 = vmatprep.mubr.msk.bf16.mxu1 %vm66_vm0, %v1521_v38 }
 0x895   :  { %v1461_v16 = vpop.permute.xlu1 %1460  ;;  %v1510_v42 = vld [vmem:[#allocation2 + $0x38] sm:$0xff]  ;;  %v1513_v3 = vld [vmem:[#allocation2 + $0x50] sm:$0xff] }
 0x896   :  { %1498 = vst.msk [vmem:[#allocation2 + $0x58] sm:$0xff] %vm1486_vm2, %v1461_v16  ;;  %v1522_v26 = vpack.c.bf16 %v1510_v42, %v1509_v0  ;;  %v6294_v16 = vld [vmem:[%s8990_s0 + $0x50] sm:$0xff] }
 0x898   :  { %5472 = vmatmul.mubr.msk.bf16.gmra.mxu1 %vm66_vm0, %v1522_v26 }
 0x899   :  { %v1512_v31 = vld [vmem:[#allocation2 + $0x48] sm:$0xff] }
 0x89a   :  { %v1523_v32 = vpack.c.bf16 %v1512_v31, %v1511_v30  ;;  %v6295_v31 = vld [vmem:[%s8990_s0 + $0x58] sm:$0xff] }
 0x89c   :  { %5475 = vmatprep.mubr.msk.bf16.mxu1 %vm66_vm0, %v1523_v32 }
 0x89d   :  { %v1514_v9 = vld [vmem:[#allocation2 + $0x58] sm:$0xff] }
 0x89e   :  { %v1524_v18 = vpack.c.bf16 %v1514_v9, %v1513_v3  ;;  %v6296_v3 = vld [vmem:[%s8990_s0 + $0x48] sm:$0xff] }
 0x8a0   :  { %5476 = vmatmul.mubr.msk.bf16.gmra.mxu1 %vm66_vm0, %v1524_v18 }
 0x8bc   :  { %v1463_v2 = vpop.permute.xlu0 %1462 }
 0x8bd   :  { %1499 = vst.msk [vmem:[#allocation2 + $0x60] sm:$0xff] %vm1486_vm2, %v1463_v2 }
 0x8c0   :  { %v1467_v44 = vpop.permute.xlu0 %1466  ;;  %v1465_v63 = vpop.permute.xlu1 %1464 }
 0x8c1   :  { %1501 = vst.msk [vmem:[#allocation2 + $0x70] sm:$0xff] %vm1486_vm2, %v1467_v44  ;;  %1500 = vst.msk [vmem:[#allocation2 + $0x68] sm:$0xff] %vm1486_vm2, %v1465_v63 }
 0x8c4   :  { %v1469_v55 = vpop.permute.xlu1 %1468  ;;  %v1515_v5 = vld [vmem:[#allocation2 + $0x60] sm:$0xff] }
 0x8c5   :  { %1502 = vst.msk [vmem:[#allocation2 + $0x78] sm:$0xff] %vm1486_vm2, %v1469_v55 }
 0x8c8   :  { %v1516_v12 = vld [vmem:[#allocation2 + $0x68] sm:$0xff]  ;;  %v1517_v43 = vld [vmem:[#allocation2 + $0x70] sm:$0xff] }
 0x8c9   :  { %v1525_v17 = vpack.c.bf16 %v1516_v12, %v1515_v5 }
 0x8cb   :  { %5479 = vmatprep.mubr.msk.bf16.mxu1 %vm66_vm0, %v1525_v17 }
 0x8cc   :  { %v1518_v20 = vld [vmem:[#allocation2 + $0x78] sm:$0xff] }
 0x8cd   :  { %v1526_v7 = vpack.c.bf16 %v1518_v20, %v1517_v43 }
 0x8cf   :  { %5480 = vmatmul.mubr.msk.bf16.gmra.mxu1 %vm66_vm0, %v1526_v7  ;;  %v6297_v7 = vld [vmem:[%s8990_s0 + $0x70] sm:$0xff] }
 0x950   :  { %v5469_v27 = vpop.f32.mrf.mxu1 }
 0x951   :  { %v1666_v34 = vadd.f32 %v6285_v40, %v5469_v27 }
 0x952   :  { %v1601_v1 = vpop.f32.mrf.mxu1 }
 0x953   :  { %v1664_v41 = vadd.f32 %v6286_v36, %v1601_v1  ;;  %v7230_v11 = vadd.f32 %v7224_v19, %v1666_v34  ;;  %v6298_v1 = vld [vmem:[%s8990_s0 + $0x60] sm:$0xff] }
 0x954   :  { %v5470_v51 = vpop.f32.mrf.mxu1 }
 0x955   :  { %v7227_v10 = vadd.f32 %v7224_v19, %v1664_v41  ;;  %v1667_v45 = vadd.f32 %v6287_v6, %v5470_v51  ;;  %v1711_v50 = vsel %vm66_vm0, %v7230_v11, 0.0 }
 0x956   :  { %v1604_v4 = vpop.f32.mrf.mxu1 }
 0x957   :  { %v1665_v23 = vadd.f32 %v6288_v48, %v1604_v4  ;;  %v1705_v25 = vsel %vm66_vm0, %v7227_v10, 0.0  ;;  %v7244_v49 = vadd.f32 %v7224_v19, %v1667_v45  ;;  %v6299_v4 = vld [vmem:[%s8990_s0 + $0x78] sm:$0xff]  ;;  %v6300_v45 = vld [vmem:[%s8990_s0 + $0x68] sm:$0xff] }
 0x958   :  { %1706 = vadd.xlane.f32.xlu0 %v1705_v25  ;;  %v5473_v46 = vpop.f32.mrf.mxu1 }
 0x959   :  { %v7241_v28 = vadd.f32 %v7224_v19, %v1665_v23  ;;  %v1670_v60 = vadd.f32 %v6290_v39, %v5473_v46  ;;  %v1714_v56 = vsel %vm66_vm0, %v7244_v49, 0.0 }
 0x95a   :  { %v1617_v53 = vpop.f32.mrf.mxu1 }
 0x95b   :  { %v1668_v33 = vadd.f32 %v6289_v57, %v1617_v53  ;;  %v1708_v59 = vsel %vm66_vm0, %v7241_v28, 0.0  ;;  %v7271_v24 = vadd.f32 %v7224_v19, %v1670_v60 }
 0x95c   :  { %1712 = vadd.xlane.f32.xlu0 %v1711_v50  ;;  %1709 = vadd.xlane.f32.xlu1 %v1708_v59  ;;  %v5474_v35 = vpop.f32.mrf.mxu1 }
 0x95d   :  { %v7257_v29 = vadd.f32 %v7224_v19, %v1668_v33  ;;  %v1671_v61 = vadd.f32 %v6291_v62, %v5474_v35  ;;  %v1723_v26 = vsel %vm66_vm0, %v7271_v24, 0.0 }
 0x95e   :  { %v1620_v37 = vpop.f32.mrf.mxu1 }
 0x95f   :  { %v1669_v52 = vadd.f32 %v6292_v47, %v1620_v37  ;;  %v7274_v8 = vadd.f32 %v7224_v19, %v1671_v61  ;;  %v1717_v15 = vsel %vm66_vm0, %v7257_v29, 0.0 }
 0x960   :  { %1715 = vadd.xlane.f32.xlu0 %v1714_v56  ;;  %v5477_v21 = vpop.f32.mrf.mxu1 }
 0x961   :  { %v7268_v58 = vadd.f32 %v7224_v19, %v1669_v52  ;;  %v1674_v0 = vadd.f32 %v6294_v16, %v5477_v21  ;;  %v1726_v18 = vsel %vm66_vm0, %v7274_v8, 0.0 }
 0x962   :  { %v1633_v54 = vpop.f32.mrf.mxu1 }
 0x963   :  { %v1672_v14 = vadd.f32 %v6293_v13, %v1633_v54  ;;  %v1720_v22 = vsel %vm66_vm0, %v7268_v58, 0.0  ;;  %v7303_v44 = vadd.f32 %v7224_v19, %v1674_v0 }
 0x964   :  { %1718 = vadd.xlane.f32.xlu0 %v1717_v15  ;;  %1721 = vadd.xlane.f32.xlu1 %v1720_v22  ;;  %v5478_v38 = vpop.f32.mrf.mxu1 }
 0x965   :  { %v7289_v30 = vadd.f32 %v7224_v19, %v1672_v14  ;;  %v1675_v32 = vadd.f32 %v6295_v31, %v5478_v38  ;;  %v1735_v12 = vsel %vm66_vm0, %v7303_v44, 0.0 }
 0x966   :  { %v1636_v42 = vpop.f32.mrf.mxu1 }
 0x967   :  { %v1673_v9 = vadd.f32 %v6296_v3, %v1636_v42  ;;  %v7306_v63 = vadd.f32 %v7224_v19, %v1675_v32  ;;  %v1729_v55 = vsel %vm66_vm0, %v7289_v30, 0.0 }
 0x968   :  { %1724 = vadd.xlane.f32.xlu0 %v1723_v26  ;;  %1727 = vadd.xlane.f32.xlu1 %v1726_v18 }
 0x969   :  { %v7300_v2 = vadd.f32 %v7224_v19, %v1673_v9  ;;  %v1738_v17 = vsel %vm66_vm0, %v7306_v63, 0.0 }
 0x96b   :  { %v1732_v5 = vsel %vm66_vm0, %v7300_v2, 0.0 }
 0x96c   :  { %1730 = vadd.xlane.f32.xlu0 %v1729_v55  ;;  %1733 = vadd.xlane.f32.xlu1 %v1732_v5 }
 0x970   :  { %1736 = vadd.xlane.f32.xlu0 %v1735_v12  ;;  %1739 = vadd.xlane.f32.xlu1 %v1738_v17 }
 0x98f   :  { %v5481_v43 = vpop.f32.mrf.mxu1 }
 0x990   :  { %v1678_v27 = vadd.f32 %v6297_v7, %v5481_v43 }
 0x991   :  { %v1649_v20 = vpop.f32.mrf.mxu1 }
 0x992   :  { %v1676_v40 = vadd.f32 %v6298_v1, %v1649_v20  ;;  %v7326_v51 = vadd.f32 %v7224_v19, %v1678_v27 }
 0x993   :  { %v5482_v34 = vpop.f32.mrf.mxu1 }
 0x994   :  { %v7323_v36 = vadd.f32 %v7224_v19, %v1676_v40  ;;  %v1679_v6 = vadd.f32 %v6299_v4, %v5482_v34  ;;  %v1747_v53 = vsel %vm66_vm0, %v7326_v51, 0.0 }
 0x995   :  { %v1652_v41 = vpop.f32.mrf.mxu1 }
 0x996   :  { %v1677_v48 = vadd.f32 %v6300_v45, %v1652_v41  ;;  %v1741_v23 = vsel %vm66_vm0, %v7323_v36, 0.0  ;;  %v7340_v46 = vadd.f32 %v7224_v19, %v1679_v6 }
 0x997   :  { %1742 = vadd.xlane.f32.xlu0 %v1741_v23 }
 0x998   :  { %v7337_v25 = vadd.f32 %v7224_v19, %v1677_v48  ;;  %v1750_v33 = vsel %vm66_vm0, %v7340_v46, 0.0 }
 0x99a   :  { %v1744_v57 = vsel %vm66_vm0, %v7337_v25, 0.0 }
 0x99b   :  { %1748 = vadd.xlane.f32.xlu0 %v1747_v53  ;;  %1745 = vadd.xlane.f32.xlu1 %v1744_v57 }
 0x99f   :  { %1751 = vadd.xlane.f32.xlu1 %v1750_v33 }
 0x9e1   :  { %v1707_v50 = vpop.xlane.xlu0 %1706 }
 0x9e2   :  { %v1753_v59 = vmul.f32 0.03125, %v1707_v50 }
 0x9e4   :  { %v7349_v35 = vsub.f32 %v7227_v10, %v1753_v59 }
 0x9e5   :  { %v1713_v39 = vpop.xlane.xlu0 %1712  ;;  %v1710_v19 = vpop.xlane.xlu1 %1709 }
 0x9e6   :  { %v1755_v60 = vmul.f32 0.03125, %v1713_v39  ;;  %v1754_v37 = vmul.f32 0.03125, %v1710_v19  ;;  %v1785_v62 = vmul.f32 %v7349_v35, %v7349_v35 }
 0x9e8   :  { %v7354_v61 = vsub.f32 %v7230_v11, %v1755_v60  ;;  %v7357_v47 = vsub.f32 %v7241_v28, %v1754_v37  ;;  %v1801_v52 = vsel %vm66_vm0, %v1785_v62, 0.0 }
 0x9e9   :  { %v1716_v56 = vpop.xlane.xlu0 %1715  ;;  %1802 = vadd.xlane.f32.xlu0 %v1801_v52 }
 0x9ea   :  { %v1756_v21 = vmul.f32 0.03125, %v1716_v56  ;;  %v1787_v54 = vmul.f32 %v7354_v61, %v7354_v61  ;;  %v1786_v13 = vmul.f32 %v7357_v47, %v7357_v47 }
 0x9ec   :  { %v7365_v14 = vsub.f32 %v7244_v49, %v1756_v21  ;;  %v1807_v15 = vsel %vm66_vm0, %v1787_v54, 0.0  ;;  %v1804_v22 = vsel %vm66_vm0, %v1786_v13, 0.0 }
 0x9ed   :  { %v1719_v38 = vpop.xlane.xlu0 %1718  ;;  %1808 = vadd.xlane.f32.xlu0 %v1807_v15  ;;  %1805 = vadd.xlane.f32.xlu1 %v1804_v22  ;;  %v1722_v16 = vpop.xlane.xlu1 %1721  ;;  %v5813_v15 = vld [vmem:[%s8998_s10 + $0x8] sm:$0xff]   ;;  %v5814_v22 = vld [vmem:[%s8998_s10] sm:$0xff]  }
 0x9ee   :  { %v1757_v0 = vmul.f32 0.03125, %v1719_v38  ;;  %v1758_v42 = vmul.f32 0.03125, %v1722_v16  ;;  %v1788_v26 = vmul.f32 %v7365_v14, %v7365_v14  ;;  %5483 = vmatprep.subr.bf16.mxu0 %v5813_v15 }
 0x9ef   :  { %5484 = vmatpush3.bf16.msra.mxu0 %v5813_v15 }
 0x9f0   :  { %v7372_v31 = vsub.f32 %v7257_v29, %v1757_v0  ;;  %v7375_v32 = vsub.f32 %v7268_v58, %v1758_v42  ;;  %v1810_v3 = vsel %vm66_vm0, %v1788_v26, 0.0  ;;  %5485 = vmatprep.subr.bf16.mxu0 %v5814_v22 }
 0x9f1   :  { %v1725_v9 = vpop.xlane.xlu0 %1724  ;;  %1811 = vadd.xlane.f32.xlu1 %v1810_v3  ;;  %v1728_v18 = vpop.xlane.xlu1 %1727 }
 0x9f2   :  { %v1759_v55 = vmul.f32 0.03125, %v1725_v9  ;;  %v1760_v5 = vmul.f32 0.03125, %v1728_v18  ;;  %v1789_v12 = vmul.f32 %v7372_v31, %v7372_v31  ;;  %v1790_v17 = vmul.f32 %v7375_v32, %v7375_v32 }
 0x9f3   :  { %5486 = vmatpush3.bf16.msra.mxu0 %v5814_v22 }
 0x9f4   :  { %v7383_v43 = vsub.f32 %v7271_v24, %v1759_v55  ;;  %v7386_v20 = vsub.f32 %v7274_v8, %v1760_v5  ;;  %v1813_v7 = vsel %vm66_vm0, %v1789_v12, 0.0  ;;  %v1816_v27 = vsel %vm66_vm0, %v1790_v17, 0.0 }
 0x9f5   :  { %v1731_v1 = vpop.xlane.xlu0 %1730  ;;  %1814 = vadd.xlane.f32.xlu0 %v1813_v7  ;;  %1817 = vadd.xlane.f32.xlu1 %v1816_v27  ;;  %v1734_v40 = vpop.xlane.xlu1 %1733 }
 0x9f6   :  { %v1761_v34 = vmul.f32 0.03125, %v1731_v1  ;;  %v1762_v41 = vmul.f32 0.03125, %v1734_v40  ;;  %v1791_v4 = vmul.f32 %v7383_v43, %v7383_v43  ;;  %v1792_v6 = vmul.f32 %v7386_v20, %v7386_v20 }
 0x9f8   :  { %v7395_v45 = vsub.f32 %v7289_v30, %v1761_v34  ;;  %v7398_v48 = vsub.f32 %v7300_v2, %v1762_v41  ;;  %v1819_v23 = vsel %vm66_vm0, %v1791_v4, 0.0  ;;  %v1822_v53 = vsel %vm66_vm0, %v1792_v6, 0.0 }
 0x9f9   :  { %v1737_v57 = vpop.xlane.xlu0 %1736  ;;  %1820 = vadd.xlane.f32.xlu0 %v1819_v23  ;;  %1823 = vadd.xlane.f32.xlu1 %v1822_v53  ;;  %v1740_v33 = vpop.xlane.xlu1 %1739 }
 0x9fa   :  { %v1763_v50 = vmul.f32 0.03125, %v1737_v57  ;;  %v1764_v59 = vmul.f32 0.03125, %v1740_v33  ;;  %v1793_v39 = vmul.f32 %v7395_v45, %v7395_v45  ;;  %v1794_v19 = vmul.f32 %v7398_v48, %v7398_v48 }
 0x9fc   :  { %v7407_v60 = vsub.f32 %v7303_v44, %v1763_v50  ;;  %v7410_v37 = vsub.f32 %v7306_v63, %v1764_v59  ;;  %v1825_v62 = vsel %vm66_vm0, %v1793_v39, 0.0  ;;  %v1828_v52 = vsel %vm66_vm0, %v1794_v19, 0.0 }
 0x9fd   :  { %1826 = vadd.xlane.f32.xlu0 %v1825_v62  ;;  %1829 = vadd.xlane.f32.xlu1 %v1828_v52 }
 0x9fe   :  { %v1795_v56 = vmul.f32 %v7407_v60, %v7407_v60  ;;  %v1796_v21 = vmul.f32 %v7410_v37, %v7410_v37 }
 0xa00   :  { %v1831_v54 = vsel %vm66_vm0, %v1795_v56, 0.0  ;;  %v1834_v13 = vsel %vm66_vm0, %v1796_v21, 0.0 }
 0xa01   :  { %1832 = vadd.xlane.f32.xlu0 %v1831_v54  ;;  %1835 = vadd.xlane.f32.xlu1 %v1834_v13 }
 0xa20   :  { %v1743_v38 = vpop.xlane.xlu0 %1742 }
 0xa21   :  { %v1765_v16 = vmul.f32 0.03125, %v1743_v38 }
 0xa23   :  { %v7427_v0 = vsub.f32 %v7323_v36, %v1765_v16 }
 0xa24   :  { %v1749_v42 = vpop.xlane.xlu0 %1748  ;;  %v1746_v26 = vpop.xlane.xlu1 %1745 }
 0xa25   :  { %v1767_v3 = vmul.f32 0.03125, %v1749_v42  ;;  %v1766_v9 = vmul.f32 0.03125, %v1746_v26  ;;  %v1797_v18 = vmul.f32 %v7427_v0, %v7427_v0 }
 0xa27   :  { %v7432_v55 = vsub.f32 %v7326_v51, %v1767_v3  ;;  %v7435_v5 = vsub.f32 %v7337_v25, %v1766_v9  ;;  %v1837_v12 = vsel %vm66_vm0, %v1797_v18, 0.0 }
 0xa28   :  { %1838 = vadd.xlane.f32.xlu0 %v1837_v12  ;;  %v1752_v17 = vpop.xlane.xlu1 %1751 }
 0xa29   :  { %v1768_v7 = vmul.f32 0.03125, %v1752_v17  ;;  %v1799_v27 = vmul.f32 %v7432_v55, %v7432_v55  ;;  %v1798_v1 = vmul.f32 %v7435_v5, %v7435_v5 }
 0xa2b   :  { %v7443_v40 = vsub.f32 %v7340_v46, %v1768_v7  ;;  %v1843_v34 = vsel %vm66_vm0, %v1799_v27, 0.0  ;;  %v1840_v41 = vsel %vm66_vm0, %v1798_v1, 0.0 }
 0xa2c   :  { %1844 = vadd.xlane.f32.xlu0 %v1843_v34  ;;  %1841 = vadd.xlane.f32.xlu1 %v1840_v41 }
 0xa2d   :  { %v1800_v4 = vmul.f32 %v7443_v40, %v7443_v40 }
 0xa2f   :  { %v1846_v6 = vsel %vm66_vm0, %v1800_v4, 0.0  ;;  %v7454_v4 = vld [vmem:[%s8999_s8] ss:$0 sm:$0xff] }
 0xa30   :  { %1847 = vadd.xlane.f32.xlu1 %v1846_v6 }
 0xa72   :  { %v1803_v23 = vpop.xlane.xlu0 %1802 }
 0xa73   :  { %v1849_v53 = vmul.f32 0.03125, %v1803_v23 }
 0xa75   :  { %v1865_v57 = vadd.f32 1e-05, %v1849_v53 }
 0xa76   :  { %v1809_v33 = vpop.xlane.xlu0 %1808  ;;  %v1806_v50 = vpop.xlane.xlu1 %1805 }
 0xa77   :  { %5997 = vrsqrt.f32 %v1865_v57  ;;  %v1851_v59 = vmul.f32 0.03125, %v1809_v33  ;;  %v1850_v39 = vmul.f32 0.03125, %v1806_v50 }
 0xa79   :  { %v1867_v19 = vadd.f32 1e-05, %v1851_v59  ;;  %v1866_v62 = vadd.f32 1e-05, %v1850_v39 }
 0xa7a   :  { %v1812_v52 = vpop.xlane.xlu1 %1811 }
 0xa7b   :  { %5999 = vrsqrt.f32 %v1867_v19  ;;  %v1852_v56 = vmul.f32 0.03125, %v1812_v52  ;;  %v7462_v52 = vld [vmem:[%s9000_s9] ss:$0 sm:$0xff] }
 0xa7c   :  { %6001 = vrsqrt.f32 %v1866_v62 }
 0xa7d   :  { %v1868_v21 = vadd.f32 1e-05, %v1852_v56 }
 0xa7e   :  { %v1815_v54 = vpop.xlane.xlu0 %1814  ;;  %v1818_v13 = vpop.xlane.xlu1 %1817 }
 0xa7f   :  { %6003 = vrsqrt.f32 %v1868_v21  ;;  %v1853_v15 = vmul.f32 0.03125, %v1815_v54  ;;  %v1854_v22 = vmul.f32 0.03125, %v1818_v13 }
 0xa81   :  { %v1869_v38 = vadd.f32 1e-05, %v1853_v15  ;;  %v1870_v16 = vadd.f32 1e-05, %v1854_v22 }
 0xa82   :  { %v1821_v42 = vpop.xlane.xlu0 %1820  ;;  %v1824_v26 = vpop.xlane.xlu1 %1823 }
 0xa83   :  { %6005 = vrsqrt.f32 %v1869_v38  ;;  %v1855_v3 = vmul.f32 0.03125, %v1821_v42  ;;  %v1856_v9 = vmul.f32 0.03125, %v1824_v26 }
 0xa84   :  { %v5998_v18 = vpop.eup %5997  ;;  %6007 = vrsqrt.f32 %v1870_v16 }
 0xa85   :  { %v1871_v12 = vadd.f32 1e-05, %v1855_v3  ;;  %v1872_v17 = vadd.f32 1e-05, %v1856_v9  ;;  %v1897_v1 = vmul.f32 %v5998_v18, %v7349_v35 }
 0xa86   :  { %v1827_v7 = vpop.xlane.xlu0 %1826  ;;  %v1830_v27 = vpop.xlane.xlu1 %1829 }
 0xa87   :  { %6009 = vrsqrt.f32 %v1871_v12  ;;  %v1857_v34 = vmul.f32 0.03125, %v1827_v7  ;;  %v1858_v41 = vmul.f32 0.03125, %v1830_v27  ;;  %v1919_v35 = vmul.f32 %v7454_v4, %v1897_v1 }
 0xa88   :  { %v6000_v6 = vpop.eup %5999  ;;  %6011 = vrsqrt.f32 %v1872_v17 }
 0xa89   :  { %v6002_v23 = vpop.eup %6001  ;;  %v1899_v53 = vmul.f32 %v6000_v6, %v7354_v61  ;;  %v1873_v57 = vadd.f32 1e-05, %v1857_v34  ;;  %v1874_v33 = vadd.f32 1e-05, %v1858_v41  ;;  %v1941_v15 = vadd.f32 %v7462_v52, %v1919_v35 }
 0xa8a   :  { %v1833_v50 = vpop.xlane.xlu0 %1832  ;;  %v1836_v59 = vpop.xlane.xlu1 %1835  ;;  %v1898_v39 = vmul.f32 %v6002_v23, %v7357_v47 }
 0xa8b   :  { %6013 = vrsqrt.f32 %v1873_v57  ;;  %v1859_v19 = vmul.f32 0.03125, %v1833_v50  ;;  %v1860_v62 = vmul.f32 0.03125, %v1836_v59  ;;  %v1921_v47 = vmul.f32 %v7454_v4, %v1899_v53 }
 0xa8c   :  { %v6004_v56 = vpop.eup %6003  ;;  %6015 = vrsqrt.f32 %v1874_v33  ;;  %v1920_v61 = vmul.f32 %v7454_v4, %v1898_v39 }
 0xa8d   :  { %v1900_v21 = vmul.f32 %v6004_v56, %v7365_v14  ;;  %v1875_v54 = vadd.f32 1e-05, %v1859_v19  ;;  %v1876_v13 = vadd.f32 1e-05, %v1860_v62  ;;  %v1943_v3 = vadd.f32 %v7462_v52, %v1921_v47 }
 0xa8e   :  { %v1942_v22 = vadd.f32 %v7462_v52, %v1920_v61 }
 0xa8f   :  { %6017 = vrsqrt.f32 %v1875_v54  ;;  %v1922_v38 = vmul.f32 %v7454_v4, %v1900_v21 }
 0xa90   :  { %v6006_v16 = vpop.eup %6005  ;;  %6019 = vrsqrt.f32 %v1876_v13  ;;  %v1957_v42 = vpack.c.bf16 %v1942_v22, %v1941_v15 }
 0xa91   :  { %v6008_v26 = vpop.eup %6007  ;;  %v1944_v9 = vadd.f32 %v7462_v52, %v1922_v38  ;;  %v1901_v14 = vmul.f32 %v6006_v16, %v7372_v31 }
 0xa92   :  { %5487 = vmatprep.mubr.msk.bf16.mxu0 %vm66_vm0, %v1957_v42  ;;  %v1902_v18 = vmul.f32 %v6008_v26, %v7375_v32 }
 0xa93   :  { %v1958_v12 = vpack.c.bf16 %v1944_v9, %v1943_v3  ;;  %v1923_v17 = vmul.f32 %v7454_v4, %v1901_v14 }
 0xa94   :  { %v6010_v7 = vpop.eup %6009  ;;  %v1924_v27 = vmul.f32 %v7454_v4, %v1902_v18 }
 0xa95   :  { %v6012_v1 = vpop.eup %6011  ;;  %5488 = vmatmul.mubr.msk.bf16.vlgmr.msra.gmra.mxu0 %vm66_vm0, %v1958_v12  ;;  %v1945_v34 = vadd.f32 %v7462_v52, %v1923_v17  ;;  %v1903_v41 = vmul.f32 %v6010_v7, %v7383_v43 }
 0xa96   :  { %v1946_v6 = vadd.f32 %v7462_v52, %v1924_v27  ;;  %v1904_v31 = vmul.f32 %v6012_v1, %v7386_v20 }
 0xa97   :  { %v1925_v23 = vmul.f32 %v7454_v4, %v1903_v41 }
 0xa98   :  { %v6014_v32 = vpop.eup %6013  ;;  %v1959_v53 = vpack.c.bf16 %v1946_v6, %v1945_v34  ;;  %v1926_v57 = vmul.f32 %v7454_v4, %v1904_v31 }
 0xa99   :  { %v6016_v33 = vpop.eup %6015  ;;  %v1947_v50 = vadd.f32 %v7462_v52, %v1925_v23  ;;  %v1905_v59 = vmul.f32 %v6014_v32, %v7395_v45 }
 0xa9a   :  { %5491 = vmatprep.mubr.msk.bf16.mxu0 %vm66_vm0, %v1959_v53  ;;  %v1948_v39 = vadd.f32 %v7462_v52, %v1926_v57  ;;  %v1906_v43 = vmul.f32 %v6016_v33, %v7398_v48 }
 0xa9b   :  { %v1927_v35 = vmul.f32 %v7454_v4, %v1905_v59 }
 0xa9c   :  { %v6018_v20 = vpop.eup %6017  ;;  %v1960_v19 = vpack.c.bf16 %v1948_v39, %v1947_v50  ;;  %v1928_v62 = vmul.f32 %v7454_v4, %v1906_v43 }
 0xa9d   :  { %v6020_v56 = vpop.eup %6019  ;;  %v1949_v61 = vadd.f32 %v7462_v52, %v1927_v35  ;;  %v1907_v21 = vmul.f32 %v6018_v20, %v7407_v60  ;;  %v5818_v35 = vld [vmem:[%s9001_s12 + $0x20] sm:$0xff]   ;;  %v5819_v20 = vld [vmem:[%s9001_s12 + $0x18] sm:$0xff]  }
 0xa9e   :  { %5492 = vmatmul.mubr.msk.bf16.gmra.mxu0 %vm66_vm0, %v1960_v19  ;;  %v1950_v45 = vadd.f32 %v7462_v52, %v1928_v62  ;;  %v1908_v54 = vmul.f32 %v6020_v56, %v7410_v37  ;;  %v5820_v19 = vld [vmem:[%s9001_s12 + $0x10] sm:$0xff]   ;;  %v5821_v62 = vld [vmem:[%s9001_s12 + $0x8] sm:$0xff]   ;;  %v5822_v56 = vld [vmem:[%s9001_s12] sm:$0xff]  }
 0xa9f   :  { %v1929_v13 = vmul.f32 %v7454_v4, %v1907_v21 }
 0xaa0   :  { %v1961_v48 = vpack.c.bf16 %v1950_v45, %v1949_v61  ;;  %v1930_v47 = vmul.f32 %v7454_v4, %v1908_v54  ;;  %v7543_v61 = vld [vmem:[%s9002_s11] ss:$0 sm:$0xff] }
 0xaa1   :  { %v1951_v15 = vadd.f32 %v7462_v52, %v1929_v13 }
 0xaa2   :  { %5495 = vmatprep.mubr.msk.bf16.mxu0 %vm66_vm0, %v1961_v48  ;;  %v1952_v22 = vadd.f32 %v7462_v52, %v1930_v47 }
 0xaa4   :  { %v1962_v38 = vpack.c.bf16 %v1952_v22, %v1951_v15 }
 0xaa6   :  { %5496 = vmatmul.mubr.msk.bf16.gmra.mxu0 %vm66_vm0, %v1962_v38 }
 0xab1   :  { %v1839_v60 = vpop.xlane.xlu0 %1838 }
 0xab2   :  { %v1861_v16 = vmul.f32 0.03125, %v1839_v60 }
 0xab4   :  { %v1877_v42 = vadd.f32 1e-05, %v1861_v16 }
 0xab5   :  { %v1845_v26 = vpop.xlane.xlu0 %1844  ;;  %v1842_v3 = vpop.xlane.xlu1 %1841 }
 0xab6   :  { %6021 = vrsqrt.f32 %v1877_v42  ;;  %v1863_v37 = vmul.f32 0.03125, %v1845_v26  ;;  %v1862_v9 = vmul.f32 0.03125, %v1842_v3 }
 0xab8   :  { %v1879_v14 = vadd.f32 1e-05, %v1863_v37  ;;  %v1878_v18 = vadd.f32 1e-05, %v1862_v9 }
 0xab9   :  { %v1848_v12 = vpop.xlane.xlu1 %1847 }
 0xaba   :  { %6023 = vrsqrt.f32 %v1879_v14  ;;  %v1864_v17 = vmul.f32 0.03125, %v1848_v12 }
 0xabb   :  { %6025 = vrsqrt.f32 %v1878_v18 }
 0xabc   :  { %v1880_v7 = vadd.f32 1e-05, %v1864_v17 }
 0xabe   :  { %6027 = vrsqrt.f32 %v1880_v7 }
 0xac3   :  { %v6022_v27 = vpop.eup %6021 }
 0xac4   :  { %v1909_v1 = vmul.f32 %v6022_v27, %v7427_v0 }
 0xac6   :  { %v1931_v23 = vmul.f32 %v7454_v4, %v1909_v1 }
 0xac7   :  { %v6024_v34 = vpop.eup %6023 }
 0xac8   :  { %v6026_v41 = vpop.eup %6025  ;;  %v1911_v6 = vmul.f32 %v6024_v34, %v7432_v55  ;;  %v1953_v50 = vadd.f32 %v7462_v52, %v1931_v23 }
 0xac9   :  { %v1910_v31 = vmul.f32 %v6026_v41, %v7435_v5 }
 0xaca   :  { %v1933_v33 = vmul.f32 %v7454_v4, %v1911_v6 }
 0xacb   :  { %v6028_v32 = vpop.eup %6027  ;;  %v1932_v53 = vmul.f32 %v7454_v4, %v1910_v31 }
 0xacc   :  { %v1912_v57 = vmul.f32 %v6028_v32, %v7443_v40  ;;  %v1955_v55 = vadd.f32 %v7462_v52, %v1933_v33  ;;  %v5815_v40 = vld [vmem:[%s9001_s12 + $0x38] sm:$0xff]  }
 0xacd   :  { %v1954_v59 = vadd.f32 %v7462_v52, %v1932_v53  ;;  %5503 = vmatprep.subr.bf16.mxu1 %v5815_v40 }
 0xace   :  { %v1934_v0 = vmul.f32 %v7454_v4, %v1912_v57  ;;  %5504 = vmatpush3.bf16.msra.mxu1 %v5815_v40  ;;  %v5816_v4 = vld [vmem:[%s9001_s12 + $0x30] sm:$0xff]  }
 0xacf   :  { %v1963_v39 = vpack.c.bf16 %v1954_v59, %v1953_v50  ;;  %5505 = vmatprep.subr.bf16.mxu1 %v5816_v4 }
 0xad0   :  { %v1956_v5 = vadd.f32 %v7462_v52, %v1934_v0  ;;  %v5817_v52 = vld [vmem:[%s9001_s12 + $0x28] sm:$0xff]  }
 0xad1   :  { %5499 = vmatprep.mubr.msk.bf16.mxu0 %vm66_vm0, %v1963_v39 }
 0xad2   :  { %v1964_v43 = vpack.c.bf16 %v1956_v5, %v1955_v55  ;;  %5506 = vmatpush3.bf16.msra.mxu1 %v5816_v4 }
 0xad3   :  { %5507 = vmatprep.subr.bf16.mxu1 %v5817_v52 }
 0xad4   :  { %5500 = vmatmul.mubr.msk.bf16.gmra.mxu0 %vm66_vm0, %v1964_v43 }
 0xad6   :  { %5508 = vmatpush3.bf16.msra.mxu1 %v5817_v52 }
 0xad7   :  { %5509 = vmatprep.subr.bf16.mxu1 %v5818_v35 }
 0xada   :  { %5510 = vmatpush3.bf16.msra.mxu1 %v5818_v35 }
 0xadb   :  { %5511 = vmatprep.subr.bf16.mxu1 %v5819_v20 }
 0xade   :  { %5512 = vmatpush3.bf16.msra.mxu1 %v5819_v20 }
 0xadf   :  { %5513 = vmatprep.subr.bf16.mxu1 %v5820_v19 }
 0xae2   :  { %5514 = vmatpush3.bf16.msra.mxu1 %v5820_v19 }
 0xae3   :  { %5515 = vmatprep.subr.bf16.mxu1 %v5821_v62 }
 0xae6   :  { %5516 = vmatpush3.bf16.msra.mxu1 %v5821_v62 }
 0xae7   :  { %5517 = vmatprep.subr.bf16.mxu1 %v5822_v56 }
 0xaea   :  { %5518 = vmatpush3.bf16.msra.mxu1 %v5822_v56 }
 0xb55   :  { %v5489_v21 = vpop.f32.mrf.mxu0 }
 0xb56   :  { %v7546_v45 = vadd.f32 %v5489_v21, %v7543_v61 }
 0xb57   :  { %v2046_v54 = vpop.f32.mrf.mxu0 }
 0xb58   :  { %v2127_v13 = vmul.f32 0.044715, %v7546_v45  ;;  %v7550_v48 = vadd.f32 %v7543_v61, %v2046_v54 }
 0xb59   :  { %v5490_v47 = vpop.f32.mrf.mxu0 }
 0xb5a   :  { %v2143_v15 = vmul.f32 %v2127_v13, %v7546_v45  ;;  %v2125_v22 = vmul.f32 0.044715, %v7550_v48  ;;  %v7555_v38 = vadd.f32 %v5490_v47, %v7543_v61 }
 0xb5b   :  { %v2049_v60 = vpop.f32.mrf.mxu0 }
 0xb5c   :  { %v2159_v16 = vmul.f32 %v2143_v15, %v7546_v45  ;;  %v2141_v42 = vmul.f32 %v2125_v22, %v7550_v48  ;;  %v2128_v26 = vmul.f32 0.044715, %v7555_v38  ;;  %v7561_v3 = vadd.f32 %v7543_v61, %v2049_v60 }
 0xb5e   :  { %v2175_v37 = vadd.f32 %v2159_v16, %v7546_v45  ;;  %v2157_v9 = vmul.f32 %v2141_v42, %v7550_v48  ;;  %v2144_v14 = vmul.f32 %v2128_v26, %v7555_v38  ;;  %v5493_v18 = vpop.f32.mrf.mxu0  ;;  %v2126_v12 = vmul.f32 0.044715, %v7561_v3 }
 0xb5f   :  { %v7568_v17 = vadd.f32 %v5493_v18, %v7543_v61 }
 0xb60   :  { %v2191_v7 = vmul.f32 0.7978846, %v2175_v37  ;;  %v2160_v27 = vmul.f32 %v2144_v14, %v7555_v38  ;;  %v2062_v1 = vpop.f32.mrf.mxu0  ;;  %v2173_v34 = vadd.f32 %v2157_v9, %v7550_v48  ;;  %v2142_v41 = vmul.f32 %v2126_v12, %v7561_v3 }
 0xb61   :  { %v2131_v6 = vmul.f32 0.044715, %v7568_v17  ;;  %v7575_v31 = vadd.f32 %v7543_v61, %v2062_v1 }
 0xb62   :  { %6029 = vtanh.f32 %v2191_v7  ;;  %v2176_v23 = vadd.f32 %v2160_v27, %v7555_v38  ;;  %v5494_v32 = vpop.f32.mrf.mxu0  ;;  %v2189_v53 = vmul.f32 0.7978846, %v2173_v34  ;;  %v2158_v57 = vmul.f32 %v2142_v41, %v7561_v3 }
 0xb63   :  { %v2147_v33 = vmul.f32 %v2131_v6, %v7568_v17  ;;  %v2129_v50 = vmul.f32 0.044715, %v7575_v31  ;;  %v7582_v59 = vadd.f32 %v5494_v32, %v7543_v61 }
 0xb64   :  { %v2192_v0 = vmul.f32 0.7978846, %v2176_v23  ;;  %v2065_v39 = vpop.f32.mrf.mxu0  ;;  %6031 = vtanh.f32 %v2189_v53  ;;  %v2174_v52 = vadd.f32 %v2158_v57, %v7561_v3 }
 0xb65   :  { %v2163_v55 = vmul.f32 %v2147_v33, %v7568_v17  ;;  %v2145_v5 = vmul.f32 %v2129_v50, %v7575_v31  ;;  %v2132_v43 = vmul.f32 0.044715, %v7582_v59  ;;  %v7588_v40 = vadd.f32 %v7543_v61, %v2065_v39 }
 0xb66   :  { %6033 = vtanh.f32 %v2192_v0  ;;  %v5497_v4 = vpop.f32.mrf.mxu0  ;;  %v2190_v21 = vmul.f32 0.7978846, %v2174_v52 }
 0xb67   :  { %v2161_v35 = vmul.f32 %v2145_v5, %v7575_v31  ;;  %v2148_v20 = vmul.f32 %v2132_v43, %v7582_v59  ;;  %v2130_v19 = vmul.f32 0.044715, %v7588_v40  ;;  %v7595_v62 = vadd.f32 %v5497_v4, %v7543_v61 }
 0xb68   :  { %v2078_v56 = vpop.f32.mrf.mxu0  ;;  %v2179_v54 = vadd.f32 %v2163_v55, %v7568_v17  ;;  %6035 = vtanh.f32 %v2190_v21 }
 0xb69   :  { %v2164_v13 = vmul.f32 %v2148_v20, %v7582_v59  ;;  %v2146_v47 = vmul.f32 %v2130_v19, %v7588_v40  ;;  %v2135_v15 = vmul.f32 0.044715, %v7595_v62  ;;  %v7602_v22 = vadd.f32 %v7543_v61, %v2078_v56 }
 0xb6a   :  { %v5498_v60 = vpop.f32.mrf.mxu0  ;;  %v2177_v16 = vadd.f32 %v2161_v35, %v7575_v31  ;;  %v2195_v42 = vmul.f32 0.7978846, %v2179_v54 }
 0xb6b   :  { %v2162_v26 = vmul.f32 %v2146_v47, %v7588_v40  ;;  %v2151_v37 = vmul.f32 %v2135_v15, %v7595_v62  ;;  %v2133_v9 = vmul.f32 0.044715, %v7602_v22  ;;  %v7609_v14 = vadd.f32 %v5498_v60, %v7543_v61 }
 0xb6c   :  { %v2081_v18 = vpop.f32.mrf.mxu0  ;;  %v2193_v12 = vmul.f32 0.7978846, %v2177_v16  ;;  %v2180_v7 = vadd.f32 %v2164_v13, %v7582_v59  ;;  %v2112_v15 = vmul.f32 0.5, %v7555_v38 }
 0xb6d   :  { %v2167_v27 = vmul.f32 %v2151_v37, %v7595_v62  ;;  %v2149_v1 = vmul.f32 %v2133_v9, %v7602_v22  ;;  %v2136_v34 = vmul.f32 0.044715, %v7609_v14  ;;  %v7616_v41 = vadd.f32 %v7543_v61, %v2081_v18 }
 0xb6e   :  { %v2178_v6 = vadd.f32 %v2162_v26, %v7588_v40  ;;  %6037 = vtanh.f32 %v2193_v12  ;;  %v2196_v23 = vmul.f32 0.7978846, %v2180_v7  ;;  %v2110_v26 = vmul.f32 0.5, %v7561_v3 }
 0xb6f   :  { %v6030_v32 = vpop.eup %6029  ;;  %v2165_v53 = vmul.f32 %v2149_v1, %v7602_v22  ;;  %v2152_v57 = vmul.f32 %v2136_v34, %v7609_v14  ;;  %v2134_v33 = vmul.f32 0.044715, %v7616_v41  ;;  %6039 = vtanh.f32 %v2195_v42 }
 0xb70   :  { %v2194_v50 = vmul.f32 0.7978846, %v2178_v6  ;;  %6041 = vtanh.f32 %v2196_v23  ;;  %v2183_v0 = vadd.f32 %v2167_v27, %v7595_v62  ;;  %v2223_v60 = vadd.f32 1.0, %v6030_v32 }
 0xb71   :  { %v6032_v39 = vpop.eup %6031  ;;  %v2168_v55 = vmul.f32 %v2152_v57, %v7609_v14  ;;  %v2150_v5 = vmul.f32 %v2134_v33, %v7616_v41  ;;  %v2181_v43 = vadd.f32 %v2165_v53, %v7602_v22  ;;  %v2109_v42 = vmul.f32 0.5, %v7550_v48 }
 0xb72   :  { %6043 = vtanh.f32 %v2194_v50  ;;  %v2199_v4 = vmul.f32 0.7978846, %v2183_v0  ;;  %v2221_v13 = vadd.f32 1.0, %v6032_v39  ;;  %v2111_v9 = vmul.f32 0.5, %v7546_v45 }
 0xb73   :  { %v6034_v52 = vpop.eup %6033  ;;  %v2166_v35 = vmul.f32 %v2150_v5, %v7616_v41  ;;  %v2197_v20 = vmul.f32 0.7978846, %v2181_v43  ;;  %v2184_v19 = vadd.f32 %v2168_v55, %v7609_v14  ;;  %v2116_v48 = vmul.f32 0.5, %v7582_v59 }
 0xb74   :  { %v2224_v56 = vadd.f32 1.0, %v6034_v52  ;;  %v2237_v12 = vmul.f32 %v2221_v13, %v2109_v42  ;;  %v2239_v1 = vmul.f32 %v2223_v60, %v2111_v9  ;;  %v2113_v45 = vmul.f32 0.5, %v7575_v31 }
 0xb75   :  { %v2182_v21 = vadd.f32 %v2166_v35, %v7616_v41  ;;  %6045 = vtanh.f32 %v2197_v20  ;;  %v2200_v54 = vmul.f32 0.7978846, %v2184_v19  ;;  %v6036_v47 = vpop.eup %6035  ;;  %v2114_v33 = vmul.f32 0.5, %v7588_v40 }
 0xb76   :  { %6047 = vtanh.f32 %v2199_v4  ;;  %v2222_v37 = vadd.f32 1.0, %v6036_v47  ;;  %v2240_v18 = vmul.f32 %v2224_v56, %v2112_v15  ;;  %v2115_v0 = vmul.f32 0.5, %v7568_v17 }
 0xb77   :  { %v2198_v16 = vmul.f32 0.7978846, %v2182_v21  ;;  %6049 = vtanh.f32 %v2200_v54  ;;  %v2117_v31 = vmul.f32 0.5, %v7602_v22  ;;  %v2118_v40 = vmul.f32 0.5, %v7616_v41 }
 0xb78   :  { %v2238_v7 = vmul.f32 %v2222_v37, %v2110_v26  ;;  %v2254_v38 = vpack.c.bf16 %v2240_v18, %v2239_v1  ;;  %v2120_v17 = vmul.f32 0.5, %v7609_v14  ;;  %v2119_v60 = vmul.f32 0.5, %v7595_v62 }
 0xb79   :  { %6051 = vtanh.f32 %v2198_v16 }
 0xb7a   :  { %v2253_v6 = vpack.c.bf16 %v2238_v7, %v2237_v12 }
 0xb7b   :  { %v6038_v27 = vpop.eup %6037 }
 0xb7c   :  { %v6040_v34 = vpop.eup %6039  ;;  %5519 = vmatprep.mubr.bf16.mxu1 %v2253_v6  ;;  %v2225_v32 = vadd.f32 1.0, %v6038_v27 }
 0xb7d   :  { %v6042_v23 = vpop.eup %6041  ;;  %5520 = vmatmul.mubr.bf16.vlgmr.msra.gmra.mxu1 %v2254_v38  ;;  %v2227_v3 = vadd.f32 1.0, %v6040_v34 }
 0xb7e   :  { %v2228_v53 = vadd.f32 1.0, %v6042_v23  ;;  %v2241_v5 = vmul.f32 %v2225_v32, %v2113_v45 }
 0xb7f   :  { %v6044_v57 = vpop.eup %6043  ;;  %v2243_v52 = vmul.f32 %v2227_v3, %v2115_v0 }
 0xb80   :  { %v2226_v50 = vadd.f32 1.0, %v6044_v57  ;;  %v2244_v39 = vmul.f32 %v2228_v53, %v2116_v48 }
 0xb82   :  { %v6046_v55 = vpop.eup %6045  ;;  %v2242_v43 = vmul.f32 %v2226_v50, %v2114_v33  ;;  %v2256_v19 = vpack.c.bf16 %v2244_v39, %v2243_v52 }
 0xb83   :  { %v6048_v4 = vpop.eup %6047  ;;  %v2229_v56 = vadd.f32 1.0, %v6046_v55 }
 0xb84   :  { %v6050_v35 = vpop.eup %6049  ;;  %v2255_v20 = vpack.c.bf16 %v2242_v43, %v2241_v5  ;;  %v2231_v13 = vadd.f32 1.0, %v6048_v4 }
 0xb85   :  { %v2232_v21 = vadd.f32 1.0, %v6050_v35  ;;  %v2245_v47 = vmul.f32 %v2229_v56, %v2117_v31 }
 0xb86   :  { %v6052_v59 = vpop.eup %6051  ;;  %5523 = vmatprep.mubr.bf16.mxu1 %v2255_v20  ;;  %v2247_v26 = vmul.f32 %v2231_v13, %v2119_v60 }
 0xb87   :  { %5524 = vmatmul.mubr.bf16.gmra.mxu1 %v2256_v19  ;;  %v2230_v54 = vadd.f32 1.0, %v6052_v59  ;;  %v2248_v16 = vmul.f32 %v2232_v21, %v2120_v17 }
 0xb89   :  { %v2246_v15 = vmul.f32 %v2230_v54, %v2118_v40  ;;  %v2258_v37 = vpack.c.bf16 %v2248_v16, %v2247_v26 }
 0xb8b   :  { %v2257_v42 = vpack.c.bf16 %v2246_v15, %v2245_v47 }
 0xb8d   :  { %5527 = vmatprep.mubr.bf16.mxu1 %v2257_v42 }
 0xb8f   :  { %5528 = vmatmul.mubr.bf16.gmra.mxu1 %v2258_v37 }
 0xb94   :  { %v5501_v9 = vpop.f32.mrf.mxu0 }
 0xb95   :  { %v2103_v22 = vadd.f32 %v5501_v9, %v7543_v61 }
 0xb96   :  { %v2094_v18 = vpop.f32.mrf.mxu0 }
 0xb97   :  { %v2139_v12 = vmul.f32 0.044715, %v2103_v22  ;;  %v2095_v41 = vadd.f32 %v7543_v61, %v2094_v18  ;;  %v2123_v17 = vmul.f32 0.5, %v2103_v22  ;;  %v7649_v18 = vld [vmem:[%s9003_s13] ss:$0 sm:$0xff] }
 0xb98   :  { %v5502_v7 = vpop.f32.mrf.mxu0 }
 0xb99   :  { %v2155_v14 = vmul.f32 %v2139_v12, %v2103_v22  ;;  %v2137_v27 = vmul.f32 0.044715, %v2095_v41  ;;  %v2106_v1 = vadd.f32 %v5502_v7, %v7543_v61  ;;  %v2121_v31 = vmul.f32 0.5, %v2095_v41 }
 0xb9a   :  { %v2097_v34 = vpop.f32.mrf.mxu0 }
 0xb9b   :  { %v2171_v62 = vmul.f32 %v2155_v14, %v2103_v22  ;;  %v2153_v6 = vmul.f32 %v2137_v27, %v2095_v41  ;;  %v2140_v23 = vmul.f32 0.044715, %v2106_v1  ;;  %v2098_v38 = vadd.f32 %v7543_v61, %v2097_v34 }
 0xb9c   :  { %v2124_v21 = vmul.f32 0.5, %v2106_v1 }
 0xb9d   :  { %v2169_v32 = vmul.f32 %v2153_v6, %v2095_v41  ;;  %v2156_v53 = vmul.f32 %v2140_v23, %v2106_v1  ;;  %v2138_v57 = vmul.f32 0.044715, %v2098_v38  ;;  %v2187_v48 = vadd.f32 %v2171_v62, %v2103_v22 }
 0xb9e   :  { %v2122_v40 = vmul.f32 0.5, %v2098_v38 }
 0xb9f   :  { %v2172_v3 = vmul.f32 %v2156_v53, %v2106_v1  ;;  %v2154_v45 = vmul.f32 %v2138_v57, %v2098_v38  ;;  %v2185_v33 = vadd.f32 %v2169_v32, %v2095_v41  ;;  %v2203_v50 = vmul.f32 0.7978846, %v2187_v48 }
 0xba1   :  { %v2170_v0 = vmul.f32 %v2154_v45, %v2098_v38  ;;  %v2201_v39 = vmul.f32 0.7978846, %v2185_v33  ;;  %v2188_v55 = vadd.f32 %v2172_v3, %v2106_v1 }
 0xba3   :  { %v2186_v5 = vadd.f32 %v2170_v0, %v2098_v38  ;;  %6053 = vtanh.f32 %v2201_v39  ;;  %v2204_v43 = vmul.f32 0.7978846, %v2188_v55 }
 0xba4   :  { %6055 = vtanh.f32 %v2203_v50 }
 0xba5   :  { %v2202_v4 = vmul.f32 0.7978846, %v2186_v5  ;;  %6057 = vtanh.f32 %v2204_v43 }
 0xba7   :  { %6059 = vtanh.f32 %v2202_v4 }
 0xbb0   :  { %v6054_v52 = vpop.eup %6053 }
 0xbb1   :  { %v6056_v61 = vpop.eup %6055  ;;  %v2233_v20 = vadd.f32 1.0, %v6054_v52 }
 0xbb2   :  { %v6058_v35 = vpop.eup %6057  ;;  %v2235_v59 = vadd.f32 1.0, %v6056_v61 }
 0xbb3   :  { %v2236_v19 = vadd.f32 1.0, %v6058_v35  ;;  %v2249_v47 = vmul.f32 %v2233_v20, %v2121_v31 }
 0xbb4   :  { %v6060_v56 = vpop.eup %6059  ;;  %v2251_v60 = vmul.f32 %v2235_v59, %v2123_v17 }
 0xbb5   :  { %v2234_v54 = vadd.f32 1.0, %v6060_v56  ;;  %v2252_v13 = vmul.f32 %v2236_v19, %v2124_v21 }
 0xbb7   :  { %v2250_v15 = vmul.f32 %v2234_v54, %v2122_v40  ;;  %v2260_v42 = vpack.c.bf16 %v2252_v13, %v2251_v60 }
 0xbb9   :  { %v2259_v16 = vpack.c.bf16 %v2250_v15, %v2249_v47 }
 0xbbb   :  { %5531 = vmatprep.mubr.bf16.mxu1 %v2259_v16 }
 0xbbc   :  { %5532 = vmatmul.mubr.bf16.gmra.mxu1 %v2260_v42 }
 0xc3d   :  { %v5521_v26 = vpop.f32.mrf.mxu1 }
 0xc3e   :  { %v2424_v37 = vadd.f32 %v5521_v26, %v7230_v11 }
 0xc3f   :  { %v2359_v9 = vpop.f32.mrf.mxu1 }
 0xc40   :  { %v2422_v12 = vadd.f32 %v2359_v9, %v7227_v10  ;;  %v7656_v7 = vadd.f32 %v7649_v18, %v2424_v37 }
 0xc41   :  { %v5522_v22 = vpop.f32.mrf.mxu1 }
 0xc42   :  { %v7653_v41 = vadd.f32 %v7649_v18, %v2422_v12  ;;  %v2425_v27 = vadd.f32 %v5522_v22, %v7244_v49  ;;  %v2471_v6 = vsel %vm66_vm0, %v7656_v7, 0.0 }
 0xc43   :  { %v2362_v14 = vpop.f32.mrf.mxu1 }
 0xc44   :  { %v2423_v11 = vadd.f32 %v2362_v14, %v7241_v28  ;;  %v2465_v1 = vsel %vm66_vm0, %v7653_v41, 0.0  ;;  %v7668_v23 = vadd.f32 %v7649_v18, %v2425_v27 }
 0xc45   :  { %2466 = vadd.xlane.f32.xlu0 %v2465_v1 }
 0xc46   :  { %v7663_v62 = vadd.f32 %v7649_v18, %v2423_v11 }
 0xc47   :  { %v5525_v34 = vpop.f32.mrf.mxu1 }
 0xc48   :  { %v2428_v38 = vadd.f32 %v5525_v34, %v7271_v24  ;;  %v2468_v28 = vsel %vm66_vm0, %v7663_v62, 0.0 }
 0xc49   :  { %v2375_v10 = vpop.f32.mrf.mxu1  ;;  %2472 = vadd.xlane.f32.xlu0 %v2471_v6  ;;  %2469 = vadd.xlane.f32.xlu1 %v2468_v28 }
 0xc4a   :  { %v2426_v49 = vadd.f32 %v2375_v10, %v7257_v29  ;;  %v7679_v3 = vadd.f32 %v7649_v18, %v2428_v38  ;;  %v2474_v29 = vsel %vm66_vm0, %v7668_v23, 0.0 }
 0xc4b   :  { %v5526_v32 = vpop.f32.mrf.mxu1 }
 0xc4c   :  { %v7675_v53 = vadd.f32 %v7649_v18, %v2426_v49  ;;  %v2429_v57 = vadd.f32 %v5526_v32, %v7274_v8  ;;  %v2483_v55 = vsel %vm66_vm0, %v7679_v3, 0.0 }
 0xc4d   :  { %v2378_v48 = vpop.f32.mrf.mxu1  ;;  %2475 = vadd.xlane.f32.xlu1 %v2474_v29 }
 0xc4e   :  { %v2427_v45 = vadd.f32 %v2378_v48, %v7268_v58  ;;  %v2477_v24 = vsel %vm66_vm0, %v7675_v53, 0.0  ;;  %v7690_v8 = vadd.f32 %v7649_v18, %v2429_v57 }
 0xc4f   :  { %2478 = vadd.xlane.f32.xlu0 %v2477_v24  ;;  %v5529_v33 = vpop.f32.mrf.mxu1 }
 0xc50   :  { %v7687_v50 = vadd.f32 %v7649_v18, %v2427_v45  ;;  %v2432_v39 = vadd.f32 %v5529_v33, %v7303_v44  ;;  %v2486_v61 = vsel %vm66_vm0, %v7690_v8, 0.0 }
 0xc51   :  { %v2391_v0 = vpop.f32.mrf.mxu1 }
 0xc52   :  { %v2430_v58 = vadd.f32 %v2391_v0, %v7289_v30  ;;  %v2480_v5 = vsel %vm66_vm0, %v7687_v50, 0.0  ;;  %v7704_v44 = vadd.f32 %v7649_v18, %v2432_v39 }
 0xc53   :  { %2484 = vadd.xlane.f32.xlu0 %v2483_v55  ;;  %2481 = vadd.xlane.f32.xlu1 %v2480_v5  ;;  %v5530_v43 = vpop.f32.mrf.mxu1 }
 0xc54   :  { %v7699_v4 = vadd.f32 %v7649_v18, %v2430_v58  ;;  %v2433_v30 = vadd.f32 %v5530_v43, %v7306_v63  ;;  %v2495_v21 = vsel %vm66_vm0, %v7704_v44, 0.0 }
 0xc55   :  { %v2394_v52 = vpop.f32.mrf.mxu1 }
 0xc56   :  { %v2431_v35 = vadd.f32 %v2394_v52, %v7300_v2  ;;  %v2489_v20 = vsel %vm66_vm0, %v7699_v4, 0.0  ;;  %v7714_v56 = vadd.f32 %v7649_v18, %v2433_v30 }
 0xc57   :  { %2487 = vadd.xlane.f32.xlu1 %v2486_v61  ;;  %2490 = vadd.xlane.f32.xlu0 %v2489_v20 }
 0xc58   :  { %v7711_v19 = vadd.f32 %v7649_v18, %v2431_v35  ;;  %v2498_v2 = vsel %vm66_vm0, %v7714_v56, 0.0 }
 0xc5a   :  { %v2492_v59 = vsel %vm66_vm0, %v7711_v19, 0.0 }
 0xc5b   :  { %2496 = vadd.xlane.f32.xlu0 %v2495_v21  ;;  %2493 = vadd.xlane.f32.xlu1 %v2492_v59 }
 0xc5f   :  { %2499 = vadd.xlane.f32.xlu1 %v2498_v2 }
 0xc7c   :  { %v5533_v63 = vpop.f32.mrf.mxu1 }
 0xc7d   :  { %v2436_v40 = vadd.f32 %v5533_v63, %v7326_v51 }
 0xc7e   :  { %v2407_v31 = vpop.f32.mrf.mxu1 }
 0xc7f   :  { %v2434_v54 = vadd.f32 %v2407_v31, %v7323_v36  ;;  %v7728_v15 = vadd.f32 %v7649_v18, %v2436_v40 }
 0xc80   :  { %v5534_v17 = vpop.f32.mrf.mxu1 }
 0xc81   :  { %v7725_v13 = vadd.f32 %v7649_v18, %v2434_v54  ;;  %v2437_v60 = vadd.f32 %v5534_v17, %v7340_v46  ;;  %v2507_v26 = vsel %vm66_vm0, %v7728_v15, 0.0 }
 0xc82   :  { %v2410_v47 = vpop.f32.mrf.mxu1 }
 0xc83   :  { %v2435_v16 = vadd.f32 %v2410_v47, %v7337_v25  ;;  %v2501_v42 = vsel %vm66_vm0, %v7725_v13, 0.0  ;;  %v7738_v36 = vadd.f32 %v7649_v18, %v2437_v60 }
 0xc84   :  { %2502 = vadd.xlane.f32.xlu0 %v2501_v42 }
 0xc85   :  { %v7735_v51 = vadd.f32 %v7649_v18, %v2435_v16  ;;  %v2510_v25 = vsel %vm66_vm0, %v7738_v36, 0.0 }
 0xc87   :  { %v2504_v37 = vsel %vm66_vm0, %v7735_v51, 0.0 }
 0xc88   :  { %2508 = vadd.xlane.f32.xlu0 %v2507_v26  ;;  %2505 = vadd.xlane.f32.xlu1 %v2504_v37 }
 0xc8c   :  { %2511 = vadd.xlane.f32.xlu1 %v2510_v25 }
 0xcce   :  { %v2467_v46 = vpop.xlane.xlu0 %2466 }
 0xccf   :  { %v2513_v9 = vmul.f32 0.03125, %v2467_v46 }
 0xcd1   :  { %v7747_v12 = vsub.f32 %v7653_v41, %v2513_v9 }
 0xcd2   :  { %v2473_v22 = vpop.xlane.xlu0 %2472  ;;  %v2470_v18 = vpop.xlane.xlu1 %2469 }
 0xcd3   :  { %v2515_v14 = vmul.f32 0.03125, %v2473_v22  ;;  %v2514_v27 = vmul.f32 0.03125, %v2470_v18  ;;  %v2545_v11 = vmul.f32 %v7747_v12, %v7747_v12 }
 0xcd5   :  { %v7752_v1 = vsub.f32 %v7656_v7, %v2515_v14  ;;  %v7755_v34 = vsub.f32 %v7663_v62, %v2514_v27  ;;  %v2561_v10 = vsel %vm66_vm0, %v2545_v11, 0.0 }
 0xcd6   :  { %2562 = vadd.xlane.f32.xlu0 %v2561_v10  ;;  %v2476_v38 = vpop.xlane.xlu1 %2475 }
 0xcd7   :  { %v2516_v28 = vmul.f32 0.03125, %v2476_v38  ;;  %v2547_v32 = vmul.f32 %v7752_v1, %v7752_v1  ;;  %v2546_v57 = vmul.f32 %v7755_v34, %v7755_v34 }
 0xcd8   :  { %v2479_v6 = vpop.xlane.xlu0 %2478 }
 0xcd9   :  { %v2517_v49 = vmul.f32 0.03125, %v2479_v6  ;;  %v7766_v45 = vsub.f32 %v7668_v23, %v2516_v28  ;;  %v2567_v29 = vsel %vm66_vm0, %v2547_v32, 0.0  ;;  %v2564_v24 = vsel %vm66_vm0, %v2546_v57, 0.0  ;;  %v5823_v32 = vld [vmem:[%s8991_s3 + $0x18] sm:$0xff]   ;;  %v5824_v57 = vld [vmem:[%s8991_s3 + $0x10] sm:$0xff]  }
 0xcda   :  { %2568 = vadd.xlane.f32.xlu0 %v2567_v29  ;;  %2565 = vadd.xlane.f32.xlu1 %v2564_v24 }
 0xcdb   :  { %v7763_v48 = vsub.f32 %v7675_v53, %v2517_v49  ;;  %v2548_v5 = vmul.f32 %v7766_v45, %v7766_v45  ;;  %5535 = vmatprep.subr.bf16.mxu0 %v5823_v32 }
 0xcdc   :  { %v2485_v33 = vpop.xlane.xlu0 %2484  ;;  %v2482_v0 = vpop.xlane.xlu1 %2481  ;;  %5536 = vmatpush3.bf16.msra.mxu0 %v5823_v32 }
 0xcdd   :  { %v2519_v39 = vmul.f32 0.03125, %v2485_v33  ;;  %v2518_v58 = vmul.f32 0.03125, %v2482_v0  ;;  %v2549_v55 = vmul.f32 %v7763_v48, %v7763_v48  ;;  %v2570_v30 = vsel %vm66_vm0, %v2548_v5, 0.0  ;;  %5537 = vmatprep.subr.bf16.mxu0 %v5824_v57 }
 0xcde   :  { %2571 = vadd.xlane.f32.xlu1 %v2570_v30 }
 0xcdf   :  { %v7775_v43 = vsub.f32 %v7679_v3, %v2519_v39  ;;  %v7778_v52 = vsub.f32 %v7687_v50, %v2518_v58  ;;  %v2573_v61 = vsel %vm66_vm0, %v2549_v55, 0.0 }
 0xce0   :  { %v2491_v35 = vpop.xlane.xlu0 %2490  ;;  %2574 = vadd.xlane.f32.xlu0 %v2573_v61  ;;  %v2488_v20 = vpop.xlane.xlu1 %2487  ;;  %5538 = vmatpush3.bf16.msra.mxu0 %v5824_v57 }
 0xce1   :  { %v2521_v21 = vmul.f32 0.03125, %v2491_v35  ;;  %v2520_v59 = vmul.f32 0.03125, %v2488_v20  ;;  %v2551_v2 = vmul.f32 %v7775_v43, %v7775_v43  ;;  %v2550_v63 = vmul.f32 %v7778_v52, %v7778_v52 }
 0xce3   :  { %v7787_v31 = vsub.f32 %v7699_v4, %v2521_v21  ;;  %v7790_v40 = vsub.f32 %v7690_v8, %v2520_v59  ;;  %v2579_v54 = vsel %vm66_vm0, %v2551_v2, 0.0  ;;  %v2576_v17 = vsel %vm66_vm0, %v2550_v63, 0.0 }
 0xce4   :  { %v2497_v47 = vpop.xlane.xlu0 %2496  ;;  %2580 = vadd.xlane.f32.xlu0 %v2579_v54  ;;  %2577 = vadd.xlane.f32.xlu1 %v2576_v17  ;;  %v2494_v60 = vpop.xlane.xlu1 %2493 }
 0xce5   :  { %v2523_v16 = vmul.f32 0.03125, %v2497_v47  ;;  %v2522_v42 = vmul.f32 0.03125, %v2494_v60  ;;  %v2553_v26 = vmul.f32 %v7787_v31, %v7787_v31  ;;  %v2552_v37 = vmul.f32 %v7790_v40, %v7790_v40 }
 0xce7   :  { %v7799_v25 = vsub.f32 %v7704_v44, %v2523_v16  ;;  %v7802_v46 = vsub.f32 %v7711_v19, %v2522_v42  ;;  %v2585_v9 = vsel %vm66_vm0, %v2553_v26, 0.0  ;;  %v2582_v22 = vsel %vm66_vm0, %v2552_v37, 0.0 }
 0xce8   :  { %2586 = vadd.xlane.f32.xlu0 %v2585_v9  ;;  %2583 = vadd.xlane.f32.xlu1 %v2582_v22  ;;  %v2500_v18 = vpop.xlane.xlu1 %2499 }
 0xce9   :  { %v2524_v14 = vmul.f32 0.03125, %v2500_v18  ;;  %v2555_v27 = vmul.f32 %v7799_v25, %v7799_v25  ;;  %v2554_v11 = vmul.f32 %v7802_v46, %v7802_v46 }
 0xceb   :  { %v7811_v10 = vsub.f32 %v7714_v56, %v2524_v14  ;;  %v2591_v6 = vsel %vm66_vm0, %v2555_v27, 0.0  ;;  %v2588_v38 = vsel %vm66_vm0, %v2554_v11, 0.0 }
 0xcec   :  { %2592 = vadd.xlane.f32.xlu0 %v2591_v6  ;;  %2589 = vadd.xlane.f32.xlu1 %v2588_v38 }
 0xced   :  { %v2556_v49 = vmul.f32 %v7811_v10, %v7811_v10 }
 0xcef   :  { %v2594_v28 = vsel %vm66_vm0, %v2556_v49, 0.0 }
 0xcf0   :  { %2595 = vadd.xlane.f32.xlu1 %v2594_v28 }
 0xd0d   :  { %v2503_v29 = vpop.xlane.xlu0 %2502 }
 0xd0e   :  { %v2525_v24 = vmul.f32 0.03125, %v2503_v29 }
 0xd10   :  { %v7825_v33 = vsub.f32 %v7725_v13, %v2525_v24 }
 0xd11   :  { %v2509_v0 = vpop.xlane.xlu0 %2508  ;;  %v2506_v39 = vpop.xlane.xlu1 %2505 }
 0xd12   :  { %v2527_v58 = vmul.f32 0.03125, %v2509_v0  ;;  %v2526_v55 = vmul.f32 0.03125, %v2506_v39  ;;  %v2557_v5 = vmul.f32 %v7825_v33, %v7825_v33 }
 0xd14   :  { %v7830_v61 = vsub.f32 %v7728_v15, %v2527_v58  ;;  %v7833_v30 = vsub.f32 %v7735_v51, %v2526_v55  ;;  %v2597_v35 = vsel %vm66_vm0, %v2557_v5, 0.0 }
 0xd15   :  { %2598 = vadd.xlane.f32.xlu0 %v2597_v35  ;;  %v2512_v20 = vpop.xlane.xlu1 %2511 }
 0xd16   :  { %v2528_v21 = vmul.f32 0.03125, %v2512_v20  ;;  %v2559_v59 = vmul.f32 %v7830_v61, %v7830_v61  ;;  %v2558_v2 = vmul.f32 %v7833_v30, %v7833_v30 }
 0xd18   :  { %v7841_v63 = vsub.f32 %v7738_v36, %v2528_v21  ;;  %v2603_v54 = vsel %vm66_vm0, %v2559_v59, 0.0  ;;  %v2600_v17 = vsel %vm66_vm0, %v2558_v2, 0.0  ;;  %v7851_v59 = vld [vmem:[%s8992_s1 + $0x1] ss:$0 sm:$0xff] }
 0xd19   :  { %2604 = vadd.xlane.f32.xlu0 %v2603_v54  ;;  %2601 = vadd.xlane.f32.xlu1 %v2600_v17 }
 0xd1a   :  { %v2560_v47 = vmul.f32 %v7841_v63, %v7841_v63 }
 0xd1c   :  { %v2606_v60 = vsel %vm66_vm0, %v2560_v47, 0.0  ;;  %v7857_v47 = vld [vmem:[%s8993_s2 + $0x1] ss:$0 sm:$0xff] }
 0xd1d   :  { %2607 = vadd.xlane.f32.xlu1 %v2606_v60 }
 0xd5f   :  { %v2563_v16 = vpop.xlane.xlu0 %2562 }
 0xd60   :  { %v2609_v42 = vmul.f32 0.03125, %v2563_v16 }
 0xd62   :  { %v2625_v26 = vadd.f32 1e-05, %v2609_v42 }
 0xd63   :  { %v2569_v37 = vpop.xlane.xlu0 %2568  ;;  %v2566_v9 = vpop.xlane.xlu1 %2565 }
 0xd64   :  { %6061 = vrsqrt.f32 %v2625_v26  ;;  %v2611_v22 = vmul.f32 0.03125, %v2569_v37  ;;  %v2610_v18 = vmul.f32 0.03125, %v2566_v9 }
 0xd66   :  { %v2627_v14 = vadd.f32 1e-05, %v2611_v22  ;;  %v2626_v27 = vadd.f32 1e-05, %v2610_v18 }
 0xd67   :  { %v2572_v6 = vpop.xlane.xlu1 %2571 }
 0xd68   :  { %6063 = vrsqrt.f32 %v2627_v14  ;;  %v2612_v49 = vmul.f32 0.03125, %v2572_v6 }
 0xd69   :  { %v2575_v11 = vpop.xlane.xlu0 %2574  ;;  %6065 = vrsqrt.f32 %v2626_v27 }
 0xd6a   :  { %v2613_v38 = vmul.f32 0.03125, %v2575_v11  ;;  %v2628_v32 = vadd.f32 1e-05, %v2612_v49 }
 0xd6c   :  { %v2629_v28 = vadd.f32 1e-05, %v2613_v38 }
 0xd6d   :  { %v2581_v57 = vpop.xlane.xlu0 %2580  ;;  %v2578_v29 = vpop.xlane.xlu1 %2577 }
 0xd6e   :  { %6067 = vrsqrt.f32 %v2629_v28  ;;  %v2615_v24 = vmul.f32 0.03125, %v2581_v57  ;;  %v2614_v0 = vmul.f32 0.03125, %v2578_v29 }
 0xd6f   :  { %6069 = vrsqrt.f32 %v2628_v32 }
 0xd70   :  { %v2631_v39 = vadd.f32 1e-05, %v2615_v24  ;;  %v2630_v58 = vadd.f32 1e-05, %v2614_v0 }
 0xd71   :  { %v2587_v55 = vpop.xlane.xlu0 %2586  ;;  %v2584_v5 = vpop.xlane.xlu1 %2583 }
 0xd72   :  { %6071 = vrsqrt.f32 %v2631_v39  ;;  %v2617_v35 = vmul.f32 0.03125, %v2587_v55  ;;  %v2616_v20 = vmul.f32 0.03125, %v2584_v5  ;;  %v6062_v21 = vpop.eup %6061 }
 0xd73   :  { %6073 = vrsqrt.f32 %v2630_v58  ;;  %v2657_v17 = vmul.f32 %v6062_v21, %v7747_v12 }
 0xd74   :  { %v2633_v2 = vadd.f32 1e-05, %v2617_v35  ;;  %v2632_v54 = vadd.f32 1e-05, %v2616_v20 }
 0xd75   :  { %v2593_v60 = vpop.xlane.xlu0 %2592  ;;  %v2590_v16 = vpop.xlane.xlu1 %2589  ;;  %v2679_v37 = vmul.f32 %v7851_v59, %v2657_v17 }
 0xd76   :  { %6075 = vrsqrt.f32 %v2633_v2  ;;  %v2619_v42 = vmul.f32 0.03125, %v2593_v60  ;;  %v2618_v26 = vmul.f32 0.03125, %v2590_v16  ;;  %v6064_v9 = vpop.eup %6063 }
 0xd77   :  { %6077 = vrsqrt.f32 %v2632_v54  ;;  %v6066_v22 = vpop.eup %6065  ;;  %v2659_v18 = vmul.f32 %v6064_v9, %v7752_v1  ;;  %v2701_v12 = vadd.f32 %v7857_v47, %v2679_v37 }
 0xd78   :  { %v2635_v14 = vadd.f32 1e-05, %v2619_v42  ;;  %v2634_v27 = vadd.f32 1e-05, %v2618_v26  ;;  %v2658_v6 = vmul.f32 %v6066_v22, %v7755_v34 }
 0xd79   :  { %v2596_v11 = vpop.xlane.xlu1 %2595  ;;  %v2681_v38 = vmul.f32 %v7851_v59, %v2659_v18 }
 0xd7a   :  { %6079 = vrsqrt.f32 %v2635_v14  ;;  %v2620_v49 = vmul.f32 0.03125, %v2596_v11  ;;  %v2680_v32 = vmul.f32 %v7851_v59, %v2658_v6 }
 0xd7b   :  { %v6068_v28 = vpop.eup %6067  ;;  %6081 = vrsqrt.f32 %v2634_v27  ;;  %v2703_v24 = vadd.f32 %v7857_v47, %v2681_v38 }
 0xd7c   :  { %v6070_v57 = vpop.eup %6069  ;;  %v2636_v29 = vadd.f32 1e-05, %v2620_v49  ;;  %v2661_v1 = vmul.f32 %v6068_v28, %v7763_v48  ;;  %v2702_v39 = vadd.f32 %v7857_v47, %v2680_v32 }
 0xd7d   :  { %v2660_v0 = vmul.f32 %v6070_v57, %v7766_v45 }
 0xd7e   :  { %6083 = vrsqrt.f32 %v2636_v29  ;;  %v2683_v34 = vmul.f32 %v7851_v59, %v2661_v1  ;;  %v2717_v5 = vpack.c.bf16 %v2702_v39, %v2701_v12 }
 0xd7f   :  { %v6072_v58 = vpop.eup %6071  ;;  %v2682_v55 = vmul.f32 %v7851_v59, %v2660_v0 }
 0xd80   :  { %v6074_v35 = vpop.eup %6073  ;;  %v2705_v20 = vadd.f32 %v7857_v47, %v2683_v34  ;;  %v2663_v21 = vmul.f32 %v6072_v58, %v7775_v43  ;;  %5539 = vmatprep.mubr.msk.bf16.mxu0 %vm66_vm0, %v2717_v5 }
 0xd81   :  { %v2704_v48 = vadd.f32 %v7857_v47, %v2682_v55  ;;  %v2662_v45 = vmul.f32 %v6074_v35, %v7778_v52 }
 0xd82   :  { %v2685_v2 = vmul.f32 %v7851_v59, %v2663_v21 }
 0xd83   :  { %v6076_v54 = vpop.eup %6075  ;;  %v2718_v17 = vpack.c.bf16 %v2704_v48, %v2703_v24  ;;  %v2684_v60 = vmul.f32 %v7851_v59, %v2662_v45 }
 0xd84   :  { %v6078_v16 = vpop.eup %6077  ;;  %v2707_v42 = vadd.f32 %v7857_v47, %v2685_v2  ;;  %v2665_v26 = vmul.f32 %v6076_v54, %v7787_v31 }
 0xd85   :  { %5540 = vmatmul.mubr.msk.bf16.vlgmr.msra.gmra.mxu0 %vm66_vm0, %v2718_v17  ;;  %v2706_v43 = vadd.f32 %v7857_v47, %v2684_v60  ;;  %v2664_v37 = vmul.f32 %v6078_v16, %v7790_v40 }
 0xd86   :  { %v2687_v9 = vmul.f32 %v7851_v59, %v2665_v26 }
 0xd87   :  { %v6080_v52 = vpop.eup %6079  ;;  %v2719_v22 = vpack.c.bf16 %v2706_v43, %v2705_v20  ;;  %v2686_v18 = vmul.f32 %v7851_v59, %v2664_v37 }
 0xd88   :  { %v6082_v14 = vpop.eup %6081  ;;  %v2709_v27 = vadd.f32 %v7857_v47, %v2687_v9  ;;  %v2667_v12 = vmul.f32 %v6080_v52, %v7799_v25 }
 0xd89   :  { %5543 = vmatprep.mubr.msk.bf16.mxu0 %vm66_vm0, %v2719_v22  ;;  %v2708_v31 = vadd.f32 %v7857_v47, %v2686_v18  ;;  %v2666_v11 = vmul.f32 %v6082_v14, %v7802_v46 }
 0xd8a   :  { %v2689_v6 = vmul.f32 %v7851_v59, %v2667_v12  ;;  %v4974_v12 = vld [vmem:[%s8994_s4 + $0x1] ss:$0 sm:$0xff] }
 0xd8b   :  { %v6084_v40 = vpop.eup %6083  ;;  %v2720_v38 = vpack.c.bf16 %v2708_v31, %v2707_v42  ;;  %v2688_v49 = vmul.f32 %v7851_v59, %v2666_v11 }
 0xd8c   :  { %v2668_v28 = vmul.f32 %v6084_v40, %v7811_v10  ;;  %v2711_v32 = vadd.f32 %v7857_v47, %v2689_v6 }
 0xd8d   :  { %5544 = vmatmul.mubr.msk.bf16.gmra.mxu0 %vm66_vm0, %v2720_v38  ;;  %v2710_v25 = vadd.f32 %v7857_v47, %v2688_v49 }
 0xd8e   :  { %v2690_v57 = vmul.f32 %v7851_v59, %v2668_v28 }
 0xd8f   :  { %v2721_v29 = vpack.c.bf16 %v2710_v25, %v2709_v27 }
 0xd90   :  { %v2712_v24 = vadd.f32 %v7857_v47, %v2690_v57 }
 0xd91   :  { %5547 = vmatprep.mubr.msk.bf16.mxu0 %vm66_vm0, %v2721_v29 }
 0xd92   :  { %v2722_v46 = vpack.c.bf16 %v2712_v24, %v2711_v32 }
 0xd95   :  { %5548 = vmatmul.mubr.msk.bf16.gmra.mxu0 %vm66_vm0, %v2722_v46 }
 0xd9e   :  { %v2599_v1 = vpop.xlane.xlu0 %2598 }
 0xd9f   :  { %v2621_v0 = vmul.f32 0.03125, %v2599_v1 }
 0xda1   :  { %v2637_v39 = vadd.f32 1e-05, %v2621_v0 }
 0xda2   :  { %v2605_v10 = vpop.xlane.xlu0 %2604  ;;  %v2602_v34 = vpop.xlane.xlu1 %2601 }
 0xda3   :  { %6085 = vrsqrt.f32 %v2637_v39  ;;  %v2623_v58 = vmul.f32 0.03125, %v2605_v10  ;;  %v2622_v55 = vmul.f32 0.03125, %v2602_v34 }
 0xda5   :  { %v2639_v5 = vadd.f32 1e-05, %v2623_v58  ;;  %v2638_v35 = vadd.f32 1e-05, %v2622_v55 }
 0xda6   :  { %v2608_v20 = vpop.xlane.xlu1 %2607 }
 0xda7   :  { %6087 = vrsqrt.f32 %v2639_v5  ;;  %v2624_v21 = vmul.f32 0.03125, %v2608_v20 }
 0xda8   :  { %6089 = vrsqrt.f32 %v2638_v35 }
 0xda9   :  { %v2640_v48 = vadd.f32 1e-05, %v2624_v21 }
 0xdab   :  { %6091 = vrsqrt.f32 %v2640_v48 }
 0xdb0   :  { %v6086_v45 = vpop.eup %6085 }
 0xdb1   :  { %v2669_v2 = vmul.f32 %v6086_v45, %v7825_v33 }
 0xdb3   :  { %v2691_v54 = vmul.f32 %v7851_v59, %v2669_v2 }
 0xdb4   :  { %v6088_v17 = vpop.eup %6087 }
 0xdb5   :  { %v6090_v60 = vpop.eup %6089  ;;  %v2713_v16 = vadd.f32 %v7857_v47, %v2691_v54  ;;  %v2671_v42 = vmul.f32 %v6088_v17, %v7830_v61 }
 0xdb6   :  { %v2670_v26 = vmul.f32 %v6090_v60, %v7833_v30 }
 0xdb7   :  { %v2693_v43 = vmul.f32 %v7851_v59, %v2671_v42 }
 0xdb8   :  { %v6092_v37 = vpop.eup %6091  ;;  %v2692_v9 = vmul.f32 %v7851_v59, %v2670_v26 }
 0xdb9   :  { %v2672_v52 = vmul.f32 %v6092_v37, %v7841_v63  ;;  %v2715_v22 = vadd.f32 %v7857_v47, %v2693_v43 }
 0xdba   :  { %v2714_v33 = vadd.f32 %v7857_v47, %v2692_v9 }
 0xdbb   :  { %v2694_v18 = vmul.f32 %v7851_v59, %v2672_v52 }
 0xdbc   :  { %v2723_v14 = vpack.c.bf16 %v2714_v33, %v2713_v16 }
 0xdbd   :  { %v2716_v27 = vadd.f32 %v7857_v47, %v2694_v18 }
 0xdbe   :  { %5551 = vmatprep.mubr.msk.bf16.mxu0 %vm66_vm0, %v2723_v14 }
 0xdbf   :  { %v2724_v61 = vpack.c.bf16 %v2716_v27, %v2715_v22 }
 0xdc1   :  { %5552 = vmatmul.mubr.msk.bf16.gmra.mxu0 %vm66_vm0, %v2724_v61 }
 0xe45   :  { %v5541_v30 = vpop.f32.mrf.mxu0 }
 0xe46   :  { %v2817_v11 = vadd.f32 %v5541_v30, %v4974_v12 }
 0xe47   :  { %v2808_v63 = vpop.f32.mrf.mxu0 }
 0xe48   :  { %v2809_v38 = vadd.f32 %v4974_v12, %v2808_v63 }
 0xe49   :  { %v5542_v31 = vpop.f32.mrf.mxu0 }
 0xe4a   :  { %v2820_v6 = vadd.f32 %v5542_v31, %v4974_v12 }
 0xe4b   :  { %v2811_v40 = vpop.f32.mrf.mxu0 }
 0xe4c   :  { %v7917_v59 = vpack.c.bf16 %v2820_v6, %v2817_v11  ;;  %v2812_v49 = vadd.f32 %v4974_v12, %v2811_v40 }
 0xe4d   :  { %v5545_v28 = vpop.f32.mrf.mxu0 }
 0xe4e   :  { %v7919_v47 = vpack.c.bf16 %v2812_v49, %v2809_v38  ;;  %v2833_v48 = vadd.f32 %v5545_v28, %v4974_v12 }
 0xe4f   :  { %v2824_v32 = vpop.f32.mrf.mxu0 }
 0xe50   :  { %5571 = vmatprep.mubr.msk.bf16.mxu1 %vm520_vm1, %v7919_v47  ;;  %v2825_v37 = vadd.f32 %v4974_v12, %v2824_v32 }
 0xe51   :  { %v5546_v25 = vpop.f32.mrf.mxu0 }
 0xe52   :  { %v2836_v5 = vadd.f32 %v5546_v25, %v4974_v12 }
 0xe53   :  { %v2827_v57 = vpop.f32.mrf.mxu0 }
 0xe54   :  { %v7929_v54 = vpack.c.bf16 %v2836_v5, %v2833_v48  ;;  %v2828_v26 = vadd.f32 %v4974_v12, %v2827_v57  ;;  %v4988_v5 = vld [vmem:[%s8995_s5 + $0x118] sm:$0xff] }
 0xe55   :  { %v5549_v29 = vpop.f32.mrf.mxu0 }
 0xe56   :  { %v2849_v17 = vadd.f32 %v5549_v29, %v4974_v12  ;;  %v7945_v9 = vpack.c.bf16 %v2828_v26, %v2825_v37 }
 0xe57   :  { %v2840_v24 = vpop.f32.mrf.mxu0 }
 0xe58   :  { %v2841_v42 = vadd.f32 %v4974_v12, %v2840_v24 }
 0xe59   :  { %v5550_v46 = vpop.f32.mrf.mxu0 }
 0xe5a   :  { %v2852_v45 = vadd.f32 %v5550_v46, %v4974_v12  ;;  %v4987_v46 = vld [vmem:[%s8995_s5 + $0x110] sm:$0xff] }
 0xe5b   :  { %v2843_v1 = vpop.f32.mrf.mxu0 }
 0xe5c   :  { %v7933_v60 = vpack.c.bf16 %v2852_v45, %v2849_v17  ;;  %v2844_v16 = vadd.f32 %v4974_v12, %v2843_v1 }
 0xe5e   :  { %v7939_v43 = vpack.c.bf16 %v2844_v16, %v2841_v42  ;;  %v4992_v16 = vld [vmem:[%s8995_s5 + $0x138] sm:$0xff] }
 0xe81   :  { %v5553_v0 = vpop.f32.mrf.mxu0 }
 0xe82   :  { %v2865_v34 = vadd.f32 %v5553_v0, %v4974_v12 }
 0xe83   :  { %v2856_v39 = vpop.f32.mrf.mxu0 }
 0xe84   :  { %v2857_v35 = vadd.f32 %v4974_v12, %v2856_v39 }
 0xe85   :  { %v5554_v10 = vpop.f32.mrf.mxu0 }
 0xe86   :  { %v2868_v58 = vadd.f32 %v5554_v10, %v4974_v12  ;;  %v4985_v10 = vld [vmem:[%s8995_s5 + $0x100] sm:$0xff] }
 0xe87   :  { %v2859_v55 = vpop.f32.mrf.mxu0 }
 0xe88   :  { %v7923_v20 = vpack.c.bf16 %v2868_v58, %v2865_v34  ;;  %v2860_v21 = vadd.f32 %v4974_v12, %v2859_v55  ;;  %v4986_v58 = vld [vmem:[%s8995_s5 + $0x108] sm:$0xff] }
 0xe8a   :  { %v7925_v2 = vpack.c.bf16 %v2860_v21, %v2857_v35  ;;  %2918 = vrot.lane.b32.xlu0 %v7923_v20, %s6301_s23 }
 0xe8c   :  { %2916 = vrot.lane.b32.xlu1 %v7925_v2, %s6301_s23 }
 0xe8e   :  { %2910 = vrot.lane.b32.xlu0 %v7929_v54, %s6301_s23 }
 0xe90   :  { %2914 = vrot.lane.b32.xlu1 %v7933_v60, %s6301_s23 }
 0xe92   :  { %2906 = vrot.lane.b32.xlu0 %v7917_v59, %s6301_s23 }
 0xe94   :  { %2912 = vrot.lane.b32.xlu1 %v7939_v43, %s6301_s23 }
 0xe96   :  { %3231 = vrot.lane.b32.xlu0 %v7923_v20, %s6302_s24 }
 0xe98   :  { %2908 = vrot.lane.b32.xlu1 %v7945_v9, %s6301_s23 }
 0xe9a   :  { %3227 = vrot.lane.b32.xlu0 %v7933_v60, %s6302_s24 }
 0xe9c   :  { %2904 = vrot.lane.b32.xlu1 %v7919_v47, %s6301_s23 }
 0xe9e   :  { %3225 = vrot.lane.b32.xlu0 %v7939_v43, %s6302_s24 }
 0xea0   :  { %3221 = vrot.lane.b32.xlu1 %v7945_v9, %s6302_s24 }
 0xea2   :  { %3223 = vrot.lane.b32.xlu0 %v7929_v54, %s6302_s24 }
 0xea4   :  { %3229 = vrot.lane.b32.xlu1 %v7925_v2, %s6302_s24 }
 0xea8   :  { %3217 = vrot.lane.b32.xlu1 %v7919_v47, %s6302_s24 }
 0xefc   :  { %v2919_v52 = vpop.permute.xlu0 %2918 }
 0xefd   :  { %5787 = vmatprep.subr.msk.bf16.mxu1 %vm520_vm1, %v2919_v52  ;;  %v2966_v22 = vsel %vm520_vm1, %v2919_v52, 0  ;;  %v4990_v52 = vld [vmem:[%s8995_s5 + $0x128] sm:$0xff] }
 0xefe   :  { %5556 = vmatpush3.bf16.xpose.msra.mxu1 %v2966_v22  ;;  %v2917_v33 = vpop.permute.xlu1 %2916 }
 0xeff   :  { %5788 = vmatprep.subr.msk.bf16.mxu1 %vm520_vm1, %v2917_v33  ;;  %v2963_v61 = vsel %vm520_vm1, %v2917_v33, 0 }
 0xf00   :  { %v2911_v18 = vpop.permute.xlu0 %2910 }
 0xf01   :  { %v2954_v32 = vsel %vm520_vm1, %v2911_v18, 0 }
 0xf02   :  { %v2915_v14 = vpop.permute.xlu1 %2914 }
 0xf03   :  { %v2960_v31 = vsel %vm520_vm1, %v2915_v14, 0 }
 0xf04   :  { %v2907_v27 = vpop.permute.xlu0 %2906 }
 0xf05   :  { %v2948_v29 = vsel %vm520_vm1, %v2907_v27, 0 }
 0xf06   :  { %5558 = vmatpush3.bf16.xpose.msra.mxu1 %v2963_v61  ;;  %v2913_v30 = vpop.permute.xlu1 %2912 }
 0xf07   :  { %5789 = vmatprep.subr.msk.bf16.mxu1 %vm520_vm1, %v2915_v14  ;;  %v2957_v38 = vsel %vm520_vm1, %v2913_v30, 0  ;;  %v4996_v14 = vld [vmem:[%s8995_s5 + $0x158] sm:$0xff] }
 0xf08   :  { %v3232_v12 = vpop.permute.xlu0 %3231 }
 0xf09   :  { %5587 = vmatprep.subr.bf16.mxu0 %v3232_v12 }
 0xf0a   :  { %5588 = vmatpush3.bf16.msra.mxu0 %v3232_v12  ;;  %v2909_v63 = vpop.permute.xlu1 %2908  ;;  %v4994_v12 = vld [vmem:[%s8995_s5 + $0x148] sm:$0xff] }
 0xf0b   :  { %v2951_v57 = vsel %vm520_vm1, %v2909_v63, 0 }
 0xf0c   :  { %v3228_v40 = vpop.permute.xlu0 %3227 }
 0xf0e   :  { %5560 = vmatpush3.bf16.xpose.msra.mxu1 %v2960_v31  ;;  %v2905_v11 = vpop.permute.xlu1 %2904  ;;  %v4991_v31 = vld [vmem:[%s8995_s5 + $0x130] sm:$0xff] }
 0xf0f   :  { %5790 = vmatprep.subr.msk.bf16.mxu1 %vm520_vm1, %v2913_v30  ;;  %v2945_v24 = vsel %vm520_vm1, %v2905_v11, 0 }
 0xf10   :  { %v3226_v28 = vpop.permute.xlu0 %3225 }
 0xf12   :  { %v3222_v6 = vpop.permute.xlu1 %3221 }
 0xf14   :  { %v3224_v25 = vpop.permute.xlu0 %3223 }
 0xf16   :  { %5562 = vmatpush3.bf16.xpose.msra.mxu1 %v2957_v38  ;;  %v3230_v49 = vpop.permute.xlu1 %3229  ;;  %v4995_v38 = vld [vmem:[%s8995_s5 + $0x150] sm:$0xff] }
 0xf17   :  { %5791 = vmatprep.subr.msk.bf16.mxu1 %vm520_vm1, %v2911_v18  ;;  %5589 = vmatprep.subr.bf16.mxu0 %v3230_v49 }
 0xf18   :  { %5590 = vmatpush3.bf16.msra.mxu0 %v3230_v49 }
 0xf19   :  { %5591 = vmatprep.subr.bf16.mxu0 %v3228_v40 }
 0xf1c   :  { %5592 = vmatpush3.bf16.msra.mxu0 %v3228_v40 }
 0xf1d   :  { %5593 = vmatprep.subr.bf16.mxu0 %v3226_v28 }
 0xf1e   :  { %5564 = vmatpush3.bf16.xpose.msra.mxu1 %v2954_v32 }
 0xf1f   :  { %5792 = vmatprep.subr.msk.bf16.mxu1 %vm520_vm1, %v2909_v63 }
 0xf20   :  { %5594 = vmatpush3.bf16.msra.mxu0 %v3226_v28  ;;  %v4993_v28 = vld [vmem:[%s8995_s5 + $0x140] sm:$0xff] }
 0xf21   :  { %5595 = vmatprep.subr.bf16.mxu0 %v3224_v25 }
 0xf24   :  { %5596 = vmatpush3.bf16.msra.mxu0 %v3224_v25 }
 0xf25   :  { %5597 = vmatprep.subr.bf16.mxu0 %v3222_v6 }
 0xf26   :  { %5566 = vmatpush3.bf16.xpose.msra.mxu1 %v2951_v57  ;;  %v4999_v57 = vld [vmem:[%s8995_s5 + $0x170] sm:$0xff] }
 0xf27   :  { %5793 = vmatprep.subr.msk.bf16.mxu1 %vm520_vm1, %v2907_v27 }
 0xf28   :  { %5598 = vmatpush3.bf16.msra.mxu0 %v3222_v6  ;;  %v4989_v6 = vld [vmem:[%s8995_s5 + $0x120] sm:$0xff] }
 0xf2e   :  { %5568 = vmatpush3.bf16.xpose.msra.mxu1 %v2948_v29 }
 0xf2f   :  { %5794 = vmatprep.subr.msk.bf16.mxu1 %vm520_vm1, %v2905_v11 }
 0xf36   :  { %5570 = vmatpush3.bf16.xpose.msra.mxu1 %v2945_v24 }
 0xf3d   :  { %5572 = vmatmul.mubr.msk.bf16.vlgmr.msra.gmra.mxu1 %vm520_vm1, %v7917_v59 }
 0xf3e   :  { %5575 = vmatprep.mubr.msk.bf16.mxu1 %vm520_vm1, %v7945_v9 }
 0xf45   :  { %5576 = vmatmul.mubr.msk.bf16.gmra.mxu1 %vm520_vm1, %v7929_v54 }
 0xf46   :  { %5579 = vmatprep.mubr.msk.bf16.mxu1 %vm520_vm1, %v7939_v43 }
 0xf4d   :  { %5580 = vmatmul.mubr.msk.bf16.gmra.mxu1 %vm520_vm1, %v7933_v60 }
 0xf4e   :  { %5583 = vmatprep.mubr.msk.bf16.mxu1 %vm520_vm1, %v7925_v2 }
 0xf55   :  { %5584 = vmatmul.mubr.msk.bf16.gmra.mxu1 %vm520_vm1, %v7923_v20 }
 0xffd   :  { %v5573_v1 = vpop.f32.mrf.mxu1 }
 0xffe   :  { %v7998_v0 = vadd.f32 %v5573_v1, %v4987_v46  ;;  %v4997_v46 = vld [vmem:[%s8995_s5 + $0x160] sm:$0xff]  ;;  %v5000_v1 = vld [vmem:[%s8995_s5 + $0x178] sm:$0xff] }
 0xfff   :  { %v3002_v39 = vpop.f32.mrf.mxu1 }
0x1000   :  { %3069 = vmax.xlane.f32.xlu0 %v7998_v0  ;;  %v8007_v55 = vadd.f32 %v4985_v10, %v3002_v39 }
0x1001   :  { %v5574_v34 = vpop.f32.mrf.mxu1 }
0x1002   :  { %v8015_v45 = vadd.f32 %v5574_v34, %v4988_v5  ;;  %v4998_v5 = vld [vmem:[%s8995_s5 + $0x168] sm:$0xff] }
0x1003   :  { %v3005_v35 = vpop.f32.mrf.mxu1 }
0x1004   :  { %v8012_v21 = vadd.f32 %v4986_v58, %v3005_v35  ;;  %3065 = vmax.xlane.f32.xlu0 %v8007_v55 }
0x1005   :  { %v5577_v48 = vpop.f32.mrf.mxu1 }
0x1006   :  { %3067 = vmax.xlane.f32.xlu1 %v8012_v21  ;;  %v8052_v11 = vadd.f32 %v5577_v48, %v4991_v31 }
0x1007   :  { %v3018_v17 = vpop.f32.mrf.mxu1 }
0x1008   :  { %3071 = vmax.xlane.f32.xlu0 %v8015_v45  ;;  %v8058_v40 = vadd.f32 %v4989_v6, %v3018_v17 }
0x1009   :  { %v5578_v42 = vpop.f32.mrf.mxu1 }
0x100a   :  { %v8022_v26 = vadd.f32 %v5578_v42, %v4992_v16  ;;  %v3218_v16 = vpop.permute.xlu1 %3217 }
0x100b   :  { %v3021_v37 = vpop.f32.mrf.mxu1 }
0x100c   :  { %3079 = vmax.xlane.f32.xlu1 %v8022_v26  ;;  %v8028_v33 = vadd.f32 %v4990_v52, %v3021_v37 }
0x100d   :  { %v5581_v22 = vpop.f32.mrf.mxu1 }
0x100e   :  { %v8064_v49 = vadd.f32 %v5581_v22, %v4995_v38 }
0x100f   :  { %v3034_v18 = vpop.f32.mrf.mxu1 }
0x1010   :  { %3075 = vmax.xlane.f32.xlu1 %v8028_v33  ;;  %v8070_v25 = vadd.f32 %v4993_v28, %v3034_v18 }
0x1011   :  { %v5582_v27 = vpop.f32.mrf.mxu1 }
0x1012   :  { %v8034_v61 = vadd.f32 %v5582_v27, %v4996_v14 }
0x1013   :  { %v3037_v30 = vpop.f32.mrf.mxu1 }
0x1014   :  { %3087 = vmax.xlane.f32.xlu1 %v8034_v61  ;;  %v8040_v63 = vadd.f32 %v4994_v12, %v3037_v30 }
0x1015   :  { %v5585_v32 = vpop.f32.mrf.mxu1 }
0x1016   :  { %v8076_v24 = vadd.f32 %v5585_v32, %v4999_v57 }
0x1017   :  { %v3050_v29 = vpop.f32.mrf.mxu1 }
0x1018   :  { %3083 = vmax.xlane.f32.xlu1 %v8040_v63  ;;  %v8085_v10 = vadd.f32 %v4997_v46, %v3050_v29 }
0x1019   :  { %v5586_v39 = vpop.f32.mrf.mxu1 }
0x101a   :  { %v8087_v34 = vadd.f32 %v5586_v39, %v5000_v1 }
0x101b   :  { %v3053_v58 = vpop.f32.mrf.mxu1 }
0x101c   :  { %v8094_v35 = vadd.f32 %v4998_v5, %v3053_v58 }
0x101e   :  { %3219 = vrot.lane.b32.xlu0 %v7917_v59, %s6302_s24 }
0x1029   :  { %3399 = vrot.lane.b32.xlu1 %v7925_v2, %s6303_s27 }
0x102d   :  { %3395 = vrot.lane.b32.xlu1 %v7939_v43, %s6303_s27 }
0x103d   :  { %3077 = vmax.xlane.f32.xlu0 %v8052_v11 }
0x1041   :  { %3073 = vmax.xlane.f32.xlu0 %v8058_v40 }
0x1045   :  { %3085 = vmax.xlane.f32.xlu0 %v8064_v49 }
0x1049   :  { %3081 = vmax.xlane.f32.xlu0 %v8070_v25 }
0x104d   :  { %3093 = vmax.xlane.f32.xlu0 %v8076_v24 }
0x1051   :  { %3095 = vmax.xlane.f32.xlu1 %v8087_v34  ;;  %3089 = vmax.xlane.f32.xlu0 %v8085_v10 }
0x1055   :  { %3091 = vmax.xlane.f32.xlu1 %v8094_v35 }
0x1067   :  { %3401 = vrot.lane.b32.xlu0 %v7923_v20, %s6303_s27 }
0x106b   :  { %3397 = vrot.lane.b32.xlu0 %v7933_v60, %s6303_s27 }
0x106f   :  { %3393 = vrot.lane.b32.xlu0 %v7929_v54, %s6303_s27 }
0x1089   :  { %v3070_v48 = vpop.xlane.xlu0 %3069 }
0x108a   :  { %v3099_v17 = vsub.f32 %v7998_v0, %v3070_v48 }
0x108c   :  { %v3117_v42 = vmul.f32 1.442695, %v3099_v17 }
0x108d   :  { %v3066_v37 = vpop.xlane.xlu0 %3065 }
0x108e   :  { %6093 = vpow2.f32 %v3117_v42  ;;  %v3097_v52 = vsub.f32 %v8007_v55, %v3066_v37 }
0x108f   :  { %v3068_v22 = vpop.xlane.xlu1 %3067 }
0x1090   :  { %v3113_v18 = vmul.f32 1.442695, %v3097_v52  ;;  %v3098_v27 = vsub.f32 %v8012_v21, %v3068_v22 }
0x1091   :  { %v3072_v14 = vpop.xlane.xlu0 %3071 }
0x1092   :  { %6095 = vpow2.f32 %v3113_v18  ;;  %v3100_v30 = vsub.f32 %v8015_v45, %v3072_v14  ;;  %v3115_v6 = vmul.f32 1.442695, %v3098_v27 }
0x1094   :  { %v3119_v12 = vmul.f32 1.442695, %v3100_v30 }
0x1095   :  { %v3220_v31 = vpop.permute.xlu0 %3219  ;;  %v3080_v38 = vpop.xlane.xlu1 %3079 }
0x1096   :  { %6097 = vpow2.f32 %v3119_v12  ;;  %5599 = vmatprep.subr.bf16.mxu0 %v3220_v31  ;;  %v3104_v39 = vsub.f32 %v8022_v26, %v3080_v38 }
0x1097   :  { %5600 = vmatpush3.bf16.msra.mxu0 %v3220_v31  ;;  %6099 = vpow2.f32 %v3115_v6 }
0x1098   :  { %5601 = vmatprep.subr.bf16.mxu0 %v3218_v16  ;;  %v3127_v42 = vmul.f32 1.442695, %v3104_v39 }
0x1099   :  { %v3076_v28 = vpop.xlane.xlu1 %3075 }
0x109a   :  { %v3102_v57 = vsub.f32 %v8028_v33, %v3076_v28 }
0x109b   :  { %v8107_v0 = vpop.eup %6093  ;;  %5602 = vmatpush3.bf16.msra.mxu0 %v3218_v16 }
0x109c   :  { %3149 = vadd.xlane.f32.xlu1 %v8107_v0  ;;  %v3123_v58 = vmul.f32 1.442695, %v3102_v57 }
0x109d   :  { %v3088_v32 = vpop.xlane.xlu1 %3087 }
0x109f   :  { %v8110_v55 = vpop.eup %6095 }
0x10a0   :  { %3145 = vadd.xlane.f32.xlu1 %v8110_v55 }
0x10a1   :  { %v3084_v5 = vpop.xlane.xlu1 %3083 }
0x10a3   :  { %v8113_v21 = vpop.eup %6097 }
0x10a4   :  { %3151 = vadd.xlane.f32.xlu1 %v8113_v21  ;;  %v8116_v45 = vpop.eup %6099 }
0x10a5   :  { %v8126_v33 = vpop.permute.xlu1 %3399 }
0x10a8   :  { %3147 = vadd.xlane.f32.xlu1 %v8116_v45 }
0x10a9   :  { %v8131_v30 = vpop.permute.xlu1 %3395 }
0x10b9   :  { %3391 = vrot.lane.b32.xlu1 %v7945_v9, %s6303_s27 }
0x10c6   :  { %v3078_v29 = vpop.xlane.xlu0 %3077 }
0x10c7   :  { %v3103_v46 = vsub.f32 %v8052_v11, %v3078_v29  ;;  %v3108_v11 = vsub.f32 %v8034_v61, %v3088_v32 }
0x10c9   :  { %v3125_v1 = vmul.f32 1.442695, %v3103_v46  ;;  %v3135_v27 = vmul.f32 1.442695, %v3108_v11 }
0x10ca   :  { %v3074_v48 = vpop.xlane.xlu0 %3073 }
0x10cb   :  { %6101 = vpow2.f32 %v3125_v1  ;;  %v3101_v17 = vsub.f32 %v8058_v40, %v3074_v48  ;;  %v3106_v40 = vsub.f32 %v8040_v63, %v3084_v5 }
0x10cc   :  { %6103 = vpow2.f32 %v3123_v58 }
0x10cd   :  { %v3121_v16 = vmul.f32 1.442695, %v3101_v17  ;;  %v3131_v61 = vmul.f32 1.442695, %v3106_v40 }
0x10ce   :  { %v3086_v37 = vpop.xlane.xlu0 %3085 }
0x10cf   :  { %6105 = vpow2.f32 %v3121_v16  ;;  %v3107_v52 = vsub.f32 %v8064_v49, %v3086_v37 }
0x10d0   :  { %6107 = vpow2.f32 %v3127_v42 }
0x10d1   :  { %v3133_v22 = vmul.f32 1.442695, %v3107_v52 }
0x10d2   :  { %v3082_v26 = vpop.xlane.xlu0 %3081 }
0x10d3   :  { %6109 = vpow2.f32 %v3133_v22  ;;  %v3105_v18 = vsub.f32 %v8070_v25, %v3082_v26 }
0x10d5   :  { %v3129_v14 = vmul.f32 1.442695, %v3105_v18 }
0x10d6   :  { %v3094_v12 = vpop.xlane.xlu0 %3093 }
0x10d7   :  { %6111 = vpow2.f32 %v3129_v14  ;;  %v3111_v49 = vsub.f32 %v8076_v24, %v3094_v12 }
0x10d8   :  { %v8134_v31 = vpop.eup %6101  ;;  %6113 = vpow2.f32 %v3135_v27 }
0x10d9   :  { %v3141_v6 = vmul.f32 1.442695, %v3111_v49  ;;  %3157 = vadd.xlane.f32.xlu0 %v8134_v31  ;;  %v8137_v25 = vpop.eup %6103 }
0x10da   :  { %v3090_v38 = vpop.xlane.xlu0 %3089  ;;  %v3096_v28 = vpop.xlane.xlu1 %3095 }
0x10db   :  { %6115 = vpow2.f32 %v3141_v6  ;;  %v3109_v63 = vsub.f32 %v8085_v10, %v3090_v38  ;;  %v3112_v32 = vsub.f32 %v8087_v34, %v3096_v28  ;;  %v3446_v38 = vsel %vm520_vm1, %v8126_v33, 0 }
0x10dc   :  { %v8141_v57 = vpop.eup %6105  ;;  %6117 = vpow2.f32 %v3131_v61 }
0x10dd   :  { %v3137_v29 = vmul.f32 1.442695, %v3109_v63  ;;  %3153 = vadd.xlane.f32.xlu0 %v8141_v57  ;;  %3155 = vadd.xlane.f32.xlu1 %v8137_v25  ;;  %v3143_v24 = vmul.f32 1.442695, %v3112_v32  ;;  %v8145_v39 = vpop.eup %6107 }
0x10de   :  { %v3402_v46 = vpop.permute.xlu0 %3401  ;;  %v3092_v1 = vpop.xlane.xlu1 %3091 }
0x10df   :  { %6119 = vpow2.f32 %v3137_v29  ;;  %v3110_v58 = vsub.f32 %v8094_v35, %v3092_v1  ;;  %5795 = vmatprep.subr.msk.bf16.mxu0 %vm520_vm1, %v3402_v46  ;;  %v3449_v61 = vsel %vm520_vm1, %v3402_v46, 0 }
0x10e0   :  { %v8149_v10 = vpop.eup %6109  ;;  %6121 = vpow2.f32 %v3143_v24 }
0x10e1   :  { %v3139_v34 = vmul.f32 1.442695, %v3110_v58  ;;  %3159 = vadd.xlane.f32.xlu0 %v8145_v39  ;;  %3165 = vadd.xlane.f32.xlu1 %v8149_v10 }
0x10e3   :  { %6123 = vpow2.f32 %v3139_v34 }
0x10e4   :  { %v8153_v5 = vpop.eup %6111 }
0x10e5   :  { %3161 = vadd.xlane.f32.xlu1 %v8153_v5  ;;  %v8156_v48 = vpop.eup %6113 }
0x10e8   :  { %v8158_v17 = vpop.eup %6115 }
0x10e9   :  { %3173 = vadd.xlane.f32.xlu0 %v8158_v17  ;;  %3167 = vadd.xlane.f32.xlu1 %v8156_v48  ;;  %v8162_v35 = vpop.eup %6117 }
0x10ec   :  { %v8164_v16 = vpop.eup %6119 }
0x10ed   :  { %3169 = vadd.xlane.f32.xlu0 %v8164_v16  ;;  %3163 = vadd.xlane.f32.xlu1 %v8162_v35  ;;  %v8168_v42 = vpop.eup %6121 }
0x10f0   :  { %v8170_v37 = vpop.eup %6123 }
0x10f1   :  { %3175 = vadd.xlane.f32.xlu0 %v8168_v42  ;;  %3171 = vadd.xlane.f32.xlu1 %v8170_v37 }
0x1102   :  { %3387 = vrot.lane.b32.xlu1 %v7919_v47, %s6303_s27 }
0x1106   :  { %3373 = vrot.lane.b32.xlu1 %v7917_v59, %s6304_s15 }
0x1107   :  { %3389 = vrot.lane.b32.xlu0 %v7917_v59, %s6303_s27 }
0x110a   :  { %3377 = vrot.lane.b32.xlu1 %v7929_v54, %s6304_s15 }
0x110b   :  { %3371 = vrot.lane.b32.xlu0 %v7919_v47, %s6304_s15 }
0x110e   :  { %3381 = vrot.lane.b32.xlu1 %v7933_v60, %s6304_s15 }
0x110f   :  { %3375 = vrot.lane.b32.xlu0 %v7945_v9, %s6304_s15 }
0x1112   :  { %3385 = vrot.lane.b32.xlu1 %v7923_v20, %s6304_s15 }
0x1113   :  { %3379 = vrot.lane.b32.xlu0 %v7939_v43, %s6304_s15 }
0x1116   :  { %3712 = vrot.lane.b32.xlu1 %v7925_v2, %s6305_s16 }
0x1117   :  { %3383 = vrot.lane.b32.xlu0 %v7925_v2, %s6304_s15 }
0x111b   :  { %3714 = vrot.lane.b32.xlu0 %v7923_v20, %s6305_s16 }
0x111f   :  { %3710 = vrot.lane.b32.xlu0 %v7933_v60, %s6305_s16 }
0x1125   :  { %v3150_v52 = vpop.xlane.xlu1 %3149 }
0x1129   :  { %v3146_v22 = vpop.xlane.xlu1 %3145 }
0x112d   :  { %v3152_v11 = vpop.xlane.xlu1 %3151 }
0x112e   :  { %6125 = vrcp.f32 %v3152_v11 }
0x112f   :  { %6127 = vrcp.f32 %v3146_v22 }
0x1130   :  { %6129 = vrcp.f32 %v3150_v52 }
0x1131   :  { %v3148_v26 = vpop.xlane.xlu1 %3147 }
0x1132   :  { %6131 = vrcp.f32 %v3148_v26 }
0x1135   :  { %v3392_v28 = vpop.permute.xlu1 %3391 }
0x113b   :  { %v6126_v18 = vpop.eup %6125 }
0x113c   :  { %v6128_v14 = vpop.eup %6127  ;;  %v3196_v2 = vmul.f32 %v6126_v18, %v8113_v21  ;;  %v3398_v21 = vpop.permute.xlu0 %3397 }
0x113d   :  { %v6130_v27 = vpop.eup %6129  ;;  %v3193_v12 = vmul.f32 %v6128_v14, %v8110_v55  ;;  %v3443_v55 = vsel %vm520_vm1, %v3398_v21, 0 }
0x113e   :  { %v3195_v60 = vmul.f32 %v6130_v27, %v8107_v0  ;;  %v3440_v0 = vsel %vm520_vm1, %v8131_v30, 0 }
0x113f   :  { %v6132_v40 = vpop.eup %6131 }
0x1140   :  { %v3194_v20 = vmul.f32 %v6132_v40, %v8116_v45  ;;  %v3210_v6 = vpack.c.bf16 %v3196_v2, %v3195_v60  ;;  %v3394_v45 = vpop.permute.xlu0 %3393 }
0x1142   :  { %v3209_v49 = vpack.c.bf16 %v3194_v20, %v3193_v12 }
0x1144   :  { %5603 = vmatprep.mubr.bf16.mxu0 %v3209_v49 }
0x1145   :  { %5604 = vmatmul.mubr.bf16.vlgmr.msra.gmra.mxu0 %v3210_v6 }
0x1146   :  { %5620 = vmatpush3.bf16.xpose.msra.mxu0 %v3449_v61 }
0x1147   :  { %5796 = vmatprep.subr.msk.bf16.mxu0 %vm520_vm1, %v8126_v33  ;;  %v3437_v33 = vsel %vm520_vm1, %v3394_v45, 0 }
0x114e   :  { %5622 = vmatpush3.bf16.xpose.msra.mxu0 %v3446_v38 }
0x114f   :  { %5797 = vmatprep.subr.msk.bf16.mxu0 %vm520_vm1, %v3398_v21 }
0x1156   :  { %5624 = vmatpush3.bf16.xpose.msra.mxu0 %v3443_v55 }
0x1157   :  { %5798 = vmatprep.subr.msk.bf16.mxu0 %vm520_vm1, %v8131_v30  ;;  %v3434_v30 = vsel %vm520_vm1, %v3392_v28, 0 }
0x115e   :  { %5626 = vmatpush3.bf16.xpose.msra.mxu0 %v3440_v0 }
0x115f   :  { %5799 = vmatprep.subr.msk.bf16.mxu0 %vm520_vm1, %v3394_v45 }
0x1162   :  { %v3158_v63 = vpop.xlane.xlu0 %3157 }
0x1166   :  { %5628 = vmatpush3.bf16.xpose.msra.mxu0 %v3437_v33  ;;  %v3154_v32 = vpop.xlane.xlu0 %3153  ;;  %v3156_v29 = vpop.xlane.xlu1 %3155 }
0x1167   :  { %6133 = vrcp.f32 %v3154_v32  ;;  %5800 = vmatprep.subr.msk.bf16.mxu0 %vm520_vm1, %v3392_v28 }
0x1168   :  { %6135 = vrcp.f32 %v3156_v29 }
0x1169   :  { %6137 = vrcp.f32 %v3158_v63 }
0x116a   :  { %v3160_v24 = vpop.xlane.xlu0 %3159  ;;  %v3166_v46 = vpop.xlane.xlu1 %3165 }
0x116b   :  { %6139 = vrcp.f32 %v3160_v24 }
0x116e   :  { %5630 = vmatpush3.bf16.xpose.msra.mxu0 %v3434_v30  ;;  %v3162_v1 = vpop.xlane.xlu1 %3161 }
0x1172   :  { %v3174_v58 = vpop.xlane.xlu0 %3173  ;;  %v3168_v34 = vpop.xlane.xlu1 %3167 }
0x1173   :  { %6141 = vrcp.f32 %v3168_v34 }
0x1174   :  { %v6134_v52 = vpop.eup %6133  ;;  %6143 = vrcp.f32 %v3162_v1 }
0x1175   :  { %v6136_v22 = vpop.eup %6135  ;;  %v3197_v11 = vmul.f32 %v6134_v52, %v8141_v57  ;;  %6145 = vrcp.f32 %v3166_v46 }
0x1176   :  { %v6138_v26 = vpop.eup %6137  ;;  %v3170_v18 = vpop.xlane.xlu0 %3169  ;;  %v3198_v27 = vmul.f32 %v6136_v22, %v8137_v25 }
0x1177   :  { %v3164_v14 = vpop.xlane.xlu1 %3163  ;;  %v3199_v12 = vmul.f32 %v6138_v26, %v8134_v31 }
0x1178   :  { %v6140_v40 = vpop.eup %6139  ;;  %6147 = vrcp.f32 %v3164_v14  ;;  %v3211_v2 = vpack.c.bf16 %v3198_v27, %v3197_v11 }
0x1179   :  { %v3200_v20 = vmul.f32 %v6140_v40, %v8145_v39  ;;  %6149 = vrcp.f32 %v3170_v18 }
0x117a   :  { %5607 = vmatprep.mubr.bf16.mxu0 %v3211_v2  ;;  %v3176_v60 = vpop.xlane.xlu0 %3175 }
0x117b   :  { %v3172_v49 = vpop.xlane.xlu1 %3171  ;;  %v3212_v6 = vpack.c.bf16 %v3200_v20, %v3199_v12 }
0x117c   :  { %6151 = vrcp.f32 %v3172_v49 }
0x117d   :  { %6153 = vrcp.f32 %v3176_v60  ;;  %5608 = vmatmul.mubr.bf16.gmra.mxu0 %v3212_v6 }
0x117e   :  { %v3390_v57 = vpop.permute.xlu0 %3389  ;;  %6155 = vrcp.f32 %v3174_v58 }
0x117f   :  { %v3388_v61 = vpop.permute.xlu1 %3387  ;;  %5801 = vmatprep.subr.msk.bf16.mxu0 %vm520_vm1, %v3390_v57  ;;  %v3431_v25 = vsel %vm520_vm1, %v3390_v57, 0 }
0x1180   :  { %5632 = vmatpush3.bf16.xpose.msra.mxu0 %v3431_v25  ;;  %v6142_v31 = vpop.eup %6141  ;;  %v3428_v24 = vsel %vm520_vm1, %v3388_v61, 0 }
0x1181   :  { %5802 = vmatprep.subr.msk.bf16.mxu0 %vm520_vm1, %v3388_v61  ;;  %v6144_v21 = vpop.eup %6143  ;;  %v3204_v45 = vmul.f32 %v6142_v31, %v8156_v48 }
0x1182   :  { %v3372_v39 = vpop.permute.xlu0 %3371  ;;  %v6146_v55 = vpop.eup %6145  ;;  %v3201_v33 = vmul.f32 %v6144_v21, %v8153_v5 }
0x1183   :  { %v3374_v38 = vpop.permute.xlu1 %3373  ;;  %v3203_v46 = vmul.f32 %v6146_v55, %v8149_v10 }
0x1185   :  { %v6148_v0 = vpop.eup %6147  ;;  %v3214_v58 = vpack.c.bf16 %v3204_v45, %v3203_v46  ;;  %v5012_v46 = vld [vmem:[%s8995_s5 + $0x198] sm:$0xff] }
0x1186   :  { %v3376_v28 = vpop.permute.xlu0 %3375  ;;  %v3202_v32 = vmul.f32 %v6148_v0, %v8162_v35  ;;  %v6150_v29 = vpop.eup %6149  ;;  %v5011_v0 = vld [vmem:[%s8995_s5 + $0x190] sm:$0xff] }
0x1187   :  { %v3378_v63 = vpop.permute.xlu1 %3377  ;;  %v3205_v48 = vmul.f32 %v6150_v29, %v8164_v16  ;;  %v5010_v29 = vld [vmem:[%s8995_s5 + $0x188] sm:$0xff] }
0x1188   :  { %5634 = vmatpush3.bf16.xpose.msra.mxu0 %v3428_v24  ;;  %v3213_v30 = vpack.c.bf16 %v3202_v32, %v3201_v33  ;;  %v5009_v33 = vld [vmem:[%s8995_s5 + $0x180] sm:$0xff] }
0x1189   :  { %v6152_v1 = vpop.eup %6151 }
0x118a   :  { %v6154_v34 = vpop.eup %6153  ;;  %5611 = vmatprep.mubr.bf16.mxu0 %v3213_v30  ;;  %v3380_v52 = vpop.permute.xlu0 %3379  ;;  %v3206_v11 = vmul.f32 %v6152_v1, %v8170_v37 }
0x118b   :  { %v3382_v22 = vpop.permute.xlu1 %3381  ;;  %5612 = vmatmul.mubr.bf16.gmra.mxu0 %v3214_v58  ;;  %v6156_v5 = vpop.eup %6155  ;;  %v3208_v26 = vmul.f32 %v6154_v34, %v8168_v42 }
0x118c   :  { %v3215_v35 = vpack.c.bf16 %v3206_v11, %v3205_v48  ;;  %v3207_v14 = vmul.f32 %v6156_v5, %v8158_v17  ;;  %v5016_v48 = vld [vmem:[%s8995_s5 + $0x1b8] sm:$0xff] }
0x118e   :  { %5615 = vmatprep.mubr.bf16.mxu0 %v3215_v35  ;;  %v3384_v18 = vpop.permute.xlu0 %3383  ;;  %v3216_v27 = vpack.c.bf16 %v3208_v26, %v3207_v14  ;;  %v5013_v26 = vld [vmem:[%s8995_s5 + $0x1a0] sm:$0xff] }
0x118f   :  { %v3386_v10 = vpop.permute.xlu1 %3385 }
0x1192   :  { %v3715_v40 = vpop.permute.xlu0 %3714 }
0x1193   :  { %5616 = vmatmul.mubr.bf16.gmra.mxu0 %v3216_v27  ;;  %5651 = vmatprep.subr.bf16.mxu1 %v3715_v40  ;;  %v3713_v2 = vpop.permute.xlu1 %3712 }
0x1194   :  { %5635 = vmatprep.mubr.msk.bf16.mxu0 %vm520_vm1, %v3372_v39  ;;  %5652 = vmatpush3.bf16.msra.mxu1 %v3715_v40 }
0x1195   :  { %5653 = vmatprep.subr.bf16.mxu1 %v3713_v2 }
0x1196   :  { %v3711_v16 = vpop.permute.xlu0 %3710 }
0x1198   :  { %5654 = vmatpush3.bf16.msra.mxu1 %v3713_v2  ;;  %v5019_v2 = vld [vmem:[%s8995_s5 + $0x1d0] sm:$0xff] }
0x1199   :  { %5655 = vmatprep.subr.bf16.mxu1 %v3711_v16 }
0x119b   :  { %5636 = vmatmul.mubr.msk.bf16.vlgmr.msra.gmra.mxu0 %vm520_vm1, %v3374_v38 }
0x119c   :  { %5639 = vmatprep.mubr.msk.bf16.mxu0 %vm520_vm1, %v3376_v28  ;;  %5656 = vmatpush3.bf16.msra.mxu1 %v3711_v16 }
0x11a3   :  { %5640 = vmatmul.mubr.msk.bf16.gmra.mxu0 %vm520_vm1, %v3378_v63 }
0x11a4   :  { %5643 = vmatprep.mubr.msk.bf16.mxu0 %vm520_vm1, %v3380_v52  ;;  %v5015_v52 = vld [vmem:[%s8995_s5 + $0x1b0] sm:$0xff] }
0x11ab   :  { %5644 = vmatmul.mubr.msk.bf16.gmra.mxu0 %vm520_vm1, %v3382_v22 }
0x11ac   :  { %5647 = vmatprep.mubr.msk.bf16.mxu0 %vm520_vm1, %v3384_v18 }
0x11b3   :  { %5648 = vmatmul.mubr.msk.bf16.gmra.mxu0 %vm520_vm1, %v3386_v10  ;;  %v5014_v10 = vld [vmem:[%s8995_s5 + $0x1a8] sm:$0xff] }
0x1205   :  { %v5605_v17 = vpop.f32.mrf.mxu0 }
0x1206   :  { %3340 = vst.msk [vmem:[#allocation2 + $0x10] sm:$0xff] %vm520_vm1, %v5605_v17  ;;  %v5020_v17 = vld [vmem:[%s8995_s5 + $0x1d8] sm:$0xff] }
0x1207   :  { %v3275_v42 = vpop.f32.mrf.mxu0 }
0x1208   :  { %3338 = vst.msk [vmem:[#allocation2] sm:$0xff] %vm520_vm1, %v3275_v42 }
0x1209   :  { %v5606_v37 = vpop.f32.mrf.mxu0 }
0x120a   :  { %3341 = vst.msk [vmem:[#allocation2 + $0x18] sm:$0xff] %vm520_vm1, %v5606_v37 }
0x120b   :  { %v3278_v12 = vpop.f32.mrf.mxu0 }
0x120c   :  { %3339 = vst.msk [vmem:[#allocation2 + $0x8] sm:$0xff] %vm520_vm1, %v3278_v12 }
0x123d   :  { %v5609_v20 = vpop.f32.mrf.mxu0 }
0x123e   :  { %3344 = vst.msk [vmem:[#allocation2 + $0x30] sm:$0xff] %vm520_vm1, %v5609_v20  ;;  %v5017_v20 = vld [vmem:[%s8995_s5 + $0x1c0] sm:$0xff] }
0x123f   :  { %v3291_v60 = vpop.f32.mrf.mxu0 }
0x1240   :  { %3342 = vst.msk [vmem:[#allocation2 + $0x20] sm:$0xff] %vm520_vm1, %v3291_v60 }
0x1241   :  { %v5610_v49 = vpop.f32.mrf.mxu0 }
0x1242   :  { %3345 = vst.msk [vmem:[#allocation2 + $0x38] sm:$0xff] %vm520_vm1, %v5610_v49  ;;  %v5018_v49 = vld [vmem:[%s8995_s5 + $0x1c8] sm:$0xff] }
0x1243   :  { %v3294_v6 = vpop.f32.mrf.mxu0 }
0x1244   :  { %3343 = vst.msk [vmem:[#allocation2 + $0x28] sm:$0xff] %vm520_vm1, %v3294_v6 }
0x124b   :  { %v5613_v57 = vpop.f32.mrf.mxu0 }
0x124c   :  { %3348 = vst.msk [vmem:[#allocation2 + $0x50] sm:$0xff] %vm520_vm1, %v5613_v57 }
0x124d   :  { %v3307_v61 = vpop.f32.mrf.mxu0 }
0x124e   :  { %3346 = vst.msk [vmem:[#allocation2 + $0x40] sm:$0xff] %vm520_vm1, %v3307_v61  ;;  %v5023_v61 = vld [vmem:[%s8995_s5 + $0x1f0] sm:$0xff] }
0x124f   :  { %v5614_v25 = vpop.f32.mrf.mxu0 }
0x1250   :  { %3349 = vst.msk [vmem:[#allocation2 + $0x58] sm:$0xff] %vm520_vm1, %v5614_v25 }
0x1251   :  { %v3310_v31 = vpop.f32.mrf.mxu0 }
0x1252   :  { %3347 = vst.msk [vmem:[#allocation2 + $0x48] sm:$0xff] %vm520_vm1, %v3310_v31 }
0x1253   :  { %v5617_v39 = vpop.f32.mrf.mxu0 }
0x1254   :  { %3352 = vst.msk [vmem:[#allocation2 + $0x70] sm:$0xff] %vm520_vm1, %v5617_v39 }
0x1255   :  { %v3323_v38 = vpop.f32.mrf.mxu0 }
0x1256   :  { %3350 = vst.msk [vmem:[#allocation2 + $0x60] sm:$0xff] %vm520_vm1, %v3323_v38  ;;  %v5021_v38 = vld [vmem:[%s8995_s5 + $0x1e0] sm:$0xff] }
0x1257   :  { %v5618_v21 = vpop.f32.mrf.mxu0 }
0x1258   :  { %3353 = vst.msk [vmem:[#allocation2 + $0x78] sm:$0xff] %vm520_vm1, %v5618_v21 }
0x1259   :  { %v3326_v55 = vpop.f32.mrf.mxu0 }
0x125a   :  { %3351 = vst.msk [vmem:[#allocation2 + $0x68] sm:$0xff] %vm520_vm1, %v3326_v55  ;;  %v5024_v55 = vld [vmem:[%s8995_s5 + $0x1f8] sm:$0xff] }
0x125b   :  { %v5637_v45 = vpop.f32.mrf.mxu0 }
0x125c   :  { %v8262_v28 = vadd.f32 %v5637_v45, %v5011_v0 }
0x125d   :  { %v3485_v63 = vpop.f32.mrf.mxu0 }
0x125e   :  { %3552 = vmax.xlane.f32.xlu0 %v8262_v28  ;;  %v8271_v24 = vadd.f32 %v5009_v33, %v3485_v63  ;;  %v5022_v33 = vld [vmem:[%s8995_s5 + $0x1e8] sm:$0xff] }
0x125f   :  { %v5638_v32 = vpop.f32.mrf.mxu0 }
0x1260   :  { %v8279_v34 = vadd.f32 %v5638_v32, %v5012_v46 }
0x1261   :  { %v3488_v30 = vpop.f32.mrf.mxu0 }
0x1262   :  { %v8276_v1 = vadd.f32 %v5010_v29, %v3488_v30  ;;  %3548 = vmax.xlane.f32.xlu0 %v8271_v24 }
0x1263   :  { %v5641_v58 = vpop.f32.mrf.mxu0 }
0x1264   :  { %3550 = vmax.xlane.f32.xlu1 %v8276_v1  ;;  %v8289_v5 = vadd.f32 %v5641_v58, %v5015_v52 }
0x1265   :  { %v3501_v22 = vpop.f32.mrf.mxu0 }
0x1266   :  { %3554 = vmax.xlane.f32.xlu0 %v8279_v34  ;;  %v8301_v27 = vadd.f32 %v5013_v26, %v3501_v22 }
0x1267   :  { %v5642_v11 = vpop.f32.mrf.mxu0 }
0x1268   :  { %v8291_v35 = vadd.f32 %v5642_v11, %v5016_v48 }
0x1269   :  { %v3504_v18 = vpop.f32.mrf.mxu0 }
0x126a   :  { %3560 = vmax.xlane.f32.xlu0 %v8289_v5  ;;  %3562 = vmax.xlane.f32.xlu1 %v8291_v35  ;;  %v8303_v40 = vadd.f32 %v5014_v10, %v3504_v18 }
0x126b   :  { %v5645_v14 = vpop.f32.mrf.mxu0 }
0x126c   :  { %v8313_v37 = vadd.f32 %v5645_v14, %v5019_v2 }
0x126d   :  { %v3517_v16 = vpop.f32.mrf.mxu0 }
0x126e   :  { %3558 = vmax.xlane.f32.xlu1 %v8303_v40  ;;  %3556 = vmax.xlane.f32.xlu0 %v8301_v27  ;;  %v8325_v6 = vadd.f32 %v5017_v20, %v3517_v16 }
0x126f   :  { %v5646_v42 = vpop.f32.mrf.mxu0 }
0x1270   :  { %v8315_v12 = vadd.f32 %v5646_v42, %v5020_v17 }
0x1271   :  { %v3520_v60 = vpop.f32.mrf.mxu0 }
0x1272   :  { %3568 = vmax.xlane.f32.xlu0 %v8313_v37  ;;  %3570 = vmax.xlane.f32.xlu1 %v8315_v12  ;;  %v8327_v57 = vadd.f32 %v5018_v49, %v3520_v60 }
0x1273   :  { %v5649_v25 = vpop.f32.mrf.mxu0 }
0x1274   :  { %v8334_v31 = vadd.f32 %v5649_v25, %v5023_v61 }
0x1275   :  { %v3533_v39 = vpop.f32.mrf.mxu0 }
0x1276   :  { %3566 = vmax.xlane.f32.xlu1 %v8327_v57  ;;  %3564 = vmax.xlane.f32.xlu0 %v8325_v6  ;;  %v8340_v21 = vadd.f32 %v5021_v38, %v3533_v39 }
0x1277   :  { %v5650_v0 = vpop.f32.mrf.mxu0 }
0x1278   :  { %v8350_v45 = vadd.f32 %v5650_v0, %v5024_v55 }
0x1279   :  { %v3536_v63 = vpop.f32.mrf.mxu0 }
0x127a   :  { %3576 = vmax.xlane.f32.xlu0 %v8334_v31  ;;  %v8356_v32 = vadd.f32 %v5022_v33, %v3536_v63 }
0x127e   :  { %3572 = vmax.xlane.f32.xlu0 %v8340_v21 }
0x1287   :  { %3706 = vrot.lane.b32.xlu1 %v7929_v54, %s6305_s16 }
0x1294   :  { %3708 = vrot.lane.b32.xlu0 %v7939_v43, %s6305_s16 }
0x12ab   :  { %3578 = vmax.xlane.f32.xlu1 %v8350_v45 }
0x12af   :  { %3574 = vmax.xlane.f32.xlu1 %v8356_v32 }
0x12c0   :  { %3704 = vrot.lane.b32.xlu1 %v7945_v9, %s6305_s16 }
0x12e7   :  { %v3553_v54 = vpop.xlane.xlu0 %3552 }
0x12e8   :  { %v3582_v43 = vsub.f32 %v8262_v28, %v3553_v54 }
0x12ea   :  { %v3600_v29 = vmul.f32 1.442695, %v3582_v43 }
0x12eb   :  { %v3549_v46 = vpop.xlane.xlu0 %3548 }
0x12ec   :  { %6157 = vpow2.f32 %v3600_v29  ;;  %v3580_v30 = vsub.f32 %v8271_v24, %v3549_v46 }
0x12ed   :  { %v3551_v58 = vpop.xlane.xlu1 %3550 }
0x12ee   :  { %v3596_v52 = vmul.f32 1.442695, %v3580_v30  ;;  %v3581_v22 = vsub.f32 %v8276_v1, %v3551_v58 }
0x12ef   :  { %v3555_v48 = vpop.xlane.xlu0 %3554 }
0x12f0   :  { %6159 = vpow2.f32 %v3596_v52  ;;  %v3583_v11 = vsub.f32 %v8279_v34, %v3555_v48  ;;  %v3598_v18 = vmul.f32 1.442695, %v3581_v22 }
0x12f2   :  { %v3602_v26 = vmul.f32 1.442695, %v3583_v11 }
0x12f3   :  { %v3561_v10 = vpop.xlane.xlu0 %3560  ;;  %v3563_v9 = vpop.xlane.xlu1 %3562 }
0x12f4   :  { %6161 = vpow2.f32 %v3602_v26  ;;  %v3586_v28 = vsub.f32 %v8289_v5, %v3561_v10  ;;  %v3587_v24 = vsub.f32 %v8291_v35, %v3563_v9 }
0x12f5   :  { %6163 = vpow2.f32 %v3598_v18 }
0x12f6   :  { %v3608_v14 = vmul.f32 1.442695, %v3586_v28  ;;  %v3610_v5 = vmul.f32 1.442695, %v3587_v24 }
0x12f7   :  { %v3557_v2 = vpop.xlane.xlu0 %3556  ;;  %v3559_v16 = vpop.xlane.xlu1 %3558 }
0x12f8   :  { %6165 = vpow2.f32 %v3608_v14  ;;  %v3584_v1 = vsub.f32 %v8301_v27, %v3557_v2  ;;  %v3585_v17 = vsub.f32 %v8303_v40, %v3559_v16 }
0x12f9   :  { %v8369_v42 = vpop.eup %6157 }
0x12fa   :  { %v3604_v34 = vmul.f32 1.442695, %v3584_v1  ;;  %v3606_v20 = vmul.f32 1.442695, %v3585_v17  ;;  %3632 = vadd.xlane.f32.xlu1 %v8369_v42 }
0x12fb   :  { %v3569_v60 = vpop.xlane.xlu0 %3568  ;;  %v3571_v49 = vpop.xlane.xlu1 %3570 }
0x12fc   :  { %6167 = vpow2.f32 %v3604_v34  ;;  %v3590_v61 = vsub.f32 %v8313_v37, %v3569_v60  ;;  %v3591_v27 = vsub.f32 %v8315_v12, %v3571_v49 }
0x12fd   :  { %v8373_v25 = vpop.eup %6159  ;;  %6169 = vpow2.f32 %v3606_v20 }
0x12fe   :  { %3628 = vadd.xlane.f32.xlu1 %v8373_v25  ;;  %v3616_v35 = vmul.f32 1.442695, %v3590_v61  ;;  %6171 = vpow2.f32 %v3610_v5  ;;  %v3618_v37 = vmul.f32 1.442695, %v3591_v27 }
0x12ff   :  { %v3565_v40 = vpop.xlane.xlu0 %3564  ;;  %v3567_v38 = vpop.xlane.xlu1 %3566 }
0x1300   :  { %v3588_v39 = vsub.f32 %v8325_v6, %v3565_v40  ;;  %6173 = vpow2.f32 %v3616_v35  ;;  %v3589_v63 = vsub.f32 %v8327_v57, %v3567_v38 }
0x1301   :  { %v8378_v55 = vpop.eup %6161 }
0x1302   :  { %v3612_v0 = vmul.f32 1.442695, %v3588_v39  ;;  %3634 = vadd.xlane.f32.xlu1 %v8378_v55  ;;  %v8382_v54 = vpop.eup %6163  ;;  %v3614_v6 = vmul.f32 1.442695, %v3589_v63 }
0x1303   :  { %v3577_v33 = vpop.xlane.xlu0 %3576  ;;  %v3707_v48 = vpop.permute.xlu1 %3706 }
0x1304   :  { %6175 = vpow2.f32 %v3612_v0  ;;  %v3594_v12 = vsub.f32 %v8334_v31, %v3577_v33 }
0x1305   :  { %v8385_v43 = vpop.eup %6165  ;;  %6177 = vpow2.f32 %v3618_v37 }
0x1306   :  { %v3624_v29 = vmul.f32 1.442695, %v3594_v12  ;;  %3640 = vadd.xlane.f32.xlu0 %v8385_v43  ;;  %3630 = vadd.xlane.f32.xlu1 %v8382_v54 }
0x1307   :  { %v3573_v46 = vpop.xlane.xlu0 %3572 }
0x1308   :  { %6179 = vpow2.f32 %v3624_v29  ;;  %v3592_v30 = vsub.f32 %v8340_v21, %v3573_v46 }
0x1309   :  { %v8390_v57 = vpop.eup %6167  ;;  %6181 = vpow2.f32 %v3614_v6 }
0x130a   :  { %v8392_v58 = vpop.eup %6169  ;;  %v3620_v52 = vmul.f32 1.442695, %v3592_v30  ;;  %3636 = vadd.xlane.f32.xlu0 %v8390_v57 }
0x130b   :  { %3638 = vadd.xlane.f32.xlu1 %v8392_v58  ;;  %v3709_v31 = vpop.permute.xlu0 %3708  ;;  %v8396_v22 = vpop.eup %6171 }
0x130c   :  { %6183 = vpow2.f32 %v3620_v52  ;;  %5657 = vmatprep.subr.bf16.mxu1 %v3709_v31 }
0x130d   :  { %5658 = vmatpush3.bf16.msra.mxu1 %v3709_v31  ;;  %v8399_v21 = vpop.eup %6173 }
0x130e   :  { %3642 = vadd.xlane.f32.xlu0 %v8396_v22  ;;  %5659 = vmatprep.subr.bf16.mxu1 %v3707_v48 }
0x1311   :  { %v8401_v11 = vpop.eup %6175  ;;  %5660 = vmatpush3.bf16.msra.mxu1 %v3707_v48 }
0x1312   :  { %3648 = vadd.xlane.f32.xlu0 %v8399_v21  ;;  %3644 = vadd.xlane.f32.xlu1 %v8401_v11  ;;  %v8405_v26 = vpop.eup %6177 }
0x1315   :  { %v8407_v18 = vpop.eup %6179 }
0x1316   :  { %3656 = vadd.xlane.f32.xlu1 %v8407_v18  ;;  %3650 = vadd.xlane.f32.xlu0 %v8405_v26  ;;  %v8411_v10 = vpop.eup %6181 }
0x1319   :  { %v8413_v9 = vpop.eup %6183 }
0x131a   :  { %3652 = vadd.xlane.f32.xlu1 %v8413_v9  ;;  %3646 = vadd.xlane.f32.xlu0 %v8411_v10 }
0x132b   :  { %3700 = vrot.lane.b32.xlu1 %v7919_v47, %s6305_s16 }
0x1330   :  { %3702 = vrot.lane.b32.xlu0 %v7917_v59, %s6305_s16 }
0x1334   :  { %v3579_v28 = vpop.xlane.xlu1 %3578 }
0x1335   :  { %v3595_v24 = vsub.f32 %v8350_v45, %v3579_v28 }
0x1337   :  { %v3626_v17 = vmul.f32 1.442695, %v3595_v24 }
0x1338   :  { %v3575_v14 = vpop.xlane.xlu1 %3574 }
0x1339   :  { %v3593_v2 = vsub.f32 %v8356_v32, %v3575_v14 }
0x133b   :  { %v3622_v1 = vmul.f32 1.442695, %v3593_v2 }
0x133c   :  { %v3705_v16 = vpop.permute.xlu1 %3704 }
0x133d   :  { %5661 = vmatprep.subr.bf16.mxu1 %v3705_v16  ;;  %6185 = vpow2.f32 %v3622_v1 }
0x133e   :  { %5662 = vmatpush3.bf16.msra.mxu1 %v3705_v16  ;;  %6187 = vpow2.f32 %v3626_v17 }
0x134a   :  { %v8423_v34 = vpop.eup %6185 }
0x134b   :  { %v8426_v47 = vpop.eup %6187 }
0x134f   :  { %3654 = vadd.xlane.f32.xlu0 %v8423_v34 }
0x1353   :  { %3658 = vadd.xlane.f32.xlu0 %v8426_v47 }
0x1383   :  { %v3633_v59 = vpop.xlane.xlu1 %3632 }
0x1387   :  { %v3629_v20 = vpop.xlane.xlu1 %3628 }
0x1388   :  { %6189 = vrcp.f32 %v3629_v20 }
0x138b   :  { %v3635_v32 = vpop.xlane.xlu1 %3634 }
0x138f   :  { %v3641_v60 = vpop.xlane.xlu0 %3640  ;;  %v3631_v45 = vpop.xlane.xlu1 %3630 }
0x1390   :  { %6191 = vrcp.f32 %v3631_v45 }
0x1391   :  { %6193 = vrcp.f32 %v3635_v32 }
0x1393   :  { %v3637_v49 = vpop.xlane.xlu0 %3636 }
0x1394   :  { %v3639_v5 = vpop.xlane.xlu1 %3638  ;;  %6195 = vrcp.f32 %v3637_v49 }
0x1395   :  { %6197 = vrcp.f32 %v3639_v5  ;;  %v6190_v40 = vpop.eup %6189 }
0x1396   :  { %6199 = vrcp.f32 %v3633_v59  ;;  %v3676_v37 = vmul.f32 %v6190_v40, %v8373_v25 }
0x1397   :  { %v3643_v61 = vpop.xlane.xlu0 %3642 }
0x1398   :  { %6201 = vrcp.f32 %v3643_v61 }
0x1399   :  { %6203 = vrcp.f32 %v3641_v60 }
0x139b   :  { %v3649_v35 = vpop.xlane.xlu0 %3648  ;;  %v3645_v27 = vpop.xlane.xlu1 %3644 }
0x139d   :  { %v6192_v39 = vpop.eup %6191 }
0x139e   :  { %v3677_v63 = vmul.f32 %v6192_v39, %v8382_v54  ;;  %v6194_v6 = vpop.eup %6193 }
0x139f   :  { %v3651_v38 = vpop.xlane.xlu0 %3650  ;;  %v3657_v0 = vpop.xlane.xlu1 %3656  ;;  %v3679_v25 = vmul.f32 %v6194_v6, %v8378_v55 }
0x13a0   :  { %v3692_v33 = vpack.c.bf16 %v3677_v63, %v3676_v37 }
0x13a1   :  { %v6196_v46 = vpop.eup %6195 }
0x13a2   :  { %5667 = vmatprep.mubr.bf16.mxu1 %v3692_v33  ;;  %v6198_v52 = vpop.eup %6197  ;;  %v3680_v54 = vmul.f32 %v6196_v46, %v8390_v57 }
0x13a3   :  { %v3647_v12 = vpop.xlane.xlu0 %3646  ;;  %v3653_v29 = vpop.xlane.xlu1 %3652  ;;  %v3681_v28 = vmul.f32 %v6198_v52, %v8392_v58 }
0x13a4   :  { %6205 = vrcp.f32 %v3647_v12  ;;  %v6200_v31 = vpop.eup %6199 }
0x13a5   :  { %6207 = vrcp.f32 %v3645_v27  ;;  %v3678_v14 = vmul.f32 %v6200_v31, %v8369_v42  ;;  %v6202_v16 = vpop.eup %6201  ;;  %v3694_v24 = vpack.c.bf16 %v3681_v28, %v3680_v54 }
0x13a6   :  { %6209 = vrcp.f32 %v3651_v38  ;;  %v6204_v1 = vpop.eup %6203  ;;  %v3683_v20 = vmul.f32 %v6202_v16, %v8396_v22 }
0x13a7   :  { %v3703_v30 = vpop.permute.xlu0 %3702  ;;  %v3701_v48 = vpop.permute.xlu1 %3700  ;;  %6211 = vrcp.f32 %v3649_v35  ;;  %v3693_v2 = vpack.c.bf16 %v3679_v25, %v3678_v14  ;;  %v3682_v57 = vmul.f32 %v6204_v1, %v8385_v43 }
0x13a8   :  { %5663 = vmatprep.subr.bf16.mxu1 %v3703_v30  ;;  %6213 = vrcp.f32 %v3653_v29 }
0x13a9   :  { %5664 = vmatpush3.bf16.msra.mxu1 %v3703_v30  ;;  %v3695_v32 = vpack.c.bf16 %v3683_v20, %v3682_v57 }
0x13aa   :  { %5665 = vmatprep.subr.bf16.mxu1 %v3701_v48 }
0x13ad   :  { %5666 = vmatpush3.bf16.msra.mxu1 %v3701_v48 }
0x13b0   :  { %5668 = vmatmul.mubr.bf16.vlgmr.msra.gmra.mxu1 %v3693_v2 }
0x13b1   :  { %v6206_v17 = vpop.eup %6205  ;;  %5671 = vmatprep.mubr.bf16.mxu1 %v3694_v24 }
0x13b2   :  { %v6208_v59 = vpop.eup %6207  ;;  %v3685_v55 = vmul.f32 %v6206_v17, %v8411_v10 }
0x13b3   :  { %v3684_v58 = vmul.f32 %v6208_v59, %v8401_v11  ;;  %v6210_v60 = vpop.eup %6209 }
0x13b4   :  { %v6212_v45 = vpop.eup %6211  ;;  %v3687_v49 = vmul.f32 %v6210_v60, %v8405_v26 }
0x13b5   :  { %v3696_v42 = vpack.c.bf16 %v3685_v55, %v3684_v58  ;;  %v3686_v5 = vmul.f32 %v6212_v45, %v8399_v21  ;;  %v6214_v43 = vpop.eup %6213 }
0x13b6   :  { %v3688_v35 = vmul.f32 %v6214_v43, %v8413_v9 }
0x13b7   :  { %v3697_v61 = vpack.c.bf16 %v3687_v49, %v3686_v5 }
0x13b8   :  { %5672 = vmatmul.mubr.bf16.gmra.mxu1 %v3695_v32 }
0x13b9   :  { %5675 = vmatprep.mubr.bf16.mxu1 %v3696_v42 }
0x13c0   :  { %5676 = vmatmul.mubr.bf16.gmra.mxu1 %v3697_v61 }
0x13d8   :  { %v3655_v22 = vpop.xlane.xlu0 %3654 }
0x13d9   :  { %6215 = vrcp.f32 %v3655_v22 }
0x13da   :  { %6217 = vrcp.f32 %v3657_v0  ;;  %v5825_v0 = vld [vmem:[%s8996_s6 + $0x18] sm:$0xff]  }
0x13db   :  { %5683 = vmatprep.subr.bf16.mxu1 %v5825_v0 }
0x13dc   :  { %v3659_v10 = vpop.xlane.xlu0 %3658  ;;  %5684 = vmatpush3.bf16.msra.mxu1 %v5825_v0 }
0x13dd   :  { %6219 = vrcp.f32 %v3659_v10 }
0x13e6   :  { %v6216_v11 = vpop.eup %6215 }
0x13e7   :  { %v3689_v27 = vmul.f32 %v6216_v11, %v8423_v34  ;;  %v6218_v40 = vpop.eup %6217  ;;  %v5826_v34 = vld [vmem:[%s8996_s6 + $0x10] sm:$0xff]  }
0x13e8   :  { %v3690_v21 = vmul.f32 %v6218_v40, %v8407_v18  ;;  %5685 = vmatprep.subr.bf16.mxu1 %v5826_v34 }
0x13e9   :  { %v3698_v39 = vpack.c.bf16 %v3689_v27, %v3688_v35  ;;  %5686 = vmatpush3.bf16.msra.mxu1 %v5826_v34 }
0x13ea   :  { %v6220_v38 = vpop.eup %6219 }
0x13eb   :  { %5679 = vmatprep.mubr.bf16.mxu1 %v3698_v39  ;;  %v3691_v26 = vmul.f32 %v6220_v38, %v8426_v47 }
0x13ed   :  { %v3699_v37 = vpack.c.bf16 %v3691_v26, %v3690_v21 }
0x13ef   :  { %5680 = vmatmul.mubr.bf16.gmra.mxu1 %v3699_v37 }
0x1470   :  { %v5669_v63 = vpop.f32.mrf.mxu1 }
0x1471   :  { %3841 = vrot.lane.b32.xlu1 %v5669_v63, %s6306_s18 }
0x1472   :  { %v3758_v9 = vpop.f32.mrf.mxu1 }
0x1473   :  { %3837 = vrot.lane.b32.xlu0 %v3758_v9, %s6306_s18 }
0x1474   :  { %v5670_v18 = vpop.f32.mrf.mxu1 }
0x1476   :  { %v3761_v47 = vpop.f32.mrf.mxu1 }
0x1477   :  { %3839 = vrot.lane.b32.xlu1 %v3761_v47, %s6306_s18 }
0x1478   :  { %v5673_v33 = vpop.f32.mrf.mxu1 }
0x147a   :  { %v3774_v12 = vpop.f32.mrf.mxu1 }
0x147b   :  { %3843 = vrot.lane.b32.xlu1 %v5670_v18, %s6306_s18  ;;  %3845 = vrot.lane.b32.xlu0 %v3774_v12, %s6306_s18 }
0x147c   :  { %v5674_v29 = vpop.f32.mrf.mxu1 }
0x147e   :  { %v3777_v6 = vpop.f32.mrf.mxu1 }
0x147f   :  { %3849 = vrot.lane.b32.xlu0 %v5673_v33, %s6306_s18  ;;  %3847 = vrot.lane.b32.xlu1 %v3777_v6, %s6306_s18 }
0x1480   :  { %v5677_v46 = vpop.f32.mrf.mxu1 }
0x1482   :  { %v3790_v30 = vpop.f32.mrf.mxu1 }
0x1483   :  { %3851 = vrot.lane.b32.xlu1 %v5674_v29, %s6306_s18  ;;  %3853 = vrot.lane.b32.xlu0 %v3790_v30, %s6306_s18 }
0x1484   :  { %v5678_v52 = vpop.f32.mrf.mxu1 }
0x1486   :  { %v3793_v31 = vpop.f32.mrf.mxu1 }
0x1487   :  { %3857 = vrot.lane.b32.xlu0 %v5677_v46, %s6306_s18  ;;  %3855 = vrot.lane.b32.xlu1 %v3793_v31, %s6306_s18 }
0x148b   :  { %3859 = vrot.lane.b32.xlu1 %v5678_v52, %s6306_s18 }
0x14af   :  { %v5681_v48 = vpop.f32.mrf.mxu1 }
0x14b1   :  { %v3806_v25 = vpop.f32.mrf.mxu1 }
0x14b2   :  { %3861 = vrot.lane.b32.xlu0 %v3806_v25, %s6306_s18 }
0x14b3   :  { %v5682_v54 = vpop.f32.mrf.mxu1 }
0x14b5   :  { %v3809_v28 = vpop.f32.mrf.mxu1 }
0x14b6   :  { %3865 = vrot.lane.b32.xlu0 %v5681_v48, %s6306_s18  ;;  %3863 = vrot.lane.b32.xlu1 %v3809_v28, %s6306_s18  ;;  %v8496_v48 = vld [vmem:[%s8997_s7 + $0x1] ss:$0 sm:$0xff] }
0x14ba   :  { %3867 = vrot.lane.b32.xlu1 %v5682_v54, %s6306_s18 }
0x14e3   :  { %v3842_v14 = vpop.permute.xlu1 %3841 }
0x14e4   :  { %3887 = vst.msk [vmem:[#allocation2 + $0x10] sm:$0xff] %vm1486_vm2, %v3842_v14 }
0x14e5   :  { %v3838_v2 = vpop.permute.xlu0 %3837 }
0x14e6   :  { %3885 = vst.msk [vmem:[#allocation2] sm:$0xff] %vm1486_vm2, %v3838_v2 }
0x14e9   :  { %v3840_v16 = vpop.permute.xlu1 %3839 }
0x14ea   :  { %3886 = vst.msk [vmem:[#allocation2 + $0x8] sm:$0xff] %vm1486_vm2, %v3840_v16 }
0x14eb   :  { %v3903_v60 = vld [vmem:[#allocation2 + $0x10] sm:$0xff] }
0x14ed   :  { %v3844_v24 = vpop.permute.xlu1 %3843  ;;  %v3846_v1 = vpop.permute.xlu0 %3845  ;;  %v3901_v20 = vld [vmem:[#allocation2] sm:$0xff] }
0x14ee   :  { %3888 = vst.msk [vmem:[#allocation2 + $0x18] sm:$0xff] %vm1486_vm2, %v3844_v24  ;;  %3889 = vst.msk [vmem:[#allocation2 + $0x20] sm:$0xff] %vm1486_vm2, %v3846_v1 }
0x14f1   :  { %v3850_v17 = vpop.permute.xlu0 %3849  ;;  %v3848_v59 = vpop.permute.xlu1 %3847  ;;  %v3902_v55 = vld [vmem:[#allocation2 + $0x8] sm:$0xff] }
0x14f2   :  { %3891 = vst.msk [vmem:[#allocation2 + $0x30] sm:$0xff] %vm1486_vm2, %v3850_v17  ;;  %3890 = vst.msk [vmem:[#allocation2 + $0x28] sm:$0xff] %vm1486_vm2, %v3848_v59  ;;  %v3917_v57 = vpack.c.bf16 %v3902_v55, %v3901_v20 }
0x14f4   :  { %5687 = vmatprep.mubr.msk.bf16.mxu1 %vm66_vm0, %v3917_v57 }
0x14f5   :  { %v3852_v58 = vpop.permute.xlu1 %3851  ;;  %v3854_v32 = vpop.permute.xlu0 %3853  ;;  %v3904_v42 = vld [vmem:[#allocation2 + $0x18] sm:$0xff]  ;;  %v3905_v61 = vld [vmem:[#allocation2 + $0x20] sm:$0xff] }
0x14f6   :  { %3892 = vst.msk [vmem:[#allocation2 + $0x38] sm:$0xff] %vm1486_vm2, %v3852_v58  ;;  %3893 = vst.msk [vmem:[#allocation2 + $0x40] sm:$0xff] %vm1486_vm2, %v3854_v32  ;;  %v3918_v45 = vpack.c.bf16 %v3904_v42, %v3903_v60 }
0x14f8   :  { %5688 = vmatmul.mubr.msk.bf16.vlgmr.msra.gmra.mxu1 %vm66_vm0, %v3918_v45 }
0x14f9   :  { %v3858_v49 = vpop.permute.xlu0 %3857  ;;  %v3856_v5 = vpop.permute.xlu1 %3855  ;;  %v3906_v22 = vld [vmem:[#allocation2 + $0x28] sm:$0xff]  ;;  %v3907_v11 = vld [vmem:[#allocation2 + $0x30] sm:$0xff] }
0x14fa   :  { %3895 = vst.msk [vmem:[#allocation2 + $0x50] sm:$0xff] %vm1486_vm2, %v3858_v49  ;;  %3894 = vst.msk [vmem:[#allocation2 + $0x48] sm:$0xff] %vm1486_vm2, %v3856_v5  ;;  %v3919_v10 = vpack.c.bf16 %v3906_v22, %v3905_v61 }
0x14fc   :  { %5691 = vmatprep.mubr.msk.bf16.mxu1 %vm66_vm0, %v3919_v10 }
0x14fd   :  { %v3860_v43 = vpop.permute.xlu1 %3859  ;;  %v3908_v35 = vld [vmem:[#allocation2 + $0x38] sm:$0xff]  ;;  %v3909_v40 = vld [vmem:[#allocation2 + $0x40] sm:$0xff] }
0x14fe   :  { %3896 = vst.msk [vmem:[#allocation2 + $0x58] sm:$0xff] %vm1486_vm2, %v3860_v43  ;;  %v3920_v27 = vpack.c.bf16 %v3908_v35, %v3907_v11 }
0x1500   :  { %5692 = vmatmul.mubr.msk.bf16.gmra.mxu1 %vm66_vm0, %v3920_v27 }
0x1501   :  { %v3910_v39 = vld [vmem:[#allocation2 + $0x48] sm:$0xff]  ;;  %v3911_v21 = vld [vmem:[#allocation2 + $0x50] sm:$0xff] }
0x1502   :  { %v3921_v38 = vpack.c.bf16 %v3910_v39, %v3909_v40 }
0x1504   :  { %5695 = vmatprep.mubr.msk.bf16.mxu1 %vm66_vm0, %v3921_v38 }
0x1505   :  { %v3912_v26 = vld [vmem:[#allocation2 + $0x58] sm:$0xff] }
0x1506   :  { %v3922_v37 = vpack.c.bf16 %v3912_v26, %v3911_v21 }
0x1508   :  { %5696 = vmatmul.mubr.msk.bf16.gmra.mxu1 %vm66_vm0, %v3922_v37 }
0x1524   :  { %v3862_v0 = vpop.permute.xlu0 %3861 }
0x1525   :  { %3897 = vst.msk [vmem:[#allocation2 + $0x60] sm:$0xff] %vm1486_vm2, %v3862_v0 }
0x1528   :  { %v3866_v63 = vpop.permute.xlu0 %3865  ;;  %v3864_v9 = vpop.permute.xlu1 %3863 }
0x1529   :  { %3899 = vst.msk [vmem:[#allocation2 + $0x70] sm:$0xff] %vm1486_vm2, %v3866_v63  ;;  %3898 = vst.msk [vmem:[#allocation2 + $0x68] sm:$0xff] %vm1486_vm2, %v3864_v9 }
0x152c   :  { %v3868_v34 = vpop.permute.xlu1 %3867  ;;  %v3913_v18 = vld [vmem:[#allocation2 + $0x60] sm:$0xff] }
0x152d   :  { %3900 = vst.msk [vmem:[#allocation2 + $0x78] sm:$0xff] %vm1486_vm2, %v3868_v34 }
0x1530   :  { %v3914_v47 = vld [vmem:[#allocation2 + $0x68] sm:$0xff]  ;;  %v3915_v12 = vld [vmem:[#allocation2 + $0x70] sm:$0xff] }
0x1531   :  { %v3923_v33 = vpack.c.bf16 %v3914_v47, %v3913_v18 }
0x1533   :  { %5699 = vmatprep.mubr.msk.bf16.mxu1 %vm66_vm0, %v3923_v33 }
0x1534   :  { %v3916_v29 = vld [vmem:[#allocation2 + $0x78] sm:$0xff] }
0x1535   :  { %v3924_v6 = vpack.c.bf16 %v3916_v29, %v3915_v12 }
0x1537   :  { %5700 = vmatmul.mubr.msk.bf16.gmra.mxu1 %vm66_vm0, %v3924_v6 }
0x15b8   :  { %v5689_v46 = vpop.f32.mrf.mxu1 }
0x15b9   :  { %v4065_v52 = vadd.f32 %v5689_v46, %v7656_v7 }
0x15ba   :  { %v4000_v30 = vpop.f32.mrf.mxu1 }
0x15bb   :  { %v4063_v31 = vadd.f32 %v4000_v30, %v7653_v41  ;;  %v8502_v14 = vadd.f32 %v8496_v48, %v4065_v52 }
0x15bc   :  { %v5690_v25 = vpop.f32.mrf.mxu1 }
0x15bd   :  { %v8499_v54 = vadd.f32 %v8496_v48, %v4063_v31  ;;  %v4066_v2 = vadd.f32 %v5690_v25, %v7668_v23  ;;  %v4113_v20 = vsel %vm66_vm0, %v8502_v14, 0.0 }
0x15be   :  { %v4003_v28 = vpop.f32.mrf.mxu1 }
0x15bf   :  { %v4064_v16 = vadd.f32 %v4003_v28, %v7663_v62  ;;  %v4107_v41 = vsel %vm66_vm0, %v8499_v54, 0.0  ;;  %v8512_v17 = vadd.f32 %v8496_v48, %v4066_v2 }
0x15c0   :  { %4108 = vadd.xlane.f32.xlu0 %v4107_v41  ;;  %v5693_v7 = vpop.f32.mrf.mxu1 }
0x15c1   :  { %v8509_v24 = vadd.f32 %v8496_v48, %v4064_v16  ;;  %v4069_v55 = vadd.f32 %v5693_v7, %v7679_v3 }
0x15c2   :  { %v4016_v1 = vpop.f32.mrf.mxu1 }
0x15c3   :  { %v4067_v59 = vadd.f32 %v4016_v1, %v7675_v53  ;;  %v4110_v62 = vsel %vm66_vm0, %v8509_v24, 0.0  ;;  %v4116_v53 = vsel %vm66_vm0, %v8512_v17, 0.0  ;;  %v8531_v49 = vadd.f32 %v8496_v48, %v4069_v55 }
0x15c4   :  { %4114 = vadd.xlane.f32.xlu0 %v4113_v20  ;;  %4111 = vadd.xlane.f32.xlu1 %v4110_v62  ;;  %v5694_v23 = vpop.f32.mrf.mxu1 }
0x15c5   :  { %v8521_v58 = vadd.f32 %v8496_v48, %v4067_v59  ;;  %v4070_v32 = vadd.f32 %v5694_v23, %v7690_v8  ;;  %v4125_v11 = vsel %vm66_vm0, %v8531_v49, 0.0 }
0x15c6   :  { %v4019_v57 = vpop.f32.mrf.mxu1 }
0x15c7   :  { %v4068_v60 = vadd.f32 %v4019_v57, %v7687_v50  ;;  %v8534_v5 = vadd.f32 %v8496_v48, %v4070_v32  ;;  %v4119_v50 = vsel %vm66_vm0, %v8521_v58, 0.0 }
0x15c8   :  { %4117 = vadd.xlane.f32.xlu0 %v4116_v53  ;;  %v5697_v42 = vpop.f32.mrf.mxu1 }
0x15c9   :  { %v8528_v45 = vadd.f32 %v8496_v48, %v4068_v60  ;;  %v4073_v10 = vadd.f32 %v5697_v42, %v7704_v44  ;;  %v4128_v40 = vsel %vm66_vm0, %v8534_v5, 0.0 }
0x15ca   :  { %v4032_v3 = vpop.f32.mrf.mxu1 }
0x15cb   :  { %v4071_v61 = vadd.f32 %v4032_v3, %v7699_v4  ;;  %v4122_v8 = vsel %vm66_vm0, %v8528_v45, 0.0  ;;  %v8555_v44 = vadd.f32 %v8496_v48, %v4073_v10 }
0x15cc   :  { %4120 = vadd.xlane.f32.xlu0 %v4119_v50  ;;  %4123 = vadd.xlane.f32.xlu1 %v4122_v8  ;;  %v5698_v22 = vpop.f32.mrf.mxu1 }
0x15cd   :  { %v8545_v35 = vadd.f32 %v8496_v48, %v4071_v61  ;;  %v4074_v4 = vadd.f32 %v5698_v22, %v7714_v56  ;;  %v4137_v56 = vsel %vm66_vm0, %v8555_v44, 0.0 }
0x15ce   :  { %v4035_v43 = vpop.f32.mrf.mxu1 }
0x15cf   :  { %v4072_v27 = vadd.f32 %v4035_v43, %v7711_v19  ;;  %v8558_v38 = vadd.f32 %v8496_v48, %v4074_v4  ;;  %v4131_v21 = vsel %vm66_vm0, %v8545_v35, 0.0 }
0x15d0   :  { %4126 = vadd.xlane.f32.xlu0 %v4125_v11  ;;  %4129 = vadd.xlane.f32.xlu1 %v4128_v40 }
0x15d1   :  { %v8552_v39 = vadd.f32 %v8496_v48, %v4072_v27  ;;  %v4140_v26 = vsel %vm66_vm0, %v8558_v38, 0.0 }
0x15d3   :  { %v4134_v19 = vsel %vm66_vm0, %v8552_v39, 0.0 }
0x15d4   :  { %4132 = vadd.xlane.f32.xlu0 %v4131_v21  ;;  %4135 = vadd.xlane.f32.xlu1 %v4134_v19 }
0x15d8   :  { %4138 = vadd.xlane.f32.xlu0 %v4137_v56  ;;  %4141 = vadd.xlane.f32.xlu1 %v4140_v26 }
0x15f7   :  { %v5701_v37 = vpop.f32.mrf.mxu1 }
0x15f8   :  { %v4077_v63 = vadd.f32 %v5701_v37, %v7728_v15 }
0x15f9   :  { %v4048_v0 = vpop.f32.mrf.mxu1 }
0x15fa   :  { %v4075_v9 = vadd.f32 %v4048_v0, %v7725_v13  ;;  %v8574_v33 = vadd.f32 %v8496_v48, %v4077_v63 }
0x15fb   :  { %v5702_v34 = vpop.f32.mrf.mxu1 }
0x15fc   :  { %v8571_v18 = vadd.f32 %v8496_v48, %v4075_v9  ;;  %v4078_v12 = vadd.f32 %v5702_v34, %v7738_v36  ;;  %v4149_v46 = vsel %vm66_vm0, %v8574_v33, 0.0 }
0x15fd   :  { %v4051_v47 = vpop.f32.mrf.mxu1 }
0x15fe   :  { %v4076_v29 = vadd.f32 %v4051_v47, %v7735_v51  ;;  %v4143_v6 = vsel %vm66_vm0, %v8571_v18, 0.0  ;;  %v8584_v13 = vadd.f32 %v8496_v48, %v4078_v12 }
0x15ff   :  { %4144 = vadd.xlane.f32.xlu0 %v4143_v6 }
0x1600   :  { %v8581_v15 = vadd.f32 %v8496_v48, %v4076_v29  ;;  %v4152_v51 = vsel %vm66_vm0, %v8584_v13, 0.0 }
0x1602   :  { %v4146_v30 = vsel %vm66_vm0, %v8581_v15, 0.0 }
0x1603   :  { %4150 = vadd.xlane.f32.xlu0 %v4149_v46  ;;  %4147 = vadd.xlane.f32.xlu1 %v4146_v30 }
0x1607   :  { %4153 = vadd.xlane.f32.xlu1 %v4152_v51 }
0x1649   :  { %v4109_v36 = vpop.xlane.xlu0 %4108 }
0x164a   :  { %v4155_v52 = vmul.f32 0.03125, %v4109_v36 }
0x164c   :  { %v8593_v31 = vsub.f32 %v8499_v54, %v4155_v52 }
0x164d   :  { %v4115_v25 = vpop.xlane.xlu0 %4114  ;;  %v4112_v48 = vpop.xlane.xlu1 %4111 }
0x164e   :  { %v4157_v28 = vmul.f32 0.03125, %v4115_v25  ;;  %v4156_v2 = vmul.f32 0.03125, %v4112_v48  ;;  %v4187_v16 = vmul.f32 %v8593_v31, %v8593_v31 }
0x1650   :  { %v8598_v41 = vsub.f32 %v8502_v14, %v4157_v28  ;;  %v8601_v7 = vsub.f32 %v8509_v24, %v4156_v2  ;;  %v4203_v1 = vsel %vm66_vm0, %v4187_v16, 0.0 }
0x1651   :  { %v4118_v59 = vpop.xlane.xlu0 %4117  ;;  %4204 = vadd.xlane.f32.xlu0 %v4203_v1 }
0x1652   :  { %v4158_v20 = vmul.f32 0.03125, %v4118_v59  ;;  %v4189_v62 = vmul.f32 %v8598_v41, %v8598_v41  ;;  %v4188_v23 = vmul.f32 %v8601_v7, %v8601_v7 }
0x1654   :  { %v8609_v55 = vsub.f32 %v8512_v17, %v4158_v20  ;;  %v4209_v57 = vsel %vm66_vm0, %v4189_v62, 0.0  ;;  %v4206_v32 = vsel %vm66_vm0, %v4188_v23, 0.0 }
0x1655   :  { %v4121_v60 = vpop.xlane.xlu0 %4120  ;;  %v4124_v53 = vpop.xlane.xlu1 %4123  ;;  %4210 = vadd.xlane.f32.xlu0 %v4209_v57  ;;  %4207 = vadd.xlane.f32.xlu1 %v4206_v32  ;;  %v5827_v57 = vld [vmem:[%s8998_s10 + $0x18] sm:$0xff]   ;;  %v5828_v32 = vld [vmem:[%s8998_s10 + $0x10] sm:$0xff]  }
0x1656   :  { %v4159_v42 = vmul.f32 0.03125, %v4121_v60  ;;  %v4160_v3 = vmul.f32 0.03125, %v4124_v53  ;;  %v4190_v61 = vmul.f32 %v8609_v55, %v8609_v55  ;;  %5703 = vmatprep.subr.bf16.mxu0 %v5827_v57 }
0x1657   :  { %5704 = vmatpush3.bf16.msra.mxu0 %v5827_v57 }
0x1658   :  { %v8616_v50 = vsub.f32 %v8521_v58, %v4159_v42  ;;  %v8619_v8 = vsub.f32 %v8528_v45, %v4160_v3  ;;  %v4212_v22 = vsel %vm66_vm0, %v4190_v61, 0.0  ;;  %5705 = vmatprep.subr.bf16.mxu0 %v5828_v32 }
0x1659   :  { %v4127_v10 = vpop.xlane.xlu0 %4126  ;;  %v4130_v43 = vpop.xlane.xlu1 %4129  ;;  %4213 = vadd.xlane.f32.xlu1 %v4212_v22 }
0x165a   :  { %v4161_v11 = vmul.f32 0.03125, %v4127_v10  ;;  %v4162_v4 = vmul.f32 0.03125, %v4130_v43  ;;  %v4191_v27 = vmul.f32 %v8616_v50, %v8616_v50  ;;  %v4192_v40 = vmul.f32 %v8619_v8, %v8619_v8 }
0x165b   :  { %5706 = vmatpush3.bf16.msra.mxu0 %v5828_v32 }
0x165c   :  { %v8627_v21 = vsub.f32 %v8531_v49, %v4161_v11  ;;  %v8630_v19 = vsub.f32 %v8534_v5, %v4162_v4  ;;  %v4215_v56 = vsel %vm66_vm0, %v4191_v27, 0.0  ;;  %v4218_v26 = vsel %vm66_vm0, %v4192_v40, 0.0 }
0x165d   :  { %v4133_v37 = vpop.xlane.xlu0 %4132  ;;  %v4136_v0 = vpop.xlane.xlu1 %4135  ;;  %4216 = vadd.xlane.f32.xlu0 %v4215_v56  ;;  %4219 = vadd.xlane.f32.xlu1 %v4218_v26 }
0x165e   :  { %v4163_v63 = vmul.f32 0.03125, %v4133_v37  ;;  %v4164_v9 = vmul.f32 0.03125, %v4136_v0  ;;  %v4193_v34 = vmul.f32 %v8627_v21, %v8627_v21  ;;  %v4194_v47 = vmul.f32 %v8630_v19, %v8630_v19 }
0x1660   :  { %v8639_v12 = vsub.f32 %v8545_v35, %v4163_v63  ;;  %v8642_v29 = vsub.f32 %v8552_v39, %v4164_v9  ;;  %v4221_v6 = vsel %vm66_vm0, %v4193_v34, 0.0  ;;  %v4224_v46 = vsel %vm66_vm0, %v4194_v47, 0.0 }
0x1661   :  { %v4139_v30 = vpop.xlane.xlu0 %4138  ;;  %v4142_v51 = vpop.xlane.xlu1 %4141  ;;  %4222 = vadd.xlane.f32.xlu0 %v4221_v6  ;;  %4225 = vadd.xlane.f32.xlu1 %v4224_v46 }
0x1662   :  { %v4165_v36 = vmul.f32 0.03125, %v4139_v30  ;;  %v4166_v52 = vmul.f32 0.03125, %v4142_v51  ;;  %v4195_v25 = vmul.f32 %v8639_v12, %v8639_v12  ;;  %v4196_v48 = vmul.f32 %v8642_v29, %v8642_v29 }
0x1664   :  { %v8651_v28 = vsub.f32 %v8555_v44, %v4165_v36  ;;  %v8654_v2 = vsub.f32 %v8558_v38, %v4166_v52  ;;  %v4227_v16 = vsel %vm66_vm0, %v4195_v25, 0.0  ;;  %v4230_v1 = vsel %vm66_vm0, %v4196_v48, 0.0 }
0x1665   :  { %4228 = vadd.xlane.f32.xlu0 %v4227_v16  ;;  %4231 = vadd.xlane.f32.xlu1 %v4230_v1 }
0x1666   :  { %v4197_v59 = vmul.f32 %v8651_v28, %v8651_v28  ;;  %v4198_v20 = vmul.f32 %v8654_v2, %v8654_v2 }
0x1668   :  { %v4233_v62 = vsel %vm66_vm0, %v4197_v59, 0.0  ;;  %v4236_v23 = vsel %vm66_vm0, %v4198_v20, 0.0 }
0x1669   :  { %4234 = vadd.xlane.f32.xlu0 %v4233_v62  ;;  %4237 = vadd.xlane.f32.xlu1 %v4236_v23 }
0x1688   :  { %v4145_v60 = vpop.xlane.xlu0 %4144 }
0x1689   :  { %v4167_v53 = vmul.f32 0.03125, %v4145_v60 }
0x168b   :  { %v8671_v42 = vsub.f32 %v8571_v18, %v4167_v53 }
0x168c   :  { %v4151_v3 = vpop.xlane.xlu0 %4150  ;;  %v4148_v61 = vpop.xlane.xlu1 %4147 }
0x168d   :  { %v4169_v22 = vmul.f32 0.03125, %v4151_v3  ;;  %v4168_v10 = vmul.f32 0.03125, %v4148_v61  ;;  %v4199_v43 = vmul.f32 %v8671_v42, %v8671_v42 }
0x168f   :  { %v8676_v11 = vsub.f32 %v8574_v33, %v4169_v22  ;;  %v8679_v4 = vsub.f32 %v8581_v15, %v4168_v10  ;;  %v4239_v27 = vsel %vm66_vm0, %v4199_v43, 0.0 }
0x1690   :  { %4240 = vadd.xlane.f32.xlu0 %v4239_v27  ;;  %v4154_v40 = vpop.xlane.xlu1 %4153 }
0x1691   :  { %v4170_v56 = vmul.f32 0.03125, %v4154_v40  ;;  %v4201_v26 = vmul.f32 %v8676_v11, %v8676_v11  ;;  %v4200_v37 = vmul.f32 %v8679_v4, %v8679_v4 }
0x1693   :  { %v8687_v0 = vsub.f32 %v8584_v13, %v4170_v56  ;;  %v4245_v63 = vsel %vm66_vm0, %v4201_v26, 0.0  ;;  %v4242_v9 = vsel %vm66_vm0, %v4200_v37, 0.0 }
0x1694   :  { %4246 = vadd.xlane.f32.xlu0 %v4245_v63  ;;  %4243 = vadd.xlane.f32.xlu1 %v4242_v9  ;;  %v8698_v63 = vld [vmem:[%s8999_s8 + $0x1] ss:$0 sm:$0xff] }
0x1695   :  { %v4202_v34 = vmul.f32 %v8687_v0, %v8687_v0 }
0x1697   :  { %v4248_v47 = vsel %vm66_vm0, %v4202_v34, 0.0 }
0x1698   :  { %4249 = vadd.xlane.f32.xlu1 %v4248_v47 }
0x16da   :  { %v4205_v6 = vpop.xlane.xlu0 %4204 }
0x16db   :  { %v4251_v46 = vmul.f32 0.03125, %v4205_v6 }
0x16dd   :  { %v4267_v30 = vadd.f32 1e-05, %v4251_v46 }
0x16de   :  { %v4211_v51 = vpop.xlane.xlu0 %4210  ;;  %v4208_v36 = vpop.xlane.xlu1 %4207 }
0x16df   :  { %6221 = vrsqrt.f32 %v4267_v30  ;;  %v4253_v52 = vmul.f32 0.03125, %v4211_v51  ;;  %v4252_v25 = vmul.f32 0.03125, %v4208_v36 }
0x16e1   :  { %v4269_v48 = vadd.f32 1e-05, %v4253_v52  ;;  %v4268_v16 = vadd.f32 1e-05, %v4252_v25 }
0x16e2   :  { %v4214_v1 = vpop.xlane.xlu1 %4213 }
0x16e3   :  { %6223 = vrsqrt.f32 %v4269_v48  ;;  %v4254_v59 = vmul.f32 0.03125, %v4214_v1  ;;  %v8706_v48 = vld [vmem:[%s9000_s9 + $0x1] ss:$0 sm:$0xff] }
0x16e4   :  { %6225 = vrsqrt.f32 %v4268_v16 }
0x16e5   :  { %v4270_v20 = vadd.f32 1e-05, %v4254_v59 }
0x16e6   :  { %v4217_v62 = vpop.xlane.xlu0 %4216  ;;  %v4220_v23 = vpop.xlane.xlu1 %4219 }
0x16e7   :  { %6227 = vrsqrt.f32 %v4270_v20  ;;  %v4255_v57 = vmul.f32 0.03125, %v4217_v62  ;;  %v4256_v32 = vmul.f32 0.03125, %v4220_v23 }
0x16e9   :  { %v4271_v60 = vadd.f32 1e-05, %v4255_v57  ;;  %v4272_v53 = vadd.f32 1e-05, %v4256_v32 }
0x16ea   :  { %v4223_v3 = vpop.xlane.xlu0 %4222  ;;  %v4226_v61 = vpop.xlane.xlu1 %4225 }
0x16eb   :  { %6229 = vrsqrt.f32 %v4271_v60  ;;  %v4257_v22 = vmul.f32 0.03125, %v4223_v3  ;;  %v4258_v10 = vmul.f32 0.03125, %v4226_v61 }
0x16ec   :  { %v6222_v43 = vpop.eup %6221  ;;  %6231 = vrsqrt.f32 %v4272_v53 }
0x16ed   :  { %v4273_v27 = vadd.f32 1e-05, %v4257_v22  ;;  %v4274_v40 = vadd.f32 1e-05, %v4258_v10  ;;  %v4299_v37 = vmul.f32 %v6222_v43, %v8593_v31 }
0x16ee   :  { %v4229_v56 = vpop.xlane.xlu0 %4228  ;;  %v4232_v26 = vpop.xlane.xlu1 %4231 }
0x16ef   :  { %6233 = vrsqrt.f32 %v4273_v27  ;;  %v4259_v9 = vmul.f32 0.03125, %v4229_v56  ;;  %v4260_v34 = vmul.f32 0.03125, %v4232_v26  ;;  %v4321_v31 = vmul.f32 %v8698_v63, %v4299_v37 }
0x16f0   :  { %v6224_v47 = vpop.eup %6223  ;;  %6235 = vrsqrt.f32 %v4274_v40 }
0x16f1   :  { %v6226_v6 = vpop.eup %6225  ;;  %v4301_v46 = vmul.f32 %v6224_v47, %v8598_v41  ;;  %v4275_v30 = vadd.f32 1e-05, %v4259_v9  ;;  %v4276_v51 = vadd.f32 1e-05, %v4260_v34  ;;  %v4343_v57 = vadd.f32 %v8706_v48, %v4321_v31 }
0x16f2   :  { %v4235_v36 = vpop.xlane.xlu0 %4234  ;;  %v4238_v52 = vpop.xlane.xlu1 %4237  ;;  %v4300_v25 = vmul.f32 %v6226_v6, %v8601_v7 }
0x16f3   :  { %6237 = vrsqrt.f32 %v4275_v30  ;;  %v4261_v16 = vmul.f32 0.03125, %v4235_v36  ;;  %v4262_v1 = vmul.f32 0.03125, %v4238_v52  ;;  %v4323_v20 = vmul.f32 %v8698_v63, %v4301_v46 }
0x16f4   :  { %v6228_v59 = vpop.eup %6227  ;;  %6239 = vrsqrt.f32 %v4276_v51  ;;  %v4322_v41 = vmul.f32 %v8698_v63, %v4300_v25 }
0x16f5   :  { %v4302_v62 = vmul.f32 %v6228_v59, %v8609_v55  ;;  %v4277_v23 = vadd.f32 1e-05, %v4261_v16  ;;  %v4278_v7 = vadd.f32 1e-05, %v4262_v1  ;;  %v4345_v22 = vadd.f32 %v8706_v48, %v4323_v20 }
0x16f6   :  { %v4344_v32 = vadd.f32 %v8706_v48, %v4322_v41 }
0x16f7   :  { %v4324_v60 = vmul.f32 %v8698_v63, %v4302_v62  ;;  %6241 = vrsqrt.f32 %v4277_v23 }
0x16f8   :  { %v6230_v53 = vpop.eup %6229  ;;  %6243 = vrsqrt.f32 %v4278_v7  ;;  %v4359_v3 = vpack.c.bf16 %v4344_v32, %v4343_v57 }
0x16f9   :  { %v6232_v61 = vpop.eup %6231  ;;  %v4346_v10 = vadd.f32 %v8706_v48, %v4324_v60  ;;  %v4303_v43 = vmul.f32 %v6230_v53, %v8616_v50 }
0x16fa   :  { %5707 = vmatprep.mubr.msk.bf16.mxu0 %vm66_vm0, %v4359_v3  ;;  %v4304_v55 = vmul.f32 %v6232_v61, %v8619_v8 }
0x16fb   :  { %v4360_v27 = vpack.c.bf16 %v4346_v10, %v4345_v22  ;;  %v4325_v40 = vmul.f32 %v8698_v63, %v4303_v43 }
0x16fc   :  { %v6234_v56 = vpop.eup %6233  ;;  %v4326_v26 = vmul.f32 %v8698_v63, %v4304_v55 }
0x16fd   :  { %v6236_v37 = vpop.eup %6235  ;;  %v4305_v9 = vmul.f32 %v6234_v56, %v8627_v21  ;;  %5708 = vmatmul.mubr.msk.bf16.vlgmr.msra.gmra.mxu0 %vm66_vm0, %v4360_v27  ;;  %v4347_v34 = vadd.f32 %v8706_v48, %v4325_v40 }
0x16fe   :  { %v4306_v47 = vmul.f32 %v6236_v37, %v8630_v19  ;;  %v4348_v50 = vadd.f32 %v8706_v48, %v4326_v26 }
0x16ff   :  { %v4327_v6 = vmul.f32 %v8698_v63, %v4305_v9 }
0x1700   :  { %v6238_v8 = vpop.eup %6237  ;;  %v4361_v46 = vpack.c.bf16 %v4348_v50, %v4347_v34  ;;  %v4328_v30 = vmul.f32 %v8698_v63, %v4306_v47 }
0x1701   :  { %v6240_v51 = vpop.eup %6239  ;;  %v4349_v36 = vadd.f32 %v8706_v48, %v4327_v6  ;;  %v4307_v52 = vmul.f32 %v6238_v8, %v8639_v12 }
0x1702   :  { %5711 = vmatprep.mubr.msk.bf16.mxu0 %vm66_vm0, %v4361_v46  ;;  %v4350_v21 = vadd.f32 %v8706_v48, %v4328_v30  ;;  %v4308_v25 = vmul.f32 %v6240_v51, %v8642_v29 }
0x1703   :  { %v4329_v19 = vmul.f32 %v8698_v63, %v4307_v52 }
0x1704   :  { %v6242_v31 = vpop.eup %6241  ;;  %v4362_v16 = vpack.c.bf16 %v4350_v21, %v4349_v36  ;;  %v4330_v1 = vmul.f32 %v8698_v63, %v4308_v25 }
0x1705   :  { %v6244_v59 = vpop.eup %6243  ;;  %v4309_v41 = vmul.f32 %v6242_v31, %v8651_v28  ;;  %v4351_v20 = vadd.f32 %v8706_v48, %v4329_v19  ;;  %v5832_v19 = vld [vmem:[%s9001_s12 + $0x60] sm:$0xff]   ;;  %v5833_v31 = vld [vmem:[%s9001_s12 + $0x58] sm:$0xff]  }
0x1706   :  { %v4310_v62 = vmul.f32 %v6244_v59, %v8654_v2  ;;  %5712 = vmatmul.mubr.msk.bf16.gmra.mxu0 %vm66_vm0, %v4362_v16  ;;  %v4352_v12 = vadd.f32 %v8706_v48, %v4330_v1  ;;  %v5834_v16 = vld [vmem:[%s9001_s12 + $0x50] sm:$0xff]   ;;  %v5835_v1 = vld [vmem:[%s9001_s12 + $0x48] sm:$0xff]   ;;  %v5836_v59 = vld [vmem:[%s9001_s12 + $0x40] sm:$0xff]  }
0x1707   :  { %v4331_v23 = vmul.f32 %v8698_v63, %v4309_v41  ;;  %v8787_v41 = vld [vmem:[%s9002_s11 + $0x1] ss:$0 sm:$0xff] }
0x1708   :  { %v4363_v29 = vpack.c.bf16 %v4352_v12, %v4351_v20  ;;  %v4332_v7 = vmul.f32 %v8698_v63, %v4310_v62 }
0x1709   :  { %v4353_v57 = vadd.f32 %v8706_v48, %v4331_v23 }
0x170a   :  { %5715 = vmatprep.mubr.msk.bf16.mxu0 %vm66_vm0, %v4363_v29  ;;  %v4354_v32 = vadd.f32 %v8706_v48, %v4332_v7 }
0x170c   :  { %v4364_v28 = vpack.c.bf16 %v4354_v32, %v4353_v57 }
0x170e   :  { %5716 = vmatmul.mubr.msk.bf16.gmra.mxu0 %vm66_vm0, %v4364_v28 }
0x1719   :  { %v4241_v60 = vpop.xlane.xlu0 %4240 }
0x171a   :  { %v4263_v2 = vmul.f32 0.03125, %v4241_v60 }
0x171c   :  { %v4279_v53 = vadd.f32 1e-05, %v4263_v2 }
0x171d   :  { %v4247_v3 = vpop.xlane.xlu0 %4246  ;;  %v4244_v61 = vpop.xlane.xlu1 %4243 }
0x171e   :  { %6245 = vrsqrt.f32 %v4279_v53  ;;  %v4265_v22 = vmul.f32 0.03125, %v4247_v3  ;;  %v4264_v10 = vmul.f32 0.03125, %v4244_v61 }
0x1720   :  { %v4281_v43 = vadd.f32 1e-05, %v4265_v22  ;;  %v4280_v55 = vadd.f32 1e-05, %v4264_v10 }
0x1721   :  { %v4250_v27 = vpop.xlane.xlu1 %4249 }
0x1722   :  { %6247 = vrsqrt.f32 %v4281_v43  ;;  %v4266_v40 = vmul.f32 0.03125, %v4250_v27 }
0x1723   :  { %6249 = vrsqrt.f32 %v4280_v55 }
0x1724   :  { %v4282_v56 = vadd.f32 1e-05, %v4266_v40 }
0x1726   :  { %6251 = vrsqrt.f32 %v4282_v56 }
0x172b   :  { %v6246_v26 = vpop.eup %6245 }
0x172c   :  { %v4311_v37 = vmul.f32 %v6246_v26, %v8671_v42 }
0x172e   :  { %v4333_v6 = vmul.f32 %v8698_v63, %v4311_v37 }
0x172f   :  { %v6248_v9 = vpop.eup %6247 }
0x1730   :  { %v6250_v34 = vpop.eup %6249  ;;  %v4313_v47 = vmul.f32 %v6248_v9, %v8676_v11  ;;  %v4355_v36 = vadd.f32 %v8706_v48, %v4333_v6 }
0x1731   :  { %v4312_v50 = vmul.f32 %v6250_v34, %v8679_v4 }
0x1732   :  { %v4335_v51 = vmul.f32 %v8698_v63, %v4313_v47 }
0x1733   :  { %v6252_v8 = vpop.eup %6251  ;;  %v4334_v46 = vmul.f32 %v8698_v63, %v4312_v50 }
0x1734   :  { %v4314_v30 = vmul.f32 %v6252_v8, %v8687_v0  ;;  %v4357_v11 = vadd.f32 %v8706_v48, %v4335_v51  ;;  %v5829_v0 = vld [vmem:[%s9001_s12 + $0x78] sm:$0xff]  }
0x1735   :  { %v4356_v52 = vadd.f32 %v8706_v48, %v4334_v46  ;;  %5723 = vmatprep.subr.bf16.mxu1 %v5829_v0 }
0x1736   :  { %v4336_v42 = vmul.f32 %v8698_v63, %v4314_v30  ;;  %5724 = vmatpush3.bf16.msra.mxu1 %v5829_v0  ;;  %v5830_v63 = vld [vmem:[%s9001_s12 + $0x70] sm:$0xff]  }
0x1737   :  { %v4365_v21 = vpack.c.bf16 %v4356_v52, %v4355_v36  ;;  %5725 = vmatprep.subr.bf16.mxu1 %v5830_v63 }
0x1738   :  { %v4358_v4 = vadd.f32 %v8706_v48, %v4336_v42  ;;  %v5831_v48 = vld [vmem:[%s9001_s12 + $0x68] sm:$0xff]  }
0x1739   :  { %5719 = vmatprep.mubr.msk.bf16.mxu0 %vm66_vm0, %v4365_v21 }
0x173a   :  { %v4366_v25 = vpack.c.bf16 %v4358_v4, %v4357_v11  ;;  %5726 = vmatpush3.bf16.msra.mxu1 %v5830_v63 }
0x173b   :  { %5727 = vmatprep.subr.bf16.mxu1 %v5831_v48 }
0x173c   :  { %5720 = vmatmul.mubr.msk.bf16.gmra.mxu0 %vm66_vm0, %v4366_v25 }
0x173e   :  { %5728 = vmatpush3.bf16.msra.mxu1 %v5831_v48 }
0x173f   :  { %5729 = vmatprep.subr.bf16.mxu1 %v5832_v19 }
0x1742   :  { %5730 = vmatpush3.bf16.msra.mxu1 %v5832_v19 }
0x1743   :  { %5731 = vmatprep.subr.bf16.mxu1 %v5833_v31 }
0x1746   :  { %5732 = vmatpush3.bf16.msra.mxu1 %v5833_v31 }
0x1747   :  { %5733 = vmatprep.subr.bf16.mxu1 %v5834_v16 }
0x174a   :  { %5734 = vmatpush3.bf16.msra.mxu1 %v5834_v16 }
0x174b   :  { %5735 = vmatprep.subr.bf16.mxu1 %v5835_v1 }
0x174e   :  { %5736 = vmatpush3.bf16.msra.mxu1 %v5835_v1 }
0x174f   :  { %5737 = vmatprep.subr.bf16.mxu1 %v5836_v59 }
0x1752   :  { %5738 = vmatpush3.bf16.msra.mxu1 %v5836_v59 }
0x17bd   :  { %v5709_v20 = vpop.f32.mrf.mxu0 }
0x17be   :  { %v8790_v62 = vadd.f32 %v5709_v20, %v8787_v41 }
0x17bf   :  { %v4450_v12 = vpop.f32.mrf.mxu0 }
0x17c0   :  { %v4531_v23 = vmul.f32 0.044715, %v8790_v62  ;;  %v8794_v29 = vadd.f32 %v8787_v41, %v4450_v12 }
0x17c1   :  { %v5710_v7 = vpop.f32.mrf.mxu0 }
0x17c2   :  { %v4547_v57 = vmul.f32 %v4531_v23, %v8790_v62  ;;  %v4529_v32 = vmul.f32 0.044715, %v8794_v29  ;;  %v8799_v28 = vadd.f32 %v5710_v7, %v8787_v41 }
0x17c3   :  { %v4453_v60 = vpop.f32.mrf.mxu0 }
0x17c4   :  { %v4563_v2 = vmul.f32 %v4547_v57, %v8790_v62  ;;  %v4545_v53 = vmul.f32 %v4529_v32, %v8794_v29  ;;  %v4532_v3 = vmul.f32 0.044715, %v8799_v28  ;;  %v8805_v61 = vadd.f32 %v8787_v41, %v4453_v60 }
0x17c6   :  { %v4579_v22 = vadd.f32 %v4563_v2, %v8790_v62  ;;  %v4561_v10 = vmul.f32 %v4545_v53, %v8794_v29  ;;  %v4548_v43 = vmul.f32 %v4532_v3, %v8799_v28  ;;  %v5713_v55 = vpop.f32.mrf.mxu0  ;;  %v4530_v27 = vmul.f32 0.044715, %v8805_v61 }
0x17c7   :  { %v8812_v40 = vadd.f32 %v5713_v55, %v8787_v41 }
0x17c8   :  { %v4595_v56 = vmul.f32 0.7978846, %v4579_v22  ;;  %v4564_v26 = vmul.f32 %v4548_v43, %v8799_v28  ;;  %v4466_v37 = vpop.f32.mrf.mxu0  ;;  %v4577_v9 = vadd.f32 %v4561_v10, %v8794_v29  ;;  %v4546_v34 = vmul.f32 %v4530_v27, %v8805_v61 }
0x17c9   :  { %v4535_v47 = vmul.f32 0.044715, %v8812_v40  ;;  %v8819_v50 = vadd.f32 %v8787_v41, %v4466_v37 }
0x17ca   :  { %6253 = vtanh.f32 %v4595_v56  ;;  %v4580_v6 = vadd.f32 %v4564_v26, %v8799_v28  ;;  %v5714_v8 = vpop.f32.mrf.mxu0  ;;  %v4593_v46 = vmul.f32 0.7978846, %v4577_v9  ;;  %v4562_v30 = vmul.f32 %v4546_v34, %v8805_v61 }
0x17cb   :  { %v4551_v51 = vmul.f32 %v4535_v47, %v8812_v40  ;;  %v4533_v36 = vmul.f32 0.044715, %v8819_v50  ;;  %v8826_v52 = vadd.f32 %v5714_v8, %v8787_v41 }
0x17cc   :  { %v4596_v42 = vmul.f32 0.7978846, %v4580_v6  ;;  %v4469_v21 = vpop.f32.mrf.mxu0  ;;  %6255 = vtanh.f32 %v4593_v46  ;;  %v4578_v48 = vadd.f32 %v4562_v30, %v8805_v61 }
0x17cd   :  { %v4567_v11 = vmul.f32 %v4551_v51, %v8812_v40  ;;  %v4549_v4 = vmul.f32 %v4533_v36, %v8819_v50  ;;  %v4536_v25 = vmul.f32 0.044715, %v8826_v52  ;;  %v8832_v0 = vadd.f32 %v8787_v41, %v4469_v21 }
0x17ce   :  { %6257 = vtanh.f32 %v4596_v42  ;;  %v5717_v63 = vpop.f32.mrf.mxu0  ;;  %v4594_v12 = vmul.f32 0.7978846, %v4578_v48 }
0x17cf   :  { %v4583_v19 = vadd.f32 %v4567_v11, %v8812_v40  ;;  %v4565_v31 = vmul.f32 %v4549_v4, %v8819_v50  ;;  %v4552_v16 = vmul.f32 %v4536_v25, %v8826_v52  ;;  %v4534_v1 = vmul.f32 0.044715, %v8832_v0 }
0x17d0   :  { %v8840_v59 = vadd.f32 %v5717_v63, %v8787_v41  ;;  %v4482_v20 = vpop.f32.mrf.mxu0  ;;  %6259 = vtanh.f32 %v4594_v12 }
0x17d1   :  { %v4599_v23 = vmul.f32 0.7978846, %v4583_v19  ;;  %v4568_v7 = vmul.f32 %v4552_v16, %v8826_v52  ;;  %v4550_v57 = vmul.f32 %v4534_v1, %v8832_v0  ;;  %v8845_v32 = vadd.f32 %v8787_v41, %v4482_v20 }
0x17d2   :  { %v4539_v60 = vmul.f32 0.044715, %v8840_v59  ;;  %v5718_v2 = vpop.f32.mrf.mxu0  ;;  %v4581_v53 = vadd.f32 %v4565_v31, %v8819_v50 }
0x17d3   :  { %v4584_v3 = vadd.f32 %v4568_v7, %v8826_v52  ;;  %v4566_v22 = vmul.f32 %v4550_v57, %v8832_v0  ;;  %v4537_v10 = vmul.f32 0.044715, %v8845_v32  ;;  %6261 = vtanh.f32 %v4599_v23 }
0x17d4   :  { %v4555_v43 = vmul.f32 %v4539_v60, %v8840_v59  ;;  %v8854_v55 = vadd.f32 %v5718_v2, %v8787_v41  ;;  %v4485_v27 = vpop.f32.mrf.mxu0  ;;  %v4597_v56 = vmul.f32 0.7978846, %v4581_v53  ;;  %v4516_v57 = vmul.f32 0.5, %v8799_v28 }
0x17d5   :  { %v4600_v26 = vmul.f32 0.7978846, %v4584_v3  ;;  %v4553_v37 = vmul.f32 %v4537_v10, %v8845_v32  ;;  %v8858_v9 = vadd.f32 %v8787_v41, %v4485_v27  ;;  %v4582_v34 = vadd.f32 %v4566_v22, %v8832_v0 }
0x17d6   :  { %v4571_v47 = vmul.f32 %v4555_v43, %v8840_v59  ;;  %v4540_v6 = vmul.f32 0.044715, %v8854_v55  ;;  %6263 = vtanh.f32 %v4597_v56  ;;  %v4513_v53 = vmul.f32 0.5, %v8794_v29 }
0x17d7   :  { %v6254_v8 = vpop.eup %6253  ;;  %6265 = vtanh.f32 %v4600_v26  ;;  %v4569_v46 = vmul.f32 %v4553_v37, %v8845_v32  ;;  %v4538_v30 = vmul.f32 0.044715, %v8858_v9  ;;  %v4598_v51 = vmul.f32 0.7978846, %v4582_v34 }
0x17d8   :  { %v4587_v36 = vadd.f32 %v4571_v47, %v8840_v59  ;;  %v4556_v42 = vmul.f32 %v4540_v6, %v8854_v55  ;;  %v4627_v60 = vadd.f32 1.0, %v6254_v8  ;;  %v4514_v3 = vmul.f32 0.5, %v8805_v61 }
0x17d9   :  { %v6256_v21 = vpop.eup %6255  ;;  %v4554_v11 = vmul.f32 %v4538_v30, %v8858_v9  ;;  %6267 = vtanh.f32 %v4598_v51  ;;  %v4585_v4 = vadd.f32 %v4569_v46, %v8845_v32  ;;  %v4515_v43 = vmul.f32 0.5, %v8790_v62 }
0x17da   :  { %v4572_v25 = vmul.f32 %v4556_v42, %v8854_v55  ;;  %v4603_v48 = vmul.f32 0.7978846, %v4587_v36  ;;  %v4625_v23 = vadd.f32 1.0, %v6256_v21  ;;  %v4517_v29 = vmul.f32 0.5, %v8819_v50 }
0x17db   :  { %v6258_v63 = vpop.eup %6257  ;;  %v4570_v19 = vmul.f32 %v4554_v11, %v8858_v9  ;;  %v4601_v31 = vmul.f32 0.7978846, %v4585_v4  ;;  %v4643_v34 = vmul.f32 %v4627_v60, %v4515_v43  ;;  %v4518_v61 = vmul.f32 0.5, %v8832_v0 }
0x17dc   :  { %v4588_v16 = vadd.f32 %v4572_v25, %v8854_v55  ;;  %v4628_v1 = vadd.f32 1.0, %v6258_v63  ;;  %v4641_v56 = vmul.f32 %v4625_v23, %v4513_v53  ;;  %v4520_v62 = vmul.f32 0.5, %v8826_v52 }
0x17dd   :  { %v4586_v20 = vadd.f32 %v4570_v19, %v8858_v9  ;;  %6269 = vtanh.f32 %v4601_v31  ;;  %v6260_v7 = vpop.eup %6259  ;;  %v4519_v11 = vmul.f32 0.5, %v8812_v40  ;;  %v4521_v0 = vmul.f32 0.5, %v8845_v32 }
0x17de   :  { %v4604_v12 = vmul.f32 0.7978846, %v4588_v16  ;;  %6271 = vtanh.f32 %v4603_v48  ;;  %v4626_v22 = vadd.f32 1.0, %v6260_v7  ;;  %v4644_v27 = vmul.f32 %v4628_v1, %v4516_v57 }
0x17df   :  { %v4602_v2 = vmul.f32 0.7978846, %v4586_v20  ;;  %v4522_v52 = vmul.f32 0.5, %v8858_v9  ;;  %v4524_v23 = vmul.f32 0.5, %v8854_v55  ;;  %v4523_v60 = vmul.f32 0.5, %v8840_v59 }
0x17e0   :  { %6273 = vtanh.f32 %v4604_v12  ;;  %v6262_v10 = vpop.eup %6261  ;;  %v4642_v26 = vmul.f32 %v4626_v22, %v4514_v3  ;;  %v4658_v6 = vpack.c.bf16 %v4644_v27, %v4643_v34 }
0x17e1   :  { %6275 = vtanh.f32 %v4602_v2  ;;  %v4631_v36 = vadd.f32 1.0, %v6262_v10 }
0x17e2   :  { %v4657_v28 = vpack.c.bf16 %v4642_v26, %v4641_v56 }
0x17e3   :  { %v6264_v37 = vpop.eup %6263  ;;  %v4647_v48 = vmul.f32 %v4631_v36, %v4519_v11 }
0x17e4   :  { %v6266_v47 = vpop.eup %6265  ;;  %v4629_v8 = vadd.f32 1.0, %v6264_v37  ;;  %5739 = vmatprep.mubr.bf16.mxu1 %v4657_v28 }
0x17e5   :  { %v4632_v46 = vadd.f32 1.0, %v6266_v47  ;;  %5740 = vmatmul.mubr.bf16.vlgmr.msra.gmra.mxu1 %v4658_v6 }
0x17e6   :  { %v6268_v30 = vpop.eup %6267  ;;  %v4645_v42 = vmul.f32 %v4629_v8, %v4517_v29 }
0x17e7   :  { %v4630_v51 = vadd.f32 1.0, %v6268_v30  ;;  %v4648_v4 = vmul.f32 %v4632_v46, %v4520_v62 }
0x17e9   :  { %v4646_v21 = vmul.f32 %v4630_v51, %v4518_v61  ;;  %v4660_v16 = vpack.c.bf16 %v4648_v4, %v4647_v48 }
0x17ea   :  { %v6270_v25 = vpop.eup %6269 }
0x17eb   :  { %v4659_v63 = vpack.c.bf16 %v4646_v21, %v4645_v42  ;;  %v6272_v19 = vpop.eup %6271  ;;  %v4633_v50 = vadd.f32 1.0, %v6270_v25 }
0x17ec   :  { %v4635_v40 = vadd.f32 1.0, %v6272_v19 }
0x17ed   :  { %v6274_v31 = vpop.eup %6273  ;;  %5743 = vmatprep.mubr.bf16.mxu1 %v4659_v63  ;;  %v4649_v7 = vmul.f32 %v4633_v50, %v4521_v0 }
0x17ee   :  { %v6276_v1 = vpop.eup %6275  ;;  %v4636_v20 = vadd.f32 1.0, %v6274_v31  ;;  %5744 = vmatmul.mubr.bf16.gmra.mxu1 %v4660_v16  ;;  %v4651_v3 = vmul.f32 %v4635_v40, %v4523_v60 }
0x17ef   :  { %v4634_v12 = vadd.f32 1.0, %v6276_v1 }
0x17f0   :  { %v4652_v2 = vmul.f32 %v4636_v20, %v4524_v23 }
0x17f1   :  { %v4650_v57 = vmul.f32 %v4634_v12, %v4522_v52 }
0x17f2   :  { %v4662_v22 = vpack.c.bf16 %v4652_v2, %v4651_v3 }
0x17f3   :  { %v4661_v53 = vpack.c.bf16 %v4650_v57, %v4649_v7 }
0x17f5   :  { %5747 = vmatprep.mubr.bf16.mxu1 %v4661_v53 }
0x17f6   :  { %5748 = vmatmul.mubr.bf16.gmra.mxu1 %v4662_v22  ;;  %v8892_v22 = vld [vmem:[%s9003_s13 + $0x1] ss:$0 sm:$0xff] }
0x17fc   :  { %v5721_v10 = vpop.f32.mrf.mxu0 }
0x17fd   :  { %v4507_v32 = vadd.f32 %v5721_v10, %v8787_v41 }
0x17fe   :  { %v4498_v43 = vpop.f32.mrf.mxu0 }
0x17ff   :  { %v4543_v27 = vmul.f32 0.044715, %v4507_v32  ;;  %v4499_v9 = vadd.f32 %v8787_v41, %v4498_v43  ;;  %v4527_v23 = vmul.f32 0.5, %v4507_v32 }
0x1800   :  { %v5722_v56 = vpop.f32.mrf.mxu0 }
0x1801   :  { %v4559_v55 = vmul.f32 %v4543_v27, %v4507_v32  ;;  %v4541_v26 = vmul.f32 0.044715, %v4499_v9  ;;  %v4510_v37 = vadd.f32 %v5722_v56, %v8787_v41  ;;  %v4525_v20 = vmul.f32 0.5, %v4499_v9 }
0x1802   :  { %v4501_v34 = vpop.f32.mrf.mxu0 }
0x1803   :  { %v4575_v59 = vmul.f32 %v4559_v55, %v4507_v32  ;;  %v4557_v47 = vmul.f32 %v4541_v26, %v4499_v9  ;;  %v4544_v28 = vmul.f32 0.044715, %v4510_v37  ;;  %v4502_v6 = vadd.f32 %v8787_v41, %v4501_v34 }
0x1804   :  { %v4528_v1 = vmul.f32 0.5, %v4510_v37 }
0x1805   :  { %v4591_v8 = vadd.f32 %v4575_v59, %v4507_v32  ;;  %v4573_v46 = vmul.f32 %v4557_v47, %v4499_v9  ;;  %v4560_v30 = vmul.f32 %v4544_v28, %v4510_v37  ;;  %v4542_v29 = vmul.f32 0.044715, %v4502_v6 }
0x1806   :  { %v4526_v52 = vmul.f32 0.5, %v4502_v6 }
0x1807   :  { %v4576_v61 = vmul.f32 %v4560_v30, %v4510_v37  ;;  %v4558_v51 = vmul.f32 %v4542_v29, %v4502_v6  ;;  %v4589_v62 = vadd.f32 %v4573_v46, %v4499_v9  ;;  %v4607_v36 = vmul.f32 0.7978846, %v4591_v8 }
0x1809   :  { %v4592_v42 = vadd.f32 %v4576_v61, %v4510_v37  ;;  %v4574_v21 = vmul.f32 %v4558_v51, %v4502_v6  ;;  %v4605_v11 = vmul.f32 0.7978846, %v4589_v62 }
0x180b   :  { %v4608_v4 = vmul.f32 0.7978846, %v4592_v42  ;;  %v4590_v25 = vadd.f32 %v4574_v21, %v4502_v6  ;;  %6277 = vtanh.f32 %v4605_v11 }
0x180c   :  { %6279 = vtanh.f32 %v4607_v36 }
0x180d   :  { %6281 = vtanh.f32 %v4608_v4  ;;  %v4606_v63 = vmul.f32 0.7978846, %v4590_v25 }
0x180f   :  { %6283 = vtanh.f32 %v4606_v63 }
0x1818   :  { %v6278_v48 = vpop.eup %6277 }
0x1819   :  { %v6280_v41 = vpop.eup %6279  ;;  %v4637_v31 = vadd.f32 1.0, %v6278_v48 }
0x181a   :  { %v6282_v19 = vpop.eup %6281  ;;  %v4639_v0 = vadd.f32 1.0, %v6280_v41 }
0x181b   :  { %v4640_v16 = vadd.f32 1.0, %v6282_v19  ;;  %v4653_v7 = vmul.f32 %v4637_v31, %v4525_v20 }
0x181c   :  { %v6284_v50 = vpop.eup %6283  ;;  %v4655_v60 = vmul.f32 %v4639_v0, %v4527_v23 }
0x181d   :  { %v4638_v12 = vadd.f32 1.0, %v6284_v50  ;;  %v4656_v40 = vmul.f32 %v4640_v16, %v4528_v1 }
0x181f   :  { %v4654_v57 = vmul.f32 %v4638_v12, %v4526_v52  ;;  %v4664_v53 = vpack.c.bf16 %v4656_v40, %v4655_v60 }
0x1821   :  { %v4663_v2 = vpack.c.bf16 %v4654_v57, %v4653_v7 }
0x1823   :  { %5751 = vmatprep.mubr.bf16.mxu1 %v4663_v2 }
0x1824   :  { %5752 = vmatmul.mubr.bf16.gmra.mxu1 %v4664_v53 }
0x18a5   :  { %v5741_v3 = vpop.f32.mrf.mxu1 }
0x18a6   :  { %v4829_v10 = vadd.f32 %v5741_v3, %v8502_v14 }
0x18a7   :  { %v4764_v43 = vpop.f32.mrf.mxu1 }
0x18a8   :  { %v4853_v27 = vadd.f32 %v8892_v22, %v4829_v10  ;;  %v4827_v32 = vadd.f32 %v4764_v43, %v8499_v54 }
0x18a9   :  { %v5742_v9 = vpop.f32.mrf.mxu1 }
0x18aa   :  { %4869 = vst.msk [vmem:[%s9004_s14 + $0x10] sm:$0xff] %vm66_vm0, %v4853_v27  ;;  %v4851_v56 = vadd.f32 %v8892_v22, %v4827_v32  ;;  %v4830_v55 = vadd.f32 %v5742_v9, %v8512_v17 }
0x18ab   :  { %v4767_v26 = vpop.f32.mrf.mxu1 }
0x18ac   :  { %4867 = vst.msk [vmem:[%s9004_s14] sm:$0xff] %vm66_vm0, %v4851_v56  ;;  %v4854_v14 = vadd.f32 %v8892_v22, %v4830_v55  ;;  %v4828_v54 = vadd.f32 %v4767_v26, %v8509_v24 }
0x18ae   :  { %v5745_v37 = vpop.f32.mrf.mxu1  ;;  %4870 = vst.msk [vmem:[%s9004_s14 + $0x18] sm:$0xff] %vm66_vm0, %v4854_v14  ;;  %v4852_v34 = vadd.f32 %v8892_v22, %v4828_v54 }
0x18af   :  { %v4833_v17 = vadd.f32 %v5745_v37, %v8531_v49 }
0x18b0   :  { %v4780_v59 = vpop.f32.mrf.mxu1  ;;  %4868 = vst.msk [vmem:[%s9004_s14 + $0x8] sm:$0xff] %vm66_vm0, %v4852_v34 }
0x18b1   :  { %v4857_v47 = vadd.f32 %v8892_v22, %v4833_v17  ;;  %v4831_v24 = vadd.f32 %v4780_v59, %v8521_v58 }
0x18b2   :  { %v5746_v28 = vpop.f32.mrf.mxu1 }
0x18b3   :  { %4873 = vst.msk [vmem:[%s9004_s14 + $0x30] sm:$0xff] %vm66_vm0, %v4857_v47  ;;  %v4855_v6 = vadd.f32 %v8892_v22, %v4831_v24  ;;  %v4834_v49 = vadd.f32 %v5746_v28, %v8534_v5 }
0x18b4   :  { %v4783_v8 = vpop.f32.mrf.mxu1 }
0x18b5   :  { %4871 = vst.msk [vmem:[%s9004_s14 + $0x20] sm:$0xff] %vm66_vm0, %v4855_v6  ;;  %v4858_v46 = vadd.f32 %v8892_v22, %v4834_v49  ;;  %v4832_v58 = vadd.f32 %v4783_v8, %v8528_v45 }
0x18b6   :  { %v5749_v30 = vpop.f32.mrf.mxu1 }
0x18b7   :  { %4874 = vst.msk [vmem:[%s9004_s14 + $0x38] sm:$0xff] %vm66_vm0, %v4858_v46  ;;  %v4856_v29 = vadd.f32 %v8892_v22, %v4832_v58  ;;  %v4837_v5 = vadd.f32 %v5749_v30, %v8555_v44 }
0x18b8   :  { %v4796_v61 = vpop.f32.mrf.mxu1 }
0x18b9   :  { %4872 = vst.msk [vmem:[%s9004_s14 + $0x28] sm:$0xff] %vm66_vm0, %v4856_v29  ;;  %v4861_v51 = vadd.f32 %v8892_v22, %v4837_v5  ;;  %v4835_v45 = vadd.f32 %v4796_v61, %v8545_v35 }
0x18ba   :  { %v5750_v62 = vpop.f32.mrf.mxu1 }
0x18bb   :  { %4877 = vst.msk [vmem:[%s9004_s14 + $0x50] sm:$0xff] %vm66_vm0, %v4861_v51  ;;  %v4859_v36 = vadd.f32 %v8892_v22, %v4835_v45  ;;  %v4838_v44 = vadd.f32 %v5750_v62, %v8558_v38 }
0x18bc   :  { %v4799_v42 = vpop.f32.mrf.mxu1 }
0x18bd   :  { %4875 = vst.msk [vmem:[%s9004_s14 + $0x40] sm:$0xff] %vm66_vm0, %v4859_v36  ;;  %v4862_v21 = vadd.f32 %v8892_v22, %v4838_v44  ;;  %v4836_v35 = vadd.f32 %v4799_v42, %v8552_v39 }
0x18bf   :  { %4878 = vst.msk [vmem:[%s9004_s14 + $0x58] sm:$0xff] %vm66_vm0, %v4862_v21  ;;  %v4860_v11 = vadd.f32 %v8892_v22, %v4836_v35 }
0x18c1   :  { %4876 = vst.msk [vmem:[%s9004_s14 + $0x48] sm:$0xff] %vm66_vm0, %v4860_v11 }
0x18e4   :  { %v5753_v38 = vpop.f32.mrf.mxu1 }
0x18e5   :  { %v4841_v4 = vadd.f32 %v5753_v38, %v8574_v33 }
0x18e6   :  { %v4812_v25 = vpop.f32.mrf.mxu1 }
0x18e7   :  { %v4865_v63 = vadd.f32 %v8892_v22, %v4841_v4  ;;  %v4839_v39 = vadd.f32 %v4812_v25, %v8571_v18 }
0x18e8   :  { %v5754_v48 = vpop.f32.mrf.mxu1 }
0x18e9   :  { %4881 = vst.msk [vmem:[%s9004_s14 + $0x70] sm:$0xff] %vm66_vm0, %v4865_v63  ;;  %v4863_v41 = vadd.f32 %v8892_v22, %v4839_v39  ;;  %v4842_v19 = vadd.f32 %v5754_v48, %v8584_v13 }
0x18ea   :  { %v4815_v31 = vpop.f32.mrf.mxu1 }
0x18eb   :  { %4879 = vst.msk [vmem:[%s9004_s14 + $0x60] sm:$0xff] %vm66_vm0, %v4863_v41  ;;  %v4866_v33 = vadd.f32 %v8892_v22, %v4842_v19  ;;  %v4840_v18 = vadd.f32 %v4815_v31, %v8581_v15 }
0x18ed   :  { %4882 = vst.msk [vmem:[%s9004_s14 + $0x78] sm:$0xff] %vm66_vm0, %v4866_v33  ;;  %v4864_v16 = vadd.f32 %v8892_v22, %v4840_v18 }
0x18ef   :  { %4880 = vst.msk [vmem:[%s9004_s14 + $0x68] sm:$0xff] %vm66_vm0, %v4864_v16 }

// kernel: swin_extractor.7
= control target key start
LH: loop header
LB: loop body
LE: loop exit
PB: predicated region body
PF: predicated region fallthrough
CT: control target
= control target key end

     0   :  { %s5315_s0 = inlined_call_operand.vmem [shape: f32[32,64], index: 0, kind: input, shape index: {}]   ;;  %s5316_s1 = inlined_call_operand.vmem [shape: f32[2,1,64], index: 1, kind: input, shape index: {}]   ;;  %s5317_s2 = inlined_call_operand.vmem [shape: f32[2,1,64], index: 2, kind: input, shape index: {}]   ;;  %s5318_s3 = inlined_call_operand.vmem [shape: bf16[2,64,192], index: 3, kind: input, shape index: {}]   ;;  %s5319_s4 = inlined_call_operand.vmem [shape: f32[2,1,192], index: 4, kind: input, shape index: {}]   ;;  %s5320_s5 = inlined_call_operand.vmem [shape: f32[2,4,32,32], index: 5, kind: input, shape index: {}]   ;;  %s5321_s6 = inlined_call_operand.vmem [shape: bf16[2,64,64], index: 6, kind: input, shape index: {}]   ;;  %s5322_s7 = inlined_call_operand.vmem [shape: f32[2,1,64], index: 7, kind: input, shape index: {}]   ;;  %s5323_s8 = inlined_call_operand.vmem [shape: f32[2,1,64], index: 8, kind: input, shape index: {}]   ;;  %s5324_s9 = inlined_call_operand.vmem [shape: f32[2,1,64], index: 9, kind: input, shape index: {}]   ;;  %s5325_s10 = inlined_call_operand.vmem [shape: bf16[2,64,256], index: 10, kind: input, shape index: {}]   ;;  %s5326_s11 = inlined_call_operand.vmem [shape: f32[2,1,256], index: 11, kind: input, shape index: {}]   ;;  %s5327_s12 = inlined_call_operand.vmem [shape: bf16[2,256,64], index: 12, kind: input, shape index: {}]   ;;  %s5328_s13 = inlined_call_operand.vmem [shape: f32[2,1,64], index: 13, kind: input, shape index: {}]   ;;  %s5329_s14 = inlined_call_operand.vmem [shape: f32[1,64], index: 14, kind: input, shape index: {}]   ;;  %s5330_s15 = inlined_call_operand.vmem [shape: f32[1,64], index: 15, kind: input, shape index: {}]   ;;  %s5331_s16 = inlined_call_operand.vmem [shape: f32[2,32], index: 16, kind: input, shape index: {}]   ;;  %s5332_s17 = inlined_call_operand.hbm [shape: f32[2,64], index: 17, kind: output, shape index: {}]  }
   0x1   :  { %5341 = sst [smem:[#allocation6_spill]] %s5315_s0 }
   0x2   :  { %5342 = sst [smem:[#allocation7_spill]] %s5316_s1 }
   0x3   :  { %s5343_s26 = sld [smem:[#allocation6_spill]]  ;;  %vm64_vm0 = vcmask 523264  }
   0x9   :  { %v58_v0 = vld [vmem:[%s5343_s26] sm:$0xff]  ;;  %v60_v1 = vld [vmem:[%s5343_s26 + $0x10] sm:$0xff]  ;;  %v59_v2 = vld [vmem:[%s5343_s26 + $0x8] sm:$0xff] }
   0xa   :  { %v65_v3 = vsel %vm64_vm0, %v58_v0, 0.0  ;;  %v71_v4 = vsel %vm64_vm0, %v60_v1, 0.0  ;;  %v61_v5 = vld [vmem:[%s5343_s26 + $0x18] sm:$0xff]  ;;  %v68_v6 = vsel %vm64_vm0, %v59_v2, 0.0 }
   0xb   :  { %66 = vadd.xlane.f32.xlu0 %v65_v3  ;;  %72 = vadd.xlane.f32.xlu1 %v71_v4  ;;  %v74_v7 = vsel %vm64_vm0, %v61_v5, 0.0 }
   0xf   :  { %69 = vadd.xlane.f32.xlu0 %v68_v6  ;;  %75 = vadd.xlane.f32.xlu1 %v74_v7 }
  0x10   :  { %22 = vsyncpa [#allocation4], 0  ;;  %v3898_v28 = vld [vmem:[%s5318_s3 + $0x34] ss:$8 sps:$4 sm:$0xff]   ;;  %v3900_v29 = vld [vmem:[%s5318_s3 + $0x30] ss:$8 sps:$4 sm:$0xff]  }
  0x11   :  { %v3901_v30 = vld [vmem:[%s5318_s3 + $0x24] ss:$8 sps:$4 sm:$0xff]   ;;  %214 = vmatprep.subr.bf16.mxu1 %v3898_v28  ;;  %v3903_v31 = vld [vmem:[%s5318_s3 + $0x20] ss:$8 sps:$4 sm:$0xff]   ;;  %v4212_v32 = vmov 0   ;;  %s5344_s22 = sld [smem:[#allocation7_spill]] }
  0x12   :  { %215 = vmatpush1.bf16.msra.mxu1 %v3900_v29  ;;  %238 = vmatprep.mubr.bf16.mxu1 %v4212_v32  ;;  %v3904_v33 = vld [vmem:[%s5318_s3 + $0x14] ss:$8 sps:$4 sm:$0xff]   ;;  %v3906_v34 = vld [vmem:[%s5318_s3 + $0x10] ss:$8 sps:$4 sm:$0xff]   ;;  %v3907_v35 = vld [vmem:[%s5318_s3 + $0x4] ss:$8 sps:$4 sm:$0xff]  }
  0x13   :  { %216 = vmatprep.subr.bf16.mxu1 %v3901_v30  ;;  %v3909_v36 = vld [vmem:[%s5318_s3] ss:$8 sps:$4 sm:$0xff]   ;;  %vm273_vm1 = vcmask 130048   ;;  %s4213_s28 = smov 48   ;;  %s4214_s29 = smov 64   ;;  %vm335_vm2 = vcmask 261120  }
  0x14   :  { %v3349_v56 = vld [vmem:[%s5317_s2] ss:$0 sm:$0xff]  ;;  %s5337_s0 = smov 112   ;;  %s4216_s30 = smov 32   ;;  %vm640_vm3 = vcmask 261248   ;;  %vm842_vm4 = vcmask 392448  }
  0x15   :  { %s5335_s18 = smov 96   ;;  %s4218_s19 = smov 16   ;;  %vm1044_vm5 = vcmask 523648   ;;  %vm4221_vm6 = vmmov 0   ;;  %vm3332_vm7 = vcmask 517120  }
  0x16   :  { %217 = vmatpush1.bf16.msra.mxu1 %v3903_v31  ;;  %s5339_s1 = smov 80   ;;  %s5346_s25 = smov 96  }
  0x17   :  { %218 = vmatprep.subr.bf16.mxu1 %v3904_v33  ;;  %v3348_v51 = vld [vmem:[%s5344_s22] ss:$0 sm:$0xff] }
  0x1a   :  { %219 = vmatpush1.bf16.msra.mxu1 %v3906_v34 }
  0x1b   :  { %220 = vmatprep.subr.bf16.mxu1 %v3907_v35 }
  0x1e   :  { %221 = vmatpush1.bf16.msra.mxu1 %v3909_v36 }
  0x94   :  { %v67_v8 = vpop.xlane.xlu0 %66  ;;  %v73_v9 = vpop.xlane.xlu1 %72 }
  0x95   :  { %v78_v10 = vmul.f32 0.015625, %v67_v8  ;;  %v80_v11 = vmul.f32 0.015625, %v73_v9  ;;  %v148_v8 = vld [vmem:[%s5319_s4] sm:$0x3] }
  0x97   :  { %v82_v12 = vsub.f32 %v58_v0, %v78_v10  ;;  %v4329_v13 = vsub.f32 %v60_v1, %v80_v11 }
  0x98   :  { %v70_v14 = vpop.xlane.xlu0 %69  ;;  %v76_v15 = vpop.xlane.xlu1 %75 }
  0x99   :  { %v79_v16 = vmul.f32 0.015625, %v70_v14  ;;  %v81_v17 = vmul.f32 0.015625, %v76_v15  ;;  %v86_v18 = vmul.f32 %v82_v12, %v82_v12  ;;  %v88_v19 = vmul.f32 %v4329_v13, %v4329_v13 }
  0x9b   :  { %v83_v20 = vsub.f32 %v59_v2, %v79_v16  ;;  %v85_v21 = vsub.f32 %v61_v5, %v81_v17  ;;  %v90_v22 = vsel %vm64_vm0, %v86_v18, 0.0  ;;  %v96_v23 = vsel %vm64_vm0, %v88_v19, 0.0 }
  0x9c   :  { %91 = vadd.xlane.f32.xlu0 %v90_v22  ;;  %v150_v5 = vlaneseq }
  0x9d   :  { %v87_v24 = vmul.f32 %v83_v20, %v83_v20  ;;  %v89_v25 = vmul.f32 %v85_v21, %v85_v21 }
  0x9e   :  { %v151_v6 = vshrl.u32 %v150_v5, 7 }
  0x9f   :  { %v93_v26 = vsel %vm64_vm0, %v87_v24, 0.0  ;;  %v99_v27 = vsel %vm64_vm0, %v89_v25, 0.0 }
  0xa0   :  { %97 = vadd.xlane.f32.xlu0 %v96_v23  ;;  %94 = vadd.xlane.f32.xlu1 %v93_v26  ;;  %v4372_v7 = vsub.s32 0, %v151_v6  ;;  %v4377_v9 = vsub.s32 1, %v151_v6  ;;  %v3364_v6 = vld [vmem:[%s5320_s5 + $0x20] sm:$0xff] }
  0xa2   :  { %v153_v11 = vrot.slane %v148_v8, %v4372_v7 }
  0xa4   :  { %100 = vadd.xlane.f32.xlu1 %v99_v27 }
 0x125   :  { %v92_v37 = vpop.xlane.xlu0 %91 }
 0x126   :  { %v102_v38 = vmul.f32 0.015625, %v92_v37 }
 0x128   :  { %v106_v39 = vadd.f32 1e-05, %v102_v38 }
 0x129   :  { %v95_v40 = vpop.xlane.xlu1 %94  ;;  %v98_v41 = vpop.xlane.xlu0 %97 }
 0x12a   :  { %3986 = vrsqrt.f32 %v106_v39  ;;  %v103_v42 = vmul.f32 0.015625, %v95_v40  ;;  %v104_v43 = vmul.f32 0.015625, %v98_v41 }
 0x12c   :  { %v107_v44 = vadd.f32 1e-05, %v103_v42  ;;  %v108_v45 = vadd.f32 1e-05, %v104_v43 }
 0x12d   :  { %v101_v46 = vpop.xlane.xlu1 %100 }
 0x12e   :  { %3988 = vrsqrt.f32 %v107_v44  ;;  %v105_v47 = vmul.f32 0.015625, %v101_v46 }
 0x12f   :  { %3990 = vrsqrt.f32 %v108_v45 }
 0x130   :  { %v109_v48 = vadd.f32 1e-05, %v105_v47 }
 0x132   :  { %3992 = vrsqrt.f32 %v109_v48 }
 0x137   :  { %v3987_v49 = vpop.eup %3986 }
 0x138   :  { %v114_v50 = vmul.f32 %v3987_v49, %v82_v12 }
 0x13a   :  { %v124_v54 = vmul.f32 %v3348_v51, %v114_v50 }
 0x13b   :  { %v3989_v52 = vpop.eup %3988 }
 0x13c   :  { %v115_v53 = vmul.f32 %v3989_v52, %v83_v20  ;;  %v3991_v55 = vpop.eup %3990  ;;  %v134_v59 = vadd.f32 %v3349_v56, %v124_v54  ;;  %v265_v52 = vld [vmem:[%s5320_s5 + $0x10] sm:$0xff] }
 0x13d   :  { %v116_v61 = vmul.f32 %v3991_v55, %v4329_v13  ;;  %v157_v13 = vrot.slane %v148_v8, %v4377_v9  ;;  %v3367_v8 = vld [vmem:[%s5320_s5 + $0x38] sm:$0xff] }
 0x13e   :  { %v125_v57 = vmul.f32 %v3348_v51, %v115_v53 }
 0x13f   :  { %v3993_v58 = vpop.eup %3992  ;;  %v126_v1 = vmul.f32 %v3348_v51, %v116_v61  ;;  %v266_v61 = vld [vmem:[%s5320_s5 + $0x18] sm:$0xff] }
 0x140   :  { %v135_v60 = vadd.f32 %v3349_v56, %v125_v57  ;;  %v117_v62 = vmul.f32 %v3993_v58, %v85_v21  ;;  %v264_v58 = vld [vmem:[%s5320_s5 + $0x8] sm:$0xff] }
 0x141   :  { %v136_v3 = vadd.f32 %v3349_v56, %v126_v1 }
 0x142   :  { %v138_v63 = vpack.c.bf16 %v135_v60, %v134_v59  ;;  %v127_v0 = vmul.f32 %v3348_v51, %v117_v62  ;;  %v263_v51 = vld [vmem:[%s5320_s5] sm:$0xff] }
 0x144   :  { %3358 = vmatmul.mubr.msk.bf16.vlgmr.msra.gmra.mxu1 %vm64_vm0, %v138_v63  ;;  %v137_v2 = vadd.f32 %v3349_v56, %v127_v0  ;;  %v3365_v0 = vld [vmem:[%s5320_s5 + $0x28] sm:$0xff] }
 0x145   :  { %248 = vmatprep.mubr.bf16.mxu1 %v4212_v32 }
 0x146   :  { %v139_v4 = vpack.c.bf16 %v137_v2, %v136_v3 }
 0x14c   :  { %3359 = vmatmul.mubr.msk.bf16.gmra.mxu1 %vm64_vm0, %v139_v4 }
 0x204   :  { %v240_v10 = vpop.f32.mrf.mxu1 }
 0x205   :  { %v241_v15 = vadd.f32 %v240_v10, %v153_v11 }
 0x206   :  { %v242_v12 = vpop.f32.mrf.mxu1 }
 0x207   :  { %v243_v18 = vadd.f32 %v242_v12, %v157_v13 }
 0x208   :  { %v244_v14 = vpop.f32.mrf.mxu1 }
 0x209   :  { %v245_v16 = vadd.f32 %v244_v14, %v153_v11  ;;  %v3366_v14 = vld [vmem:[%s5320_s5 + $0x30] sm:$0xff] }
 0x20a   :  { %v246_v17 = vpop.f32.mrf.mxu1 }
 0x20b   :  { %v4381_v19 = vpack.c.bf16 %v245_v16, %v241_v15  ;;  %v247_v20 = vadd.f32 %v246_v17, %v157_v13 }
 0x20c   :  { %v250_v21 = vpop.f32.mrf.mxu1 }
 0x20d   :  { %v4383_v22 = vpack.c.bf16 %v247_v20, %v243_v18  ;;  %3712 = vmatprep.mubr.msk.bf16.mxu1 %vm273_vm1, %v4381_v19  ;;  %v251_v25 = vadd.f32 %v250_v21, %v153_v11  ;;  %v3372_v21 = vld [vmem:[%s5320_s5 + $0x40] sm:$0xff] }
 0x20e   :  { %v252_v23 = vpop.f32.mrf.mxu1 }
 0x20f   :  { %v253_v37 = vadd.f32 %v252_v23, %v157_v13 }
 0x210   :  { %v254_v24 = vpop.f32.mrf.mxu1 }
 0x211   :  { %v255_v26 = vadd.f32 %v254_v24, %v153_v11  ;;  %v3373_v24 = vld [vmem:[%s5320_s5 + $0x48] sm:$0xff] }
 0x212   :  { %v256_v33 = vpop.f32.mrf.mxu1 }
 0x213   :  { %v4387_v27 = vpack.c.bf16 %v255_v26, %v251_v25  ;;  %v257_v36 = vadd.f32 %v256_v33, %v157_v13 }
 0x215   :  { %452 = vrot.lane.b32.xlu1 %v4387_v27, %s4213_s28  ;;  %271 = vrot.lane.b32.xlu0 %v4387_v27, %s4214_s29  ;;  %v4415_v39 = vpack.c.bf16 %v257_v36, %v253_v37 }
 0x219   :  { %269 = vrot.lane.b32.xlu1 %v4381_v19, %s4214_s29  ;;  %446 = vrot.lane.b32.xlu0 %v4381_v19, %s5337_s0 }
 0x21d   :  { %450 = vrot.lane.b32.xlu1 %v4381_v19, %s4213_s28  ;;  %448 = vrot.lane.b32.xlu0 %v4387_v27, %s5337_s0 }
 0x221   :  { %656 = vrot.lane.b32.xlu1 %v4387_v27, %s4216_s30  ;;  %650 = vrot.lane.b32.xlu0 %v4381_v19, %s5335_s18 }
 0x225   :  { %654 = vrot.lane.b32.xlu1 %v4381_v19, %s4216_s30 }
 0x229   :  { %652 = vrot.lane.b32.xlu1 %v4387_v27, %s5335_s18 }
 0x287   :  { %v453_v28 = vpop.permute.xlu1 %452  ;;  %v272_v29 = vpop.permute.xlu0 %271 }
 0x288   :  { %3871 = vmatprep.subr.msk.bf16.mxu1 %vm273_vm1, %v272_v29  ;;  %3873 = vmatprep.subr.msk.bf16.mxu0 %vm273_vm1, %v453_v28  ;;  %v284_v30 = vsel %vm273_vm1, %v272_v29, 0  ;;  %v464_v31 = vsel %vm273_vm1, %v453_v28, 0  ;;  %v3374_v28 = vld [vmem:[%s5320_s5 + $0x50] sm:$0xff]  ;;  %v3375_v29 = vld [vmem:[%s5320_s5 + $0x58] sm:$0xff] }
 0x289   :  { %3709 = vmatpush3.bf16.xpose.msra.mxu1 %v284_v30  ;;  %3725 = vmatpush3.bf16.xpose.msra.mxu0 %v464_v31 }
 0x28b   :  { %v270_v34 = vpop.permute.xlu1 %269  ;;  %v447_v35 = vpop.permute.xlu0 %446 }
 0x28c   :  { %3872 = vmatprep.subr.msk.bf16.mxu1 %vm273_vm1, %v270_v34  ;;  %3728 = vmatprep.mubr.msk.bf16.mxu0 %vm273_vm1, %v447_v35  ;;  %v281_v40 = vsel %vm273_vm1, %v270_v34, 0 }
 0x28f   :  { %v451_v38 = vpop.permute.xlu1 %450  ;;  %v449_v42 = vpop.permute.xlu0 %448 }
 0x290   :  { %3874 = vmatprep.subr.msk.bf16.mxu0 %vm273_vm1, %v451_v38  ;;  %v461_v41 = vsel %vm273_vm1, %v451_v38, 0 }
 0x291   :  { %3711 = vmatpush3.bf16.xpose.msra.mxu1 %v281_v40  ;;  %3727 = vmatpush3.bf16.xpose.msra.mxu0 %v461_v41 }
 0x292   :  { %3716 = vmatprep.subr.bf16.mxu1 %v4415_v39 }
 0x293   :  { %v657_v43 = vpop.permute.xlu1 %656  ;;  %v651_v45 = vpop.permute.xlu0 %650 }
 0x294   :  { %3875 = vmatprep.subr.msk.bf16.mxu0 %vm273_vm1, %v657_v43  ;;  %v668_v44 = vsel %vm273_vm1, %v657_v43, 0 }
 0x297   :  { %v655_v46 = vpop.permute.xlu1 %654 }
 0x298   :  { %3713 = vmatmul.mubr.msk.bf16.vlgmr.msra.gmra.mxu1 %vm273_vm1, %v4387_v27  ;;  %3729 = vmatmul.mubr.msk.bf16.vlgmr.msra.gmra.mxu0 %vm273_vm1, %v449_v42  ;;  %v665_v47 = vsel %vm273_vm1, %v655_v46, 0 }
 0x299   :  { %3717 = vmatpush3.bf16.msra.mxu1 %v4415_v39  ;;  %3741 = vmatpush3.bf16.xpose.msra.mxu0 %v668_v44 }
 0x29a   :  { %3744 = vmatprep.mubr.msk.bf16.mxu0 %vm273_vm1, %v651_v45  ;;  %3718 = vmatprep.subr.bf16.mxu1 %v4383_v22 }
 0x29b   :  { %3876 = vmatprep.subr.msk.bf16.mxu0 %vm273_vm1, %v655_v46  ;;  %v653_v48 = vpop.permute.xlu1 %652 }
 0x29d   :  { %3719 = vmatpush3.bf16.msra.mxu1 %v4383_v22 }
 0x2a1   :  { %3743 = vmatpush3.bf16.xpose.msra.mxu0 %v665_v47 }
 0x2a8   :  { %3745 = vmatmul.mubr.msk.bf16.vlgmr.msra.gmra.mxu0 %vm273_vm1, %v653_v48 }
 0x358   :  { %v3714_v49 = vpop.f32.mrf.mxu1  ;;  %v3730_v50 = vpop.f32.mrf.mxu0 }
 0x359   :  { %v329_v59 = vadd.f32 %v3714_v49, %v265_v52  ;;  %v509_v16 = vadd.f32 %v3730_v50, %v3366_v14 }
 0x35a   :  { %v320_v53 = vpop.f32.mrf.mxu1  ;;  %v500_v54 = vpop.f32.mrf.mxu0 }
 0x35b   :  { %v4439_v55 = vadd.f32 %v320_v53, %v263_v51  ;;  %v342_v5 = vsel %vm335_vm2, %v329_v59, -inf  ;;  %v4462_v10 = vadd.f32 %v3364_v6, %v500_v54  ;;  %v521_v26 = vsel %vm335_vm2, %v509_v16, -inf }
 0x35c   :  { %v3715_v56 = vpop.f32.mrf.mxu1  ;;  %v3731_v57 = vpop.f32.mrf.mxu0 }
 0x35d   :  { %v336_v60 = vsel %vm335_vm2, %v4439_v55, -inf  ;;  %v332_v2 = vadd.f32 %v3715_v56, %v266_v61  ;;  %v512_v11 = vadd.f32 %v3731_v57, %v3367_v8  ;;  %v515_v18 = vsel %vm335_vm2, %v4462_v10, -inf }
 0x35e   :  { %v323_v62 = vpop.f32.mrf.mxu1  ;;  %337 = vmax.xlane.f32.xlu0 %v336_v60  ;;  %v503_v63 = vpop.f32.mrf.mxu0 }
 0x35f   :  { %v324_v1 = vadd.f32 %v323_v62, %v264_v58  ;;  %v4452_v3 = vadd.f32 %v3365_v0, %v503_v63  ;;  %v345_v12 = vsel %vm335_vm2, %v332_v2, -inf  ;;  %v524_v17 = vsel %vm335_vm2, %v512_v11, -inf }
 0x361   :  { %v339_v4 = vsel %vm335_vm2, %v324_v1, -inf  ;;  %v518_v13 = vsel %vm335_vm2, %v4452_v3, -inf }
 0x362   :  { %340 = vmax.xlane.f32.xlu1 %v339_v4  ;;  %343 = vmax.xlane.f32.xlu0 %v342_v5 }
 0x366   :  { %346 = vmax.xlane.f32.xlu0 %v345_v12  ;;  %519 = vmax.xlane.f32.xlu1 %v518_v13 }
 0x368   :  { %v3746_v15 = vpop.f32.mrf.mxu0 }
 0x369   :  { %v4488_v33 = vadd.f32 %v3746_v15, %v3374_v28 }
 0x36a   :  { %525 = vmax.xlane.f32.xlu1 %v524_v17  ;;  %516 = vmax.xlane.f32.xlu0 %v515_v18  ;;  %v704_v20 = vpop.f32.mrf.mxu0 }
 0x36b   :  { %v4479_v25 = vadd.f32 %v3372_v21, %v704_v20  ;;  %v725_v38 = vsel %vm335_vm2, %v4488_v33, -inf }
 0x36c   :  { %v3747_v23 = vpop.f32.mrf.mxu0 }
 0x36d   :  { %v716_v34 = vadd.f32 %v3747_v23, %v3375_v29  ;;  %v719_v36 = vsel %vm335_vm2, %v4479_v25, -inf }
 0x36e   :  { %522 = vmax.xlane.f32.xlu0 %v521_v26  ;;  %v707_v30 = vpop.f32.mrf.mxu0 }
 0x36f   :  { %v708_v31 = vadd.f32 %v3373_v24, %v707_v30  ;;  %v728_v37 = vsel %vm335_vm2, %v716_v34, -inf }
 0x371   :  { %v722_v35 = vsel %vm335_vm2, %v708_v31, -inf }
 0x372   :  { %723 = vmax.xlane.f32.xlu1 %v722_v35  ;;  %720 = vmax.xlane.f32.xlu0 %v719_v36 }
 0x376   :  { %729 = vmax.xlane.f32.xlu1 %v728_v37  ;;  %726 = vmax.xlane.f32.xlu0 %v725_v38 }
 0x387   :  { %563 = vrot.lane.b32.xlu1 %v4383_v22, %s5337_s0 }
 0x38b   :  { %767 = vrot.lane.b32.xlu1 %v4415_v39, %s5335_s18 }
 0x3e7   :  { %v338_v40 = vpop.xlane.xlu0 %337 }
 0x3e8   :  { %v348_v53 = vsub.f32 %v4439_v55, %v338_v40 }
 0x3ea   :  { %v352_v60 = vmul.f32 1.442695, %v348_v53 }
 0x3eb   :  { %v341_v41 = vpop.xlane.xlu1 %340  ;;  %v344_v42 = vpop.xlane.xlu0 %343 }
 0x3ec   :  { %v350_v43 = vsub.f32 %v329_v59, %v344_v42  ;;  %v349_v49 = vsub.f32 %v324_v1, %v341_v41 }
 0x3ee   :  { %v356_v44 = vmul.f32 1.442695, %v350_v43  ;;  %v354_v56 = vmul.f32 1.442695, %v349_v49 }
 0x3ef   :  { %v520_v45 = vpop.xlane.xlu1 %519  ;;  %v347_v46 = vpop.xlane.xlu0 %346 }
 0x3f0   :  { %v351_v47 = vsub.f32 %v332_v2, %v347_v46  ;;  %3994 = vpow2.f32 %v356_v44  ;;  %v528_v57 = vsub.f32 %v4452_v3, %v520_v45 }
 0x3f2   :  { %v358_v48 = vmul.f32 1.442695, %v351_v47  ;;  %v533_v62 = vmul.f32 1.442695, %v528_v57 }
 0x3f3   :  { %v526_v50 = vpop.xlane.xlu1 %525  ;;  %v517_v51 = vpop.xlane.xlu0 %516 }
 0x3f4   :  { %v530_v52 = vsub.f32 %v512_v11, %v526_v50  ;;  %3996 = vpow2.f32 %v358_v48  ;;  %v527_v30 = vsub.f32 %v4462_v10, %v517_v51 }
 0x3f6   :  { %v537_v54 = vmul.f32 1.442695, %v530_v52 }
 0x3f7   :  { %v523_v58 = vpop.xlane.xlu0 %522 }
 0x3f8   :  { %3998 = vpow2.f32 %v537_v54  ;;  %v529_v59 = vsub.f32 %v509_v16, %v523_v58 }
 0x3f9   :  { %4000 = vpow2.f32 %v354_v56 }
 0x3fa   :  { %v535_v61 = vmul.f32 1.442695, %v529_v59 }
 0x3fb   :  { %v724_v63 = vpop.xlane.xlu1 %723  ;;  %v721_v29 = vpop.xlane.xlu0 %720 }
 0x3fc   :  { %4002 = vpow2.f32 %v535_v61  ;;  %v732_v1 = vsub.f32 %v708_v31, %v724_v63  ;;  %v731_v36 = vsub.f32 %v4479_v25, %v721_v29 }
 0x3fd   :  { %v4502_v0 = vpop.eup %3994  ;;  %4004 = vpow2.f32 %v352_v60 }
 0x3fe   :  { %4006 = vpow2.f32 %v533_v62  ;;  %v366_v55 = vsel %vm335_vm2, %v4502_v0, 0.0  ;;  %v737_v6 = vmul.f32 1.442695, %v732_v1  ;;  %v735_v38 = vmul.f32 1.442695, %v731_v36 }
 0x3ff   :  { %v730_v2 = vpop.xlane.xlu1 %729  ;;  %367 = vadd.xlane.f32.xlu0 %v366_v55  ;;  %v727_v31 = vpop.xlane.xlu0 %726 }
 0x400   :  { %v734_v4 = vsub.f32 %v716_v34, %v730_v2  ;;  %v531_v34 = vmul.f32 1.442695, %v527_v30  ;;  %v733_v35 = vsub.f32 %v4488_v33, %v727_v31 }
 0x401   :  { %v4506_v3 = vpop.eup %3996 }
 0x402   :  { %v741_v5 = vmul.f32 1.442695, %v734_v4  ;;  %v369_v8 = vsel %vm335_vm2, %v4506_v3, 0.0  ;;  %v739_v37 = vmul.f32 1.442695, %v733_v35 }
 0x403   :  { %370 = vadd.xlane.f32.xlu1 %v369_v8  ;;  %v564_v25 = vpop.permute.xlu1 %563 }
 0x404   :  { %4008 = vpow2.f32 %v741_v5 }
 0x405   :  { %v4510_v11 = vpop.eup %3998  ;;  %4010 = vpow2.f32 %v737_v6 }
 0x406   :  { %v548_v12 = vsel %vm335_vm2, %v4510_v11, 0.0  ;;  %v4514_v13 = vpop.eup %4000  ;;  %4012 = vpow2.f32 %v531_v34 }
 0x407   :  { %549 = vadd.xlane.f32.xlu1 %v548_v12  ;;  %v363_v17 = vsel %vm335_vm2, %v4514_v13, 0.0  ;;  %4014 = vpow2.f32 %v739_v37  ;;  %v768_v44 = vpop.permute.xlu1 %767 }
 0x408   :  { %4016 = vpow2.f32 %v735_v38 }
 0x409   :  { %v4516_v14 = vpop.eup %4002 }
 0x40a   :  { %v545_v15 = vsel %vm335_vm2, %v4516_v14, 0.0  ;;  %v4005_v16 = vpop.eup %4004 }
 0x40b   :  { %546 = vadd.xlane.f32.xlu0 %v545_v15  ;;  %v4522_v18 = vpop.eup %4006  ;;  %364 = vadd.xlane.f32.xlu1 %v363_v17  ;;  %v360_v20 = vsel %vm335_vm2, %v4005_v16, 0.0 }
 0x40c   :  { %v542_v21 = vsel %vm335_vm2, %v4522_v18, 0.0 }
 0x40f   :  { %361 = vadd.xlane.f32.xlu0 %v360_v20  ;;  %543 = vadd.xlane.f32.xlu1 %v542_v21 }
 0x411   :  { %v4527_v23 = vpop.eup %4008 }
 0x412   :  { %v752_v24 = vsel %vm335_vm2, %v4527_v23, 0.0  ;;  %v4531_v26 = vpop.eup %4010 }
 0x413   :  { %753 = vadd.xlane.f32.xlu1 %v752_v24  ;;  %v746_v28 = vsel %vm335_vm2, %v4531_v26, 0.0  ;;  %v4013_v10 = vpop.eup %4012 }
 0x414   :  { %v539_v40 = vsel %vm335_vm2, %v4013_v10, 0.0  ;;  %v4547_v41 = vpop.eup %4014 }
 0x415   :  { %v749_v33 = vsel %vm335_vm2, %v4547_v41, 0.0  ;;  %v4551_v42 = vpop.eup %4016 }
 0x416   :  { %v743_v43 = vsel %vm335_vm2, %v4551_v42, 0.0 }
 0x417   :  { %747 = vadd.xlane.f32.xlu1 %v746_v28 }
 0x425   :  { %565 = vrot.lane.b32.xlu0 %v4415_v39, %s5337_s0 }
 0x428   :  { %765 = vrot.lane.b32.xlu1 %v4383_v22, %s5335_s18 }
 0x42c   :  { %856 = vrot.lane.b32.xlu1 %v4381_v19, %s4218_s19 }
 0x430   :  { %854 = vrot.lane.b32.xlu1 %v4387_v27, %s5339_s1 }
 0x444   :  { %540 = vadd.xlane.f32.xlu0 %v539_v40 }
 0x448   :  { %750 = vadd.xlane.f32.xlu0 %v749_v33 }
 0x44c   :  { %744 = vadd.xlane.f32.xlu0 %v743_v43 }
 0x462   :  { %858 = vrot.lane.b32.xlu0 %v4387_v27, %s4218_s19 }
 0x466   :  { %852 = vrot.lane.b32.xlu0 %v4381_v19, %s5339_s1 }
 0x488   :  { %v368_v46 = vpop.xlane.xlu0 %367 }
 0x48c   :  { %v371_v45 = vpop.xlane.xlu1 %370 }
 0x48d   :  { %4018 = vrcp.f32 %v371_v45 }
 0x490   :  { %v550_v47 = vpop.xlane.xlu1 %549 }
 0x494   :  { %v547_v48 = vpop.xlane.xlu0 %546  ;;  %v365_v49 = vpop.xlane.xlu1 %364 }
 0x495   :  { %4020 = vrcp.f32 %v365_v49  ;;  %v3380_v49 = vld [vmem:[%s5320_s5 + $0x60] sm:$0xff] }
 0x496   :  { %4022 = vrcp.f32 %v368_v46 }
 0x498   :  { %v362_v50 = vpop.xlane.xlu0 %361  ;;  %v544_v61 = vpop.xlane.xlu1 %543 }
 0x499   :  { %4024 = vrcp.f32 %v362_v50  ;;  %v3382_v50 = vld [vmem:[%s5320_s5 + $0x70] sm:$0xff] }
 0x49a   :  { %v4019_v52 = vpop.eup %4018  ;;  %4026 = vrcp.f32 %v547_v48 }
 0x49b   :  { %v379_v19 = vmul.f32 %v4019_v52, %v4506_v3  ;;  %4028 = vrcp.f32 %v544_v61 }
 0x49c   :  { %v566_v51 = vpop.permute.xlu0 %565  ;;  %v754_v62 = vpop.xlane.xlu1 %753  ;;  %4030 = vrcp.f32 %v550_v47 }
 0x49d   :  { %3732 = vmatprep.subr.bf16.mxu1 %v566_v51 }
 0x4a0   :  { %v748_v1 = vpop.xlane.xlu1 %747 }
 0x4a2   :  { %v4021_v53 = vpop.eup %4020 }
 0x4a3   :  { %v4023_v27 = vpop.eup %4022  ;;  %v377_v57 = vmul.f32 %v4021_v53, %v4514_v13 }
 0x4a4   :  { %v378_v58 = vmul.f32 %v4023_v27, %v4502_v0  ;;  %v766_v24 = vpop.permute.xlu1 %765  ;;  %v3381_v27 = vld [vmem:[%s5320_s5 + $0x68] sm:$0xff] }
 0x4a6   :  { %v4025_v54 = vpop.eup %4024  ;;  %v381_v60 = vpack.c.bf16 %v379_v19, %v378_v58 }
 0x4a7   :  { %v376_v56 = vmul.f32 %v4025_v54, %v4005_v16  ;;  %v4027_v55 = vpop.eup %4026 }
 0x4a8   :  { %v4029_v4 = vpop.eup %4028  ;;  %v557_v6 = vmul.f32 %v4027_v55, %v4516_v14  ;;  %v857_v37 = vpop.permute.xlu1 %856 }
 0x4a9   :  { %v380_v59 = vpack.c.bf16 %v377_v57, %v376_v56  ;;  %v4031_v3 = vpop.eup %4030  ;;  %v556_v12 = vmul.f32 %v4029_v4, %v4522_v18  ;;  %v3383_v56 = vld [vmem:[%s5320_s5 + $0x78] sm:$0xff] }
 0x4aa   :  { %v558_v13 = vmul.f32 %v4031_v3, %v4510_v11 }
 0x4ab   :  { %3720 = vmatprep.mubr.msk.bf16.mxu1 %vm335_vm2, %v380_v59 }
 0x4ac   :  { %3721 = vmatmul.mubr.msk.bf16.vlgmr.msra.gmra.mxu1 %vm335_vm2, %v381_v60  ;;  %v560_v16 = vpack.c.bf16 %v558_v13, %v557_v6 }
 0x4ad   :  { %3733 = vmatpush3.bf16.msra.mxu1 %v566_v51 }
 0x4ae   :  { %3734 = vmatprep.subr.bf16.mxu1 %v564_v25 }
 0x4b1   :  { %3735 = vmatpush3.bf16.msra.mxu1 %v564_v25 }
 0x4b2   :  { %3748 = vmatprep.subr.bf16.mxu1 %v768_v44 }
 0x4cd   :  { %v541_v63 = vpop.xlane.xlu0 %540 }
 0x4ce   :  { %4032 = vrcp.f32 %v541_v63 }
 0x4d1   :  { %v751_v2 = vpop.xlane.xlu0 %750 }
 0x4d2   :  { %4034 = vrcp.f32 %v751_v2 }
 0x4d3   :  { %4036 = vrcp.f32 %v748_v1 }
 0x4d4   :  { %4038 = vrcp.f32 %v754_v62 }
 0x4d5   :  { %v745_v0 = vpop.xlane.xlu0 %744 }
 0x4d6   :  { %4040 = vrcp.f32 %v745_v0 }
 0x4d9   :  { %v859_v29 = vpop.permute.xlu0 %858 }
 0x4da   :  { %v870_v36 = vsel %vm273_vm1, %v859_v29, 0 }
 0x4db   :  { %v4033_v5 = vpop.eup %4032 }
 0x4dc   :  { %v555_v8 = vmul.f32 %v4033_v5, %v4013_v10 }
 0x4dd   :  { %v853_v35 = vpop.permute.xlu0 %852 }
 0x4de   :  { %v559_v15 = vpack.c.bf16 %v556_v12, %v555_v8 }
 0x4df   :  { %v4035_v17 = vpop.eup %4034 }
 0x4e0   :  { %3736 = vmatprep.mubr.msk.bf16.mxu1 %vm335_vm2, %v559_v15  ;;  %v4037_v20 = vpop.eup %4036  ;;  %v761_v14 = vmul.f32 %v4035_v17, %v4547_v41 }
 0x4e1   :  { %3737 = vmatmul.mubr.msk.bf16.vlgmr.msra.gmra.mxu1 %vm335_vm2, %v560_v16  ;;  %v4039_v21 = vpop.eup %4038  ;;  %v760_v11 = vmul.f32 %v4037_v20, %v4531_v26  ;;  %v855_v26 = vpop.permute.xlu1 %854 }
 0x4e2   :  { %3749 = vmatpush3.bf16.msra.mxu1 %v768_v44  ;;  %v762_v30 = vmul.f32 %v4039_v21, %v4527_v23  ;;  %v867_v23 = vsel %vm273_vm1, %v857_v37, 0 }
 0x4e3   :  { %v4041_v28 = vpop.eup %4040  ;;  %3750 = vmatprep.subr.bf16.mxu1 %v766_v24 }
 0x4e4   :  { %v759_v18 = vmul.f32 %v4041_v28, %v4551_v42  ;;  %v764_v34 = vpack.c.bf16 %v762_v30, %v761_v14 }
 0x4e6   :  { %3751 = vmatpush3.bf16.msra.mxu1 %v766_v24  ;;  %v763_v31 = vpack.c.bf16 %v760_v11, %v759_v18 }
 0x4e7   :  { %3877 = vmatprep.subr.msk.bf16.mxu1 %vm273_vm1, %v859_v29 }
 0x4e8   :  { %3752 = vmatprep.mubr.msk.bf16.mxu1 %vm335_vm2, %v763_v31 }
 0x4e9   :  { %3753 = vmatmul.mubr.msk.bf16.vlgmr.msra.gmra.mxu1 %vm335_vm2, %v764_v34 }
 0x4ea   :  { %3757 = vmatpush3.bf16.xpose.msra.mxu1 %v870_v36  ;;  %3760 = vmatprep.mubr.msk.bf16.mxu1 %vm273_vm1, %v853_v35 }
 0x4eb   :  { %3878 = vmatprep.subr.msk.bf16.mxu1 %vm273_vm1, %v857_v37 }
 0x4f2   :  { %3759 = vmatpush3.bf16.xpose.msra.mxu1 %v867_v23 }
 0x4f9   :  { %3761 = vmatmul.mubr.msk.bf16.vlgmr.msra.gmra.mxu1 %vm273_vm1, %v855_v26 }
 0x4fa   :  { %1331 = vmatprep.mubr.bf16.mxu1 %v4212_v32 }
 0x56c   :  { %v3722_v38 = vpop.f32.mrf.mxu1 }
 0x56d   :  { %439 = vst.msk [vmem:[#allocation2 + $0x10] sm:$0xff] %vm273_vm1, %v3722_v38 }
 0x56e   :  { %v422_v10 = vpop.f32.mrf.mxu1 }
 0x56f   :  { %437 = vst.msk [vmem:[#allocation2] sm:$0xff] %vm273_vm1, %v422_v10 }
 0x570   :  { %v3723_v40 = vpop.f32.mrf.mxu1 }
 0x571   :  { %440 = vst.msk [vmem:[#allocation2 + $0x18] sm:$0xff] %vm273_vm1, %v3723_v40 }
 0x572   :  { %v425_v41 = vpop.f32.mrf.mxu1 }
 0x573   :  { %438 = vst.msk [vmem:[#allocation2 + $0x8] sm:$0xff] %vm273_vm1, %v425_v41 }
 0x5a1   :  { %v3738_v33 = vpop.f32.mrf.mxu1 }
 0x5a3   :  { %v609_v42 = vpop.f32.mrf.mxu1 }
 0x5a5   :  { %v3739_v43 = vpop.f32.mrf.mxu1 }
 0x5a7   :  { %v612_v25 = vpop.f32.mrf.mxu1 }
 0x5a9   :  { %v3754_v44 = vpop.f32.mrf.mxu1 }
 0x5ab   :  { %v811_v45 = vpop.f32.mrf.mxu1 }
 0x5ad   :  { %v3755_v46 = vpop.f32.mrf.mxu1 }
 0x5af   :  { %v814_v47 = vpop.f32.mrf.mxu1 }
 0x5b9   :  { %v3762_v48 = vpop.f32.mrf.mxu1 }
 0x5ba   :  { %v915_v54 = vadd.f32 %v3762_v48, %v3382_v50  ;;  %v3911_v48 = vld [vmem:[%s5321_s6 + $0x10] sm:$0xff]   ;;  %v3913_v50 = vld [vmem:[%s5321_s6] sm:$0xff]  }
 0x5bb   :  { %v906_v51 = vpop.f32.mrf.mxu1 }
 0x5bc   :  { %v907_v52 = vadd.f32 %v3380_v49, %v906_v51  ;;  %v927_v61 = vsel %vm335_vm2, %v915_v54, -inf  ;;  %v3912_v49 = vld [vmem:[%s5321_s6 + $0x8] sm:$0xff]  }
 0x5bd   :  { %v3763_v53 = vpop.f32.mrf.mxu1 }
 0x5be   :  { %v921_v19 = vsel %vm335_vm2, %v907_v52, -inf  ;;  %v918_v59 = vadd.f32 %v3763_v53, %v3383_v56 }
 0x5bf   :  { %v909_v57 = vpop.f32.mrf.mxu1  ;;  %922 = vmax.xlane.f32.xlu0 %v921_v19 }
 0x5c0   :  { %v910_v58 = vadd.f32 %v3381_v27, %v909_v57  ;;  %v930_v62 = vsel %vm335_vm2, %v918_v59, -inf }
 0x5c2   :  { %v924_v60 = vsel %vm335_vm2, %v910_v58, -inf }
 0x5c3   :  { %925 = vmax.xlane.f32.xlu1 %v924_v60  ;;  %928 = vmax.xlane.f32.xlu0 %v927_v61 }
 0x5c7   :  { %931 = vmax.xlane.f32.xlu0 %v930_v62 }
 0x648   :  { %v923_v63 = vpop.xlane.xlu0 %922 }
 0x649   :  { %v933_v1 = vsub.f32 %v907_v52, %v923_v63 }
 0x64b   :  { %v937_v5 = vmul.f32 1.442695, %v933_v1 }
 0x64c   :  { %v926_v2 = vpop.xlane.xlu1 %925  ;;  %v929_v0 = vpop.xlane.xlu0 %928 }
 0x64d   :  { %v935_v55 = vsub.f32 %v915_v54, %v929_v0  ;;  %v934_v4 = vsub.f32 %v910_v58, %v926_v2  ;;  %v4186_v0 = vld [vmem:[%s5343_s26 + $0x10] sm:$0xff] }
 0x64f   :  { %v941_v3 = vmul.f32 1.442695, %v935_v55  ;;  %v939_v12 = vmul.f32 1.442695, %v934_v4  ;;  %v4187_v4 = vld [vmem:[%s5343_s26] sm:$0xff] }
 0x650   :  { %v932_v6 = vpop.xlane.xlu0 %931 }
 0x651   :  { %v936_v8 = vsub.f32 %v918_v59, %v932_v6  ;;  %4042 = vpow2.f32 %v941_v3 }
 0x652   :  { %4044 = vpow2.f32 %v937_v5  ;;  %v3394_v5 = vld [vmem:[%s5322_s7] ss:$0 sm:$0xff] }
 0x653   :  { %v943_v13 = vmul.f32 1.442695, %v936_v8 }
 0x655   :  { %4046 = vpow2.f32 %v943_v13 }
 0x656   :  { %4048 = vpow2.f32 %v939_v12 }
 0x65e   :  { %v4043_v15 = vpop.eup %4042 }
 0x65f   :  { %v951_v16 = vsel %vm335_vm2, %v4043_v15, 0.0  ;;  %v4045_v17 = vpop.eup %4044 }
 0x660   :  { %952 = vadd.xlane.f32.xlu0 %v951_v16  ;;  %v945_v28 = vsel %vm335_vm2, %v4045_v17, 0.0 }
 0x662   :  { %v4047_v20 = vpop.eup %4046 }
 0x663   :  { %v954_v21 = vsel %vm335_vm2, %v4047_v20, 0.0  ;;  %v4049_v24 = vpop.eup %4048 }
 0x664   :  { %955 = vadd.xlane.f32.xlu1 %v954_v21  ;;  %946 = vadd.xlane.f32.xlu0 %v945_v28  ;;  %v948_v29 = vsel %vm335_vm2, %v4049_v24, 0.0 }
 0x668   :  { %949 = vadd.xlane.f32.xlu1 %v948_v29 }
 0x679   :  { %967 = vrot.lane.b32.xlu1 %v4383_v22, %s5339_s1 }
 0x67a   :  { %969 = vrot.lane.b32.xlu0 %v4415_v39, %s5339_s1 }
 0x67d   :  { %628 = vrot.lane.b32.xlu1 %v609_v42, %s4218_s19 }
 0x67e   :  { %632 = vrot.lane.b32.xlu0 %v3738_v33, %s4218_s19 }
 0x681   :  { %630 = vrot.lane.b32.xlu1 %v612_v25, %s4218_s19 }
 0x682   :  { %830 = vrot.lane.b32.xlu0 %v811_v45, %s4216_s30 }
 0x685   :  { %634 = vrot.lane.b32.xlu1 %v3739_v43, %s4218_s19 }
 0x686   :  { %834 = vrot.lane.b32.xlu0 %v3754_v44, %s4216_s30 }
 0x689   :  { %832 = vrot.lane.b32.xlu1 %v814_v47, %s4216_s30  ;;  %v3910_v47 = vld [vmem:[%s5321_s6 + $0x18] sm:$0xff]  }
 0x68d   :  { %836 = vrot.lane.b32.xlu1 %v3755_v46, %s4216_s30 }
 0x6e9   :  { %v953_v22 = vpop.xlane.xlu0 %952 }
 0x6ed   :  { %v956_v14 = vpop.xlane.xlu1 %955  ;;  %v947_v18 = vpop.xlane.xlu0 %946 }
 0x6ee   :  { %4050 = vrcp.f32 %v956_v14 }
 0x6ef   :  { %4052 = vrcp.f32 %v947_v18 }
 0x6f0   :  { %4054 = vrcp.f32 %v953_v22 }
 0x6f1   :  { %v950_v39 = vpop.xlane.xlu1 %949  ;;  %v970_v11 = vpop.permute.xlu0 %969 }
 0x6f2   :  { %4056 = vrcp.f32 %v950_v39  ;;  %3764 = vmatprep.subr.bf16.mxu0 %v970_v11 }
 0x6f3   :  { %3765 = vmatpush3.bf16.msra.mxu0 %v970_v11 }
 0x6f5   :  { %v968_v30 = vpop.permute.xlu1 %967  ;;  %v633_v31 = vpop.permute.xlu0 %632 }
 0x6f6   :  { %3766 = vmatprep.subr.bf16.mxu0 %v968_v30  ;;  %643 = vst.msk [vmem:[#allocation2 + $0x10] sm:$0xff] %vm640_vm3, %v633_v31 }
 0x6f7   :  { %3767 = vmatpush3.bf16.msra.mxu0 %v968_v30 }
 0x6f8   :  { %3772 = vmatprep.subr.bf16.mxu0 %v3910_v47 }
 0x6f9   :  { %v629_v34 = vpop.permute.xlu1 %628  ;;  %v831_v35 = vpop.permute.xlu0 %830 }
 0x6fa   :  { %641 = vst.msk [vmem:[#allocation2] sm:$0xff] %vm640_vm3, %v629_v34 }
 0x6fb   :  { %843 = vst.msk [vmem:[#allocation2] sm:$0xff] %vm842_vm4, %v831_v35  ;;  %v4051_v36 = vpop.eup %4050 }
 0x6fc   :  { %v4053_v37 = vpop.eup %4052  ;;  %v964_v40 = vmul.f32 %v4051_v36, %v4047_v20 }
 0x6fd   :  { %v631_v23 = vpop.permute.xlu1 %630  ;;  %v4055_v26 = vpop.eup %4054  ;;  %v961_v41 = vmul.f32 %v4053_v37, %v4045_v17  ;;  %v4189_v17 = vld [vmem:[%s5343_s26 + $0x8] sm:$0xff] }
 0x6fe   :  { %642 = vst.msk [vmem:[#allocation2 + $0x8] sm:$0xff] %vm640_vm3, %v631_v23  ;;  %v835_v38 = vpop.permute.xlu0 %834  ;;  %v963_v43 = vmul.f32 %v4055_v26, %v4043_v15  ;;  %v4188_v15 = vld [vmem:[%s5343_s26 + $0x18] sm:$0xff] }
 0x6ff   :  { %v4057_v10 = vpop.eup %4056  ;;  %845 = vst.msk [vmem:[#allocation2 + $0x10] sm:$0xff] %vm842_vm4, %v835_v38 }
 0x700   :  { %v962_v33 = vmul.f32 %v4057_v10, %v4049_v24  ;;  %v966_v44 = vpack.c.bf16 %v964_v40, %v963_v43 }
 0x701   :  { %v635_v42 = vpop.permute.xlu1 %634 }
 0x702   :  { %644 = vst.msk [vmem:[#allocation2 + $0x18] sm:$0xff] %vm640_vm3, %v635_v42  ;;  %v965_v25 = vpack.c.bf16 %v962_v33, %v961_v41 }
 0x704   :  { %3768 = vmatprep.mubr.msk.bf16.mxu0 %vm335_vm2, %v965_v25 }
 0x705   :  { %v833_v45 = vpop.permute.xlu1 %832  ;;  %3769 = vmatmul.mubr.msk.bf16.vlgmr.msra.gmra.mxu0 %vm335_vm2, %v966_v44 }
 0x706   :  { %844 = vst.msk [vmem:[#allocation2 + $0x8] sm:$0xff] %vm842_vm4, %v833_v45  ;;  %3773 = vmatpush3.bf16.msra.mxu0 %v3910_v47  ;;  %v3916_v45 = vld [vmem:[%s5325_s10 + $0x34] ss:$8 sps:$4 sm:$0xff]   ;;  %v3919_v47 = vld [vmem:[%s5325_s10 + $0x24] ss:$8 sps:$4 sm:$0xff]  }
 0x707   :  { %3774 = vmatprep.subr.bf16.mxu0 %v3911_v48  ;;  %1307 = vmatprep.subr.bf16.mxu1 %v3916_v45 }
 0x709   :  { %v837_v46 = vpop.permute.xlu1 %836 }
 0x70a   :  { %846 = vst.msk [vmem:[#allocation2 + $0x18] sm:$0xff] %vm842_vm4, %v837_v46  ;;  %3775 = vmatpush3.bf16.msra.mxu0 %v3911_v48  ;;  %v3914_v46 = vld [vmem:[%s5325_s10 + $0x30] ss:$8 sps:$4 sm:$0xff]   ;;  %v3917_v48 = vld [vmem:[%s5325_s10 + $0x20] ss:$8 sps:$4 sm:$0xff]  }
 0x70b   :  { %3776 = vmatprep.subr.bf16.mxu0 %v3912_v49  ;;  %1308 = vmatpush1.bf16.msra.mxu1 %v3914_v46 }
 0x70c   :  { %1309 = vmatprep.subr.bf16.mxu1 %v3919_v47 }
 0x70e   :  { %3777 = vmatpush3.bf16.msra.mxu0 %v3912_v49  ;;  %v3922_v49 = vld [vmem:[%s5325_s10 + $0x14] ss:$8 sps:$4 sm:$0xff]  }
 0x70f   :  { %3778 = vmatprep.subr.bf16.mxu0 %v3913_v50  ;;  %1310 = vmatpush1.bf16.msra.mxu1 %v3917_v48 }
 0x710   :  { %1311 = vmatprep.subr.bf16.mxu1 %v3922_v49 }
 0x712   :  { %3779 = vmatpush3.bf16.msra.mxu0 %v3913_v50  ;;  %v3920_v50 = vld [vmem:[%s5325_s10 + $0x10] ss:$8 sps:$4 sm:$0xff]  }
 0x713   :  { %1312 = vmatpush1.bf16.msra.mxu1 %v3920_v50 }
 0x7c5   :  { %v3770_v51 = vpop.f32.mrf.mxu0 }
 0x7c7   :  { %v1013_v52 = vpop.f32.mrf.mxu0 }
 0x7c8   :  { %1032 = vrot.lane.b32.xlu0 %v1013_v52, %s4213_s28  ;;  %v3923_v52 = vld [vmem:[%s5325_s10] ss:$8 sps:$4 sm:$0xff]  }
 0x7c9   :  { %v3771_v53 = vpop.f32.mrf.mxu0 }
 0x7cb   :  { %v1016_v27 = vpop.f32.mrf.mxu0 }
 0x7cc   :  { %1036 = vrot.lane.b32.xlu0 %v3770_v51, %s4213_s28  ;;  %1034 = vrot.lane.b32.xlu1 %v1016_v27, %s4213_s28  ;;  %v3925_v51 = vld [vmem:[%s5325_s10 + $0x4] ss:$8 sps:$4 sm:$0xff]  }
 0x7cd   :  { %1313 = vmatprep.subr.bf16.mxu1 %v3925_v51 }
 0x7ce   :  { %1314 = vmatpush1.bf16.msra.mxu1 %v3923_v52 }
 0x7d0   :  { %1038 = vrot.lane.b32.xlu1 %v3771_v53, %s4213_s28 }
 0x83a   :  { %v1033_v54 = vpop.permute.xlu0 %1032 }
 0x83b   :  { %1045 = vst.msk [vmem:[#allocation2] sm:$0xff] %vm1044_vm5, %v1033_v54 }
 0x83e   :  { %v1035_v19 = vpop.permute.xlu1 %1034  ;;  %v1037_v56 = vpop.permute.xlu0 %1036 }
 0x83f   :  { %1046 = vst.msk [vmem:[#allocation2 + $0x8] sm:$0xff] %vm1044_vm5, %v1035_v19  ;;  %1047 = vst.msk [vmem:[#allocation2 + $0x10] sm:$0xff] %vm1044_vm5, %v1037_v56 }
 0x842   :  { %v1039_v57 = vpop.permute.xlu1 %1038  ;;  %v1049_v58 = vld [vmem:[#allocation2] sm:$0xff] }
 0x843   :  { %1048 = vst.msk [vmem:[#allocation2 + $0x18] sm:$0xff] %vm1044_vm5, %v1039_v57 }
 0x846   :  { %v1050_v59 = vld [vmem:[#allocation2 + $0x8] sm:$0xff]  ;;  %v1051_v61 = vld [vmem:[#allocation2 + $0x10] sm:$0xff] }
 0x847   :  { %v1053_v60 = vpack.c.bf16 %v1050_v59, %v1049_v58 }
 0x849   :  { %3780 = vmatprep.mubr.msk.bf16.mxu0 %vm64_vm0, %v1053_v60 }
 0x84a   :  { %v1052_v62 = vld [vmem:[#allocation2 + $0x18] sm:$0xff] }
 0x84b   :  { %v1054_v63 = vpack.c.bf16 %v1052_v62, %v1051_v61 }
 0x84d   :  { %3781 = vmatmul.mubr.msk.bf16.vlgmr.msra.gmra.mxu0 %vm64_vm0, %v1054_v63 }
 0x90d   :  { %v3782_v1 = vpop.f32.mrf.mxu0 }
 0x90e   :  { %v1144_v55 = vadd.f32 %v4186_v0, %v3782_v1  ;;  %v3395_v0 = vld [vmem:[%s5323_s8] ss:$0 sm:$0xff] }
 0x90f   :  { %v1127_v2 = vpop.f32.mrf.mxu0 }
 0x910   :  { %v1142_v3 = vadd.f32 %v4187_v4, %v1127_v2  ;;  %v4661_v13 = vadd.f32 %v3394_v5, %v1144_v55 }
 0x911   :  { %v3783_v6 = vpop.f32.mrf.mxu0 }
 0x912   :  { %v4659_v8 = vadd.f32 %v3394_v5, %v1142_v3  ;;  %v1145_v16 = vadd.f32 %v4188_v15, %v3783_v6  ;;  %v1165_v29 = vsel %vm64_vm0, %v4661_v13, 0.0  ;;  %v3396_v6 = vld [vmem:[%s5324_s9] ss:$0 sm:$0xff] }
 0x913   :  { %v1130_v12 = vpop.f32.mrf.mxu0 }
 0x914   :  { %v1143_v20 = vadd.f32 %v4189_v17, %v1130_v12  ;;  %v1159_v21 = vsel %vm64_vm0, %v4659_v8, 0.0  ;;  %v4673_v28 = vadd.f32 %v3394_v5, %v1145_v16 }
 0x915   :  { %1160 = vadd.xlane.f32.xlu0 %v1159_v21 }
 0x916   :  { %v4671_v24 = vadd.f32 %v3394_v5, %v1143_v20  ;;  %v1168_v14 = vsel %vm64_vm0, %v4673_v28, 0.0 }
 0x918   :  { %v1162_v22 = vsel %vm64_vm0, %v4671_v24, 0.0 }
 0x919   :  { %1166 = vadd.xlane.f32.xlu0 %v1165_v29  ;;  %1163 = vadd.xlane.f32.xlu1 %v1162_v22 }
 0x91d   :  { %1169 = vadd.xlane.f32.xlu0 %v1168_v14 }
 0x99e   :  { %v1161_v18 = vpop.xlane.xlu0 %1160 }
 0x99f   :  { %v1171_v39 = vmul.f32 0.015625, %v1161_v18 }
 0x9a1   :  { %v1175_v11 = vsub.f32 %v4659_v8, %v1171_v39 }
 0x9a2   :  { %v1167_v30 = vpop.xlane.xlu0 %1166  ;;  %v1164_v31 = vpop.xlane.xlu1 %1163 }
 0x9a3   :  { %v1173_v34 = vmul.f32 0.015625, %v1167_v30  ;;  %v1172_v35 = vmul.f32 0.015625, %v1164_v31  ;;  %v1179_v36 = vmul.f32 %v1175_v11, %v1175_v11  ;;  %v3926_v30 = vld [vmem:[%s5327_s12 + $0x78] sm:$0xff]  }
 0x9a4   :  { %v3927_v31 = vld [vmem:[%s5327_s12 + $0x38] sm:$0xff]   ;;  %3609 = vmatprep.subr.bf16.mxu0 %v3926_v30 }
 0x9a5   :  { %v1177_v37 = vsub.f32 %v4661_v13, %v1173_v34  ;;  %v1176_v23 = vsub.f32 %v4671_v24, %v1172_v35  ;;  %v1183_v26 = vsel %vm64_vm0, %v1179_v36, 0.0  ;;  %3610 = vmatpush3.bf16.msra.mxu0 %v3927_v31  ;;  %v3928_v34 = vld [vmem:[%s5327_s12 + $0x70] sm:$0xff]   ;;  %v3930_v36 = vld [vmem:[%s5327_s12 + $0x68] sm:$0xff]  }
 0x9a6   :  { %1184 = vadd.xlane.f32.xlu0 %v1183_v26  ;;  %v1170_v38 = vpop.xlane.xlu0 %1169  ;;  %v3929_v35 = vld [vmem:[%s5327_s12 + $0x30] sm:$0xff]   ;;  %3611 = vmatprep.subr.bf16.mxu0 %v3928_v34  ;;  %v3933_v26 = vld [vmem:[%s5327_s12 + $0x20] sm:$0xff]  }
 0x9a7   :  { %v1174_v10 = vmul.f32 0.015625, %v1170_v38  ;;  %v1181_v40 = vmul.f32 %v1177_v37, %v1177_v37  ;;  %v1180_v41 = vmul.f32 %v1176_v23, %v1176_v23  ;;  %v3934_v38 = vld [vmem:[%s5327_s12 + $0x58] sm:$0xff]  }
 0x9a9   :  { %v1178_v33 = vsub.f32 %v4673_v28, %v1174_v10  ;;  %v1189_v42 = vsel %vm64_vm0, %v1181_v40, 0.0  ;;  %v1186_v43 = vsel %vm64_vm0, %v1180_v41, 0.0  ;;  %3612 = vmatpush3.bf16.msra.mxu0 %v3929_v35  ;;  %v3935_v10 = vld [vmem:[%s5327_s12 + $0x18] sm:$0xff]   ;;  %v3936_v40 = vld [vmem:[%s5327_s12 + $0x50] sm:$0xff]  }
 0x9aa   :  { %1190 = vadd.xlane.f32.xlu0 %v1189_v42  ;;  %1187 = vadd.xlane.f32.xlu1 %v1186_v43  ;;  %v3937_v41 = vld [vmem:[%s5327_s12 + $0x10] sm:$0xff]   ;;  %v3939_v42 = vld [vmem:[%s5327_s12 + $0x8] sm:$0xff]   ;;  %v3940_v43 = vld [vmem:[%s5327_s12 + $0x40] sm:$0xff]  }
 0x9ab   :  { %v1182_v25 = vmul.f32 %v1178_v33, %v1178_v33  ;;  %3613 = vmatprep.subr.bf16.mxu0 %v3930_v36 }
 0x9ad   :  { %v1192_v44 = vsel %vm64_vm0, %v1182_v25, 0.0  ;;  %v3941_v25 = vld [vmem:[%s5327_s12] sm:$0xff]  }
 0x9ae   :  { %1193 = vadd.xlane.f32.xlu1 %v1192_v44  ;;  %v1241_v44 = vld [vmem:[%s5326_s11] sm:$0x3] }
 0x9af   :  { %v1246_v45 = vrot.slane %v1241_v44, %v4372_v7  ;;  %v1250_v46 = vrot.slane %v1241_v44, %v4377_v9 }
 0xa2f   :  { %v1185_v53 = vpop.xlane.xlu0 %1184 }
 0xa30   :  { %v1195_v27 = vmul.f32 0.015625, %v1185_v53 }
 0xa32   :  { %v1199_v54 = vadd.f32 1e-05, %v1195_v27 }
 0xa33   :  { %v1191_v19 = vpop.xlane.xlu0 %1190  ;;  %v1188_v56 = vpop.xlane.xlu1 %1187 }
 0xa34   :  { %4058 = vrsqrt.f32 %v1199_v54  ;;  %v1197_v57 = vmul.f32 0.015625, %v1191_v19  ;;  %v1196_v58 = vmul.f32 0.015625, %v1188_v56 }
 0xa36   :  { %v1200_v59 = vadd.f32 1e-05, %v1196_v58  ;;  %v1201_v60 = vadd.f32 1e-05, %v1197_v57 }
 0xa37   :  { %v1194_v61 = vpop.xlane.xlu1 %1193 }
 0xa38   :  { %v1198_v62 = vmul.f32 0.015625, %v1194_v61  ;;  %4060 = vrsqrt.f32 %v1200_v59 }
 0xa39   :  { %4062 = vrsqrt.f32 %v1201_v60 }
 0xa3a   :  { %v1202_v63 = vadd.f32 1e-05, %v1198_v62 }
 0xa3c   :  { %4064 = vrsqrt.f32 %v1202_v63 }
 0xa41   :  { %v4059_v1 = vpop.eup %4058 }
 0xa42   :  { %v1207_v2 = vmul.f32 %v4059_v1, %v1175_v11 }
 0xa44   :  { %v1217_v3 = vmul.f32 %v3395_v0, %v1207_v2 }
 0xa45   :  { %v4061_v55 = vpop.eup %4060 }
 0xa46   :  { %v1208_v4 = vmul.f32 %v4061_v55, %v1176_v23  ;;  %v4063_v5 = vpop.eup %4062  ;;  %v1227_v17 = vadd.f32 %v3396_v6, %v1217_v3  ;;  %v3932_v23 = vld [vmem:[%s5327_s12 + $0x60] sm:$0xff]  }
 0xa47   :  { %v1209_v21 = vmul.f32 %v4063_v5, %v1177_v37  ;;  %v3931_v37 = vld [vmem:[%s5327_s12 + $0x28] sm:$0xff]  }
 0xa48   :  { %v1218_v15 = vmul.f32 %v3395_v0, %v1208_v4  ;;  %3614 = vmatpush3.bf16.msra.mxu0 %v3931_v37 }
 0xa49   :  { %v4065_v12 = vpop.eup %4064  ;;  %v1219_v14 = vmul.f32 %v3395_v0, %v1209_v21  ;;  %3615 = vmatprep.subr.bf16.mxu0 %v3932_v23 }
 0xa4a   :  { %v1210_v16 = vmul.f32 %v4065_v12, %v1178_v33  ;;  %v1228_v20 = vadd.f32 %v3396_v6, %v1218_v15  ;;  %v3938_v33 = vld [vmem:[%s5327_s12 + $0x48] sm:$0xff]  }
 0xa4b   :  { %v1229_v39 = vadd.f32 %v3396_v6, %v1219_v14 }
 0xa4c   :  { %v1231_v29 = vpack.c.bf16 %v1228_v20, %v1227_v17  ;;  %v1220_v22 = vmul.f32 %v3395_v0, %v1210_v16  ;;  %3616 = vmatpush3.bf16.msra.mxu0 %v3933_v26 }
 0xa4d   :  { %3617 = vmatprep.subr.bf16.mxu0 %v3934_v38 }
 0xa4e   :  { %3405 = vmatmul.mubr.msk.bf16.vlgmr.msra.gmra.mxu1 %vm64_vm0, %v1231_v29  ;;  %v1230_v18 = vadd.f32 %v3396_v6, %v1220_v22 }
 0xa4f   :  { %1341 = vmatprep.mubr.bf16.mxu1 %v4212_v32 }
 0xa50   :  { %v1232_v11 = vpack.c.bf16 %v1230_v18, %v1229_v39  ;;  %3618 = vmatpush3.bf16.msra.mxu0 %v3935_v10 }
 0xa51   :  { %3619 = vmatprep.subr.bf16.mxu0 %v3936_v40 }
 0xa54   :  { %3620 = vmatpush3.bf16.msra.mxu0 %v3937_v41 }
 0xa55   :  { %3621 = vmatprep.subr.bf16.mxu0 %v3938_v33 }
 0xa56   :  { %3406 = vmatmul.mubr.msk.bf16.gmra.mxu1 %vm64_vm0, %v1232_v11 }
 0xa57   :  { %1798 = vmatprep.mubr.bf16.mxu1 %v4212_v32 }
 0xa58   :  { %3622 = vmatpush3.bf16.msra.mxu0 %v3939_v42 }
 0xa59   :  { %3623 = vmatprep.subr.bf16.mxu0 %v3940_v43 }
 0xa5c   :  { %3624 = vmatpush3.bf16.msra.mxu0 %v3941_v25 }
 0xb0e   :  { %v1333_v47 = vpop.f32.mrf.mxu1 }
 0xb0f   :  { %v4776_v48 = vadd.f32 %v1333_v47, %v1246_v45 }
 0xb10   :  { %v1335_v49 = vpop.f32.mrf.mxu1 }
 0xb11   :  { %v1360_v50 = vmul.f32 0.044715, %v4776_v48  ;;  %v4779_v51 = vadd.f32 %v1335_v49, %v1250_v46 }
 0xb12   :  { %v1337_v52 = vpop.f32.mrf.mxu1 }
 0xb13   :  { %v1368_v53 = vmul.f32 %v1360_v50, %v4776_v48  ;;  %v1361_v27 = vmul.f32 0.044715, %v4779_v51  ;;  %v1338_v54 = vadd.f32 %v1337_v52, %v1246_v45 }
 0xb14   :  { %v1339_v19 = vpop.f32.mrf.mxu1 }
 0xb15   :  { %v1376_v56 = vmul.f32 %v1368_v53, %v4776_v48  ;;  %v1369_v57 = vmul.f32 %v1361_v27, %v4779_v51  ;;  %v1362_v58 = vmul.f32 0.044715, %v1338_v54  ;;  %v1340_v59 = vadd.f32 %v1339_v19, %v1250_v46 }
 0xb16   :  { %v1343_v60 = vpop.f32.mrf.mxu1  ;;  %v1354_v27 = vmul.f32 0.5, %v1338_v54 }
 0xb17   :  { %v1384_v61 = vadd.f32 %v1376_v56, %v4776_v48  ;;  %v1377_v62 = vmul.f32 %v1369_v57, %v4779_v51  ;;  %v1370_v63 = vmul.f32 %v1362_v58, %v1338_v54  ;;  %v1363_v1 = vmul.f32 0.044715, %v1340_v59 }
 0xb18   :  { %v4787_v2 = vadd.f32 %v1343_v60, %v1246_v45  ;;  %v1345_v0 = vpop.f32.mrf.mxu1  ;;  %v1353_v56 = vmul.f32 0.5, %v4779_v51  ;;  %v1355_v57 = vmul.f32 0.5, %v1340_v59  ;;  %v1352_v60 = vmul.f32 0.5, %v4776_v48 }
 0xb19   :  { %v1392_v55 = vmul.f32 0.7978846, %v1384_v61  ;;  %v1378_v4 = vmul.f32 %v1370_v63, %v1338_v54  ;;  %v1371_v3 = vmul.f32 %v1363_v1, %v1340_v59  ;;  %v4789_v5 = vadd.f32 %v1345_v0, %v1250_v46 }
 0xb1a   :  { %v1364_v6 = vmul.f32 0.044715, %v4787_v2  ;;  %v1347_v12 = vpop.f32.mrf.mxu1  ;;  %v1385_v15 = vadd.f32 %v1377_v62, %v4779_v51 }
 0xb1b   :  { %v1386_v16 = vadd.f32 %v1378_v4, %v1338_v54  ;;  %v1379_v17 = vmul.f32 %v1371_v3, %v1340_v59  ;;  %v1365_v20 = vmul.f32 0.044715, %v4789_v5  ;;  %4066 = vtanh.f32 %v1392_v55 }
 0xb1c   :  { %v1372_v21 = vmul.f32 %v1364_v6, %v4787_v2  ;;  %v1348_v29 = vadd.f32 %v1347_v12, %v1246_v45  ;;  %v1349_v22 = vpop.f32.mrf.mxu1  ;;  %v1393_v14 = vmul.f32 0.7978846, %v1385_v15 }
 0xb1d   :  { %v1394_v18 = vmul.f32 0.7978846, %v1386_v16  ;;  %v1373_v39 = vmul.f32 %v1365_v20, %v4789_v5  ;;  %v1350_v11 = vadd.f32 %v1349_v22, %v1250_v46  ;;  %v1387_v30 = vadd.f32 %v1379_v17, %v1340_v59 }
 0xb1e   :  { %v1380_v31 = vmul.f32 %v1372_v21, %v4787_v2  ;;  %v1366_v34 = vmul.f32 0.044715, %v1348_v29  ;;  %4068 = vtanh.f32 %v1393_v14  ;;  %v1358_v54 = vmul.f32 0.5, %v1348_v29 }
 0xb1f   :  { %4070 = vtanh.f32 %v1394_v18  ;;  %v1381_v35 = vmul.f32 %v1373_v39, %v4789_v5  ;;  %v1367_v36 = vmul.f32 0.044715, %v1350_v11  ;;  %v1395_v37 = vmul.f32 0.7978846, %v1387_v30 }
 0xb20   :  { %v1374_v23 = vmul.f32 %v1366_v34, %v1348_v29  ;;  %v1388_v26 = vadd.f32 %v1380_v31, %v4787_v2  ;;  %v1357_v59 = vmul.f32 0.5, %v4789_v5  ;;  %v1359_v17 = vmul.f32 0.5, %v1350_v11 }
 0xb21   :  { %v1375_v38 = vmul.f32 %v1367_v36, %v1350_v11  ;;  %4072 = vtanh.f32 %v1395_v37  ;;  %v1389_v10 = vadd.f32 %v1381_v35, %v4789_v5  ;;  %v1356_v20 = vmul.f32 0.5, %v4787_v2 }
 0xb22   :  { %v1382_v40 = vmul.f32 %v1374_v23, %v1348_v29  ;;  %v1396_v41 = vmul.f32 0.7978846, %v1388_v26 }
 0xb23   :  { %v1383_v33 = vmul.f32 %v1375_v38, %v1350_v11  ;;  %v1397_v42 = vmul.f32 0.7978846, %v1389_v10 }
 0xb24   :  { %v1390_v43 = vadd.f32 %v1382_v40, %v1348_v29  ;;  %v3423_v29 = vld [vmem:[%s5328_s13] ss:$0 sm:$0xff] }
 0xb25   :  { %v1391_v25 = vadd.f32 %v1383_v33, %v1350_v11  ;;  %4074 = vtanh.f32 %v1397_v42 }
 0xb26   :  { %v1398_v44 = vmul.f32 0.7978846, %v1390_v43  ;;  %4076 = vtanh.f32 %v1396_v41 }
 0xb27   :  { %v1399_v45 = vmul.f32 0.7978846, %v1391_v25 }
 0xb28   :  { %4078 = vtanh.f32 %v1398_v44  ;;  %v4067_v46 = vpop.eup %4066 }
 0xb29   :  { %4080 = vtanh.f32 %v1399_v45  ;;  %v1408_v19 = vadd.f32 1.0, %v4067_v46 }
 0xb2b   :  { %v4069_v47 = vpop.eup %4068  ;;  %v1416_v0 = vmul.f32 %v1408_v19, %v1352_v60 }
 0xb2c   :  { %v4071_v49 = vpop.eup %4070  ;;  %v1409_v50 = vadd.f32 1.0, %v4069_v47 }
 0xb2d   :  { %v1410_v52 = vadd.f32 1.0, %v4071_v49 }
 0xb2e   :  { %v4073_v53 = vpop.eup %4072  ;;  %v1417_v62 = vmul.f32 %v1409_v50, %v1353_v56 }
 0xb2f   :  { %v1411_v58 = vadd.f32 1.0, %v4073_v53  ;;  %v1418_v61 = vmul.f32 %v1410_v52, %v1354_v27 }
 0xb31   :  { %v1419_v63 = vmul.f32 %v1411_v58, %v1355_v57  ;;  %v1424_v3 = vpack.c.bf16 %v1418_v61, %v1416_v0 }
 0xb32   :  { %v4075_v1 = vpop.eup %4074 }
 0xb33   :  { %v4077_v55 = vpop.eup %4076  ;;  %v1425_v4 = vpack.c.bf16 %v1419_v63, %v1417_v62  ;;  %v1413_v12 = vadd.f32 1.0, %v4075_v1 }
 0xb34   :  { %v1412_v16 = vadd.f32 1.0, %v4077_v55 }
 0xb35   :  { %v4079_v6 = vpop.eup %4078  ;;  %1588 = vmatprep.mubr.bf16.mxu0 %v1425_v4  ;;  %v1421_v22 = vmul.f32 %v1413_v12, %v1357_v59  ;;  %v3942_v12 = vld [vmem:[%s5318_s3 + $0x70] ss:$8 sps:$4 sm:$0xff]   ;;  %v3951_v59 = vld [vmem:[%s5318_s3 + $0x40] ss:$8 sps:$4 sm:$0xff]  }
 0xb36   :  { %v4081_v15 = vpop.eup %4080  ;;  %1589 = vmatmul.mubr.bf16.vlgmr.msra.gmra.mxu0 %v1424_v3  ;;  %v1414_v51 = vadd.f32 1.0, %v4079_v6  ;;  %v1420_v18 = vmul.f32 %v1412_v16, %v1356_v20  ;;  %v3944_v6 = vld [vmem:[%s5318_s3 + $0x74] ss:$8 sps:$4 sm:$0xff]  }
 0xb37   :  { %v1415_v48 = vadd.f32 1.0, %v4081_v15  ;;  %1774 = vmatprep.subr.bf16.mxu1 %v3944_v6  ;;  %v3947_v15 = vld [vmem:[%s5318_s3 + $0x64] ss:$8 sps:$4 sm:$0xff]   ;;  %v3950_v16 = vld [vmem:[%s5318_s3 + $0x54] ss:$8 sps:$4 sm:$0xff]  }
 0xb38   :  { %v1422_v21 = vmul.f32 %v1414_v51, %v1358_v54  ;;  %1775 = vmatpush1.bf16.msra.mxu1 %v3942_v12  ;;  %v3945_v54 = vld [vmem:[%s5318_s3 + $0x60] ss:$8 sps:$4 sm:$0xff]   ;;  %v3948_v51 = vld [vmem:[%s5318_s3 + $0x50] ss:$8 sps:$4 sm:$0xff]  }
 0xb39   :  { %v1423_v14 = vmul.f32 %v1415_v48, %v1359_v17  ;;  %1776 = vmatprep.subr.bf16.mxu1 %v3947_v15  ;;  %v3953_v17 = vld [vmem:[%s5318_s3 + $0x44] ss:$8 sps:$4 sm:$0xff]  }
 0xb3a   :  { %v1426_v30 = vpack.c.bf16 %v1422_v21, %v1420_v18 }
 0xb3b   :  { %v1427_v39 = vpack.c.bf16 %v1423_v14, %v1421_v22 }
 0xb3c   :  { %1777 = vmatpush1.bf16.msra.mxu1 %v3945_v54 }
 0xb3d   :  { %1596 = vmatprep.mubr.bf16.mxu0 %v1427_v39  ;;  %1778 = vmatprep.subr.bf16.mxu1 %v3950_v16 }
 0xb3e   :  { %1597 = vmatmul.mubr.bf16.gmra.mxu0 %v1426_v30 }
 0xb40   :  { %1779 = vmatpush1.bf16.msra.mxu1 %v3948_v51 }
 0xb41   :  { %1780 = vmatprep.subr.bf16.mxu1 %v3953_v17 }
 0xb44   :  { %1781 = vmatpush1.bf16.msra.mxu1 %v3951_v59 }
 0xbf6   :  { %v3625_v31 = vpop.f32.mrf.mxu0 }
 0xbf8   :  { %v3626_v34 = vpop.f32.mrf.mxu0 }
 0xbf9   :  { %v3627_v35 = vadd.f32 %v3626_v34, %v3625_v31 }
 0xbfa   :  { %v3628_v5 = vpop.f32.mrf.mxu0 }
 0xbfb   :  { %v1605_v11 = vadd.f32 %v3627_v35, %v4659_v8 }
 0xbfc   :  { %v3629_v36 = vpop.f32.mrf.mxu0 }
 0xbfd   :  { %v4808_v2 = vadd.f32 %v3423_v29, %v1605_v11  ;;  %v3630_v37 = vadd.f32 %v3629_v36, %v3628_v5  ;;  %v3426_v36 = vld [vmem:[%s5344_s22 + $0x1] ss:$0 sm:$0xff] }
 0xbfe   :  { %v3631_v23 = vpop.f32.mrf.mxu0 }
 0xbff   :  { %v1606_v26 = vadd.f32 %v3630_v37, %v4671_v24  ;;  %v1624_v38 = vsel %vm64_vm0, %v4808_v2, 0.0 }
 0xc00   :  { %1625 = vadd.xlane.f32.xlu0 %v1624_v38  ;;  %v3632_v10 = vpop.f32.mrf.mxu0  ;;  %v3427_v38 = vld [vmem:[%s5317_s2 + $0x1] ss:$0 sm:$0xff]  ;;  %s5347_s2 = smov 80  }
 0xc01   :  { %v4813_v40 = vadd.f32 %v3423_v29, %v1606_v26  ;;  %v3633_v41 = vadd.f32 %v3632_v10, %v3631_v23 }
 0xc02   :  { %v3634_v33 = vpop.f32.mrf.mxu0 }
 0xc03   :  { %v1607_v42 = vadd.f32 %v3633_v41, %v4661_v13  ;;  %v1627_v8 = vsel %vm64_vm0, %v4813_v40, 0.0 }
 0xc04   :  { %1628 = vadd.xlane.f32.xlu1 %v1627_v8  ;;  %v3635_v43 = vpop.f32.mrf.mxu0 }
 0xc05   :  { %v4818_v25 = vadd.f32 %v3423_v29, %v1607_v42  ;;  %v3636_v44 = vadd.f32 %v3635_v43, %v3634_v33 }
 0xc07   :  { %v1608_v24 = vadd.f32 %v3636_v44, %v4673_v28  ;;  %v1630_v45 = vsel %vm64_vm0, %v4818_v25, 0.0 }
 0xc08   :  { %1631 = vadd.xlane.f32.xlu0 %v1630_v45 }
 0xc09   :  { %v4823_v46 = vadd.f32 %v3423_v29, %v1608_v24 }
 0xc0b   :  { %v1633_v47 = vsel %vm64_vm0, %v4823_v46, 0.0 }
 0xc0c   :  { %1634 = vadd.xlane.f32.xlu1 %v1633_v47 }
 0xc89   :  { %v1626_v13 = vpop.xlane.xlu0 %1625 }
 0xc8a   :  { %v1636_v49 = vmul.f32 0.015625, %v1626_v13 }
 0xc8c   :  { %v1640_v50 = vsub.f32 %v4808_v2, %v1636_v49 }
 0xc8d   :  { %v1629_v52 = vpop.xlane.xlu1 %1628 }
 0xc8e   :  { %v1637_v53 = vmul.f32 0.015625, %v1629_v52  ;;  %v1644_v27 = vmul.f32 %v1640_v50, %v1640_v50  ;;  %v3436_v52 = vld [vmem:[%s5319_s4 + $0x2] sm:$0x3]  ;;  %s5345_s4 = smov 112  }
 0xc90   :  { %v1641_v19 = vsub.f32 %v4813_v40, %v1637_v53  ;;  %v1648_v28 = vsel %vm64_vm0, %v1644_v27, 0.0  ;;  %v1713_v27 = vrot.slane %v3436_v52, %v4372_v7 }
 0xc91   :  { %1649 = vadd.xlane.f32.xlu0 %v1648_v28  ;;  %v1632_v56 = vpop.xlane.xlu0 %1631  ;;  %v1717_v28 = vrot.slane %v3436_v52, %v4377_v9 }
 0xc92   :  { %v1638_v57 = vmul.f32 0.015625, %v1632_v56  ;;  %v1645_v58 = vmul.f32 %v1641_v19, %v1641_v19 }
 0xc94   :  { %v1642_v60 = vsub.f32 %v4818_v25, %v1638_v57  ;;  %v1651_v61 = vsel %vm64_vm0, %v1645_v58, 0.0 }
 0xc95   :  { %1652 = vadd.xlane.f32.xlu1 %v1651_v61  ;;  %v1635_v62 = vpop.xlane.xlu1 %1634 }
 0xc96   :  { %v1639_v63 = vmul.f32 0.015625, %v1635_v62  ;;  %v1646_v1 = vmul.f32 %v1642_v60, %v1642_v60 }
 0xc98   :  { %v1643_v0 = vsub.f32 %v4823_v46, %v1639_v63  ;;  %v1654_v55 = vsel %vm64_vm0, %v1646_v1, 0.0 }
 0xc99   :  { %1655 = vadd.xlane.f32.xlu0 %v1654_v55 }
 0xc9a   :  { %v1647_v4 = vmul.f32 %v1643_v0, %v1643_v0 }
 0xc9c   :  { %v1657_v3 = vsel %vm64_vm0, %v1647_v4, 0.0 }
 0xc9d   :  { %1658 = vadd.xlane.f32.xlu1 %v1657_v3 }
 0xd1a   :  { %v1650_v48 = vpop.xlane.xlu0 %1649 }
 0xd1b   :  { %v1660_v20 = vmul.f32 0.015625, %v1650_v48 }
 0xd1d   :  { %v1664_v21 = vadd.f32 1e-05, %v1660_v20 }
 0xd1e   :  { %v1653_v22 = vpop.xlane.xlu1 %1652 }
 0xd1f   :  { %4082 = vrsqrt.f32 %v1664_v21  ;;  %v1661_v14 = vmul.f32 0.015625, %v1653_v22 }
 0xd21   :  { %v1665_v18 = vadd.f32 1e-05, %v1661_v14 }
 0xd22   :  { %v1656_v39 = vpop.xlane.xlu0 %1655 }
 0xd23   :  { %4084 = vrsqrt.f32 %v1665_v18  ;;  %v1662_v30 = vmul.f32 0.015625, %v1656_v39 }
 0xd25   :  { %v1666_v31 = vadd.f32 1e-05, %v1662_v30 }
 0xd26   :  { %v1659_v34 = vpop.xlane.xlu1 %1658 }
 0xd27   :  { %4086 = vrsqrt.f32 %v1666_v31  ;;  %v1663_v35 = vmul.f32 0.015625, %v1659_v34 }
 0xd29   :  { %v1667_v29 = vadd.f32 1e-05, %v1663_v35 }
 0xd2b   :  { %4088 = vrsqrt.f32 %v1667_v29 }
 0xd2c   :  { %v4083_v5 = vpop.eup %4082 }
 0xd2d   :  { %v1672_v11 = vmul.f32 %v4083_v5, %v1640_v50 }
 0xd2f   :  { %v1682_v23 = vmul.f32 %v3426_v36, %v1672_v11 }
 0xd30   :  { %v4085_v37 = vpop.eup %4084 }
 0xd31   :  { %v1673_v26 = vmul.f32 %v4085_v37, %v1641_v19  ;;  %v1692_v33 = vadd.f32 %v3427_v38, %v1682_v23  ;;  %v3447_v23 = vld [vmem:[%s5320_s5 + $0x80] sm:$0xff] }
 0xd33   :  { %v1683_v10 = vmul.f32 %v3426_v36, %v1673_v26  ;;  %v3449_v26 = vld [vmem:[%s5320_s5 + $0x90] sm:$0xff] }
 0xd34   :  { %v4087_v41 = vpop.eup %4086 }
 0xd35   :  { %v1693_v42 = vadd.f32 %v3427_v38, %v1683_v10  ;;  %v1674_v8 = vmul.f32 %v4087_v41, %v1642_v60 }
 0xd37   :  { %v1696_v43 = vpack.c.bf16 %v1693_v42, %v1692_v33  ;;  %v1684_v45 = vmul.f32 %v3426_v36, %v1674_v8  ;;  %v3448_v8 = vld [vmem:[%s5320_s5 + $0x88] sm:$0xff] }
 0xd38   :  { %v4089_v44 = vpop.eup %4088 }
 0xd39   :  { %3445 = vmatmul.mubr.msk.bf16.vlgmr.msra.gmra.mxu1 %vm64_vm0, %v1696_v43  ;;  %v1675_v24 = vmul.f32 %v4089_v44, %v1643_v0  ;;  %v1694_v13 = vadd.f32 %v3427_v38, %v1684_v45 }
 0xd3a   :  { %1808 = vmatprep.mubr.bf16.mxu1 %v4212_v32 }
 0xd3b   :  { %v1685_v47 = vmul.f32 %v3426_v36, %v1675_v24  ;;  %v3450_v24 = vld [vmem:[%s5320_s5 + $0x98] sm:$0xff] }
 0xd3d   :  { %v1695_v49 = vadd.f32 %v3427_v38, %v1685_v47 }
 0xd3f   :  { %v1697_v50 = vpack.c.bf16 %v1695_v49, %v1694_v13  ;;  %v3456_v13 = vld [vmem:[%s5320_s5 + $0xa8] sm:$0xff] }
 0xd41   :  { %3446 = vmatmul.mubr.msk.bf16.gmra.mxu1 %vm64_vm0, %v1697_v50 }
 0xdf9   :  { %v1800_v53 = vpop.f32.mrf.mxu1 }
 0xdfa   :  { %v1801_v57 = vadd.f32 %v1800_v53, %v1713_v27 }
 0xdfb   :  { %v1802_v19 = vpop.f32.mrf.mxu1 }
 0xdfc   :  { %v1803_v61 = vadd.f32 %v1802_v19, %v1717_v28  ;;  %v3455_v19 = vld [vmem:[%s5320_s5 + $0xa0] sm:$0xff] }
 0xdfd   :  { %v1804_v56 = vpop.f32.mrf.mxu1 }
 0xdfe   :  { %v1805_v58 = vadd.f32 %v1804_v56, %v1713_v27 }
 0xdff   :  { %v1806_v60 = vpop.f32.mrf.mxu1 }
 0xe00   :  { %v4873_v62 = vpack.c.bf16 %v1805_v58, %v1801_v57  ;;  %v1807_v63 = vadd.f32 %v1806_v60, %v1717_v28 }
 0xe01   :  { %v1810_v1 = vpop.f32.mrf.mxu1 }
 0xe02   :  { %v4875_v0 = vpack.c.bf16 %v1807_v63, %v1803_v61  ;;  %3788 = vmatprep.mubr.msk.bf16.mxu1 %vm273_vm1, %v4873_v62  ;;  %v1811_v3 = vadd.f32 %v1810_v1, %v1713_v27  ;;  %v3457_v61 = vld [vmem:[%s5320_s5 + $0xb0] sm:$0xff] }
 0xe03   :  { %v1812_v55 = vpop.f32.mrf.mxu1 }
 0xe04   :  { %v1813_v21 = vadd.f32 %v1812_v55, %v1717_v28 }
 0xe05   :  { %v1814_v4 = vpop.f32.mrf.mxu1 }
 0xe06   :  { %v1815_v6 = vadd.f32 %v1814_v4, %v1713_v27 }
 0xe07   :  { %v1816_v59 = vpop.f32.mrf.mxu1 }
 0xe08   :  { %v4879_v12 = vpack.c.bf16 %v1815_v6, %v1811_v3  ;;  %v1817_v20 = vadd.f32 %v1816_v59, %v1717_v28  ;;  %v3458_v28 = vld [vmem:[%s5320_s5 + $0xb8] sm:$0xff]  ;;  %v3463_v6 = vld [vmem:[%s5320_s5 + $0xc0] sm:$0xff]  ;;  %v3465_v59 = vld [vmem:[%s5320_s5 + $0xd0] sm:$0xff] }
 0xe0a   :  { %2011 = vrot.lane.b32.xlu1 %v4879_v12, %s4213_s28  ;;  %1832 = vrot.lane.b32.xlu0 %v4879_v12, %s4214_s29  ;;  %v4907_v14 = vpack.c.bf16 %v1817_v20, %v1813_v21 }
 0xe0e   :  { %1830 = vrot.lane.b32.xlu1 %v4873_v62, %s4214_s29  ;;  %2005 = vrot.lane.b32.xlu0 %v4873_v62, %s5345_s4 }
 0xe12   :  { %2009 = vrot.lane.b32.xlu1 %v4873_v62, %s4213_s28  ;;  %2007 = vrot.lane.b32.xlu0 %v4879_v12, %s5345_s4 }
 0xe16   :  { %2214 = vrot.lane.b32.xlu1 %v4879_v12, %s4216_s30  ;;  %2208 = vrot.lane.b32.xlu0 %v4873_v62, %s5346_s25 }
 0xe1a   :  { %2212 = vrot.lane.b32.xlu1 %v4873_v62, %s4216_s30 }
 0xe1e   :  { %2210 = vrot.lane.b32.xlu1 %v4879_v12, %s5346_s25 }
 0xe7c   :  { %v2012_v15 = vpop.permute.xlu1 %2011  ;;  %v1833_v54 = vpop.permute.xlu0 %1832 }
 0xe7d   :  { %v2023_v16 = vsel %vm273_vm1, %v2012_v15, 0  ;;  %v1844_v51 = vsel %vm273_vm1, %v1833_v54, 0  ;;  %3879 = vmatprep.subr.msk.bf16.mxu1 %vm273_vm1, %v1833_v54  ;;  %3881 = vmatprep.subr.msk.bf16.mxu0 %vm273_vm1, %v2012_v15  ;;  %v3464_v54 = vld [vmem:[%s5320_s5 + $0xc8] sm:$0xff] }
 0xe7e   :  { %3785 = vmatpush3.bf16.xpose.msra.mxu1 %v1844_v51  ;;  %3801 = vmatpush3.bf16.xpose.msra.mxu0 %v2023_v16 }
 0xe80   :  { %v1831_v17 = vpop.permute.xlu1 %1830  ;;  %v2006_v48 = vpop.permute.xlu0 %2005 }
 0xe81   :  { %3880 = vmatprep.subr.msk.bf16.mxu1 %vm273_vm1, %v1831_v17  ;;  %3804 = vmatprep.mubr.msk.bf16.mxu0 %vm273_vm1, %v2006_v48  ;;  %v1841_v18 = vsel %vm273_vm1, %v1831_v17, 0  ;;  %v3466_v17 = vld [vmem:[%s5320_s5 + $0xd8] sm:$0xff] }
 0xe84   :  { %v2010_v22 = vpop.permute.xlu1 %2009  ;;  %v2008_v30 = vpop.permute.xlu0 %2007 }
 0xe85   :  { %v2020_v39 = vsel %vm273_vm1, %v2010_v22, 0  ;;  %3882 = vmatprep.subr.msk.bf16.mxu0 %vm273_vm1, %v2010_v22 }
 0xe86   :  { %3787 = vmatpush3.bf16.xpose.msra.mxu1 %v1841_v18  ;;  %3803 = vmatpush3.bf16.xpose.msra.mxu0 %v2020_v39 }
 0xe87   :  { %3792 = vmatprep.subr.bf16.mxu1 %v4907_v14 }
 0xe88   :  { %v2215_v31 = vpop.permute.xlu1 %2214  ;;  %v2209_v35 = vpop.permute.xlu0 %2208 }
 0xe89   :  { %3883 = vmatprep.subr.msk.bf16.mxu0 %vm273_vm1, %v2215_v31  ;;  %v2226_v34 = vsel %vm273_vm1, %v2215_v31, 0 }
 0xe8c   :  { %v2213_v29 = vpop.permute.xlu1 %2212 }
 0xe8d   :  { %3789 = vmatmul.mubr.msk.bf16.vlgmr.msra.gmra.mxu1 %vm273_vm1, %v4879_v12  ;;  %3805 = vmatmul.mubr.msk.bf16.vlgmr.msra.gmra.mxu0 %vm273_vm1, %v2008_v30  ;;  %v2223_v5 = vsel %vm273_vm1, %v2213_v29, 0 }
 0xe8e   :  { %3793 = vmatpush3.bf16.msra.mxu1 %v4907_v14  ;;  %3817 = vmatpush3.bf16.xpose.msra.mxu0 %v2226_v34 }
 0xe8f   :  { %3820 = vmatprep.mubr.msk.bf16.mxu0 %vm273_vm1, %v2209_v35  ;;  %3794 = vmatprep.subr.bf16.mxu1 %v4875_v0 }
 0xe90   :  { %3884 = vmatprep.subr.msk.bf16.mxu0 %vm273_vm1, %v2213_v29  ;;  %v2211_v11 = vpop.permute.xlu1 %2210 }
 0xe92   :  { %3795 = vmatpush3.bf16.msra.mxu1 %v4875_v0 }
 0xe96   :  { %3819 = vmatpush3.bf16.xpose.msra.mxu0 %v2223_v5 }
 0xe9d   :  { %3821 = vmatmul.mubr.msk.bf16.vlgmr.msra.gmra.mxu0 %vm273_vm1, %v2211_v11 }
 0xf4d   :  { %v3790_v36 = vpop.f32.mrf.mxu1  ;;  %v3806_v37 = vpop.f32.mrf.mxu0 }
 0xf4e   :  { %v1889_v43 = vadd.f32 %v3790_v36, %v3449_v26  ;;  %v2068_v1 = vadd.f32 %v3806_v37, %v3457_v61 }
 0xf4f   :  { %v1880_v38 = vpop.f32.mrf.mxu1  ;;  %v2059_v10 = vpop.f32.mrf.mxu0 }
 0xf50   :  { %v4931_v41 = vadd.f32 %v3447_v23, %v1880_v38  ;;  %v1901_v27 = vsel %vm335_vm2, %v1889_v43, -inf  ;;  %v4954_v56 = vadd.f32 %v3455_v19, %v2059_v10  ;;  %v2080_v51 = vsel %vm335_vm2, %v2068_v1, -inf }
 0xf51   :  { %v3791_v33 = vpop.f32.mrf.mxu1  ;;  %v3807_v42 = vpop.f32.mrf.mxu0 }
 0xf52   :  { %v1895_v44 = vsel %vm335_vm2, %v4931_v41, -inf  ;;  %v1892_v50 = vadd.f32 %v3791_v33, %v3450_v24  ;;  %v2071_v57 = vadd.f32 %v3807_v42, %v3458_v28  ;;  %v2074_v4 = vsel %vm335_vm2, %v4954_v56, -inf }
 0xf53   :  { %v1883_v45 = vpop.f32.mrf.mxu1  ;;  %1896 = vmax.xlane.f32.xlu0 %v1895_v44  ;;  %v2062_v47 = vpop.f32.mrf.mxu0 }
 0xf54   :  { %v1884_v49 = vadd.f32 %v3448_v8, %v1883_v45  ;;  %v4944_v52 = vadd.f32 %v3456_v13, %v2062_v47  ;;  %v1904_v58 = vsel %vm335_vm2, %v1892_v50, -inf  ;;  %v2083_v55 = vsel %vm335_vm2, %v2071_v57, -inf }
 0xf56   :  { %v1898_v53 = vsel %vm335_vm2, %v1884_v49, -inf  ;;  %v2077_v60 = vsel %vm335_vm2, %v4944_v52, -inf }
 0xf57   :  { %1899 = vmax.xlane.f32.xlu1 %v1898_v53  ;;  %1902 = vmax.xlane.f32.xlu0 %v1901_v27 }
 0xf5b   :  { %1905 = vmax.xlane.f32.xlu0 %v1904_v58  ;;  %2078 = vmax.xlane.f32.xlu1 %v2077_v60 }
 0xf5d   :  { %v3822_v63 = vpop.f32.mrf.mxu0 }
 0xf5e   :  { %v4980_v21 = vadd.f32 %v3822_v63, %v3465_v59 }
 0xf5f   :  { %2084 = vmax.xlane.f32.xlu1 %v2083_v55  ;;  %2075 = vmax.xlane.f32.xlu0 %v2074_v4  ;;  %v2262_v3 = vpop.f32.mrf.mxu0 }
 0xf60   :  { %v4971_v16 = vadd.f32 %v3463_v6, %v2262_v3  ;;  %v2283_v31 = vsel %vm335_vm2, %v4980_v21, -inf }
 0xf61   :  { %v3823_v15 = vpop.f32.mrf.mxu0 }
 0xf62   :  { %v2274_v22 = vadd.f32 %v3823_v15, %v3466_v17  ;;  %v2277_v39 = vsel %vm335_vm2, %v4971_v16, -inf }
 0xf63   :  { %2081 = vmax.xlane.f32.xlu0 %v2080_v51  ;;  %v2265_v48 = vpop.f32.mrf.mxu0 }
 0xf64   :  { %v2266_v20 = vadd.f32 %v3464_v54, %v2265_v48  ;;  %v2286_v30 = vsel %vm335_vm2, %v2274_v22, -inf }
 0xf66   :  { %v2280_v18 = vsel %vm335_vm2, %v2266_v20, -inf }
 0xf67   :  { %2281 = vmax.xlane.f32.xlu1 %v2280_v18  ;;  %2278 = vmax.xlane.f32.xlu0 %v2277_v39 }
 0xf6b   :  { %2287 = vmax.xlane.f32.xlu1 %v2286_v30  ;;  %2284 = vmax.xlane.f32.xlu0 %v2283_v31 }
 0xf7c   :  { %2122 = vrot.lane.b32.xlu1 %v4875_v0, %s5345_s4 }
 0xf80   :  { %2325 = vrot.lane.b32.xlu1 %v4907_v14, %s5346_s25 }
 0xfdc   :  { %v1897_v34 = vpop.xlane.xlu0 %1896 }
 0xfdd   :  { %v1907_v8 = vsub.f32 %v4931_v41, %v1897_v34 }
 0xfdf   :  { %v1911_v13 = vmul.f32 1.442695, %v1907_v8 }
 0xfe0   :  { %v1900_v35 = vpop.xlane.xlu1 %1899  ;;  %v1903_v29 = vpop.xlane.xlu0 %1902 }
 0xfe1   :  { %v1909_v5 = vsub.f32 %v1889_v43, %v1903_v29  ;;  %v1908_v38 = vsub.f32 %v1884_v49, %v1900_v35 }
 0xfe3   :  { %v1915_v11 = vmul.f32 1.442695, %v1909_v5  ;;  %v1913_v24 = vmul.f32 1.442695, %v1908_v38 }
 0xfe4   :  { %v2079_v36 = vpop.xlane.xlu1 %2078  ;;  %v1906_v37 = vpop.xlane.xlu0 %1905 }
 0xfe5   :  { %v1910_v23 = vsub.f32 %v1892_v50, %v1906_v37  ;;  %4090 = vpow2.f32 %v1915_v11  ;;  %v2087_v45 = vsub.f32 %v4944_v52, %v2079_v36 }
 0xfe7   :  { %v1917_v26 = vmul.f32 1.442695, %v1910_v23  ;;  %v2092_v50 = vmul.f32 1.442695, %v2087_v45 }
 0xfe8   :  { %v2085_v10 = vpop.xlane.xlu1 %2084  ;;  %v2076_v33 = vpop.xlane.xlu0 %2075 }
 0xfe9   :  { %v2089_v42 = vsub.f32 %v2071_v57, %v2085_v10  ;;  %4092 = vpow2.f32 %v1917_v26  ;;  %v2086_v39 = vsub.f32 %v4954_v56, %v2076_v33 }
 0xfeb   :  { %v2096_v44 = vmul.f32 1.442695, %v2089_v42  ;;  %v2090_v31 = vmul.f32 1.442695, %v2086_v39 }
 0xfec   :  { %v2082_v47 = vpop.xlane.xlu0 %2081 }
 0xfed   :  { %4094 = vpow2.f32 %v2096_v44  ;;  %v2088_v43 = vsub.f32 %v2068_v1, %v2082_v47 }
 0xfee   :  { %4096 = vpow2.f32 %v1913_v24 }
 0xfef   :  { %v2094_v53 = vmul.f32 1.442695, %v2088_v43 }
 0xff0   :  { %v2282_v27 = vpop.xlane.xlu1 %2281  ;;  %v2279_v18 = vpop.xlane.xlu0 %2278 }
 0xff1   :  { %4098 = vpow2.f32 %v2094_v53  ;;  %v2290_v19 = vsub.f32 %v2266_v20, %v2282_v27  ;;  %v2289_v35 = vsub.f32 %v4971_v16, %v2279_v18 }
 0xff2   :  { %v4994_v49 = vpop.eup %4090  ;;  %4100 = vpow2.f32 %v1911_v13 }
 0xff3   :  { %4102 = vpow2.f32 %v2092_v50  ;;  %v1925_v41 = vsel %vm335_vm2, %v4994_v49, 0.0  ;;  %v2295_v60 = vmul.f32 1.442695, %v2290_v19  ;;  %v2293_v5 = vmul.f32 1.442695, %v2289_v35 }
 0xff4   :  { %v2288_v28 = vpop.xlane.xlu1 %2287  ;;  %1926 = vadd.xlane.f32.xlu0 %v1925_v41  ;;  %v2285_v30 = vpop.xlane.xlu0 %2284 }
 0xff5   :  { %v2292_v57 = vsub.f32 %v2274_v22, %v2288_v28  ;;  %v2291_v34 = vsub.f32 %v4980_v21, %v2285_v30 }
 0xff6   :  { %v4998_v52 = vpop.eup %4092 }
 0xff7   :  { %v2299_v58 = vmul.f32 1.442695, %v2292_v57  ;;  %v1928_v61 = vsel %vm335_vm2, %v4998_v52, 0.0  ;;  %v2297_v29 = vmul.f32 1.442695, %v2291_v34 }
 0xff8   :  { %1929 = vadd.xlane.f32.xlu1 %v1928_v61  ;;  %v2123_v16 = vpop.permute.xlu1 %2122 }
 0xff9   :  { %4104 = vpow2.f32 %v2299_v58 }
 0xffa   :  { %v5002_v63 = vpop.eup %4094  ;;  %4106 = vpow2.f32 %v2295_v60 }
 0xffb   :  { %v2107_v1 = vsel %vm335_vm2, %v5002_v63, 0.0  ;;  %v5006_v55 = vpop.eup %4096  ;;  %4108 = vpow2.f32 %v2090_v31 }
 0xffc   :  { %2108 = vadd.xlane.f32.xlu1 %v2107_v1  ;;  %v1922_v15 = vsel %vm335_vm2, %v5006_v55, 0.0  ;;  %4110 = vpow2.f32 %v2297_v29  ;;  %v2326_v26 = vpop.permute.xlu1 %2325 }
 0xffd   :  { %4112 = vpow2.f32 %v2293_v5 }
 0xffe   :  { %v5008_v4 = vpop.eup %4098 }
 0xfff   :  { %v2104_v3 = vsel %vm335_vm2, %v5008_v4, 0.0  ;;  %v4101_v6 = vpop.eup %4100 }
0x1000   :  { %2105 = vadd.xlane.f32.xlu0 %v2104_v3  ;;  %v5014_v54 = vpop.eup %4102  ;;  %1923 = vadd.xlane.f32.xlu1 %v1922_v15  ;;  %v1919_v51 = vsel %vm335_vm2, %v4101_v6, 0.0 }
0x1001   :  { %v2101_v59 = vsel %vm335_vm2, %v5014_v54, 0.0 }
0x1004   :  { %1920 = vadd.xlane.f32.xlu0 %v1919_v51  ;;  %2102 = vadd.xlane.f32.xlu1 %v2101_v59 }
0x1006   :  { %v5019_v17 = vpop.eup %4104 }
0x1007   :  { %v2310_v48 = vsel %vm335_vm2, %v5019_v17, 0.0  ;;  %v5023_v20 = vpop.eup %4106 }
0x1008   :  { %2311 = vadd.xlane.f32.xlu1 %v2310_v48  ;;  %v2304_v22 = vsel %vm335_vm2, %v5023_v20, 0.0  ;;  %v4109_v11 = vpop.eup %4108 }
0x1009   :  { %v2098_v56 = vsel %vm335_vm2, %v4109_v11, 0.0  ;;  %v5039_v36 = vpop.eup %4110 }
0x100a   :  { %v2307_v37 = vsel %vm335_vm2, %v5039_v36, 0.0  ;;  %v5043_v21 = vpop.eup %4112 }
0x100b   :  { %v2301_v23 = vsel %vm335_vm2, %v5043_v21, 0.0 }
0x100c   :  { %2305 = vadd.xlane.f32.xlu1 %v2304_v22 }
0x101a   :  { %2124 = vrot.lane.b32.xlu0 %v4907_v14, %s5345_s4 }
0x101d   :  { %2323 = vrot.lane.b32.xlu1 %v4875_v0, %s5346_s25 }
0x1021   :  { %2413 = vrot.lane.b32.xlu1 %v4873_v62, %s4218_s19 }
0x1025   :  { %2411 = vrot.lane.b32.xlu1 %v4879_v12, %s5347_s2 }
0x1039   :  { %2099 = vadd.xlane.f32.xlu0 %v2098_v56 }
0x103d   :  { %2308 = vadd.xlane.f32.xlu0 %v2307_v37 }
0x1041   :  { %2302 = vadd.xlane.f32.xlu0 %v2301_v23 }
0x1057   :  { %2415 = vrot.lane.b32.xlu0 %v4879_v12, %s4218_s19 }
0x105b   :  { %2409 = vrot.lane.b32.xlu0 %v4873_v62, %s5347_s2 }
0x107d   :  { %v1927_v10 = vpop.xlane.xlu0 %1926 }
0x1081   :  { %v1930_v38 = vpop.xlane.xlu1 %1929 }
0x1082   :  { %4114 = vrcp.f32 %v1930_v38 }
0x1085   :  { %v2109_v33 = vpop.xlane.xlu1 %2108 }
0x1089   :  { %v2106_v42 = vpop.xlane.xlu0 %2105  ;;  %v1924_v8 = vpop.xlane.xlu1 %1923 }
0x108a   :  { %4116 = vrcp.f32 %v1924_v8 }
0x108b   :  { %4118 = vrcp.f32 %v1927_v10 }
0x108d   :  { %v1921_v44 = vpop.xlane.xlu0 %1920  ;;  %v2103_v28 = vpop.xlane.xlu1 %2102 }
0x108e   :  { %4120 = vrcp.f32 %v1921_v44 }
0x108f   :  { %v4115_v45 = vpop.eup %4114  ;;  %4122 = vrcp.f32 %v2106_v42 }
0x1090   :  { %v1938_v62 = vmul.f32 %v4115_v45, %v4998_v52  ;;  %4124 = vrcp.f32 %v2103_v28 }
0x1091   :  { %v2125_v24 = vpop.permute.xlu0 %2124  ;;  %v2312_v41 = vpop.xlane.xlu1 %2311  ;;  %4126 = vrcp.f32 %v2109_v33 }
0x1092   :  { %3808 = vmatprep.subr.bf16.mxu1 %v2125_v24 }
0x1095   :  { %v2306_v52 = vpop.xlane.xlu1 %2305 }
0x1097   :  { %v4117_v47 = vpop.eup %4116 }
0x1098   :  { %v4119_v12 = vpop.eup %4118  ;;  %v1936_v53 = vmul.f32 %v4117_v47, %v5006_v55  ;;  %v3471_v47 = vld [vmem:[%s5320_s5 + $0xe0] sm:$0xff] }
0x1099   :  { %v1937_v50 = vmul.f32 %v4119_v12, %v4994_v49  ;;  %v2324_v30 = vpop.permute.xlu1 %2323  ;;  %v3473_v12 = vld [vmem:[%s5320_s5 + $0xf0] sm:$0xff] }
0x109b   :  { %v4121_v43 = vpop.eup %4120  ;;  %v1940_v19 = vpack.c.bf16 %v1938_v62, %v1937_v50 }
0x109c   :  { %v1935_v13 = vmul.f32 %v4121_v43, %v4101_v6  ;;  %v4123_v60 = vpop.eup %4122 }
0x109d   :  { %v4125_v61 = vpop.eup %4124  ;;  %v2116_v3 = vmul.f32 %v4123_v60, %v5008_v4  ;;  %v2414_v37 = vpop.permute.xlu1 %2413 }
0x109e   :  { %v1939_v27 = vpack.c.bf16 %v1936_v53, %v1935_v13  ;;  %v4127_v1 = vpop.eup %4126  ;;  %v2115_v15 = vmul.f32 %v4125_v61, %v5014_v54  ;;  %v3472_v53 = vld [vmem:[%s5320_s5 + $0xe8] sm:$0xff] }
0x109f   :  { %v2117_v51 = vmul.f32 %v4127_v1, %v5002_v63 }
0x10a0   :  { %3796 = vmatprep.mubr.msk.bf16.mxu1 %vm335_vm2, %v1939_v27 }
0x10a1   :  { %3797 = vmatmul.mubr.msk.bf16.vlgmr.msra.gmra.mxu1 %vm335_vm2, %v1940_v19  ;;  %v2119_v48 = vpack.c.bf16 %v2117_v51, %v2116_v3  ;;  %v3474_v19 = vld [vmem:[%s5320_s5 + $0xf8] sm:$0xff] }
0x10a2   :  { %3809 = vmatpush3.bf16.msra.mxu1 %v2125_v24 }
0x10a3   :  { %3810 = vmatprep.subr.bf16.mxu1 %v2123_v16 }
0x10a6   :  { %3811 = vmatpush3.bf16.msra.mxu1 %v2123_v16 }
0x10a7   :  { %3824 = vmatprep.subr.bf16.mxu1 %v2326_v26 }
0x10c2   :  { %v2100_v57 = vpop.xlane.xlu0 %2099 }
0x10c3   :  { %4128 = vrcp.f32 %v2100_v57 }
0x10c6   :  { %v2309_v58 = vpop.xlane.xlu0 %2308 }
0x10c7   :  { %4130 = vrcp.f32 %v2309_v58 }
0x10c8   :  { %4132 = vrcp.f32 %v2306_v52 }
0x10c9   :  { %4134 = vrcp.f32 %v2312_v41 }
0x10ca   :  { %v2303_v49 = vpop.xlane.xlu0 %2302 }
0x10cb   :  { %4136 = vrcp.f32 %v2303_v49 }
0x10ce   :  { %v2416_v34 = vpop.permute.xlu0 %2415 }
0x10d0   :  { %v4129_v55 = vpop.eup %4128 }
0x10d1   :  { %v2114_v6 = vmul.f32 %v4129_v55, %v4109_v11  ;;  %v2427_v11 = vsel %vm273_vm1, %v2416_v34, 0 }
0x10d2   :  { %v2410_v56 = vpop.permute.xlu0 %2409 }
0x10d3   :  { %v2118_v59 = vpack.c.bf16 %v2115_v15, %v2114_v6 }
0x10d4   :  { %v4131_v22 = vpop.eup %4130 }
0x10d5   :  { %3812 = vmatprep.mubr.msk.bf16.mxu1 %vm335_vm2, %v2118_v59  ;;  %v4133_v18 = vpop.eup %4132  ;;  %v2319_v4 = vmul.f32 %v4131_v22, %v5039_v36 }
0x10d6   :  { %3813 = vmatmul.mubr.msk.bf16.vlgmr.msra.gmra.mxu1 %vm335_vm2, %v2119_v48  ;;  %v4135_v39 = vpop.eup %4134  ;;  %v2318_v63 = vmul.f32 %v4133_v18, %v5023_v20  ;;  %v2412_v20 = vpop.permute.xlu1 %2411 }
0x10d7   :  { %3825 = vmatpush3.bf16.msra.mxu1 %v2326_v26  ;;  %v2320_v35 = vmul.f32 %v4135_v39, %v5019_v17  ;;  %v2424_v17 = vsel %vm273_vm1, %v2414_v37, 0 }
0x10d8   :  { %v4137_v31 = vpop.eup %4136  ;;  %3826 = vmatprep.subr.bf16.mxu1 %v2324_v30 }
0x10d9   :  { %v2317_v54 = vmul.f32 %v4137_v31, %v5043_v21  ;;  %v2322_v5 = vpack.c.bf16 %v2320_v35, %v2319_v4 }
0x10db   :  { %3827 = vmatpush3.bf16.msra.mxu1 %v2324_v30  ;;  %v2321_v29 = vpack.c.bf16 %v2318_v63, %v2317_v54 }
0x10dc   :  { %3885 = vmatprep.subr.msk.bf16.mxu1 %vm273_vm1, %v2416_v34 }
0x10dd   :  { %3828 = vmatprep.mubr.msk.bf16.mxu1 %vm335_vm2, %v2321_v29 }
0x10de   :  { %3829 = vmatmul.mubr.msk.bf16.vlgmr.msra.gmra.mxu1 %vm335_vm2, %v2322_v5 }
0x10df   :  { %3833 = vmatpush3.bf16.xpose.msra.mxu1 %v2427_v11  ;;  %3836 = vmatprep.mubr.msk.bf16.mxu1 %vm273_vm1, %v2410_v56 }
0x10e0   :  { %3886 = vmatprep.subr.msk.bf16.mxu1 %vm273_vm1, %v2414_v37 }
0x10e7   :  { %3835 = vmatpush3.bf16.xpose.msra.mxu1 %v2424_v17 }
0x10ee   :  { %3837 = vmatmul.mubr.msk.bf16.vlgmr.msra.gmra.mxu1 %vm273_vm1, %v2412_v20 }
0x10ef   :  { %2893 = vmatprep.mubr.bf16.mxu1 %v4212_v32 }
0x1161   :  { %v3798_v36 = vpop.f32.mrf.mxu1 }
0x1162   :  { %1998 = vst.msk [vmem:[#allocation2 + $0x10] sm:$0xff] %vm273_vm1, %v3798_v36 }
0x1163   :  { %v1981_v21 = vpop.f32.mrf.mxu1 }
0x1164   :  { %1996 = vst.msk [vmem:[#allocation2] sm:$0xff] %vm273_vm1, %v1981_v21 }
0x1165   :  { %v3799_v23 = vpop.f32.mrf.mxu1 }
0x1166   :  { %1999 = vst.msk [vmem:[#allocation2 + $0x18] sm:$0xff] %vm273_vm1, %v3799_v23 }
0x1167   :  { %v1984_v16 = vpop.f32.mrf.mxu1 }
0x1168   :  { %1997 = vst.msk [vmem:[#allocation2 + $0x8] sm:$0xff] %vm273_vm1, %v1984_v16 }
0x1196   :  { %v3814_v26 = vpop.f32.mrf.mxu1 }
0x1198   :  { %v2168_v38 = vpop.f32.mrf.mxu1 }
0x119a   :  { %v3815_v10 = vpop.f32.mrf.mxu1 }
0x119c   :  { %v2171_v33 = vpop.f32.mrf.mxu1 }
0x119e   :  { %v3830_v42 = vpop.f32.mrf.mxu1 }
0x11a0   :  { %v2369_v8 = vpop.f32.mrf.mxu1 }
0x11a2   :  { %v3831_v44 = vpop.f32.mrf.mxu1 }
0x11a4   :  { %v2372_v24 = vpop.f32.mrf.mxu1 }
0x11ae   :  { %v3838_v45 = vpop.f32.mrf.mxu1 }
0x11af   :  { %v2472_v50 = vadd.f32 %v3838_v45, %v3473_v12 }
0x11b0   :  { %v2463_v43 = vpop.f32.mrf.mxu1 }
0x11b1   :  { %v2464_v62 = vadd.f32 %v3471_v47, %v2463_v43  ;;  %v2484_v58 = vsel %vm335_vm2, %v2472_v50, -inf  ;;  %v3954_v43 = vld [vmem:[%s5321_s6 + $0x38] sm:$0xff]  }
0x11b2   :  { %v3839_v13 = vpop.f32.mrf.mxu1 }
0x11b3   :  { %v2478_v27 = vsel %vm335_vm2, %v2464_v62, -inf  ;;  %v2475_v57 = vadd.f32 %v3839_v13, %v3474_v19  ;;  %v3956_v13 = vld [vmem:[%s5321_s6 + $0x28] sm:$0xff]  }
0x11b4   :  { %v2466_v28 = vpop.f32.mrf.mxu1  ;;  %2479 = vmax.xlane.f32.xlu0 %v2478_v27 }
0x11b5   :  { %v2467_v41 = vadd.f32 %v3472_v53, %v2466_v28  ;;  %v2487_v49 = vsel %vm335_vm2, %v2475_v57, -inf  ;;  %v3957_v53 = vld [vmem:[%s5321_s6 + $0x20] sm:$0xff]  }
0x11b7   :  { %v2481_v52 = vsel %vm335_vm2, %v2467_v41, -inf }
0x11b8   :  { %2482 = vmax.xlane.f32.xlu1 %v2481_v52  ;;  %2485 = vmax.xlane.f32.xlu0 %v2484_v58 }
0x11bc   :  { %2488 = vmax.xlane.f32.xlu0 %v2487_v49 }
0x123d   :  { %v2480_v60 = vpop.xlane.xlu0 %2479 }
0x123e   :  { %v2490_v61 = vsub.f32 %v2464_v62, %v2480_v60  ;;  %v3955_v62 = vld [vmem:[%s5321_s6 + $0x30] sm:$0xff]  }
0x1240   :  { %v2494_v51 = vmul.f32 1.442695, %v2490_v61 }
0x1241   :  { %v2483_v1 = vpop.xlane.xlu1 %2482  ;;  %v2486_v55 = vpop.xlane.xlu0 %2485 }
0x1242   :  { %v2492_v3 = vsub.f32 %v2472_v50, %v2486_v55  ;;  %v2491_v6 = vsub.f32 %v2467_v41, %v2483_v1 }
0x1244   :  { %v2498_v15 = vmul.f32 1.442695, %v2492_v3  ;;  %v2496_v22 = vmul.f32 1.442695, %v2491_v6 }
0x1245   :  { %v2489_v59 = vpop.xlane.xlu0 %2488 }
0x1246   :  { %v2493_v48 = vsub.f32 %v2475_v57, %v2489_v59  ;;  %4138 = vpow2.f32 %v2498_v15 }
0x1247   :  { %4140 = vpow2.f32 %v2494_v51 }
0x1248   :  { %v2500_v18 = vmul.f32 1.442695, %v2493_v48  ;;  %v3494_v48 = vld [vmem:[%s5322_s7 + $0x1] ss:$0 sm:$0xff] }
0x124a   :  { %4142 = vpow2.f32 %v2500_v18 }
0x124b   :  { %4144 = vpow2.f32 %v2496_v22 }
0x1253   :  { %v4139_v39 = vpop.eup %4138 }
0x1254   :  { %v2508_v30 = vsel %vm335_vm2, %v4139_v39, 0.0  ;;  %v4141_v31 = vpop.eup %4140 }
0x1255   :  { %2509 = vadd.xlane.f32.xlu0 %v2508_v30  ;;  %v2502_v63 = vsel %vm335_vm2, %v4141_v31, 0.0 }
0x1257   :  { %v4143_v34 = vpop.eup %4142 }
0x1258   :  { %v2511_v4 = vsel %vm335_vm2, %v4143_v34, 0.0  ;;  %v4145_v54 = vpop.eup %4144 }
0x1259   :  { %2512 = vadd.xlane.f32.xlu1 %v2511_v4  ;;  %2503 = vadd.xlane.f32.xlu0 %v2502_v63  ;;  %v2505_v35 = vsel %vm335_vm2, %v4145_v54, 0.0 }
0x125d   :  { %2506 = vadd.xlane.f32.xlu1 %v2505_v35 }
0x126e   :  { %2524 = vrot.lane.b32.xlu1 %v4875_v0, %s5347_s2 }
0x126f   :  { %2526 = vrot.lane.b32.xlu0 %v4907_v14, %s5347_s2 }
0x1272   :  { %2187 = vrot.lane.b32.xlu1 %v2168_v38, %s4218_s19 }
0x1273   :  { %2191 = vrot.lane.b32.xlu0 %v3814_v26, %s4218_s19 }
0x1276   :  { %2189 = vrot.lane.b32.xlu1 %v2171_v33, %s4218_s19 }
0x1277   :  { %2388 = vrot.lane.b32.xlu0 %v2369_v8, %s4216_s30 }
0x127a   :  { %2193 = vrot.lane.b32.xlu1 %v3815_v10, %s4218_s19 }
0x127b   :  { %2392 = vrot.lane.b32.xlu0 %v3830_v42, %s4216_s30 }
0x127e   :  { %2390 = vrot.lane.b32.xlu1 %v2372_v24, %s4216_s30 }
0x1282   :  { %2394 = vrot.lane.b32.xlu1 %v3831_v44, %s4216_s30 }
0x12de   :  { %v2510_v0 = vpop.xlane.xlu0 %2509 }
0x12e2   :  { %v2513_v29 = vpop.xlane.xlu1 %2512  ;;  %v2504_v5 = vpop.xlane.xlu0 %2503 }
0x12e3   :  { %4146 = vrcp.f32 %v2513_v29 }
0x12e4   :  { %4148 = vrcp.f32 %v2504_v5 }
0x12e5   :  { %4150 = vrcp.f32 %v2510_v0 }
0x12e6   :  { %v2507_v14 = vpop.xlane.xlu1 %2506  ;;  %v2527_v11 = vpop.permute.xlu0 %2526 }
0x12e7   :  { %4152 = vrcp.f32 %v2507_v14  ;;  %3840 = vmatprep.subr.bf16.mxu0 %v2527_v11 }
0x12e8   :  { %3841 = vmatpush3.bf16.msra.mxu0 %v2527_v11 }
0x12ea   :  { %v2525_v56 = vpop.permute.xlu1 %2524  ;;  %v2192_v37 = vpop.permute.xlu0 %2191 }
0x12eb   :  { %3842 = vmatprep.subr.bf16.mxu0 %v2525_v56  ;;  %2201 = vst.msk [vmem:[#allocation2 + $0x10] sm:$0xff] %vm640_vm3, %v2192_v37 }
0x12ec   :  { %3843 = vmatpush3.bf16.msra.mxu0 %v2525_v56 }
0x12ed   :  { %3848 = vmatprep.subr.bf16.mxu0 %v3954_v43 }
0x12ee   :  { %v2188_v17 = vpop.permute.xlu1 %2187  ;;  %v2389_v20 = vpop.permute.xlu0 %2388 }
0x12ef   :  { %2199 = vst.msk [vmem:[#allocation2] sm:$0xff] %vm640_vm3, %v2188_v17 }
0x12f0   :  { %2400 = vst.msk [vmem:[#allocation2] sm:$0xff] %vm842_vm4, %v2389_v20  ;;  %v4147_v36 = vpop.eup %4146 }
0x12f1   :  { %v4149_v21 = vpop.eup %4148  ;;  %v2521_v10 = vmul.f32 %v4147_v36, %v4143_v34 }
0x12f2   :  { %v2190_v23 = vpop.permute.xlu1 %2189  ;;  %v4151_v16 = vpop.eup %4150  ;;  %v2518_v33 = vmul.f32 %v4149_v21, %v4141_v31 }
0x12f3   :  { %2200 = vst.msk [vmem:[#allocation2 + $0x8] sm:$0xff] %vm640_vm3, %v2190_v23  ;;  %v2393_v26 = vpop.permute.xlu0 %2392  ;;  %v2520_v44 = vmul.f32 %v4151_v16, %v4139_v39 }
0x12f4   :  { %v4153_v38 = vpop.eup %4152  ;;  %2402 = vst.msk [vmem:[#allocation2 + $0x10] sm:$0xff] %vm842_vm4, %v2393_v26 }
0x12f5   :  { %v2519_v42 = vmul.f32 %v4153_v38, %v4145_v54  ;;  %v2523_v45 = vpack.c.bf16 %v2521_v10, %v2520_v44  ;;  %v3958_v44 = vld [vmem:[%s5325_s10 + $0x70] ss:$8 sps:$4 sm:$0xff]  }
0x12f6   :  { %v2194_v8 = vpop.permute.xlu1 %2193 }
0x12f7   :  { %2202 = vst.msk [vmem:[#allocation2 + $0x18] sm:$0xff] %vm640_vm3, %v2194_v8  ;;  %v2522_v24 = vpack.c.bf16 %v2519_v42, %v2518_v33  ;;  %v3960_v8 = vld [vmem:[%s5325_s10 + $0x74] ss:$8 sps:$4 sm:$0xff]  }
0x12f8   :  { %2869 = vmatprep.subr.bf16.mxu1 %v3960_v8 }
0x12f9   :  { %3844 = vmatprep.mubr.msk.bf16.mxu0 %vm335_vm2, %v2522_v24  ;;  %2870 = vmatpush1.bf16.msra.mxu1 %v3958_v44  ;;  %v3963_v24 = vld [vmem:[%s5325_s10 + $0x64] ss:$8 sps:$4 sm:$0xff]  }
0x12fa   :  { %v2391_v47 = vpop.permute.xlu1 %2390  ;;  %3845 = vmatmul.mubr.msk.bf16.vlgmr.msra.gmra.mxu0 %vm335_vm2, %v2523_v45  ;;  %v3961_v45 = vld [vmem:[%s5325_s10 + $0x60] ss:$8 sps:$4 sm:$0xff]   ;;  %2871 = vmatprep.subr.bf16.mxu1 %v3963_v24 }
0x12fb   :  { %2401 = vst.msk [vmem:[#allocation2 + $0x8] sm:$0xff] %vm842_vm4, %v2391_v47  ;;  %3849 = vmatpush3.bf16.msra.mxu0 %v3954_v43  ;;  %v3966_v47 = vld [vmem:[%s5325_s10 + $0x54] ss:$8 sps:$4 sm:$0xff]   ;;  %v3969_v43 = vld [vmem:[%s5325_s10 + $0x44] ss:$8 sps:$4 sm:$0xff]  }
0x12fc   :  { %3850 = vmatprep.subr.bf16.mxu0 %v3955_v62 }
0x12fd   :  { %2872 = vmatpush1.bf16.msra.mxu1 %v3961_v45 }
0x12fe   :  { %v2395_v12 = vpop.permute.xlu1 %2394  ;;  %2873 = vmatprep.subr.bf16.mxu1 %v3966_v47 }
0x12ff   :  { %2403 = vst.msk [vmem:[#allocation2 + $0x18] sm:$0xff] %vm842_vm4, %v2395_v12  ;;  %3851 = vmatpush3.bf16.msra.mxu0 %v3955_v62  ;;  %v3964_v12 = vld [vmem:[%s5325_s10 + $0x50] ss:$8 sps:$4 sm:$0xff]   ;;  %v3967_v62 = vld [vmem:[%s5325_s10 + $0x40] ss:$8 sps:$4 sm:$0xff]  }
0x1300   :  { %3852 = vmatprep.subr.bf16.mxu0 %v3956_v13 }
0x1301   :  { %2874 = vmatpush1.bf16.msra.mxu1 %v3964_v12 }
0x1302   :  { %2875 = vmatprep.subr.bf16.mxu1 %v3969_v43 }
0x1303   :  { %3853 = vmatpush3.bf16.msra.mxu0 %v3956_v13 }
0x1304   :  { %3854 = vmatprep.subr.bf16.mxu0 %v3957_v53 }
0x1305   :  { %2876 = vmatpush1.bf16.msra.mxu1 %v3967_v62 }
0x1307   :  { %3855 = vmatpush3.bf16.msra.mxu0 %v3957_v53 }
0x13ba   :  { %v3846_v50 = vpop.f32.mrf.mxu0 }
0x13bc   :  { %v2570_v27 = vpop.f32.mrf.mxu0 }
0x13bd   :  { %2589 = vrot.lane.b32.xlu0 %v2570_v27, %s4213_s28 }
0x13be   :  { %v3847_v19 = vpop.f32.mrf.mxu0 }
0x13c0   :  { %v2573_v28 = vpop.f32.mrf.mxu0 }
0x13c1   :  { %2593 = vrot.lane.b32.xlu0 %v3846_v50, %s4213_s28  ;;  %2591 = vrot.lane.b32.xlu1 %v2573_v28, %s4213_s28 }
0x13c5   :  { %2595 = vrot.lane.b32.xlu1 %v3847_v19, %s4213_s28 }
0x142f   :  { %v2590_v41 = vpop.permute.xlu0 %2589 }
0x1430   :  { %2601 = vst.msk [vmem:[#allocation2] sm:$0xff] %vm1044_vm5, %v2590_v41 }
0x1433   :  { %v2592_v57 = vpop.permute.xlu1 %2591  ;;  %v2594_v52 = vpop.permute.xlu0 %2593 }
0x1434   :  { %2602 = vst.msk [vmem:[#allocation2 + $0x8] sm:$0xff] %vm1044_vm5, %v2592_v57  ;;  %2603 = vst.msk [vmem:[#allocation2 + $0x10] sm:$0xff] %vm1044_vm5, %v2594_v52 }
0x1437   :  { %v2596_v58 = vpop.permute.xlu1 %2595  ;;  %v2605_v49 = vld [vmem:[#allocation2] sm:$0xff] }
0x1438   :  { %2604 = vst.msk [vmem:[#allocation2 + $0x18] sm:$0xff] %vm1044_vm5, %v2596_v58 }
0x143b   :  { %v2606_v60 = vld [vmem:[#allocation2 + $0x8] sm:$0xff]  ;;  %v2607_v1 = vld [vmem:[#allocation2 + $0x10] sm:$0xff] }
0x143c   :  { %v2609_v61 = vpack.c.bf16 %v2606_v60, %v2605_v49 }
0x143e   :  { %3856 = vmatprep.mubr.msk.bf16.mxu0 %vm64_vm0, %v2609_v61 }
0x143f   :  { %v2608_v55 = vld [vmem:[#allocation2 + $0x18] sm:$0xff] }
0x1440   :  { %v2610_v3 = vpack.c.bf16 %v2608_v55, %v2607_v1  ;;  %v3497_v55 = vld [vmem:[%s5323_s8 + $0x1] ss:$0 sm:$0xff] }
0x1442   :  { %3857 = vmatmul.mubr.msk.bf16.vlgmr.msra.gmra.mxu0 %vm64_vm0, %v2610_v3 }
0x1502   :  { %v3858_v6 = vpop.f32.mrf.mxu0 }
0x1503   :  { %v2701_v51 = vadd.f32 %v3858_v6, %v4818_v25 }
0x1504   :  { %v2684_v15 = vpop.f32.mrf.mxu0 }
0x1505   :  { %v2699_v59 = vadd.f32 %v2684_v15, %v4808_v2  ;;  %v5149_v30 = vadd.f32 %v3494_v48, %v2701_v51 }
0x1506   :  { %v3859_v22 = vpop.f32.mrf.mxu0 }
0x1507   :  { %v5147_v18 = vadd.f32 %v3494_v48, %v2699_v59  ;;  %v2702_v31 = vadd.f32 %v3859_v22, %v4823_v46  ;;  %v2725_v54 = vsel %vm64_vm0, %v5149_v30, 0.0  ;;  %v3498_v59 = vld [vmem:[%s5324_s9 + $0x1] ss:$0 sm:$0xff] }
0x1508   :  { %v2687_v39 = vpop.f32.mrf.mxu0 }
0x1509   :  { %v2700_v34 = vadd.f32 %v2687_v39, %v4813_v40  ;;  %v2719_v4 = vsel %vm64_vm0, %v5147_v18, 0.0  ;;  %v5157_v2 = vadd.f32 %v3494_v48, %v2702_v31 }
0x150a   :  { %2720 = vadd.xlane.f32.xlu0 %v2719_v4 }
0x150b   :  { %v5155_v25 = vadd.f32 %v3494_v48, %v2700_v34  ;;  %v2728_v46 = vsel %vm64_vm0, %v5157_v2, 0.0 }
0x150d   :  { %v2722_v63 = vsel %vm64_vm0, %v5155_v25, 0.0 }
0x150e   :  { %2726 = vadd.xlane.f32.xlu0 %v2725_v54  ;;  %2723 = vadd.xlane.f32.xlu1 %v2722_v63 }
0x1512   :  { %2729 = vadd.xlane.f32.xlu0 %v2728_v46 }
0x1593   :  { %v2721_v40 = vpop.xlane.xlu0 %2720 }
0x1594   :  { %v2731_v35 = vmul.f32 0.015625, %v2721_v40 }
0x1596   :  { %v2735_v0 = vsub.f32 %v5147_v18, %v2731_v35 }
0x1597   :  { %v2727_v29 = vpop.xlane.xlu0 %2726  ;;  %v2724_v5 = vpop.xlane.xlu1 %2723 }
0x1598   :  { %v2733_v14 = vmul.f32 0.015625, %v2727_v29  ;;  %v2732_v11 = vmul.f32 0.015625, %v2724_v5  ;;  %v2739_v56 = vmul.f32 %v2735_v0, %v2735_v0  ;;  %v3970_v29 = vld [vmem:[%s5327_s12 + $0xf8] sm:$0xff]  }
0x1599   :  { %v3971_v5 = vld [vmem:[%s5327_s12 + $0xb8] sm:$0xff]   ;;  %3675 = vmatprep.subr.bf16.mxu0 %v3970_v29 }
0x159a   :  { %v2737_v37 = vsub.f32 %v5149_v30, %v2733_v14  ;;  %v2736_v17 = vsub.f32 %v5155_v25, %v2732_v11  ;;  %v2743_v20 = vsel %vm64_vm0, %v2739_v56, 0.0  ;;  %3676 = vmatpush3.bf16.msra.mxu0 %v3971_v5  ;;  %v3972_v14 = vld [vmem:[%s5327_s12 + $0xf0] sm:$0xff]   ;;  %v3974_v11 = vld [vmem:[%s5327_s12 + $0xe8] sm:$0xff]  }
0x159b   :  { %2744 = vadd.xlane.f32.xlu0 %v2743_v20  ;;  %v2730_v36 = vpop.xlane.xlu0 %2729  ;;  %3677 = vmatprep.subr.bf16.mxu0 %v3972_v14  ;;  %v3975_v56 = vld [vmem:[%s5327_s12 + $0xa8] sm:$0xff]   ;;  %v3978_v20 = vld [vmem:[%s5327_s12 + $0xd8] sm:$0xff]  }
0x159c   :  { %v2734_v21 = vmul.f32 0.015625, %v2730_v36  ;;  %v2741_v23 = vmul.f32 %v2737_v37, %v2737_v37  ;;  %v2740_v16 = vmul.f32 %v2736_v17, %v2736_v17  ;;  %v3979_v36 = vld [vmem:[%s5327_s12 + $0x98] sm:$0xff]  }
0x159e   :  { %v2738_v26 = vsub.f32 %v5157_v2, %v2734_v21  ;;  %v2749_v38 = vsel %vm64_vm0, %v2741_v23, 0.0  ;;  %v2746_v10 = vsel %vm64_vm0, %v2740_v16, 0.0  ;;  %v3980_v21 = vld [vmem:[%s5327_s12 + $0xd0] sm:$0xff]   ;;  %v3982_v16 = vld [vmem:[%s5327_s12 + $0xc8] sm:$0xff]  }
0x159f   :  { %2750 = vadd.xlane.f32.xlu0 %v2749_v38  ;;  %2747 = vadd.xlane.f32.xlu1 %v2746_v10  ;;  %v3981_v23 = vld [vmem:[%s5327_s12 + $0x90] sm:$0xff]   ;;  %v3984_v38 = vld [vmem:[%s5327_s12 + $0xc0] sm:$0xff]  }
0x15a0   :  { %v2742_v33 = vmul.f32 %v2738_v26, %v2738_v26  ;;  %v3985_v10 = vld [vmem:[%s5327_s12 + $0x80] sm:$0xff]  }
0x15a2   :  { %v2752_v42 = vsel %vm64_vm0, %v2742_v33, 0.0  ;;  %v3507_v33 = vld [vmem:[%s5326_s11 + $0x2] sm:$0x3] }
0x15a3   :  { %2753 = vadd.xlane.f32.xlu1 %v2752_v42  ;;  %v2808_v42 = vrot.slane %v3507_v33, %v4372_v7  ;;  %v2812_v8 = vrot.slane %v3507_v33, %v4377_v9 }
0x1624   :  { %v2745_v13 = vpop.xlane.xlu0 %2744 }
0x1625   :  { %v2755_v53 = vmul.f32 0.015625, %v2745_v13 }
0x1627   :  { %v2759_v50 = vadd.f32 1e-05, %v2755_v53 }
0x1628   :  { %v2751_v27 = vpop.xlane.xlu0 %2750  ;;  %v2748_v19 = vpop.xlane.xlu1 %2747 }
0x1629   :  { %4154 = vrsqrt.f32 %v2759_v50  ;;  %v2757_v28 = vmul.f32 0.015625, %v2751_v27  ;;  %v2756_v41 = vmul.f32 0.015625, %v2748_v19 }
0x162b   :  { %v2760_v57 = vadd.f32 1e-05, %v2756_v41  ;;  %v2761_v52 = vadd.f32 1e-05, %v2757_v28 }
0x162c   :  { %v2754_v58 = vpop.xlane.xlu1 %2753 }
0x162d   :  { %v2758_v49 = vmul.f32 0.015625, %v2754_v58  ;;  %4156 = vrsqrt.f32 %v2760_v57 }
0x162e   :  { %4158 = vrsqrt.f32 %v2761_v52 }
0x162f   :  { %v2762_v60 = vadd.f32 1e-05, %v2758_v49 }
0x1631   :  { %4160 = vrsqrt.f32 %v2762_v60 }
0x1636   :  { %v4155_v61 = vpop.eup %4154 }
0x1637   :  { %v2767_v1 = vmul.f32 %v4155_v61, %v2735_v0 }
0x1639   :  { %v2777_v15 = vmul.f32 %v3497_v55, %v2767_v1 }
0x163a   :  { %v4157_v3 = vpop.eup %4156 }
0x163b   :  { %v2768_v6 = vmul.f32 %v4157_v3, %v2736_v17  ;;  %v4159_v51 = vpop.eup %4158  ;;  %v2787_v31 = vadd.f32 %v3498_v59, %v2777_v15  ;;  %v3977_v17 = vld [vmem:[%s5327_s12 + $0xa0] sm:$0xff]  }
0x163c   :  { %v2769_v4 = vmul.f32 %v4159_v51, %v2737_v37  ;;  %v3976_v37 = vld [vmem:[%s5327_s12 + $0xe0] sm:$0xff]  }
0x163d   :  { %v2778_v22 = vmul.f32 %v3497_v55, %v2768_v6 }
0x163e   :  { %v4161_v48 = vpop.eup %4160  ;;  %v2779_v46 = vmul.f32 %v3497_v55, %v2769_v4 }
0x163f   :  { %v2770_v39 = vmul.f32 %v4161_v48, %v2738_v26  ;;  %v2788_v34 = vadd.f32 %v3498_v59, %v2778_v22  ;;  %v3983_v26 = vld [vmem:[%s5327_s12 + $0x88] sm:$0xff]  }
0x1640   :  { %v2789_v35 = vadd.f32 %v3498_v59, %v2779_v46 }
0x1641   :  { %v2791_v54 = vpack.c.bf16 %v2788_v34, %v2787_v31  ;;  %v2780_v63 = vmul.f32 %v3497_v55, %v2770_v39 }
0x1643   :  { %3516 = vmatmul.mubr.msk.bf16.vlgmr.msra.gmra.mxu1 %vm64_vm0, %v2791_v54  ;;  %v2790_v40 = vadd.f32 %v3498_v59, %v2780_v63 }
0x1644   :  { %2903 = vmatprep.mubr.bf16.mxu1 %v4212_v32  ;;  %v3973_v32 = vld [vmem:[%s5327_s12 + $0xb0] sm:$0xff]  }
0x1645   :  { %v2792_v0 = vpack.c.bf16 %v2790_v40, %v2789_v35  ;;  %3678 = vmatpush3.bf16.msra.mxu0 %v3973_v32 }
0x1646   :  { %3679 = vmatprep.subr.bf16.mxu0 %v3974_v11 }
0x1649   :  { %3680 = vmatpush3.bf16.msra.mxu0 %v3975_v56 }
0x164a   :  { %3681 = vmatprep.subr.bf16.mxu0 %v3976_v37 }
0x164b   :  { %3517 = vmatmul.mubr.msk.bf16.gmra.mxu1 %vm64_vm0, %v2792_v0 }
0x164d   :  { %3682 = vmatpush3.bf16.msra.mxu0 %v3977_v17 }
0x164e   :  { %3683 = vmatprep.subr.bf16.mxu0 %v3978_v20 }
0x1651   :  { %3684 = vmatpush3.bf16.msra.mxu0 %v3979_v36 }
0x1652   :  { %3685 = vmatprep.subr.bf16.mxu0 %v3980_v21 }
0x1655   :  { %3686 = vmatpush3.bf16.msra.mxu0 %v3981_v23 }
0x1656   :  { %3687 = vmatprep.subr.bf16.mxu0 %v3982_v16 }
0x1659   :  { %3688 = vmatpush3.bf16.msra.mxu0 %v3983_v26 }
0x165a   :  { %3689 = vmatprep.subr.bf16.mxu0 %v3984_v38 }
0x165d   :  { %3690 = vmatpush3.bf16.msra.mxu0 %v3985_v10 }
0x1703   :  { %v2895_v44 = vpop.f32.mrf.mxu1 }
0x1704   :  { %v5259_v24 = vadd.f32 %v2895_v44, %v2808_v42 }
0x1705   :  { %v2897_v45 = vpop.f32.mrf.mxu1 }
0x1706   :  { %v2922_v47 = vmul.f32 0.044715, %v5259_v24  ;;  %v5262_v12 = vadd.f32 %v2897_v45, %v2812_v8 }
0x1707   :  { %v2899_v43 = vpop.f32.mrf.mxu1 }
0x1708   :  { %v2930_v62 = vmul.f32 %v2922_v47, %v5259_v24  ;;  %v2923_v13 = vmul.f32 0.044715, %v5262_v12  ;;  %v2900_v53 = vadd.f32 %v2899_v43, %v2808_v42 }
0x1709   :  { %v2901_v50 = vpop.f32.mrf.mxu1 }
0x170a   :  { %v2938_v27 = vmul.f32 %v2930_v62, %v5259_v24  ;;  %v2931_v7 = vmul.f32 %v2923_v13, %v5262_v12  ;;  %v2924_v9 = vmul.f32 0.044715, %v2900_v53  ;;  %v2902_v19 = vadd.f32 %v2901_v50, %v2812_v8 }
0x170b   :  { %v2905_v28 = vpop.f32.mrf.mxu1  ;;  %v2916_v47 = vmul.f32 0.5, %v2900_v53  ;;  %v2915_v62 = vmul.f32 0.5, %v5262_v12 }
0x170c   :  { %v2946_v41 = vadd.f32 %v2938_v27, %v5259_v24  ;;  %v2939_v57 = vmul.f32 %v2931_v7, %v5262_v12  ;;  %v2932_v52 = vmul.f32 %v2924_v9, %v2900_v53  ;;  %v2925_v58 = vmul.f32 0.044715, %v2902_v19 }
0x170d   :  { %v5270_v49 = vadd.f32 %v2905_v28, %v2808_v42  ;;  %v2907_v60 = vpop.f32.mrf.mxu1  ;;  %v2917_v13 = vmul.f32 0.5, %v2902_v19  ;;  %v2914_v27 = vmul.f32 0.5, %v5259_v24 }
0x170e   :  { %v2954_v61 = vmul.f32 0.7978846, %v2946_v41  ;;  %v2940_v1 = vmul.f32 %v2932_v52, %v2900_v53  ;;  %v2933_v55 = vmul.f32 %v2925_v58, %v2902_v19  ;;  %v5272_v3 = vadd.f32 %v2907_v60, %v2812_v8 }
0x170f   :  { %v2926_v6 = vmul.f32 0.044715, %v5270_v49  ;;  %v2909_v15 = vpop.f32.mrf.mxu1  ;;  %v2947_v51 = vadd.f32 %v2939_v57, %v5262_v12 }
0x1710   :  { %v2948_v59 = vadd.f32 %v2940_v1, %v2900_v53  ;;  %v2941_v48 = vmul.f32 %v2933_v55, %v2902_v19  ;;  %v2927_v22 = vmul.f32 0.044715, %v5272_v3  ;;  %4162 = vtanh.f32 %v2954_v61 }
0x1711   :  { %v2934_v39 = vmul.f32 %v2926_v6, %v5270_v49  ;;  %v2910_v31 = vadd.f32 %v2909_v15, %v2808_v42  ;;  %v2911_v34 = vpop.f32.mrf.mxu1  ;;  %v2955_v4 = vmul.f32 0.7978846, %v2947_v51  ;;  %v2918_v51 = vmul.f32 0.5, %v5270_v49 }
0x1712   :  { %v2956_v54 = vmul.f32 0.7978846, %v2948_v59  ;;  %v2935_v63 = vmul.f32 %v2927_v22, %v5272_v3  ;;  %v2912_v46 = vadd.f32 %v2911_v34, %v2812_v8  ;;  %v2949_v40 = vadd.f32 %v2941_v48, %v2902_v19 }
0x1713   :  { %v2942_v35 = vmul.f32 %v2934_v39, %v5270_v49  ;;  %v2928_v0 = vmul.f32 0.044715, %v2910_v31  ;;  %4164 = vtanh.f32 %v2955_v4  ;;  %v2920_v53 = vmul.f32 0.5, %v2910_v31 }
0x1714   :  { %4166 = vtanh.f32 %v2956_v54  ;;  %v2943_v29 = vmul.f32 %v2935_v63, %v5272_v3  ;;  %v2929_v5 = vmul.f32 0.044715, %v2912_v46  ;;  %v2957_v14 = vmul.f32 0.7978846, %v2949_v40 }
0x1715   :  { %v2936_v32 = vmul.f32 %v2928_v0, %v2910_v31  ;;  %v2950_v11 = vadd.f32 %v2942_v35, %v5270_v49  ;;  %v2919_v19 = vmul.f32 0.5, %v5272_v3  ;;  %v2921_v15 = vmul.f32 0.5, %v2912_v46 }
0x1716   :  { %v2937_v56 = vmul.f32 %v2929_v5, %v2912_v46  ;;  %4168 = vtanh.f32 %v2957_v14  ;;  %v2951_v37 = vadd.f32 %v2943_v29, %v5272_v3 }
0x1717   :  { %v2944_v17 = vmul.f32 %v2936_v32, %v2910_v31  ;;  %v2958_v20 = vmul.f32 0.7978846, %v2950_v11  ;;  %v3567_v11 = vld [vmem:[%s5328_s13 + $0x1] ss:$0 sm:$0xff] }
0x1718   :  { %v2945_v36 = vmul.f32 %v2937_v56, %v2912_v46  ;;  %v2959_v21 = vmul.f32 0.7978846, %v2951_v37 }
0x1719   :  { %v2952_v23 = vadd.f32 %v2944_v17, %v2910_v31 }
0x171a   :  { %v2953_v16 = vadd.f32 %v2945_v36, %v2912_v46  ;;  %4170 = vtanh.f32 %v2959_v21 }
0x171b   :  { %v2960_v26 = vmul.f32 0.7978846, %v2952_v23  ;;  %4172 = vtanh.f32 %v2958_v20 }
0x171c   :  { %v2961_v38 = vmul.f32 0.7978846, %v2953_v16 }
0x171d   :  { %4174 = vtanh.f32 %v2960_v26  ;;  %v4163_v10 = vpop.eup %4162 }
0x171e   :  { %4176 = vtanh.f32 %v2961_v38  ;;  %v2970_v43 = vadd.f32 1.0, %v4163_v10 }
0x1720   :  { %v4165_v33 = vpop.eup %4164  ;;  %v2978_v57 = vmul.f32 %v2970_v43, %v2914_v27 }
0x1721   :  { %v4167_v42 = vpop.eup %4166  ;;  %v2971_v8 = vadd.f32 1.0, %v4165_v33 }
0x1722   :  { %v2972_v44 = vadd.f32 1.0, %v4167_v42 }
0x1723   :  { %v4169_v45 = vpop.eup %4168  ;;  %v2979_v9 = vmul.f32 %v2971_v8, %v2915_v62 }
0x1724   :  { %v2973_v50 = vadd.f32 1.0, %v4169_v45  ;;  %v2980_v7 = vmul.f32 %v2972_v44, %v2916_v47 }
0x1726   :  { %v2981_v28 = vmul.f32 %v2973_v50, %v2917_v13  ;;  %v2986_v60 = vpack.c.bf16 %v2980_v7, %v2978_v57 }
0x1727   :  { %v4171_v41 = vpop.eup %4170 }
0x1728   :  { %v4173_v52 = vpop.eup %4172  ;;  %v2987_v58 = vpack.c.bf16 %v2981_v28, %v2979_v9  ;;  %v2975_v1 = vadd.f32 1.0, %v4171_v41 }
0x1729   :  { %v2974_v6 = vadd.f32 1.0, %v4173_v52  ;;  %v4220_v52 = vmov 0.0  }
0x172a   :  { %v4175_v61 = vpop.eup %4174  ;;  %3151 = vmatprep.mubr.bf16.mxu0 %v2987_v58  ;;  %v2983_v48 = vmul.f32 %v2975_v1, %v2919_v19  ;;  %3860 = vmatprep.subr.mxu1 %v4220_v52 }
0x172b   :  { %v4177_v55 = vpop.eup %4176  ;;  %3152 = vmatmul.mubr.bf16.vlgmr.msra.gmra.mxu0 %v2986_v60  ;;  %v2976_v12 = vadd.f32 1.0, %v4175_v61  ;;  %v2982_v39 = vmul.f32 %v2974_v6, %v2918_v51  ;;  %3868 = vmatprep.mubr.msk.f32.mxu1 %vm4221_vm6, %v4220_v52 }
0x172c   :  { %v2977_v24 = vadd.f32 1.0, %v4177_v55 }
0x172d   :  { %v2984_v59 = vmul.f32 %v2976_v12, %v2920_v53 }
0x172e   :  { %v2985_v22 = vmul.f32 %v2977_v24, %v2921_v15 }
0x172f   :  { %v2988_v4 = vpack.c.bf16 %v2984_v59, %v2982_v39  ;;  %v3568_v39 = vld [vmem:[%s5329_s14] ss:$0 sm:$0xff] }
0x1730   :  { %v2989_v34 = vpack.c.bf16 %v2985_v22, %v2983_v48 }
0x1732   :  { %3159 = vmatprep.mubr.bf16.mxu0 %v2989_v34 }
0x1733   :  { %3160 = vmatmul.mubr.bf16.gmra.mxu0 %v2988_v4 }
0x17eb   :  { %v3691_v54 = vpop.f32.mrf.mxu0 }
0x17ed   :  { %v3692_v63 = vpop.f32.mrf.mxu0 }
0x17ee   :  { %v3693_v0 = vadd.f32 %v3692_v63, %v3691_v54 }
0x17ef   :  { %v3694_v40 = vpop.f32.mrf.mxu0 }
0x17f0   :  { %v3168_v5 = vadd.f32 %v3693_v0, %v5147_v18 }
0x17f1   :  { %v3695_v31 = vpop.f32.mrf.mxu0 }
0x17f2   :  { %v3696_v49 = vadd.f32 %v3695_v31, %v3694_v40  ;;  %v3180_v21 = vadd.f32 %v3567_v11, %v3168_v5 }
0x17f3   :  { %v3697_v35 = vpop.f32.mrf.mxu0 }
0x17f4   :  { %v3169_v17 = vadd.f32 %v3696_v49, %v5155_v25 }
0x17f5   :  { %v3698_v29 = vpop.f32.mrf.mxu0 }
0x17f6   :  { %v3699_v3 = vadd.f32 %v3698_v29, %v3697_v35  ;;  %v3181_v16 = vadd.f32 %v3567_v11, %v3169_v17  ;;  %v3569_v35 = vld [vmem:[%s5330_s15] ss:$0 sm:$0xff]  ;;  %s4222_s15 = smov [#allocation3]  }
0x17f7   :  { %v3700_v46 = vpop.f32.mrf.mxu0  ;;  %s3340_s18 = sshll.u32 %s4222_s15, 4  ;;  %s3341_s18 = int_to_ptr.vmem [resolvable:$true] %s3340_s18 }
0x17f8   :  { %v3170_v14 = vadd.f32 %v3699_v3, %v5149_v30  ;;  %v3186_v30 = vsel %vm64_vm0, %v3180_v21, 0.0  ;;  %v3189_v26 = vsel %vm64_vm0, %v3181_v16, 0.0  ;;  %s4190_s5 = scalar_lea.vmem %s3341_s18, 32  ;;  %p4195_p1 = scmp.lt.s32.totalorder %s3341_s18, %s3341_s18 }
0x17f9   :  { %v3701_v32 = vpop.f32.mrf.mxu0  ;;  %p4191_p0 = scmp.ne.s32.totalorder %s3341_s18, %s4190_s5  ;;  %p4196_p2 = scmp.lt.s32.totalorder %s4190_s5, %s4190_s5 }
0x17fa   :  { %v3702_v56 = vadd.f32 %v3701_v32, %v3700_v46  ;;  %v3182_v37 = vadd.f32 %v3567_v11, %v3170_v14  ;;  %v3258_v32 = vld [vmem:[%s5331_s16] sm:$0x3] }
0x17fb   :  { %p4197_p3 = por %p4196_p2, %p4195_p1 }
0x17fc   :  { %v3171_v20 = vadd.f32 %v3702_v56, %v5157_v2  ;;  %v3192_v36 = vsel %vm64_vm0, %v3182_v37, 0.0 }
0x17fd   :  { %3193 = vadd.xlane.f32.xlu1 %v3192_v36  ;;  %p4198_p4 = pnand %p4197_p3, %p4191_p0 }
0x17fe   :  { %v3183_v23 = vadd.f32 %v3567_v11, %v3171_v20 }
0x1800   :  { %v3195_v18 = vsel %vm64_vm0, %v3183_v23, 0.0 }
0x1801   :  { %3196 = vadd.xlane.f32.xlu0 %v3195_v18  ;;  %3187 = vadd.xlane.f32.xlu1 %v3186_v30 }
0x1805   :  { %3190 = vadd.xlane.f32.xlu0 %v3189_v26 }
0x1886   :  { %v3194_v38 = vpop.xlane.xlu1 %3193 }
0x1887   :  { %v3200_v10 = vmul.f32 0.015625, %v3194_v38 }
0x1889   :  { %v3204_v25 = vsub.f32 %v3182_v37, %v3200_v10 }
0x188a   :  { %v3197_v33 = vpop.xlane.xlu0 %3196  ;;  %v3188_v2 = vpop.xlane.xlu1 %3187 }
0x188b   :  { %v3201_v42 = vmul.f32 0.015625, %v3197_v33  ;;  %v3198_v8 = vmul.f32 0.015625, %v3188_v2  ;;  %v3208_v44 = vmul.f32 %v3204_v25, %v3204_v25 }
0x188d   :  { %v3205_v45 = vsub.f32 %v3183_v23, %v3201_v42  ;;  %v3202_v47 = vsub.f32 %v3180_v21, %v3198_v8  ;;  %v3216_v43 = vsel %vm64_vm0, %v3208_v44, 0.0 }
0x188e   :  { %v3191_v62 = vpop.xlane.xlu0 %3190  ;;  %3217 = vadd.xlane.f32.xlu1 %v3216_v43 }
0x188f   :  { %v3199_v13 = vmul.f32 0.015625, %v3191_v62  ;;  %v3209_v50 = vmul.f32 %v3205_v45, %v3205_v45  ;;  %v3206_v27 = vmul.f32 %v3202_v47, %v3202_v47 }
0x1891   :  { %v3203_v7 = vsub.f32 %v3181_v16, %v3199_v13  ;;  %v3219_v9 = vsel %vm64_vm0, %v3209_v50, 0.0  ;;  %v3210_v28 = vsel %vm64_vm0, %v3206_v27, 0.0 }
0x1892   :  { %3220 = vadd.xlane.f32.xlu0 %v3219_v9  ;;  %3211 = vadd.xlane.f32.xlu1 %v3210_v28 }
0x1893   :  { %v3207_v41 = vmul.f32 %v3203_v7, %v3203_v7 }
0x1895   :  { %v3213_v57 = vsel %vm64_vm0, %v3207_v41, 0.0 }
0x1896   :  { %3214 = vadd.xlane.f32.xlu0 %v3213_v57 }
0x1917   :  { %v3218_v58 = vpop.xlane.xlu1 %3217 }
0x1918   :  { %v3224_v60 = vmul.f32 0.015625, %v3218_v58 }
0x191a   :  { %v3228_v61 = vadd.f32 1e-05, %v3224_v60 }
0x191b   :  { %v3221_v1 = vpop.xlane.xlu0 %3220  ;;  %v3212_v55 = vpop.xlane.xlu1 %3211 }
0x191c   :  { %4178 = vrsqrt.f32 %v3228_v61  ;;  %v3225_v53 = vmul.f32 0.015625, %v3221_v1  ;;  %v3222_v6 = vmul.f32 0.015625, %v3212_v55 }
0x191e   :  { %v3229_v12 = vadd.f32 1e-05, %v3225_v53  ;;  %v3226_v19 = vadd.f32 1e-05, %v3222_v6 }
0x191f   :  { %v3215_v15 = vpop.xlane.xlu0 %3214 }
0x1920   :  { %4180 = vrsqrt.f32 %v3229_v12  ;;  %v3223_v24 = vmul.f32 0.015625, %v3215_v15 }
0x1921   :  { %4182 = vrsqrt.f32 %v3226_v19 }
0x1922   :  { %v3227_v51 = vadd.f32 1e-05, %v3223_v24 }
0x1924   :  { %4184 = vrsqrt.f32 %v3227_v51 }
0x1929   :  { %v4179_v59 = vpop.eup %4178 }
0x192a   :  { %v3236_v48 = vmul.f32 %v4179_v59, %v3204_v25 }
0x192c   :  { %v3246_v63 = vmul.f32 %v3568_v39, %v3236_v48 }
0x192d   :  { %v4181_v22 = vpop.eup %4180 }
0x192e   :  { %v4183_v34 = vpop.eup %4182  ;;  %v3237_v4 = vmul.f32 %v4181_v22, %v3205_v45  ;;  %v3256_v3 = vadd.f32 %v3569_v35, %v3246_v63 }
0x192f   :  { %v3234_v40 = vmul.f32 %v4183_v34, %v3202_v47 }
0x1930   :  { %v3247_v54 = vmul.f32 %v3568_v39, %v3237_v4 }
0x1931   :  { %v4185_v31 = vpop.eup %4184  ;;  %v3244_v5 = vmul.f32 %v3568_v39, %v3234_v40 }
0x1932   :  { %v3257_v0 = vadd.f32 %v3569_v35, %v3247_v54  ;;  %v3235_v29 = vmul.f32 %v4185_v31, %v3203_v7 }
0x1933   :  { %v3254_v14 = vadd.f32 %v3569_v35, %v3244_v5 }
0x1934   :  { %3861 = vmatpush3.msra.mxu1 %v3257_v0  ;;  %v3245_v46 = vmul.f32 %v3568_v39, %v3235_v29 }
0x1935   :  { %3862 = vmatprep.subr.mxu1 %v4220_v52 }
0x1936   :  { %3863 = vmatpush3.msra.mxu1 %v3256_v3  ;;  %v3255_v49 = vadd.f32 %v3569_v35, %v3245_v46 }
0x1937   :  { %3864 = vmatprep.subr.mxu1 %v4220_v52 }
0x1938   :  { %3865 = vmatpush3.msra.mxu1 %v3255_v49 }
0x1939   :  { %3866 = vmatprep.subr.mxu1 %v4220_v52 }
0x193a   :  { %3867 = vmatpush3.msra.mxu1 %v3254_v14 }
0x193b   :  { %3869 = vmatmul.mubr.msk.f32.vlgmr.msra.gmra.mxu1 %vm335_vm2, %v3258_v32 }
0x19fb   :  { %v3328_v11 = vpop.f32.mrf.mxu1 }
0x19fc   :  { %3333 = vst.msk [vmem:[#allocation3] sm:$0x3] %vm3332_vm7, %v3328_v11 }
0x19fd   :  { %v3870_v56 = vpop.f32.mrf.mxu1 }
0x19fe   :  { %4201 = shalt.err (!%p4198_p4)
}
0x19ff   :  { %3343 = dma.vmem_to_hbm [thread:$0]  %s3341_s18, 32, %s5332_s17, [#allocation4]  }
0x1a00   :  { %4210 = dma.done.wait [#allocation4], 32  }
0x1a01   :  { %4211 = vsyncadd [#allocation4], 4294967264 }
0x1a02   :  { %3347 = vsyncpa [#allocation4], 1 }

</bundles_post_ra>
